<compile_context>
chip_gen: v7x
topology: tpu7x:2x2x1
jax: 0.10.0
libtpu: 0.0.40
codegen_flags: <defaults>
</compile_context>

<pallas_src>
import jax
import jax.numpy as jnp
from jax.experimental import pallas as pl
from jax.experimental.pallas import tpu as pltpu

_BN_EPS = 1e-5           # nn.BatchNorm2d default
_FINAL_CHANNELS = 192    # real (unpadded) output channels of the stem


# ----------------------------------------------------------------------------
# Pallas kernel: (patches @ folded-weights) + shift, then SiLU
# ----------------------------------------------------------------------------
def _conv_bn_silu_kernel(p_ref, w_ref, shift_ref, o_ref):
    # p_ref:     (BM, K)      im2col patches tile (bf16, real channels only)
    # w_ref:     (K, Cout)    conv weights with BN scale folded in (bf16)
    # shift_ref: (1, Cout)    beta - mean * scale   (f32)
    # o_ref:     (BM, Cout)   bf16 output (Cout is a 128-multiple)
    acc = jnp.dot(p_ref[...], w_ref[...], preferred_element_type=jnp.float32)
    y = acc + shift_ref[...]
    o_ref[...] = (y * jax.nn.sigmoid(y)).astype(o_ref.dtype)   # SiLU


# ----------------------------------------------------------------------------
# Row tiling
# ----------------------------------------------------------------------------
def _row_tiles(m):
    """Return (block_rows, num_blocks).

    Small M: one full-array block (8-aligned).  Large M: an even number of
    ~equal, 8-aligned blocks (>= 2 so both v7x TensorCores get one), roughly
    1-2K rows each -- big tiles, <1% ragged-tail waste, no pad copy."""
    if m <= 512:
        bm = ((m + 7) // 8) * 8
    else:
        nblk = 2 * pl.cdiv(m, 2048)          # even number of blocks
        bm = ((pl.cdiv(m, nblk) + 7) // 8) * 8
    return bm, pl.cdiv(m, bm)


def _conv_bn_silu(patches, w2, shift):
    # patches: (M, K) bf16, w2: (K, Cout) bf16, shift: (Cout,) f32
    m, k = patches.shape
    cout = w2.shape[1]
    bm, nblk = _row_tiles(m)
    return pl.pallas_call(
        _conv_bn_silu_kernel,
        out_shape=jax.ShapeDtypeStruct((m, cout), jnp.bfloat16),
        grid=(nblk,),
        in_specs=[
            pl.BlockSpec((bm, k), lambda i: (i, 0)),
            pl.BlockSpec((k, cout), lambda i: (0, 0)),
            pl.BlockSpec((1, cout), lambda i: (0, 0)),
        ],
        out_specs=pl.BlockSpec((bm, cout), lambda i: (i, 0)),
        compiler_params=pltpu.CompilerParams(
            dimension_semantics=("parallel",)),
    )(patches, w2, shift.reshape(1, cout))


# ----------------------------------------------------------------------------
# XLA glue: im2col (real channels only) and 3x3/s2 max-pool
# ----------------------------------------------------------------------------
def _im2col(x, kh, kw, sh, sw):
    # x: (N, H, W, C) -> patches (N*OH*OW, kh*kw*C), column order (kh, kw, C)
    n, h, w, c = x.shape
    oh = (h - kh) // sh + 1
    ow = (w - kw) // sw + 1
    cols = []
    for i in range(kh):
        for j in range(kw):
            cols.append(x[:, i:i + sh * (oh - 1) + 1:sh,
                          j:j + sw * (ow - 1) + 1:sw, :])
    patches = jnp.concatenate(cols, axis=-1)          # (N, OH, OW, kh*kw*C)
    return patches.reshape(n * oh * ow, kh * kw * c), (n, oh, ow)


def _conv_bn_layer(x, params, stride, cin_real):
    w2, shift = params
    # Drop the previous layer's zero-padded lanes BEFORE window extraction so
    # the patch matrix / matmul K only carry real channels.
    patches, (n, oh, ow) = _im2col(x[..., :cin_real], 3, 3, stride, stride)
    k_w = w2.shape[0]
    if patches.shape[1] < k_w:            # conv_0 only: K padded 9 -> 16
        patches = jnp.pad(patches, ((0, 0), (0, k_w - patches.shape[1])))
    out = _conv_bn_silu(patches, w2, shift)
    return out.reshape(n, oh, ow, w2.shape[1])


def _maxpool_3x3_s2(x):
    # TODO(synk): kept as an XLA reduce_window (per review option) -- fusing
    # the pool into the preceding conv epilogue needs an in-kernel spatial
    # relayout of the im2col-row output, which Mosaic may not lower cleanly.
    return jax.lax.reduce_window(
        x, jnp.array(-jnp.inf, dtype=x.dtype), jax.lax.max,
        window_dimensions=(1, 3, 3, 1),
        window_strides=(1, 2, 2, 1),
        padding="VALID")


# ----------------------------------------------------------------------------
# Parameters (deterministic, synthetic, BN folded, Cout lane-padded)
# ----------------------------------------------------------------------------
def _make_conv_bn_params(key, cin, cout, cout_pad, k_pad=None):
    k1, k2, k3, k4, k5 = jax.random.split(key, 5)
    w = jax.random.normal(k1, (cout, cin, 3, 3), jnp.float32)
    w = w * (1.0 / jnp.sqrt(float(cin * 9)))
    gamma = 1.0 + 0.1 * jax.random.normal(k2, (cout,), jnp.float32)
    beta = 0.1 * jax.random.normal(k3, (cout,), jnp.float32)
    mean = 0.1 * jax.random.normal(k4, (cout,), jnp.float32)
    var = jax.random.uniform(k5, (cout,), jnp.float32, 0.5, 1.5)
    scale = gamma / jnp.sqrt(var + _BN_EPS)
    shift = beta - mean * scale

    # (Cout,Cin,KH,KW) -> (KH*KW*Cin, Cout) matching im2col column order
    # (kh, kw, c), BN scale folded in.  Only Cout is zero-padded (lane-dense
    # stores); K stays at 9*cin_real (except conv_0: padded to 16).
    w2 = jnp.transpose(w, (2, 3, 1, 0)).reshape(9 * cin, cout) * scale[None, :]
    w2 = jnp.pad(w2, ((0, 0), (0, cout_pad - cout)))
    if k_pad is not None and k_pad > w2.shape[0]:
        w2 = jnp.pad(w2, ((0, k_pad - w2.shape[0]), (0, 0)))
    shift_p = jnp.pad(shift, (0, cout_pad - cout))
    return w2.astype(jnp.bfloat16), shift_p


def make_stem_params(key, in_channels=1):
    keys = jax.random.split(key, 5)
    k0_pad = ((9 * in_channels + 15) // 16) * 16     # conv_0 K: 9 -> 16
    return [
        _make_conv_bn_params(keys[0], in_channels, 32, 128, k_pad=k0_pad),
        _make_conv_bn_params(keys[1], 32, 32, 128),    # conv_1, s1
        _make_conv_bn_params(keys[2], 32, 64, 128),    # conv_2, s1
        _make_conv_bn_params(keys[3], 64, 80, 128),    # conv_3, s2
        _make_conv_bn_params(keys[4], 80, 192, 256),   # conv_4, s1
    ]


# ----------------------------------------------------------------------------
# Stem_layer forward (NCHW in / NCHW out, like PyTorch)
# ----------------------------------------------------------------------------
@jax.jit
def stem_layer_forward(x_nchw, params):
    x = jnp.transpose(x_nchw, (0, 2, 3, 1)).astype(jnp.bfloat16)  # -> NHWC
    x = _conv_bn_layer(x, params[0], stride=2, cin_real=x.shape[-1])  # conv_0
    x = _conv_bn_layer(x, params[1], stride=1, cin_real=32)           # conv_1
    x = _conv_bn_layer(x, params[2], stride=1, cin_real=32)           # conv_2
    x = _maxpool_3x3_s2(x)                                            # pool_0
    x = _conv_bn_layer(x, params[3], stride=2, cin_real=64)           # conv_3
    x = _conv_bn_layer(x, params[4], stride=1, cin_real=80)           # conv_4
    x = _maxpool_3x3_s2(x)                                            # pool_1
    x = x[..., :_FINAL_CHANNELS].astype(jnp.float32)   # drop padded lanes
    return jnp.transpose(x, (0, 3, 1, 2))              # -> NCHW


if __name__ == "__main__":
    key = jax.random.PRNGKey(0)
    k_x, k_p = jax.random.split(key)
    # Smallest spatial size that survives all strided/pooling stages: 63x63.
    x = jax.random.normal(k_x, (2, 1, 63, 63), jnp.float32)   # NCHW
    params = make_stem_params(k_p, in_channels=1)
    out = stem_layer_forward(x, params)
    out = jax.block_until_ready(out)
    assert out.shape == (2, 192, 1, 1), out.shape
    assert bool(jnp.all(jnp.isfinite(out)))
    print("KERNEL_OK")
</pallas_src>

<mosaic_0001>
module attributes {stable_mosaic.version = 11 : i64} {
  func.func @_conv_bn_silu_kernel(%arg0: i32, %arg1: memref<968x16xbf16, #tpu.memory_space<vmem>>, %arg2: memref<16x128xbf16, #tpu.memory_space<vmem>>, %arg3: memref<1x128xf32, #tpu.memory_space<vmem>>, %arg4: memref<968x128xbf16, #tpu.memory_space<vmem>>) attributes {dimension_semantics = [#tpu.dimension_semantics<parallel>], iteration_bounds = array<i64: 2>, scalar_prefetch = 0 : i64, scratch_operands = 0 : i64, tpu.core_type = #tpu.core_type<tc>, window_params = [{transform_indices = @transform_0, window_bounds = array<i64: 968, 16>}, {pipeline_mode = #tpu.pipeline_mode<synchronous>, transform_indices = @transform_1, window_bounds = array<i64: 16, 128>}, {pipeline_mode = #tpu.pipeline_mode<synchronous>, transform_indices = @transform_2, window_bounds = array<i64: 1, 128>}, {transform_indices = @transform_3, window_bounds = array<i64: 968, 128>}]} {
    %c0 = arith.constant 0 : index
    %c0_0 = arith.constant 0 : index
    %0 = vector.load %arg1[%c0, %c0_0] : memref<968x16xbf16, #tpu.memory_space<vmem>>, vector<968x16xbf16>
    %c0_1 = arith.constant 0 : index
    %c0_2 = arith.constant 0 : index
    %1 = vector.load %arg2[%c0_1, %c0_2] : memref<16x128xbf16, #tpu.memory_space<vmem>>, vector<16x128xbf16>
    %cst = arith.constant dense<0.000000e+00> : vector<968x128xf32>
    %2 = tpu.matmul %0, %1, %cst {dimension_numbers = #tpu.dot_dimension_numbers<[1], [0], [0], [1], [0, 0, 1, 1], [], []>} : vector<968x16xbf16>, vector<16x128xbf16>, vector<968x128xf32> -> vector<968x128xf32>
    %c0_3 = arith.constant 0 : index
    %c0_4 = arith.constant 0 : index
    %3 = vector.load %arg3[%c0_3, %c0_4] : memref<1x128xf32, #tpu.memory_space<vmem>>, vector<1x128xf32>
    %4 = vector.broadcast %3 : vector<1x128xf32> to vector<968x128xf32>
    %5 = arith.addf %2, %4 : vector<968x128xf32>
    %6 = arith.negf %5 : vector<968x128xf32>
    %7 = math.exp %6 : vector<968x128xf32>
    %cst_5 = arith.constant 1.000000e+00 : f32
    %8 = vector.broadcast %cst_5 : f32 to vector<968x128xf32>
    %9 = arith.addf %8, %7 : vector<968x128xf32>
    %10 = arith.divf %8, %9 : vector<968x128xf32>
    %11 = arith.mulf %5, %10 : vector<968x128xf32>
    %12 = arith.truncf %11 : vector<968x128xf32> to vector<968x128xbf16>
    %c0_6 = arith.constant 0 : index
    %c0_7 = arith.constant 0 : index
    %13 = vector.load %arg4[%c0_6, %c0_7] : memref<968x128xbf16, #tpu.memory_space<vmem>>, vector<968x128xbf16>
    tpu.vector_store %arg4[%c0_6, %c0_7], %12 {strides = array<i32>} : memref<968x128xbf16, #tpu.memory_space<vmem>>, vector<968x128xbf16>,
    return
  }
  func.func @transform_0(%arg0: i32) -> (i32, i32) {
    %c0_i32 = arith.constant 0 : i32
    %c0_i32_0 = arith.constant 0 : i32
    return %arg0, %c0_i32 : i32, i32
  }
  func.func @transform_1(%arg0: i32) -> (i32, i32) {
    %c0_i32 = arith.constant 0 : i32
    %c0_i32_0 = arith.constant 0 : i32
    %c0_i32_1 = arith.constant 0 : i32
    return %c0_i32, %c0_i32_0 : i32, i32
  }
  func.func @transform_2(%arg0: i32) -> (i32, i32) {
    %c0_i32 = arith.constant 0 : i32
    %c0_i32_0 = arith.constant 0 : i32
    %c0_i32_1 = arith.constant 0 : i32
    return %c0_i32, %c0_i32_0 : i32, i32
  }
  func.func @transform_3(%arg0: i32) -> (i32, i32) {
    %c0_i32 = arith.constant 0 : i32
    %c0_i32_0 = arith.constant 0 : i32
    return %arg0, %c0_i32 : i32, i32
  }
}

module attributes {stable_mosaic.version = 11 : i64} {
  func.func @_conv_bn_silu_kernel(%arg0: i32, %arg1: memref<848x288xbf16, #tpu.memory_space<vmem>>, %arg2: memref<288x128xbf16, #tpu.memory_space<vmem>>, %arg3: memref<1x128xf32, #tpu.memory_space<vmem>>, %arg4: memref<848x128xbf16, #tpu.memory_space<vmem>>) attributes {dimension_semantics = [#tpu.dimension_semantics<parallel>], iteration_bounds = array<i64: 2>, scalar_prefetch = 0 : i64, scratch_operands = 0 : i64, tpu.core_type = #tpu.core_type<tc>, window_params = [{transform_indices = @transform_0, window_bounds = array<i64: 848, 288>}, {pipeline_mode = #tpu.pipeline_mode<synchronous>, transform_indices = @transform_1, window_bounds = array<i64: 288, 128>}, {pipeline_mode = #tpu.pipeline_mode<synchronous>, transform_indices = @transform_2, window_bounds = array<i64: 1, 128>}, {transform_indices = @transform_3, window_bounds = array<i64: 848, 128>}]} {
    %c0 = arith.constant 0 : index
    %c0_0 = arith.constant 0 : index
    %0 = vector.load %arg1[%c0, %c0_0] : memref<848x288xbf16, #tpu.memory_space<vmem>>, vector<848x288xbf16>
    %c0_1 = arith.constant 0 : index
    %c0_2 = arith.constant 0 : index
    %1 = vector.load %arg2[%c0_1, %c0_2] : memref<288x128xbf16, #tpu.memory_space<vmem>>, vector<288x128xbf16>
    %cst = arith.constant dense<0.000000e+00> : vector<848x128xf32>
    %2 = tpu.matmul %0, %1, %cst {dimension_numbers = #tpu.dot_dimension_numbers<[1], [0], [0], [1], [0, 0, 1, 1], [], []>} : vector<848x288xbf16>, vector<288x128xbf16>, vector<848x128xf32> -> vector<848x128xf32>
    %c0_3 = arith.constant 0 : index
    %c0_4 = arith.constant 0 : index
    %3 = vector.load %arg3[%c0_3, %c0_4] : memref<1x128xf32, #tpu.memory_space<vmem>>, vector<1x128xf32>
    %4 = vector.broadcast %3 : vector<1x128xf32> to vector<848x128xf32>
    %5 = arith.addf %2, %4 : vector<848x128xf32>
    %6 = arith.negf %5 : vector<848x128xf32>
    %7 = math.exp %6 : vector<848x128xf32>
    %cst_5 = arith.constant 1.000000e+00 : f32
    %8 = vector.broadcast %cst_5 : f32 to vector<848x128xf32>
    %9 = arith.addf %8, %7 : vector<848x128xf32>
    %10 = arith.divf %8, %9 : vector<848x128xf32>
    %11 = arith.mulf %5, %10 : vector<848x128xf32>
    %12 = arith.truncf %11 : vector<848x128xf32> to vector<848x128xbf16>
    %c0_6 = arith.constant 0 : index
    %c0_7 = arith.constant 0 : index
    %13 = vector.load %arg4[%c0_6, %c0_7] : memref<848x128xbf16, #tpu.memory_space<vmem>>, vector<848x128xbf16>
    tpu.vector_store %arg4[%c0_6, %c0_7], %12 {strides = array<i32>} : memref<848x128xbf16, #tpu.memory_space<vmem>>, vector<848x128xbf16>,
    return
  }
  func.func @transform_0(%arg0: i32) -> (i32, i32) {
    %c0_i32 = arith.constant 0 : i32
    %c0_i32_0 = arith.constant 0 : i32
    return %arg0, %c0_i32 : i32, i32
  }
  func.func @transform_1(%arg0: i32) -> (i32, i32) {
    %c0_i32 = arith.constant 0 : i32
    %c0_i32_0 = arith.constant 0 : i32
    %c0_i32_1 = arith.constant 0 : i32
    return %c0_i32, %c0_i32_0 : i32, i32
  }
  func.func @transform_2(%arg0: i32) -> (i32, i32) {
    %c0_i32 = arith.constant 0 : i32
    %c0_i32_0 = arith.constant 0 : i32
    %c0_i32_1 = arith.constant 0 : i32
    return %c0_i32, %c0_i32_0 : i32, i32
  }
  func.func @transform_3(%arg0: i32) -> (i32, i32) {
    %c0_i32 = arith.constant 0 : i32
    %c0_i32_0 = arith.constant 0 : i32
    return %arg0, %c0_i32 : i32, i32
  }
}

module attributes {stable_mosaic.version = 11 : i64} {
  func.func @_conv_bn_silu_kernel(%arg0: i32, %arg1: memref<736x288xbf16, #tpu.memory_space<vmem>>, %arg2: memref<288x128xbf16, #tpu.memory_space<vmem>>, %arg3: memref<1x128xf32, #tpu.memory_space<vmem>>, %arg4: memref<736x128xbf16, #tpu.memory_space<vmem>>) attributes {dimension_semantics = [#tpu.dimension_semantics<parallel>], iteration_bounds = array<i64: 2>, scalar_prefetch = 0 : i64, scratch_operands = 0 : i64, tpu.core_type = #tpu.core_type<tc>, window_params = [{transform_indices = @transform_0, window_bounds = array<i64: 736, 288>}, {pipeline_mode = #tpu.pipeline_mode<synchronous>, transform_indices = @transform_1, window_bounds = array<i64: 288, 128>}, {pipeline_mode = #tpu.pipeline_mode<synchronous>, transform_indices = @transform_2, window_bounds = array<i64: 1, 128>}, {transform_indices = @transform_3, window_bounds = array<i64: 736, 128>}]} {
    %c0 = arith.constant 0 : index
    %c0_0 = arith.constant 0 : index
    %0 = vector.load %arg1[%c0, %c0_0] : memref<736x288xbf16, #tpu.memory_space<vmem>>, vector<736x288xbf16>
    %c0_1 = arith.constant 0 : index
    %c0_2 = arith.constant 0 : index
    %1 = vector.load %arg2[%c0_1, %c0_2] : memref<288x128xbf16, #tpu.memory_space<vmem>>, vector<288x128xbf16>
    %cst = arith.constant dense<0.000000e+00> : vector<736x128xf32>
    %2 = tpu.matmul %0, %1, %cst {dimension_numbers = #tpu.dot_dimension_numbers<[1], [0], [0], [1], [0, 0, 1, 1], [], []>} : vector<736x288xbf16>, vector<288x128xbf16>, vector<736x128xf32> -> vector<736x128xf32>
    %c0_3 = arith.constant 0 : index
    %c0_4 = arith.constant 0 : index
    %3 = vector.load %arg3[%c0_3, %c0_4] : memref<1x128xf32, #tpu.memory_space<vmem>>, vector<1x128xf32>
    %4 = vector.broadcast %3 : vector<1x128xf32> to vector<736x128xf32>
    %5 = arith.addf %2, %4 : vector<736x128xf32>
    %6 = arith.negf %5 : vector<736x128xf32>
    %7 = math.exp %6 : vector<736x128xf32>
    %cst_5 = arith.constant 1.000000e+00 : f32
    %8 = vector.broadcast %cst_5 : f32 to vector<736x128xf32>
    %9 = arith.addf %8, %7 : vector<736x128xf32>
    %10 = arith.divf %8, %9 : vector<736x128xf32>
    %11 = arith.mulf %5, %10 : vector<736x128xf32>
    %12 = arith.truncf %11 : vector<736x128xf32> to vector<736x128xbf16>
    %c0_6 = arith.constant 0 : index
    %c0_7 = arith.constant 0 : index
    %13 = vector.load %arg4[%c0_6, %c0_7] : memref<736x128xbf16, #tpu.memory_space<vmem>>, vector<736x128xbf16>
    tpu.vector_store %arg4[%c0_6, %c0_7], %12 {strides = array<i32>} : memref<736x128xbf16, #tpu.memory_space<vmem>>, vector<736x128xbf16>,
    return
  }
  func.func @transform_0(%arg0: i32) -> (i32, i32) {
    %c0_i32 = arith.constant 0 : i32
    %c0_i32_0 = arith.constant 0 : i32
    return %arg0, %c0_i32 : i32, i32
  }
  func.func @transform_1(%arg0: i32) -> (i32, i32) {
    %c0_i32 = arith.constant 0 : i32
    %c0_i32_0 = arith.constant 0 : i32
    %c0_i32_1 = arith.constant 0 : i32
    return %c0_i32, %c0_i32_0 : i32, i32
  }
  func.func @transform_2(%arg0: i32) -> (i32, i32) {
    %c0_i32 = arith.constant 0 : i32
    %c0_i32_0 = arith.constant 0 : i32
    %c0_i32_1 = arith.constant 0 : i32
    return %c0_i32, %c0_i32_0 : i32, i32
  }
  func.func @transform_3(%arg0: i32) -> (i32, i32) {
    %c0_i32 = arith.constant 0 : i32
    %c0_i32_0 = arith.constant 0 : i32
    return %arg0, %c0_i32 : i32, i32
  }
}

module attributes {stable_mosaic.version = 11 : i64} {
  func.func @_conv_bn_silu_kernel(%arg0: i32, %arg1: memref<72x576xbf16, #tpu.memory_space<vmem>>, %arg2: memref<576x128xbf16, #tpu.memory_space<vmem>>, %arg3: memref<1x128xf32, #tpu.memory_space<vmem>>, %arg4: memref<72x128xbf16, #tpu.memory_space<vmem>>) attributes {dimension_semantics = [#tpu.dimension_semantics<parallel>], iteration_bounds = array<i64: 1>, scalar_prefetch = 0 : i64, scratch_operands = 0 : i64, tpu.core_type = #tpu.core_type<tc>, window_params = [{transform_indices = @transform_0, window_bounds = array<i64: 72, 576>}, {pipeline_mode = #tpu.pipeline_mode<synchronous>, transform_indices = @transform_1, window_bounds = array<i64: 576, 128>}, {pipeline_mode = #tpu.pipeline_mode<synchronous>, transform_indices = @transform_2, window_bounds = array<i64: 1, 128>}, {transform_indices = @transform_3, window_bounds = array<i64: 72, 128>}]} {
    %c0 = arith.constant 0 : index
    %c0_0 = arith.constant 0 : index
    %0 = vector.load %arg1[%c0, %c0_0] : memref<72x576xbf16, #tpu.memory_space<vmem>>, vector<72x576xbf16>
    %c0_1 = arith.constant 0 : index
    %c0_2 = arith.constant 0 : index
    %1 = vector.load %arg2[%c0_1, %c0_2] : memref<576x128xbf16, #tpu.memory_space<vmem>>, vector<576x128xbf16>
    %cst = arith.constant dense<0.000000e+00> : vector<72x128xf32>
    %2 = tpu.matmul %0, %1, %cst {dimension_numbers = #tpu.dot_dimension_numbers<[1], [0], [0], [1], [0, 0, 1, 1], [], []>} : vector<72x576xbf16>, vector<576x128xbf16>, vector<72x128xf32> -> vector<72x128xf32>
    %c0_3 = arith.constant 0 : index
    %c0_4 = arith.constant 0 : index
    %3 = vector.load %arg3[%c0_3, %c0_4] : memref<1x128xf32, #tpu.memory_space<vmem>>, vector<1x128xf32>
    %4 = vector.broadcast %3 : vector<1x128xf32> to vector<72x128xf32>
    %5 = arith.addf %2, %4 : vector<72x128xf32>
    %6 = arith.negf %5 : vector<72x128xf32>
    %7 = math.exp %6 : vector<72x128xf32>
    %cst_5 = arith.constant 1.000000e+00 : f32
    %8 = vector.broadcast %cst_5 : f32 to vector<72x128xf32>
    %9 = arith.addf %8, %7 : vector<72x128xf32>
    %10 = arith.divf %8, %9 : vector<72x128xf32>
    %11 = arith.mulf %5, %10 : vector<72x128xf32>
    %12 = arith.truncf %11 : vector<72x128xf32> to vector<72x128xbf16>
    %c0_6 = arith.constant 0 : index
    %c0_7 = arith.constant 0 : index
    %13 = vector.load %arg4[%c0_6, %c0_7] : memref<72x128xbf16, #tpu.memory_space<vmem>>, vector<72x128xbf16>
    tpu.vector_store %arg4[%c0_6, %c0_7], %12 {strides = array<i32>} : memref<72x128xbf16, #tpu.memory_space<vmem>>, vector<72x128xbf16>,
    return
  }
  func.func @transform_0(%arg0: i32) -> (i32, i32) {
    %c0_i32 = arith.constant 0 : i32
    %c0_i32_0 = arith.constant 0 : i32
    return %arg0, %c0_i32 : i32, i32
  }
  func.func @transform_1(%arg0: i32) -> (i32, i32) {
    %c0_i32 = arith.constant 0 : i32
    %c0_i32_0 = arith.constant 0 : i32
    %c0_i32_1 = arith.constant 0 : i32
    return %c0_i32, %c0_i32_0 : i32, i32
  }
  func.func @transform_2(%arg0: i32) -> (i32, i32) {
    %c0_i32 = arith.constant 0 : i32
    %c0_i32_0 = arith.constant 0 : i32
    %c0_i32_1 = arith.constant 0 : i32
    return %c0_i32, %c0_i32_0 : i32, i32
  }
  func.func @transform_3(%arg0: i32) -> (i32, i32) {
    %c0_i32 = arith.constant 0 : i32
    %c0_i32_0 = arith.constant 0 : i32
    return %arg0, %c0_i32 : i32, i32
  }
}

module attributes {stable_mosaic.version = 11 : i64} {
  func.func @_conv_bn_silu_kernel(%arg0: i32, %arg1: memref<32x720xbf16, #tpu.memory_space<vmem>>, %arg2: memref<720x256xbf16, #tpu.memory_space<vmem>>, %arg3: memref<1x256xf32, #tpu.memory_space<vmem>>, %arg4: memref<32x256xbf16, #tpu.memory_space<vmem>>) attributes {dimension_semantics = [#tpu.dimension_semantics<parallel>], iteration_bounds = array<i64: 1>, scalar_prefetch = 0 : i64, scratch_operands = 0 : i64, tpu.core_type = #tpu.core_type<tc>, window_params = [{transform_indices = @transform_0, window_bounds = array<i64: 32, 720>}, {pipeline_mode = #tpu.pipeline_mode<synchronous>, transform_indices = @transform_1, window_bounds = array<i64: 720, 256>}, {pipeline_mode = #tpu.pipeline_mode<synchronous>, transform_indices = @transform_2, window_bounds = array<i64: 1, 256>}, {transform_indices = @transform_3, window_bounds = array<i64: 32, 256>}]} {
    %c0 = arith.constant 0 : index
    %c0_0 = arith.constant 0 : index
    %0 = vector.load %arg1[%c0, %c0_0] : memref<32x720xbf16, #tpu.memory_space<vmem>>, vector<32x720xbf16>
    %c0_1 = arith.constant 0 : index
    %c0_2 = arith.constant 0 : index
    %1 = vector.load %arg2[%c0_1, %c0_2] : memref<720x256xbf16, #tpu.memory_space<vmem>>, vector<720x256xbf16>
    %cst = arith.constant dense<0.000000e+00> : vector<32x256xf32>
    %2 = tpu.matmul %0, %1, %cst {dimension_numbers = #tpu.dot_dimension_numbers<[1], [0], [0], [1], [0, 0, 1, 1], [], []>} : vector<32x720xbf16>, vector<720x256xbf16>, vector<32x256xf32> -> vector<32x256xf32>
    %c0_3 = arith.constant 0 : index
    %c0_4 = arith.constant 0 : index
    %3 = vector.load %arg3[%c0_3, %c0_4] : memref<1x256xf32, #tpu.memory_space<vmem>>, vector<1x256xf32>
    %4 = vector.broadcast %3 : vector<1x256xf32> to vector<32x256xf32>
    %5 = arith.addf %2, %4 : vector<32x256xf32>
    %6 = arith.negf %5 : vector<32x256xf32>
    %7 = math.exp %6 : vector<32x256xf32>
    %cst_5 = arith.constant 1.000000e+00 : f32
    %8 = vector.broadcast %cst_5 : f32 to vector<32x256xf32>
    %9 = arith.addf %8, %7 : vector<32x256xf32>
    %10 = arith.divf %8, %9 : vector<32x256xf32>
    %11 = arith.mulf %5, %10 : vector<32x256xf32>
    %12 = arith.truncf %11 : vector<32x256xf32> to vector<32x256xbf16>
    %c0_6 = arith.constant 0 : index
    %c0_7 = arith.constant 0 : index
    %13 = vector.load %arg4[%c0_6, %c0_7] : memref<32x256xbf16, #tpu.memory_space<vmem>>, vector<32x256xbf16>
    tpu.vector_store %arg4[%c0_6, %c0_7], %12 {strides = array<i32>} : memref<32x256xbf16, #tpu.memory_space<vmem>>, vector<32x256xbf16>,
    return
  }
  func.func @transform_0(%arg0: i32) -> (i32, i32) {
    %c0_i32 = arith.constant 0 : i32
    %c0_i32_0 = arith.constant 0 : i32
    return %arg0, %c0_i32 : i32, i32
  }
  func.func @transform_1(%arg0: i32) -> (i32, i32) {
    %c0_i32 = arith.constant 0 : i32
    %c0_i32_0 = arith.constant 0 : i32
    %c0_i32_1 = arith.constant 0 : i32
    return %c0_i32, %c0_i32_0 : i32, i32
  }
  func.func @transform_2(%arg0: i32) -> (i32, i32) {
    %c0_i32 = arith.constant 0 : i32
    %c0_i32_0 = arith.constant 0 : i32
    %c0_i32_1 = arith.constant 0 : i32
    return %c0_i32, %c0_i32_0 : i32, i32
  }
  func.func @transform_3(%arg0: i32) -> (i32, i32) {
    %c0_i32 = arith.constant 0 : i32
    %c0_i32_0 = arith.constant 0 : i32
    return %arg0, %c0_i32 : i32, i32
  }
}

</mosaic_0001>

<bundles_post_ra>
// kernel: stem_layer_forward.5
= control target key start
LH: loop header
LB: loop body
LE: loop exit
PB: predicated region body
PF: predicated region fallthrough
CT: control target
= control target key end

     0   :  { %s5183_s12 = smov 0   ;;  %s5185_s13 = smov 0   ;;  %s6357_s0 = inlined_call_operand.vmem [shape: bf16[1922,16], index: 0, kind: input, shape index: {}]   ;;  %s6358_s1 = inlined_call_operand.vmem [shape: bf16[16,128], index: 1, kind: input, shape index: {}]   ;;  %s6359_s2 = inlined_call_operand.vmem [shape: f32[1,128], index: 2, kind: input, shape index: {}]   ;;  %s6360_s3 = inlined_call_operand.vmem [shape: bf16[1922,128], index: 3, kind: output, shape index: {}]  }
   0x1   :  { %s5187_s14 = smov 0  }
   0x2 LB: > { %s5196_s15 = sadd.s32 4294967295, %s5127_s14   ;;  %s5198_s16 = sadd.s32 1, %s5127_s14   ;;  %s5127_s14 = sphi %s5187_s14, %s6367_s14   ;;  %s5123_s13 = sphi %s5185_s13, %s6366_s13   ;;  %s5119_s12 = sphi %s5183_s12, %s6365_s12  }
   0x3   : > { %s85_s17 = ssub.s32 %s5127_s14, %s5198_s16  ;;  %s88_s18 = sadd.s32 1, %s5123_s13 }
   0x4   : > { %p86_p0 = scmp.eq.s32.totalorder %s85_s17, 0  ;;  %p98_p1 = scmp.ne.s32.totalorder %s5123_s13, %s5119_s12 }
   0x5   : > { %p99_p2 = scmp.eq.s32.totalorder %s5196_s15, 1  ;;  %p3258_p3 = scmp.ge.s32.totalorder %s5127_s14, 1 }
   0x6   : > { %s5206_s19 = scalar_select %p86_p0, %s5123_s13, %s88_s18  }
   0x7   : > { %p5208_p4 = por %p99_p2, %p98_p1  ;;  %p146_p5 = scmp.lt.s32.totalorder %s5127_s14, 3 }
   0x9   : > { %p147_p6 = pnand %p3258_p3, %p146_p5 }
   0xa   : > { %v4525_v0 = vld [vmem:[%s6358_s1] sm:$0xff] (!%p147_p6)   ;;  %v5161_v1 = vmov (!%p147_p6), 0.0   ;;  %s5218_s23 = smul.u32 (!%p147_p6), 121, %s5196_s15  ;;  %vm5162_vm0 = vmmov (!%p147_p6), 0   ;;  %vm632_vm1 = vcmask (!%p147_p6), 130048   ;;  %s170_s4 = sand.u32 (!%p147_p6), 1, %s5119_s12  }
   0xb   : > { %150 = sbr.rel (%p147_p6) target bundleno = 601 (0x259), region = 32  ;;  %4186 = vmatprep.subr.bf16.mxu0 (!%p147_p6), %v5161_v1  ;;  %4432 = vmatprep.subr.bf16.mxu1 (!%p147_p6), %v5161_v1  ;;  %v5446_v56 = vld [vmem:[%s6359_s2] ss:$0 sm:$0xff] (!%p147_p6) }
   0xc   : > { %4187 = vmatpush3.bf16.msra.mxu0 (!%p147_p6), %v4525_v0  ;;  %4433 = vmatpush3.bf16.msra.mxu1 (!%p147_p6), %v4525_v0  ;;  %p178_p7 = scmp.lt.s32.totalorder (!%p147_p6), %s5218_s23, 240  ;;  %s5534_s5 = smul.u32 (!%p147_p6), 484, %s170_s4 }
   0xd   : > { %4188 = vmatprep.mubr.msk.bf16.mxu0 (!%p147_p6), %vm5162_vm0, %v5161_v1  ;;  %4312 = vmatprep.mubr.msk.bf16.mxu1 (!%p147_p6), %vm5162_vm0, %v5161_v1 }
   0xe   : > { %s5554_s6 = scalar_lea.vmem (!%p147_p6), [#allocation2], %s5534_s5  }
  0x12   : > { %s179_s24 = scalar_select %p178_p7, %s5218_s23, 240 }
  0x13   : > { %s2797_s11 = ssub.s32 (%p5208_p4), 241, %s5218_s23  ;;  %s3762_s12 = smul.u32 (%p5208_p4), 484, %s5196_s15 }
  0x14   : > { %s3259_s25 = sshll.u32 %s179_s24, 2  ;;  %p2798_p8 = scmp.lt.s32.totalorder (%p5208_p4), %s2797_s11, 121 }
  0x15   : > { %s5229_s28 = scalar_lea.vmem %s6357_s0, %s3259_s25  ;;  %s6165_s18 = scalar_lea.vmem (%p5208_p4), %s6360_s3, %s3762_s12  }
  0x16   : > { %v4526_v2 = vld [vmem:[%s5229_s28] sm:$0xff]   ;;  %v4527_v3 = vld [vmem:[%s5229_s28 + $0xf8] sm:$0xff]   ;;  %v4528_v4 = vld [vmem:[%s5229_s28 + $0x8] sm:$0xff]  }
  0x17   : > { %4189 = vmatmul.mubr.msk.bf16.vlgmr.msra.gmra.mrb[0].mxu0 %vm632_vm1, %v4526_v2  ;;  %4313 = vmatmul.mubr.msk.bf16.vlgmr.msra.gmra.mrb[0].mxu1 %vm632_vm1, %v4527_v3  ;;  %v4529_v5 = vld [vmem:[%s5229_s28 + $0x100] sm:$0xff]   ;;  %v4530_v6 = vld [vmem:[%s5229_s28 + $0x10] sm:$0xff]   ;;  %v4531_v7 = vld [vmem:[%s5229_s28 + $0x108] sm:$0xff]  }
  0x18   : > { %4192 = vmatprep.mubr.msk.bf16.mxu0 %vm5162_vm0, %v5161_v1  ;;  %4316 = vmatprep.mubr.msk.bf16.mxu1 %vm5162_vm0, %v5161_v1  ;;  %v4532_v8 = vld [vmem:[%s5229_s28 + $0x18] sm:$0xff]   ;;  %v4533_v9 = vld [vmem:[%s5229_s28 + $0x110] sm:$0xff]   ;;  %v4534_v10 = vld [vmem:[%s5229_s28 + $0x20] sm:$0xff]  }
  0x19   : > { %v4535_v11 = vld [vmem:[%s5229_s28 + $0x118] sm:$0xff]   ;;  %v4536_v12 = vld [vmem:[%s5229_s28 + $0x28] sm:$0xff]   ;;  %v4537_v13 = vld [vmem:[%s5229_s28 + $0x120] sm:$0xff]  }
  0x1a   : > { %v4538_v14 = vld [vmem:[%s5229_s28 + $0x30] sm:$0xff]   ;;  %v4539_v15 = vld [vmem:[%s5229_s28 + $0x128] sm:$0xff]   ;;  %v4540_v16 = vld [vmem:[%s5229_s28 + $0x38] sm:$0xff]  }
  0x1b   : > { %v4541_v17 = vld [vmem:[%s5229_s28 + $0x130] sm:$0xff]   ;;  %v4542_v18 = vld [vmem:[%s5229_s28 + $0x40] sm:$0xff]   ;;  %v4543_v19 = vld [vmem:[%s5229_s28 + $0x138] sm:$0xff]  }
  0x1c   : > { %v4544_v20 = vld [vmem:[%s5229_s28 + $0x48] sm:$0xff]   ;;  %v4545_v21 = vld [vmem:[%s5229_s28 + $0x140] sm:$0xff]   ;;  %v4546_v22 = vld [vmem:[%s5229_s28 + $0x50] sm:$0xff]  }
  0x1d   : > { %v4547_v23 = vld [vmem:[%s5229_s28 + $0x148] sm:$0xff]   ;;  %v4548_v24 = vld [vmem:[%s5229_s28 + $0x58] sm:$0xff]   ;;  %v4549_v25 = vld [vmem:[%s5229_s28 + $0x150] sm:$0xff]  }
  0x1e   : > { %v4550_v26 = vld [vmem:[%s5229_s28 + $0x60] sm:$0xff]   ;;  %v4551_v27 = vld [vmem:[%s5229_s28 + $0x158] sm:$0xff]   ;;  %v4552_v28 = vld [vmem:[%s5229_s28 + $0x68] sm:$0xff]  }
  0x1f   : > { %4193 = vmatmul.mubr.msk.bf16.gmra.mrb[4].mxu0 %vm632_vm1, %v4528_v4  ;;  %4317 = vmatmul.mubr.msk.bf16.gmra.mrb[4].mxu1 %vm632_vm1, %v4529_v5  ;;  %v4553_v29 = vld [vmem:[%s5229_s28 + $0x160] sm:$0xff]   ;;  %v4554_v30 = vld [vmem:[%s5229_s28 + $0x70] sm:$0xff]   ;;  %v4555_v31 = vld [vmem:[%s5229_s28 + $0x168] sm:$0xff]  }
  0x20   : > { %4196 = vmatprep.mubr.msk.bf16.mxu0 %vm5162_vm0, %v5161_v1  ;;  %4320 = vmatprep.mubr.msk.bf16.mxu1 %vm5162_vm0, %v5161_v1  ;;  %v4556_v32 = vld [vmem:[%s5229_s28 + $0x78] sm:$0xff]   ;;  %v4557_v33 = vld [vmem:[%s5229_s28 + $0x170] sm:$0xff]   ;;  %v4558_v34 = vld [vmem:[%s5229_s28 + $0x80] sm:$0xff]  }
  0x21   : > { %v4559_v35 = vld [vmem:[%s5229_s28 + $0x178] sm:$0xff]   ;;  %v4560_v36 = vld [vmem:[%s5229_s28 + $0x88] sm:$0xff]   ;;  %v4561_v37 = vld [vmem:[%s5229_s28 + $0x180] sm:$0xff]  }
  0x22   : > { %v4562_v38 = vld [vmem:[%s5229_s28 + $0x90] sm:$0xff]   ;;  %v4563_v39 = vld [vmem:[%s5229_s28 + $0x188] sm:$0xff]   ;;  %v4564_v40 = vld [vmem:[%s5229_s28 + $0x98] sm:$0xff]  }
  0x23   : > { %v4565_v41 = vld [vmem:[%s5229_s28 + $0x190] sm:$0xff]   ;;  %v4566_v42 = vld [vmem:[%s5229_s28 + $0xa0] sm:$0xff]   ;;  %v4567_v43 = vld [vmem:[%s5229_s28 + $0x198] sm:$0xff]  }
  0x24   : > { %v4568_v44 = vld [vmem:[%s5229_s28 + $0xa8] sm:$0xff]   ;;  %v4569_v45 = vld [vmem:[%s5229_s28 + $0x1a0] sm:$0xff]   ;;  %v4570_v46 = vld [vmem:[%s5229_s28 + $0xb0] sm:$0xff]  }
  0x25   : > { %v4571_v47 = vld [vmem:[%s5229_s28 + $0x1a8] sm:$0xff]   ;;  %v4572_v48 = vld [vmem:[%s5229_s28 + $0xb8] sm:$0xff]   ;;  %v4573_v49 = vld [vmem:[%s5229_s28 + $0x1b0] sm:$0xff]  }
  0x26   : > { %v4574_v50 = vld [vmem:[%s5229_s28 + $0xc0] sm:$0xff]   ;;  %v4575_v51 = vld [vmem:[%s5229_s28 + $0x1b8] sm:$0xff]   ;;  %v4576_v52 = vld [vmem:[%s5229_s28 + $0xc8] sm:$0xff]  }
  0x27   : > { %4197 = vmatmul.mubr.msk.bf16.gmra.mrb[8].mxu0 %vm632_vm1, %v4530_v6  ;;  %4321 = vmatmul.mubr.msk.bf16.gmra.mrb[8].mxu1 %vm632_vm1, %v4531_v7  ;;  %v4577_v53 = vld [vmem:[%s5229_s28 + $0x1c0] sm:$0xff]   ;;  %v4578_v54 = vld [vmem:[%s5229_s28 + $0xd0] sm:$0xff]   ;;  %v4579_v55 = vld [vmem:[%s5229_s28 + $0x1c8] sm:$0xff]  }
  0x28   : > { %4200 = vmatprep.mubr.msk.bf16.mxu0 %vm5162_vm0, %v5161_v1  ;;  %4324 = vmatprep.mubr.msk.bf16.mxu1 %vm5162_vm0, %v5161_v1  ;;  %v4580_v61 = vld [vmem:[%s5229_s28 + $0xd8] sm:$0xff]   ;;  %v4581_v2 = vld [vmem:[%s5229_s28 + $0x1d0] sm:$0xff]  }
  0x2f   : > { %4201 = vmatmul.mubr.msk.bf16.gmra.mrb[12].mxu0 %vm632_vm1, %v4532_v8  ;;  %4325 = vmatmul.mubr.msk.bf16.gmra.mrb[12].mxu1 %vm632_vm1, %v4533_v9 }
  0x30   : > { %4204 = vmatprep.mubr.msk.bf16.mxu0 %vm5162_vm0, %v5161_v1  ;;  %4328 = vmatprep.mubr.msk.bf16.mxu1 %vm5162_vm0, %v5161_v1 }
  0x37   : > { %4205 = vmatmul.mubr.msk.bf16.gmra.mrb[16].mxu0 %vm632_vm1, %v4534_v10  ;;  %4329 = vmatmul.mubr.msk.bf16.gmra.mrb[16].mxu1 %vm632_vm1, %v4535_v11 }
  0x38   : > { %4208 = vmatprep.mubr.msk.bf16.mxu0 %vm5162_vm0, %v5161_v1  ;;  %4332 = vmatprep.mubr.msk.bf16.mxu1 %vm5162_vm0, %v5161_v1 }
  0x3f   : > { %4209 = vmatmul.mubr.msk.bf16.gmra.mrb[20].mxu0 %vm632_vm1, %v4536_v12  ;;  %4333 = vmatmul.mubr.msk.bf16.gmra.mrb[20].mxu1 %vm632_vm1, %v4537_v13 }
  0x40   : > { %4212 = vmatprep.mubr.msk.bf16.mxu0 %vm5162_vm0, %v5161_v1  ;;  %4336 = vmatprep.mubr.msk.bf16.mxu1 %vm5162_vm0, %v5161_v1 }
  0x47   : > { %4213 = vmatmul.mubr.msk.bf16.gmra.mrb[24].mxu0 %vm632_vm1, %v4538_v14  ;;  %4337 = vmatmul.mubr.msk.bf16.gmra.mrb[24].mxu1 %vm632_vm1, %v4539_v15 }
  0x48   : > { %4216 = vmatprep.mubr.msk.bf16.mxu0 %vm5162_vm0, %v5161_v1  ;;  %4340 = vmatprep.mubr.msk.bf16.mxu1 %vm5162_vm0, %v5161_v1 }
  0x4f   : > { %4217 = vmatmul.mubr.msk.bf16.gmra.mrb[28].mxu0 %vm632_vm1, %v4540_v16  ;;  %4341 = vmatmul.mubr.msk.bf16.gmra.mrb[28].mxu1 %vm632_vm1, %v4541_v17  ;;  %v4582_v16 = vld [vmem:[%s5229_s28 + $0xe0] sm:$0xff]  }
  0x50   : > { %4220 = vmatprep.mubr.msk.bf16.mxu0 %vm5162_vm0, %v5161_v1  ;;  %4344 = vmatprep.mubr.msk.bf16.mxu1 %vm5162_vm0, %v5161_v1 }
  0x57   : > { %4221 = vmatmul.mubr.msk.bf16.gmra.mrb[32].mxu0 %vm632_vm1, %v4542_v18  ;;  %4345 = vmatmul.mubr.msk.bf16.gmra.mrb[32].mxu1 %vm632_vm1, %v4543_v19 }
  0x58   : > { %4224 = vmatprep.mubr.msk.bf16.mxu0 %vm5162_vm0, %v5161_v1  ;;  %4348 = vmatprep.mubr.msk.bf16.mxu1 %vm5162_vm0, %v5161_v1 }
  0x5f   : > { %4225 = vmatmul.mubr.msk.bf16.gmra.mrb[36].mxu0 %vm632_vm1, %v4544_v20  ;;  %4349 = vmatmul.mubr.msk.bf16.gmra.mrb[36].mxu1 %vm632_vm1, %v4545_v21  ;;  %v4583_v20 = vld [vmem:[%s5229_s28 + $0x1d8] sm:$0xff]  }
  0x60   : > { %4228 = vmatprep.mubr.msk.bf16.mxu0 %vm5162_vm0, %v5161_v1  ;;  %4352 = vmatprep.mubr.msk.bf16.mxu1 %vm5162_vm0, %v5161_v1 }
  0x67   : > { %4229 = vmatmul.mubr.msk.bf16.gmra.mrb[40].mxu0 %vm632_vm1, %v4546_v22  ;;  %4353 = vmatmul.mubr.msk.bf16.gmra.mrb[40].mxu1 %vm632_vm1, %v4547_v23 }
  0x68   : > { %4232 = vmatprep.mubr.msk.bf16.mxu0 %vm5162_vm0, %v5161_v1  ;;  %4356 = vmatprep.mubr.msk.bf16.mxu1 %vm5162_vm0, %v5161_v1 }
  0x6f   : > { %4233 = vmatmul.mubr.msk.bf16.gmra.mrb[44].mxu0 %vm632_vm1, %v4548_v24  ;;  %4357 = vmatmul.mubr.msk.bf16.gmra.mrb[44].mxu1 %vm632_vm1, %v4549_v25 }
  0x70   : > { %4236 = vmatprep.mubr.msk.bf16.mxu0 %vm5162_vm0, %v5161_v1  ;;  %4360 = vmatprep.mubr.msk.bf16.mxu1 %vm5162_vm0, %v5161_v1 }
  0x77   : > { %4237 = vmatmul.mubr.msk.bf16.gmra.mrb[48].mxu0 %vm632_vm1, %v4550_v26  ;;  %4361 = vmatmul.mubr.msk.bf16.gmra.mrb[48].mxu1 %vm632_vm1, %v4551_v27 }
  0x78   : > { %4240 = vmatprep.mubr.msk.bf16.mxu0 %vm5162_vm0, %v5161_v1  ;;  %4364 = vmatprep.mubr.msk.bf16.mxu1 %vm5162_vm0, %v5161_v1 }
  0x7f   : > { %4241 = vmatmul.mubr.msk.bf16.gmra.mrb[52].mxu0 %vm632_vm1, %v4552_v28  ;;  %4365 = vmatmul.mubr.msk.bf16.gmra.mrb[52].mxu1 %vm632_vm1, %v4553_v29 }
  0x80   : > { %4244 = vmatprep.mubr.msk.bf16.mxu0 %vm5162_vm0, %v5161_v1  ;;  %4368 = vmatprep.mubr.msk.bf16.mxu1 %vm5162_vm0, %v5161_v1 }
  0x87   : > { %4245 = vmatmul.mubr.msk.bf16.gmra.mrb[56].mxu0 %vm632_vm1, %v4554_v30  ;;  %4369 = vmatmul.mubr.msk.bf16.gmra.mrb[56].mxu1 %vm632_vm1, %v4555_v31 }
  0x88   : > { %4248 = vmatprep.mubr.msk.bf16.mxu0 %vm5162_vm0, %v5161_v1  ;;  %4372 = vmatprep.mubr.msk.bf16.mxu1 %vm5162_vm0, %v5161_v1 }
  0x8f   : > { %4249 = vmatmul.mubr.msk.bf16.gmra.mrb[60].mxu0 %vm632_vm1, %v4556_v32  ;;  %4373 = vmatmul.mubr.msk.bf16.gmra.mrb[60].mxu1 %vm632_vm1, %v4557_v33 }
  0x90   : > { %4252 = vmatprep.mubr.msk.bf16.mxu0 %vm5162_vm0, %v5161_v1  ;;  %4376 = vmatprep.mubr.msk.bf16.mxu1 %vm5162_vm0, %v5161_v1 }
  0x97   : > { %4253 = vmatmul.mubr.msk.bf16.gmra.mrb[64].mxu0 %vm632_vm1, %v4558_v34  ;;  %4377 = vmatmul.mubr.msk.bf16.gmra.mrb[64].mxu1 %vm632_vm1, %v4559_v35 }
  0x98   : > { %4256 = vmatprep.mubr.msk.bf16.mxu0 %vm5162_vm0, %v5161_v1  ;;  %4380 = vmatprep.mubr.msk.bf16.mxu1 %vm5162_vm0, %v5161_v1 }
  0x9f   : > { %4257 = vmatmul.mubr.msk.bf16.gmra.mrb[68].mxu0 %vm632_vm1, %v4560_v36  ;;  %4381 = vmatmul.mubr.msk.bf16.gmra.mrb[68].mxu1 %vm632_vm1, %v4561_v37 }
  0xa0   : > { %4260 = vmatprep.mubr.msk.bf16.mxu0 %vm5162_vm0, %v5161_v1  ;;  %4384 = vmatprep.mubr.msk.bf16.mxu1 %vm5162_vm0, %v5161_v1 }
  0xa7   : > { %4261 = vmatmul.mubr.msk.bf16.gmra.mrb[72].mxu0 %vm632_vm1, %v4562_v38  ;;  %4385 = vmatmul.mubr.msk.bf16.gmra.mrb[72].mxu1 %vm632_vm1, %v4563_v39  ;;  %v4584_v39 = vld [vmem:[%s5229_s28 + $0xe8] sm:$0xff]  }
  0xa8   : > { %4264 = vmatprep.mubr.msk.bf16.mxu0 %vm5162_vm0, %v5161_v1  ;;  %4388 = vmatprep.mubr.msk.bf16.mxu1 %vm5162_vm0, %v5161_v1 }
  0xaf   : > { %4265 = vmatmul.mubr.msk.bf16.gmra.mrb[76].mxu0 %vm632_vm1, %v4564_v40  ;;  %4389 = vmatmul.mubr.msk.bf16.gmra.mrb[76].mxu1 %vm632_vm1, %v4565_v41 }
  0xb0   : > { %4268 = vmatprep.mubr.msk.bf16.mxu0 %vm5162_vm0, %v5161_v1  ;;  %4392 = vmatprep.mubr.msk.bf16.mxu1 %vm5162_vm0, %v5161_v1 }
  0xb7   : > { %4269 = vmatmul.mubr.msk.bf16.gmra.mrb[80].mxu0 %vm632_vm1, %v4566_v42  ;;  %4393 = vmatmul.mubr.msk.bf16.gmra.mrb[80].mxu1 %vm632_vm1, %v4567_v43 }
  0xb8   : > { %4272 = vmatprep.mubr.msk.bf16.mxu0 %vm5162_vm0, %v5161_v1  ;;  %4396 = vmatprep.mubr.msk.bf16.mxu1 %vm5162_vm0, %v5161_v1 }
  0xbf   : > { %4273 = vmatmul.mubr.msk.bf16.gmra.mrb[84].mxu0 %vm632_vm1, %v4568_v44  ;;  %4397 = vmatmul.mubr.msk.bf16.gmra.mrb[84].mxu1 %vm632_vm1, %v4569_v45  ;;  %v4585_v45 = vld [vmem:[%s5229_s28 + $0x1e0] ss:$0 sps:$4 sm:$0xff]  }
  0xc0   : > { %4276 = vmatprep.mubr.msk.bf16.mxu0 %vm5162_vm0, %v5161_v1  ;;  %4400 = vmatprep.mubr.msk.bf16.mxu1 %vm5162_vm0, %v5161_v1 }
  0xc7   : > { %4277 = vmatmul.mubr.msk.bf16.gmra.mrb[88].mxu0 %vm632_vm1, %v4570_v46  ;;  %4401 = vmatmul.mubr.msk.bf16.gmra.mrb[88].mxu1 %vm632_vm1, %v4571_v47 }
  0xc8   : > { %4280 = vmatprep.mubr.msk.bf16.mxu0 %vm5162_vm0, %v5161_v1  ;;  %4404 = vmatprep.mubr.msk.bf16.mxu1 %vm5162_vm0, %v5161_v1 }
  0xcf   : > { %4281 = vmatmul.mubr.msk.bf16.gmra.mrb[92].mxu0 %vm632_vm1, %v4572_v48  ;;  %4405 = vmatmul.mubr.msk.bf16.gmra.mrb[92].mxu1 %vm632_vm1, %v4573_v49 }
  0xd0   : > { %4284 = vmatprep.mubr.msk.bf16.mxu0 %vm5162_vm0, %v5161_v1  ;;  %4408 = vmatprep.mubr.msk.bf16.mxu1 %vm5162_vm0, %v5161_v1 }
  0xd7   : > { %4285 = vmatmul.mubr.msk.bf16.gmra.mrb[96].mxu0 %vm632_vm1, %v4574_v50  ;;  %4409 = vmatmul.mubr.msk.bf16.gmra.mrb[96].mxu1 %vm632_vm1, %v4575_v51 }
  0xd8   : > { %4288 = vmatprep.mubr.msk.bf16.mxu0 %vm5162_vm0, %v5161_v1  ;;  %4412 = vmatprep.mubr.msk.bf16.mxu1 %vm5162_vm0, %v5161_v1 }
  0xdf   : > { %4289 = vmatmul.mubr.msk.bf16.gmra.mrb[100].mxu0 %vm632_vm1, %v4576_v52  ;;  %4413 = vmatmul.mubr.msk.bf16.gmra.mrb[100].mxu1 %vm632_vm1, %v4577_v53 }
  0xe0   : > { %4292 = vmatprep.mubr.msk.bf16.mxu0 %vm5162_vm0, %v5161_v1  ;;  %4416 = vmatprep.mubr.msk.bf16.mxu1 %vm5162_vm0, %v5161_v1 }
  0xe7   : > { %4293 = vmatmul.mubr.msk.bf16.gmra.mrb[104].mxu0 %vm632_vm1, %v4578_v54  ;;  %4417 = vmatmul.mubr.msk.bf16.gmra.mrb[104].mxu1 %vm632_vm1, %v4579_v55 }
  0xe8   : > { %4296 = vmatprep.mubr.msk.bf16.mxu0 %vm5162_vm0, %v5161_v1  ;;  %4420 = vmatprep.mubr.msk.bf16.mxu1 %vm5162_vm0, %v5161_v1 }
  0xea   : > { %v850_v57 = vpop.f32.mrb[0].mxu0  ;;  %v1098_v59 = vpop.f32.mrb[0].mxu1 }
  0xeb   : > { %v5453_v58 = vadd.f32 %v5446_v56, %v850_v57  ;;  %v4190_v60 = vpop.f32.mrb[1].mxu0  ;;  %v5457_v62 = vadd.f32 %v5446_v56, %v1098_v59  ;;  %v4314_v63 = vpop.f32.mrb[1].mxu1 }
  0xec   : > { %v853_v0 = vpop.f32.mrb[2].mxu0  ;;  %v1101_v5 = vpop.f32.mrb[2].mxu1 }
  0xed   : > { %v3384_v3 = vmul.f32 -1.442695, %v5453_v58  ;;  %v5462_v4 = vadd.f32 %v5446_v56, %v853_v0  ;;  %v4191_v6 = vpop.f32.mrb[3].mxu0  ;;  %v3446_v7 = vmul.f32 -1.442695, %v5457_v62  ;;  %v5466_v8 = vadd.f32 %v5446_v56, %v1101_v5  ;;  %v4315_v9 = vpop.f32.mrb[3].mxu1 }
  0xee   : > { %v4586_v6 = vld [vmem:[%s5229_s28 + $0xf0] sm:$0xff]  }
  0xef   : > { %4587 = vpow2.f32 %v3384_v3  ;;  %v3385_v10 = vmul.f32 -1.442695, %v5462_v4  ;;  %4297 = vmatmul.mubr.msk.bf16.gmra.mrb[108].mxu0 %vm632_vm1, %v4580_v61  ;;  %v3447_v11 = vmul.f32 -1.442695, %v5466_v8  ;;  %4421 = vmatmul.mubr.msk.bf16.gmra.mrb[108].mxu1 %vm632_vm1, %v4581_v2 }
  0xf0   : > { %4589 = vpow2.f32 %v3446_v7  ;;  %4300 = vmatprep.mubr.msk.bf16.mxu0 %vm5162_vm0, %v5161_v1  ;;  %4424 = vmatprep.mubr.msk.bf16.mxu1 %vm5162_vm0, %v5161_v1 }
  0xf1   : > { %4591 = vpow2.f32 %v3385_v10 }
  0xf2   : > { %4593 = vpow2.f32 %v3447_v11  ;;  %v858_v12 = vpop.f32.mrb[4].mxu0  ;;  %v1106_v14 = vpop.f32.mrb[4].mxu1 }
  0xf3   : > { %v5477_v13 = vadd.f32 %v5446_v56, %v858_v12  ;;  %v4194_v15 = vpop.f32.mrb[5].mxu0  ;;  %v5481_v17 = vadd.f32 %v5446_v56, %v1106_v14  ;;  %v4318_v18 = vpop.f32.mrb[5].mxu1 }
  0xf4   : > { %v861_v19 = vpop.f32.mrb[6].mxu0  ;;  %v1109_v23 = vpop.f32.mrb[6].mxu1 }
  0xf5   : > { %v3386_v21 = vmul.f32 -1.442695, %v5477_v13  ;;  %v5486_v22 = vadd.f32 %v5446_v56, %v861_v19  ;;  %v4195_v24 = vpop.f32.mrb[7].mxu0  ;;  %v3448_v25 = vmul.f32 -1.442695, %v5481_v17  ;;  %v5490_v26 = vadd.f32 %v5446_v56, %v1109_v23  ;;  %v4319_v27 = vpop.f32.mrb[7].mxu1 }
  0xf7   : > { %4595 = vpow2.f32 %v3386_v21  ;;  %v3387_v28 = vmul.f32 -1.442695, %v5486_v22  ;;  %4301 = vmatmul.mubr.msk.bf16.gmra.mrb[112].mxu0 %vm632_vm1, %v4582_v16  ;;  %v3449_v29 = vmul.f32 -1.442695, %v5490_v26  ;;  %4425 = vmatmul.mubr.msk.bf16.gmra.mrb[112].mxu1 %vm632_vm1, %v4583_v20 }
  0xf8   : > { %4597 = vpow2.f32 %v3448_v25  ;;  %4304 = vmatprep.mubr.msk.bf16.mxu0 %vm5162_vm0, %v5161_v1  ;;  %4428 = vmatprep.mubr.msk.bf16.mxu1 %vm5162_vm0, %v5161_v1 }
  0xf9   : > { %v4588_v30 = vpop.eup %4587  ;;  %4599 = vpow2.f32 %v3387_v28 }
  0xfa   : > { %v4590_v31 = vpop.eup %4589  ;;  %v1699_v32 = vadd.f32 1.0, %v4588_v30  ;;  %4601 = vpow2.f32 %v3449_v29  ;;  %v866_v33 = vpop.f32.mrb[8].mxu0 }
  0xfb   : > { %v4592_v34 = vpop.eup %4591  ;;  %v1761_v35 = vadd.f32 1.0, %v4590_v31  ;;  %v5501_v36 = vadd.f32 %v5446_v56, %v866_v33  ;;  %v1114_v37 = vpop.f32.mrb[8].mxu1 }
  0xfc   : > { %v4198_v38 = vpop.f32.mrb[9].mxu0  ;;  %v4594_v40 = vpop.eup %4593  ;;  %4603 = vrcp.f32 %v1699_v32  ;;  %v1700_v41 = vadd.f32 1.0, %v4592_v34  ;;  %v5505_v42 = vadd.f32 %v5446_v56, %v1114_v37 }
  0xfd   : > { %v4322_v43 = vpop.f32.mrb[9].mxu1  ;;  %v869_v44 = vpop.f32.mrb[10].mxu0  ;;  %4605 = vrcp.f32 %v1761_v35  ;;  %v1762_v46 = vadd.f32 1.0, %v4594_v40  ;;  %v3388_v47 = vmul.f32 -1.442695, %v5501_v36 }
  0xfe   : > { %v5510_v48 = vadd.f32 %v5446_v56, %v869_v44  ;;  %v1117_v49 = vpop.f32.mrb[10].mxu1  ;;  %v4199_v50 = vpop.f32.mrb[11].mxu0  ;;  %4607 = vrcp.f32 %v1700_v41  ;;  %v3450_v51 = vmul.f32 -1.442695, %v5505_v42 }
  0xff   : > { %v5514_v52 = vadd.f32 %v5446_v56, %v1117_v49  ;;  %v4323_v53 = vpop.f32.mrb[11].mxu1  ;;  %4609 = vrcp.f32 %v1762_v46  ;;  %4305 = vmatmul.mubr.msk.bf16.gmra.mrb[116].mxu0 %vm632_vm1, %v4584_v39  ;;  %4429 = vmatmul.mubr.msk.bf16.gmra.mrb[116].mxu1 %vm632_vm1, %v4585_v45 }
 0x100   : > { %v3389_v54 = vmul.f32 -1.442695, %v5510_v48  ;;  %4611 = vpow2.f32 %v3388_v47  ;;  %4308 = vmatprep.mubr.msk.bf16.mxu0 %vm5162_vm0, %v5161_v1 }
 0x101   : > { %v3451_v55 = vmul.f32 -1.442695, %v5514_v52  ;;  %v4596_v57 = vpop.eup %4595  ;;  %4613 = vpow2.f32 %v3450_v51 }
 0x102   : > { %v4598_v59 = vpop.eup %4597  ;;  %v1701_v60 = vadd.f32 1.0, %v4596_v57  ;;  %4615 = vpow2.f32 %v3389_v54  ;;  %v874_v61 = vpop.f32.mrb[12].mxu0 }
 0x103   : > { %v4600_v63 = vpop.eup %4599  ;;  %v1763_v0 = vadd.f32 1.0, %v4598_v59  ;;  %4617 = vpow2.f32 %v3451_v55  ;;  %v5524_v2 = vadd.f32 %v5446_v56, %v874_v61  ;;  %v1122_v3 = vpop.f32.mrb[12].mxu1 }
 0x104   : > { %v4202_v5 = vpop.f32.mrb[13].mxu0  ;;  %v4602_v7 = vpop.eup %4601  ;;  %4619 = vrcp.f32 %v1701_v60  ;;  %v1702_v9 = vadd.f32 1.0, %v4600_v63  ;;  %v5528_v1 = vadd.f32 %v5446_v56, %v1122_v3 }
 0x105   : > { %v4326_v10 = vpop.f32.mrb[13].mxu1  ;;  %v877_v11 = vpop.f32.mrb[14].mxu0  ;;  %4621 = vrcp.f32 %v1763_v0  ;;  %v1764_v12 = vadd.f32 1.0, %v4602_v7  ;;  %v3390_v14 = vmul.f32 -1.442695, %v5524_v2 }
 0x106   : > { %v5532_v15 = vadd.f32 %v5446_v56, %v877_v11  ;;  %v1125_v16 = vpop.f32.mrb[14].mxu1  ;;  %v4203_v18 = vpop.f32.mrb[15].mxu0  ;;  %4623 = vrcp.f32 %v1702_v9  ;;  %v3452_v20 = vmul.f32 -1.442695, %v5528_v1 }
 0x107   : > { %v4604_v19 = vpop.eup %4603  ;;  %v5538_v21 = vadd.f32 %v5446_v56, %v1125_v16  ;;  %v4327_v23 = vpop.f32.mrb[15].mxu1  ;;  %4625 = vrcp.f32 %v1764_v12  ;;  %4309 = vmatmul.mubr.msk.bf16.gmra.mrb[120].mxu0 %vm632_vm1, %v4586_v6 }
 0x108   : > { %v4606_v24 = vpop.eup %4605  ;;  %v3391_v25 = vmul.f32 -1.442695, %v5532_v15  ;;  %4627 = vpow2.f32 %v3390_v14  ;;  %v2062_v30 = vmul.f32 %v4604_v19, %v5453_v58 }
 0x109   : > { %v4608_v27 = vpop.eup %4607  ;;  %v3453_v28 = vmul.f32 -1.442695, %v5538_v21  ;;  %4629 = vpow2.f32 %v3452_v20  ;;  %v2124_v33 = vmul.f32 %v4606_v24, %v5457_v62 }
 0x10a   : > { %v4610_v29 = vpop.eup %4609  ;;  %v2063_v31 = vmul.f32 %v4608_v27, %v5462_v4  ;;  %4631 = vpow2.f32 %v3391_v25  ;;  %v882_v35 = vpop.f32.mrb[16].mxu0 }
 0x10b   : > { %v4612_v32 = vpop.eup %4611  ;;  %v2125_v34 = vmul.f32 %v4610_v29, %v5466_v8  ;;  %4633 = vpow2.f32 %v3453_v28  ;;  %v5548_v40 = vadd.f32 %v5446_v56, %v882_v35  ;;  %v1130_v41 = vpop.f32.mrb[16].mxu1 }
 0x10c   : > { %v4614_v37 = vpop.eup %4613  ;;  %v3768_v38 = vpack.c.bf16 %v2063_v31, %v2062_v30  ;;  %v1703_v39 = vadd.f32 1.0, %v4612_v32  ;;  %v4206_v58 = vpop.f32.mrb[17].mxu0  ;;  %v5551_v45 = vadd.f32 %v5446_v56, %v1130_v41 }
 0x10d   : > { %v4616_v43 = vpop.eup %4615  ;;  %v3923_v4 = vpack.c.bf16 %v2125_v34, %v2124_v33  ;;  %v1765_v44 = vadd.f32 1.0, %v4614_v37  ;;  %v4330_v62 = vpop.f32.mrb[17].mxu1  ;;  %v3392_v49 = vmul.f32 -1.442695, %v5548_v40 }
 0x10e   : > { %v885_v8 = vpop.f32.mrb[18].mxu0  ;;  %v4618_v46 = vpop.eup %4617  ;;  %3769 = vst [vmem:[%s5554_s6] sm:$0xff] %v3768_v38   ;;  %4635 = vrcp.f32 %v1703_v39  ;;  %v1704_v47 = vadd.f32 1.0, %v4616_v43  ;;  %v3454_v57 = vmul.f32 -1.442695, %v5551_v45 }
 0x10f   : > { %v5559_v50 = vadd.f32 %v5446_v56, %v885_v8  ;;  %v1133_v51 = vpop.f32.mrb[18].mxu1  ;;  %v4207_v53 = vpop.f32.mrb[19].mxu0  ;;  %4095 = vst [vmem:[%s5554_s6 + $0xf8] sm:$0xff] %v3923_v4   ;;  %4637 = vrcp.f32 %v1765_v44  ;;  %v1766_v55 = vadd.f32 1.0, %v4618_v46 }
 0x110   : > { %v4620_v54 = vpop.eup %4619  ;;  %v5564_v59 = vadd.f32 %v5446_v56, %v1133_v51  ;;  %v4331_v60 = vpop.f32.mrb[19].mxu1  ;;  %4639 = vrcp.f32 %v1704_v47 }
 0x111   : > { %v4622_v61 = vpop.eup %4621  ;;  %v3393_v63 = vmul.f32 -1.442695, %v5559_v50  ;;  %4641 = vrcp.f32 %v1766_v55  ;;  %v2064_v6 = vmul.f32 %v4620_v54, %v5477_v13 }
 0x112   : > { %v4624_v0 = vpop.eup %4623  ;;  %v3455_v3 = vmul.f32 -1.442695, %v5564_v59  ;;  %4643 = vpow2.f32 %v3392_v49  ;;  %v2126_v10 = vmul.f32 %v4622_v61, %v5481_v17  ;;  %v890_v12 = vpop.f32.mrb[20].mxu0 }
 0x113   : > { %v4626_v5 = vpop.eup %4625  ;;  %v2065_v7 = vmul.f32 %v4624_v0, %v5486_v22  ;;  %4645 = vpow2.f32 %v3454_v57  ;;  %v5573_v19 = vadd.f32 %v5446_v56, %v890_v12  ;;  %v1138_v20 = vpop.f32.mrb[20].mxu1 }
 0x114   : > { %v4628_v9 = vpop.eup %4627  ;;  %v2127_v11 = vmul.f32 %v4626_v5, %v5490_v26  ;;  %4647 = vpow2.f32 %v3393_v63  ;;  %v4210_v13 = vpop.f32.mrb[21].mxu0  ;;  %v5576_v17 = vadd.f32 %v5446_v56, %v1138_v20 }
 0x115   : > { %v4630_v14 = vpop.eup %4629  ;;  %v3773_v16 = vpack.c.bf16 %v2065_v7, %v2064_v6  ;;  %v1705_v18 = vadd.f32 1.0, %v4628_v9  ;;  %4649 = vpow2.f32 %v3455_v3  ;;  %v4334_v26 = vpop.f32.mrb[21].mxu1  ;;  %v3394_v29 = vmul.f32 -1.442695, %v5573_v19 }
 0x116   : > { %v4632_v22 = vpop.eup %4631  ;;  %v3928_v23 = vpack.c.bf16 %v2127_v11, %v2126_v10  ;;  %v1767_v24 = vadd.f32 1.0, %v4630_v14  ;;  %v893_v25 = vpop.f32.mrb[22].mxu0  ;;  %v3456_v34 = vmul.f32 -1.442695, %v5576_v17 }
 0x117   : > { %v4634_v27 = vpop.eup %4633  ;;  %4065 = vst [vmem:[%s5554_s6 + $0x8] sm:$0xff] %v3773_v16   ;;  %4651 = vrcp.f32 %v1705_v18  ;;  %v1706_v28 = vadd.f32 1.0, %v4632_v22  ;;  %v5581_v30 = vadd.f32 %v5446_v56, %v893_v25  ;;  %v1141_v31 = vpop.f32.mrb[22].mxu1 }
 0x118   : > { %v4211_v32 = vpop.f32.mrb[23].mxu0  ;;  %4096 = vst [vmem:[%s5554_s6 + $0x100] sm:$0xff] %v3928_v23   ;;  %4653 = vrcp.f32 %v1767_v24  ;;  %v1768_v33 = vadd.f32 1.0, %v4634_v27  ;;  %v5586_v35 = vadd.f32 %v5446_v56, %v1141_v31  ;;  %v4335_v37 = vpop.f32.mrb[23].mxu1 }
 0x119   : > { %v4636_v38 = vpop.eup %4635  ;;  %4655 = vrcp.f32 %v1706_v28  ;;  %v3395_v39 = vmul.f32 -1.442695, %v5581_v30 }
 0x11a   : > { %v4638_v41 = vpop.eup %4637  ;;  %4657 = vrcp.f32 %v1768_v33  ;;  %v3457_v58 = vmul.f32 -1.442695, %v5586_v35  ;;  %v2066_v44 = vmul.f32 %v4636_v38, %v5501_v36  ;;  %v898_v8 = vpop.f32.mrb[24].mxu0 }
 0x11b   : > { %v4640_v43 = vpop.eup %4639  ;;  %4659 = vpow2.f32 %v3394_v29  ;;  %v2128_v47 = vmul.f32 %v4638_v41, %v5505_v42  ;;  %v5595_v51 = vadd.f32 %v5446_v56, %v898_v8  ;;  %v1146_v53 = vpop.f32.mrb[24].mxu1 }
 0x11c   : > { %v4642_v4 = vpop.eup %4641  ;;  %v2067_v62 = vmul.f32 %v4640_v43, %v5510_v48  ;;  %4661 = vpow2.f32 %v3456_v34  ;;  %v4214_v54 = vpop.f32.mrb[25].mxu0  ;;  %v5598_v36 = vadd.f32 %v5446_v56, %v1146_v53 }
 0x11d   : > { %v4644_v46 = vpop.eup %4643  ;;  %v2129_v49 = vmul.f32 %v4642_v4, %v5514_v52  ;;  %4663 = vpow2.f32 %v3395_v39  ;;  %v4338_v48 = vpop.f32.mrb[25].mxu1  ;;  %v3396_v9 = vmul.f32 -1.442695, %v5595_v51 }
 0x11e   : > { %v4646_v55 = vpop.eup %4645  ;;  %v3778_v57 = vpack.c.bf16 %v2067_v62, %v2066_v44  ;;  %v1707_v60 = vadd.f32 1.0, %v4644_v46  ;;  %4665 = vpow2.f32 %v3457_v58  ;;  %v901_v61 = vpop.f32.mrb[26].mxu0  ;;  %v3458_v16 = vmul.f32 -1.442695, %v5598_v36 }
 0x11f   : > { %v4648_v42 = vpop.eup %4647  ;;  %v3933_v63 = vpack.c.bf16 %v2129_v49, %v2128_v47  ;;  %v1769_v52 = vadd.f32 1.0, %v4646_v55  ;;  %v5601_v0 = vadd.f32 %v5446_v56, %v901_v61  ;;  %v1149_v3 = vpop.f32.mrb[26].mxu1 }
 0x120   : > { %v4215_v5 = vpop.f32.mrb[27].mxu0  ;;  %v4650_v6 = vpop.eup %4649  ;;  %4066 = vst [vmem:[%s5554_s6 + $0x10] sm:$0xff] %v3778_v57   ;;  %4667 = vrcp.f32 %v1707_v60  ;;  %v1708_v7 = vadd.f32 1.0, %v4648_v42  ;;  %v5606_v10 = vadd.f32 %v5446_v56, %v1149_v3 }
 0x121   : > { %v4339_v11 = vpop.f32.mrb[27].mxu1  ;;  %v4652_v12 = vpop.eup %4651  ;;  %4097 = vst [vmem:[%s5554_s6 + $0x108] sm:$0xff] %v3933_v63   ;;  %4669 = vrcp.f32 %v1769_v52  ;;  %v1770_v14 = vadd.f32 1.0, %v4650_v6  ;;  %v3397_v20 = vmul.f32 -1.442695, %v5601_v0 }
 0x122   : > { %v4654_v18 = vpop.eup %4653  ;;  %4671 = vrcp.f32 %v1708_v7  ;;  %v3459_v22 = vmul.f32 -1.442695, %v5606_v10  ;;  %v2068_v24 = vmul.f32 %v4652_v12, %v5524_v2  ;;  %v906_v25 = vpop.f32.mrb[28].mxu0 }
 0x123   : > { %v4656_v13 = vpop.eup %4655  ;;  %4673 = vrcp.f32 %v1770_v14  ;;  %v2130_v28 = vmul.f32 %v4654_v18, %v5528_v1  ;;  %v5617_v31 = vadd.f32 %v5446_v56, %v906_v25  ;;  %v1154_v32 = vpop.f32.mrb[28].mxu1 }
 0x124   : > { %v4658_v23 = vpop.eup %4657  ;;  %v2069_v26 = vmul.f32 %v4656_v13, %v5532_v15  ;;  %4675 = vpow2.f32 %v3396_v9  ;;  %v4218_v33 = vpop.f32.mrb[29].mxu0  ;;  %v5620_v2 = vadd.f32 %v5446_v56, %v1154_v32 }
 0x125   : > { %v4660_v27 = vpop.eup %4659  ;;  %v2131_v29 = vmul.f32 %v4658_v23, %v5538_v21  ;;  %4677 = vpow2.f32 %v3458_v16  ;;  %v4342_v15 = vpop.f32.mrb[29].mxu1  ;;  %v3398_v62 = vmul.f32 -1.442695, %v5617_v31 }
 0x126   : > { %v4662_v34 = vpop.eup %4661  ;;  %v3783_v37 = vpack.c.bf16 %v2069_v26, %v2068_v24  ;;  %v1709_v38 = vadd.f32 1.0, %v4660_v27  ;;  %4679 = vpow2.f32 %v3397_v20  ;;  %v909_v39 = vpop.f32.mrb[30].mxu0  ;;  %v3460_v49 = vmul.f32 -1.442695, %v5620_v2 }
 0x127   : > { %v4664_v1 = vpop.eup %4663  ;;  %v3938_v41 = vpack.c.bf16 %v2131_v29, %v2130_v28  ;;  %v1771_v21 = vadd.f32 1.0, %v4662_v34  ;;  %4681 = vpow2.f32 %v3459_v22  ;;  %v1157_v58 = vpop.f32.mrb[30].mxu1  ;;  %v5625_v8 = vadd.f32 %v5446_v56, %v909_v39 }
 0x128   : > { %v4219_v43 = vpop.f32.mrb[31].mxu0  ;;  %v4666_v4 = vpop.eup %4665  ;;  %4067 = vst [vmem:[%s5554_s6 + $0x18] sm:$0xff] %v3783_v37   ;;  %4683 = vrcp.f32 %v1709_v38  ;;  %v1710_v44 = vadd.f32 1.0, %v4664_v1  ;;  %v5630_v53 = vadd.f32 %v5446_v56, %v1157_v58 }
 0x129   : > { %v4343_v46 = vpop.f32.mrb[31].mxu1  ;;  %4098 = vst [vmem:[%s5554_s6 + $0x110] sm:$0xff] %v3938_v41   ;;  %4685 = vrcp.f32 %v1771_v21  ;;  %v1772_v47 = vadd.f32 1.0, %v4666_v4  ;;  %v3399_v55 = vmul.f32 -1.442695, %v5625_v8 }
 0x12a   : > { %v4668_v54 = vpop.eup %4667  ;;  %4687 = vrcp.f32 %v1710_v44  ;;  %v3461_v60 = vmul.f32 -1.442695, %v5630_v53  ;;  %v914_v61 = vpop.f32.mrb[32].mxu0 }
 0x12b   : > { %v4670_v57 = vpop.eup %4669  ;;  %4689 = vrcp.f32 %v1772_v47  ;;  %v2070_v63 = vmul.f32 %v4668_v54, %v5548_v40  ;;  %v5637_v3 = vadd.f32 %v5446_v56, %v914_v61  ;;  %v1162_v5 = vpop.f32.mrb[32].mxu1 }
 0x12c   : > { %v4672_v48 = vpop.eup %4671  ;;  %4691 = vpow2.f32 %v3398_v62  ;;  %v4222_v6 = vpop.f32.mrb[33].mxu0  ;;  %v2132_v9 = vmul.f32 %v4670_v57, %v5551_v45  ;;  %v5642_v12 = vadd.f32 %v5446_v56, %v1162_v5 }
 0x12d   : > { %v4674_v42 = vpop.eup %4673  ;;  %v2071_v52 = vmul.f32 %v4672_v48, %v5559_v50  ;;  %4693 = vpow2.f32 %v3460_v49  ;;  %v4346_v14 = vpop.f32.mrb[33].mxu1  ;;  %v3400_v27 = vmul.f32 -1.442695, %v5637_v3 }
 0x12e   : > { %v4676_v7 = vpop.eup %4675  ;;  %v2133_v11 = vmul.f32 %v4674_v42, %v5564_v59  ;;  %4695 = vpow2.f32 %v3399_v55  ;;  %v917_v40 = vpop.f32.mrb[34].mxu0  ;;  %v3462_v33 = vmul.f32 -1.442695, %v5642_v12 }
 0x12f   : > { %v4678_v16 = vpop.eup %4677  ;;  %v3788_v50 = vpack.c.bf16 %v2071_v52, %v2070_v63  ;;  %v1711_v18 = vadd.f32 1.0, %v4676_v7  ;;  %4697 = vpow2.f32 %v3461_v60  ;;  %v1165_v20 = vpop.f32.mrb[34].mxu1  ;;  %v5645_v45 = vadd.f32 %v5446_v56, %v917_v40 }
 0x130   : > { %v4223_v13 = vpop.f32.mrb[35].mxu0  ;;  %v4680_v22 = vpop.eup %4679  ;;  %v3943_v23 = vpack.c.bf16 %v2133_v11, %v2132_v9  ;;  %v1773_v24 = vadd.f32 1.0, %v4678_v16  ;;  %v5650_v28 = vadd.f32 %v5446_v56, %v1165_v20 }
 0x131   : > { %v4347_v59 = vpop.f32.mrb[35].mxu1  ;;  %v4682_v26 = vpop.eup %4681  ;;  %4068 = vst [vmem:[%s5554_s6 + $0x20] sm:$0xff] %v3788_v50   ;;  %4699 = vrcp.f32 %v1711_v18  ;;  %v1712_v25 = vadd.f32 1.0, %v4680_v22  ;;  %v3401_v37 = vmul.f32 -1.442695, %v5645_v45 }
 0x132   : > { %v4684_v29 = vpop.eup %4683  ;;  %4099 = vst [vmem:[%s5554_s6 + $0x118] sm:$0xff] %v3943_v23   ;;  %4701 = vrcp.f32 %v1773_v24  ;;  %v1774_v32 = vadd.f32 1.0, %v4682_v26  ;;  %v3463_v15 = vmul.f32 -1.442695, %v5650_v28  ;;  %v922_v39 = vpop.f32.mrb[36].mxu0 }
 0x133   : > { %v4686_v34 = vpop.eup %4685  ;;  %4703 = vrcp.f32 %v1712_v25  ;;  %v2072_v41 = vmul.f32 %v4684_v29, %v5573_v19  ;;  %v5659_v58 = vadd.f32 %v5446_v56, %v922_v39  ;;  %v1170_v43 = vpop.f32.mrb[36].mxu1 }
 0x134   : > { %v4688_v38 = vpop.eup %4687  ;;  %4705 = vrcp.f32 %v1774_v32  ;;  %v4226_v4 = vpop.f32.mrb[37].mxu0  ;;  %v2134_v62 = vmul.f32 %v4686_v34, %v5576_v17  ;;  %v5664_v47 = vadd.f32 %v5446_v56, %v1170_v43 }
 0x135   : > { %v4690_v1 = vpop.eup %4689  ;;  %v2073_v21 = vmul.f32 %v4688_v38, %v5581_v30  ;;  %4707 = vpow2.f32 %v3400_v27  ;;  %v4350_v49 = vpop.f32.mrb[37].mxu1  ;;  %v3402_v17 = vmul.f32 -1.442695, %v5659_v58 }
 0x136   : > { %v4692_v44 = vpop.eup %4691  ;;  %v2135_v46 = vmul.f32 %v4690_v1, %v5586_v35  ;;  %4709 = vpow2.f32 %v3462_v33  ;;  %v925_v19 = vpop.f32.mrb[38].mxu0  ;;  %v3464_v9 = vmul.f32 -1.442695, %v5664_v47 }
 0x137   : > { %v4694_v54 = vpop.eup %4693  ;;  %v3793_v30 = vpack.c.bf16 %v2073_v21, %v2072_v41  ;;  %v1713_v55 = vadd.f32 1.0, %v4692_v44  ;;  %4711 = vpow2.f32 %v3401_v37  ;;  %v1173_v57 = vpop.f32.mrb[38].mxu1  ;;  %v5669_v5 = vadd.f32 %v5446_v56, %v925_v19 }
 0x138   : > { %v4227_v60 = vpop.f32.mrb[39].mxu0  ;;  %v4696_v48 = vpop.eup %4695  ;;  %v3948_v61 = vpack.c.bf16 %v2135_v46, %v2134_v62  ;;  %v1775_v42 = vadd.f32 1.0, %v4694_v54  ;;  %4713 = vpow2.f32 %v3463_v15  ;;  %v5672_v6 = vadd.f32 %v5446_v56, %v1173_v57 }
 0x139   : > { %v4351_v35 = vpop.f32.mrb[39].mxu1  ;;  %v4698_v63 = vpop.eup %4697  ;;  %4069 = vst [vmem:[%s5554_s6 + $0x28] sm:$0xff] %v3793_v30   ;;  %4715 = vrcp.f32 %v1713_v55  ;;  %v1714_v52 = vadd.f32 1.0, %v4696_v48  ;;  %v3403_v14 = vmul.f32 -1.442695, %v5669_v5 }
 0x13a   : > { %4100 = vst [vmem:[%s5554_s6 + $0x120] sm:$0xff] %v3948_v61   ;;  %4717 = vrcp.f32 %v1775_v42  ;;  %v1776_v7 = vadd.f32 1.0, %v4698_v63  ;;  %v3465_v16 = vmul.f32 -1.442695, %v5672_v6  ;;  %v930_v50 = vpop.f32.mrb[40].mxu0  ;;  %v1178_v22 = vpop.f32.mrb[40].mxu1 }
 0x13b   : > { %v4700_v11 = vpop.eup %4699  ;;  %4719 = vrcp.f32 %v1714_v52  ;;  %v5680_v13 = vadd.f32 %v5446_v56, %v930_v50  ;;  %v4230_v23 = vpop.f32.mrb[41].mxu0  ;;  %v5685_v25 = vadd.f32 %v5446_v56, %v1178_v22 }
 0x13c   : > { %v4702_v40 = vpop.eup %4701  ;;  %4721 = vrcp.f32 %v1776_v7  ;;  %v2074_v20 = vmul.f32 %v4700_v11, %v5595_v51  ;;  %v4354_v27 = vpop.f32.mrb[41].mxu1 }
 0x13d   : > { %v4704_v18 = vpop.eup %4703  ;;  %4723 = vpow2.f32 %v3402_v17  ;;  %v2136_v59 = vmul.f32 %v4702_v40, %v5598_v36  ;;  %v933_v29 = vpop.f32.mrb[42].mxu0  ;;  %v3404_v33 = vmul.f32 -1.442695, %v5680_v13  ;;  %v3466_v4 = vmul.f32 -1.442695, %v5685_v25 }
 0x13e   : > { %v4706_v24 = vpop.eup %4705  ;;  %v2075_v26 = vmul.f32 %v4704_v18, %v5601_v0  ;;  %4725 = vpow2.f32 %v3464_v9  ;;  %v5690_v34 = vadd.f32 %v5446_v56, %v933_v29  ;;  %v1181_v37 = vpop.f32.mrb[42].mxu1 }
 0x13f   : > { %v4708_v32 = vpop.eup %4707  ;;  %v2137_v51 = vmul.f32 %v4706_v24, %v5606_v10  ;;  %4727 = vpow2.f32 %v3403_v14  ;;  %v4231_v36 = vpop.f32.mrb[43].mxu0  ;;  %v5695_v44 = vadd.f32 %v5446_v56, %v1181_v37 }
 0x140   : > { %v4710_v38 = vpop.eup %4709  ;;  %v3798_v0 = vpack.c.bf16 %v2075_v26, %v2074_v20  ;;  %v1715_v15 = vadd.f32 1.0, %v4708_v32  ;;  %4729 = vpow2.f32 %v3465_v16  ;;  %v4355_v39 = vpop.f32.mrb[43].mxu1  ;;  %v3405_v49 = vmul.f32 -1.442695, %v5690_v34 }
 0x141   : > { %v4712_v1 = vpop.eup %4711  ;;  %v3953_v41 = vpack.c.bf16 %v2137_v51, %v2136_v59  ;;  %v1777_v21 = vadd.f32 1.0, %v4710_v38  ;;  %4731 = vpow2.f32 %v3404_v33  ;;  %v3467_v54 = vmul.f32 -1.442695, %v5695_v44 }
 0x142   : > { %v4714_v10 = vpop.eup %4713  ;;  %4070 = vst [vmem:[%s5554_s6 + $0x30] sm:$0xff] %v3798_v0   ;;  %4733 = vrcp.f32 %v1715_v15  ;;  %v1716_v43 = vadd.f32 1.0, %v4712_v1  ;;  %v938_v30 = vpop.f32.mrb[44].mxu0 }
 0x143   : > { %v4716_v62 = vpop.eup %4715  ;;  %4101 = vst [vmem:[%s5554_s6 + $0x128] sm:$0xff] %v3953_v41   ;;  %4735 = vrcp.f32 %v1777_v21  ;;  %v1778_v46 = vadd.f32 1.0, %v4714_v10  ;;  %v5701_v57 = vadd.f32 %v5446_v56, %v938_v30  ;;  %v1186_v60 = vpop.f32.mrb[44].mxu1 }
 0x144   : > { %v4718_v19 = vpop.eup %4717  ;;  %4737 = vrcp.f32 %v1716_v43  ;;  %v4234_v48 = vpop.f32.mrb[45].mxu0  ;;  %v2076_v42 = vmul.f32 %v4716_v62, %v5617_v31  ;;  %v5709_v14 = vadd.f32 %v5446_v56, %v1186_v60 }
 0x145   : > { %v4720_v55 = vpop.eup %4719  ;;  %4739 = vrcp.f32 %v1778_v46  ;;  %v2138_v17 = vmul.f32 %v4718_v19, %v5620_v2  ;;  %v4358_v63 = vpop.f32.mrb[45].mxu1  ;;  %v3406_v11 = vmul.f32 -1.442695, %v5701_v57 }
 0x146   : > { %v4722_v61 = vpop.eup %4721  ;;  %v2077_v35 = vmul.f32 %v4720_v55, %v5625_v8  ;;  %4741 = vpow2.f32 %v3466_v4  ;;  %v941_v52 = vpop.f32.mrb[46].mxu0  ;;  %v3468_v29 = vmul.f32 -1.442695, %v5709_v14 }
 0x147   : > { %v4724_v7 = vpop.eup %4723  ;;  %v2139_v9 = vmul.f32 %v4722_v61, %v5630_v53  ;;  %4743 = vpow2.f32 %v3405_v49  ;;  %v1189_v40 = vpop.f32.mrb[46].mxu1  ;;  %v5712_v8 = vadd.f32 %v5446_v56, %v941_v52 }
 0x148   : > { %v4235_v16 = vpop.f32.mrb[47].mxu0  ;;  %v4726_v31 = vpop.eup %4725  ;;  %v3803_v2 = vpack.c.bf16 %v2077_v35, %v2076_v42  ;;  %v1717_v50 = vadd.f32 1.0, %v4724_v7  ;;  %4745 = vpow2.f32 %v3467_v54  ;;  %v5716_v59 = vadd.f32 %v5446_v56, %v1189_v40 }
 0x149   : > { %v4359_v18 = vpop.f32.mrb[47].mxu1  ;;  %v4728_v20 = vpop.eup %4727  ;;  %v3958_v53 = vpack.c.bf16 %v2139_v9, %v2138_v17  ;;  %v1779_v22 = vadd.f32 1.0, %v4726_v31  ;;  %4747 = vpow2.f32 %v3406_v11  ;;  %v3407_v33 = vmul.f32 -1.442695, %v5712_v8  ;;  %v5747_v31 = vld [vmem:[%s6359_s2] ss:$0 sm:$0xff] }
 0x14a   : > { %v4730_v23 = vpop.eup %4729  ;;  %4071 = vst [vmem:[%s5554_s6 + $0x38] sm:$0xff] %v3803_v2   ;;  %4749 = vrcp.f32 %v1717_v50  ;;  %v1718_v24 = vadd.f32 1.0, %v4728_v20  ;;  %v946_v37 = vpop.f32.mrb[48].mxu0  ;;  %v3469_v38 = vmul.f32 -1.442695, %v5716_v59 }
 0x14b   : > { %v4732_v26 = vpop.eup %4731  ;;  %4102 = vst [vmem:[%s5554_s6 + $0x130] sm:$0xff] %v3958_v53   ;;  %4751 = vrcp.f32 %v1779_v22  ;;  %v1780_v27 = vadd.f32 1.0, %v4730_v23  ;;  %v5723_v0 = vadd.f32 %v5446_v56, %v946_v37  ;;  %v1194_v15 = vpop.f32.mrb[48].mxu1 }
 0x14c   : > { %v4734_v32 = vpop.eup %4733  ;;  %4753 = vrcp.f32 %v1718_v24  ;;  %v1719_v51 = vadd.f32 1.0, %v4732_v26  ;;  %v4238_v39 = vpop.f32.mrb[49].mxu0  ;;  %v5729_v46 = vadd.f32 %v5446_v56, %v1194_v15 }
 0x14d   : > { %v4736_v36 = vpop.eup %4735  ;;  %4755 = vrcp.f32 %v1780_v27  ;;  %v2078_v41 = vmul.f32 %v4734_v32, %v5637_v3  ;;  %v4362_v21 = vpop.f32.mrb[49].mxu1  ;;  %v3408_v62 = vmul.f32 -1.442695, %v5723_v0 }
 0x14e   : > { %v4738_v1 = vpop.eup %4737  ;;  %4757 = vrcp.f32 %v1719_v51  ;;  %v949_v10 = vpop.f32.mrb[50].mxu0  ;;  %v2140_v30 = vmul.f32 %v4736_v36, %v5642_v12  ;;  %v3470_v52 = vmul.f32 -1.442695, %v5729_v46 }
 0x14f   : > { %v4740_v43 = vpop.eup %4739  ;;  %v2079_v4 = vmul.f32 %v4738_v1, %v5645_v45  ;;  %4759 = vpow2.f32 %v3468_v29  ;;  %v1197_v49 = vpop.f32.mrb[50].mxu1  ;;  %v5734_v55 = vadd.f32 %v5446_v56, %v949_v10 }
 0x150   : > { %v4239_v19 = vpop.f32.mrb[51].mxu0  ;;  %v4742_v54 = vpop.eup %4741  ;;  %v2141_v3 = vmul.f32 %v4740_v43, %v5650_v28  ;;  %4761 = vpow2.f32 %v3407_v33  ;;  %v5737_v42 = vadd.f32 %v5446_v56, %v1197_v49 }
 0x151   : > { %v4363_v60 = vpop.f32.mrb[51].mxu1  ;;  %v4744_v45 = vpop.eup %4743  ;;  %v3808_v48 = vpack.c.bf16 %v2079_v4, %v2078_v41  ;;  %v1781_v61 = vadd.f32 1.0, %v4742_v54  ;;  %4763 = vpow2.f32 %v3469_v38  ;;  %v3409_v11 = vmul.f32 -1.442695, %v5734_v55 }
 0x152   : > { %v4746_v17 = vpop.eup %4745  ;;  %v3963_v35 = vpack.c.bf16 %v2141_v3, %v2140_v30  ;;  %v1720_v63 = vadd.f32 1.0, %v4744_v45  ;;  %4765 = vpow2.f32 %v3408_v62  ;;  %v954_v40 = vpop.f32.mrb[52].mxu0  ;;  %v3471_v56 = vmul.f32 -1.442695, %v5737_v42 }
 0x153   : > { %v4748_v12 = vpop.eup %4747  ;;  %4072 = vst [vmem:[%s5554_s6 + $0x40] sm:$0xff] %v3808_v48   ;;  %4767 = vrcp.f32 %v1781_v61  ;;  %v1782_v28 = vadd.f32 1.0, %v4746_v17  ;;  %v5750_v2 = vadd.f32 %v5747_v31, %v954_v40  ;;  %v1202_v50 = vpop.f32.mrb[52].mxu1 }
 0x154   : > { %v4750_v7 = vpop.eup %4749  ;;  %4103 = vst [vmem:[%s5554_s6 + $0x138] sm:$0xff] %v3963_v35   ;;  %4769 = vrcp.f32 %v1720_v63  ;;  %v1721_v9 = vadd.f32 1.0, %v4748_v12  ;;  %v4242_v18 = vpop.f32.mrb[53].mxu0  ;;  %v5754_v22 = vadd.f32 %v5747_v31, %v1202_v50 }
 0x155   : > { %v4752_v16 = vpop.eup %4751  ;;  %4771 = vrcp.f32 %v1782_v28  ;;  %v2080_v53 = vmul.f32 %v4750_v7, %v5659_v58  ;;  %v4366_v23 = vpop.f32.mrb[53].mxu1  ;;  %v3410_v32 = vmul.f32 -1.442695, %v5750_v2 }
 0x156   : > { %v4754_v20 = vpop.eup %4753  ;;  %4773 = vrcp.f32 %v1721_v9  ;;  %v957_v24 = vpop.f32.mrb[54].mxu0  ;;  %v2142_v27 = vmul.f32 %v4752_v16, %v5664_v47  ;;  %v3472_v36 = vmul.f32 -1.442695, %v5754_v22 }
 0x157   : > { %v4756_v26 = vpop.eup %4755  ;;  %v2081_v29 = vmul.f32 %v4754_v20, %v5669_v5  ;;  %4775 = vpow2.f32 %v3470_v52  ;;  %v1205_v51 = vpop.f32.mrb[54].mxu1  ;;  %v5762_v38 = vadd.f32 %v5747_v31, %v957_v24 }
 0x158   : > { %v4243_v33 = vpop.f32.mrb[55].mxu0  ;;  %v4758_v37 = vpop.eup %4757  ;;  %v2143_v58 = vmul.f32 %v4756_v26, %v5672_v6  ;;  %4777 = vpow2.f32 %v3409_v11  ;;  %v5765_v5 = vadd.f32 %v5747_v31, %v1205_v51 }
 0x159   : > { %v4367_v15 = vpop.f32.mrb[55].mxu1  ;;  %v4760_v47 = vpop.eup %4759  ;;  %v3813_v39 = vpack.c.bf16 %v2081_v29, %v2080_v53  ;;  %4779 = vpow2.f32 %v3471_v56  ;;  %v3411_v62 = vmul.f32 -1.442695, %v5762_v38  ;;  %v2082_v12 = vmul.f32 %v4758_v37, %v5680_v13 }
 0x15a   : > { %v4762_v1 = vpop.eup %4761  ;;  %v3968_v41 = vpack.c.bf16 %v2143_v58, %v2142_v27  ;;  %v1783_v21 = vadd.f32 1.0, %v4760_v47  ;;  %4781 = vpow2.f32 %v3410_v32  ;;  %v962_v49 = vpop.f32.mrb[56].mxu0  ;;  %v3473_v30 = vmul.f32 -1.442695, %v5765_v5 }
 0x15b   : > { %v4764_v10 = vpop.eup %4763  ;;  %4073 = vst [vmem:[%s5554_s6 + $0x48] sm:$0xff] %v3813_v39   ;;  %v1722_v6 = vadd.f32 1.0, %v4762_v1  ;;  %4783 = vpow2.f32 %v3472_v36  ;;  %v5772_v3 = vadd.f32 %v5747_v31, %v962_v49  ;;  %v1210_v60 = vpop.f32.mrb[56].mxu1 }
 0x15c   : > { %v4766_v43 = vpop.eup %4765  ;;  %4104 = vst [vmem:[%s5554_s6 + $0x140] sm:$0xff] %v3968_v41   ;;  %4785 = vrcp.f32 %v1783_v21  ;;  %v1784_v4 = vadd.f32 1.0, %v4764_v10  ;;  %v4246_v45 = vpop.f32.mrb[57].mxu0  ;;  %v5775_v61 = vadd.f32 %v5747_v31, %v1210_v60 }
 0x15d   : > { %v4768_v19 = vpop.eup %4767  ;;  %4787 = vrcp.f32 %v1722_v6  ;;  %v1723_v54 = vadd.f32 1.0, %v4766_v43  ;;  %v4370_v17 = vpop.f32.mrb[57].mxu1  ;;  %v3412_v52 = vmul.f32 -1.442695, %v5772_v3 }
 0x15e   : > { %v4770_v48 = vpop.eup %4769  ;;  %4789 = vrcp.f32 %v1784_v4  ;;  %v965_v35 = vpop.f32.mrb[58].mxu0  ;;  %v2144_v40 = vmul.f32 %v4768_v19, %v5685_v25  ;;  %v3474_v56 = vmul.f32 -1.442695, %v5775_v61 }
 0x15f   : > { %v4772_v63 = vpop.eup %4771  ;;  %v2083_v28 = vmul.f32 %v4770_v48, %v5690_v34  ;;  %4791 = vrcp.f32 %v1723_v54  ;;  %v1213_v7 = vpop.f32.mrb[58].mxu1  ;;  %v5784_v34 = vadd.f32 %v5747_v31, %v965_v35 }
 0x160   : > { %v4247_v9 = vpop.f32.mrb[59].mxu0  ;;  %v4774_v11 = vpop.eup %4773  ;;  %v2145_v16 = vmul.f32 %v4772_v63, %v5695_v44  ;;  %4793 = vpow2.f32 %v3411_v62  ;;  %v5787_v24 = vadd.f32 %v5747_v31, %v1213_v7 }
 0x161   : > { %v4371_v50 = vpop.f32.mrb[59].mxu1  ;;  %v4776_v18 = vpop.eup %4775  ;;  %v3818_v13 = vpack.c.bf16 %v2083_v28, %v2082_v12  ;;  %4795 = vpow2.f32 %v3473_v30  ;;  %v3413_v33 = vmul.f32 -1.442695, %v5784_v34  ;;  %v2084_v49 = vmul.f32 %v4774_v11, %v5701_v57 }
 0x162   : > { %v4778_v20 = vpop.eup %4777  ;;  %v3973_v53 = vpack.c.bf16 %v2145_v16, %v2144_v40  ;;  %v1785_v23 = vadd.f32 1.0, %v4776_v18  ;;  %4797 = vpow2.f32 %v3412_v52  ;;  %v970_v29 = vpop.f32.mrb[60].mxu0  ;;  %v3475_v39 = vmul.f32 -1.442695, %v5787_v24 }
 0x163   : > { %v4780_v25 = vpop.eup %4779  ;;  %4074 = vst [vmem:[%s5554_s6 + $0x50] sm:$0xff] %v3818_v13   ;;  %v1724_v44 = vadd.f32 1.0, %v4778_v20  ;;  %4799 = vpow2.f32 %v3474_v56  ;;  %v5793_v37 = vadd.f32 %v5747_v31, %v970_v29  ;;  %v1218_v58 = vpop.f32.mrb[60].mxu1 }
 0x164   : > { %v4782_v26 = vpop.eup %4781  ;;  %4105 = vst [vmem:[%s5554_s6 + $0x148] sm:$0xff] %v3973_v53   ;;  %4801 = vrcp.f32 %v1785_v23  ;;  %v1786_v27 = vadd.f32 1.0, %v4780_v25  ;;  %v4250_v36 = vpop.f32.mrb[61].mxu0  ;;  %v5797_v1 = vadd.f32 %v5747_v31, %v1218_v58 }
 0x165   : > { %v4784_v32 = vpop.eup %4783  ;;  %4803 = vrcp.f32 %v1724_v44  ;;  %v1725_v51 = vadd.f32 1.0, %v4782_v26  ;;  %v4374_v41 = vpop.f32.mrb[61].mxu1  ;;  %v3414_v6 = vmul.f32 -1.442695, %v5793_v37 }
 0x166   : > { %v4786_v15 = vpop.eup %4785  ;;  %4805 = vrcp.f32 %v1786_v27  ;;  %v1787_v47 = vadd.f32 1.0, %v4784_v32  ;;  %v973_v21 = vpop.f32.mrb[62].mxu0  ;;  %v3476_v54 = vmul.f32 -1.442695, %v5797_v1 }
 0x167   : > { %v4788_v10 = vpop.eup %4787  ;;  %4807 = vrcp.f32 %v1725_v51  ;;  %v1221_v43 = vpop.f32.mrb[62].mxu1  ;;  %v2146_v45 = vmul.f32 %v4786_v15, %v5709_v14  ;;  %v5806_v17 = vadd.f32 %v5747_v31, %v973_v21 }
 0x168   : > { %v4251_v4 = vpop.f32.mrb[63].mxu0  ;;  %v4790_v62 = vpop.eup %4789  ;;  %v2085_v19 = vmul.f32 %v4788_v10, %v5712_v8  ;;  %4809 = vrcp.f32 %v1787_v47  ;;  %v5809_v57 = vadd.f32 %v5747_v31, %v1221_v43 }
 0x169   : > { %v4375_v30 = vpop.f32.mrb[63].mxu1  ;;  %v4792_v60 = vpop.eup %4791  ;;  %v2147_v48 = vmul.f32 %v4790_v62, %v5716_v59  ;;  %4811 = vpow2.f32 %v3413_v33  ;;  %v3415_v11 = vmul.f32 -1.442695, %v5806_v17 }
 0x16a   : > { %v4794_v35 = vpop.eup %4793  ;;  %v3823_v63 = vpack.c.bf16 %v2085_v19, %v2084_v49  ;;  %4813 = vpow2.f32 %v3475_v39  ;;  %v978_v59 = vpop.f32.mrb[64].mxu0  ;;  %v3477_v13 = vmul.f32 -1.442695, %v5809_v57  ;;  %v2086_v51 = vmul.f32 %v4792_v60, %v5723_v0 }
 0x16b   : > { %v4796_v8 = vpop.eup %4795  ;;  %v3978_v12 = vpack.c.bf16 %v2147_v48, %v2146_v45  ;;  %v1726_v28 = vadd.f32 1.0, %v4794_v35  ;;  %4815 = vpow2.f32 %v3414_v6  ;;  %v5815_v40 = vadd.f32 %v5747_v31, %v978_v59  ;;  %v1226_v16 = vpop.f32.mrb[64].mxu1 }
 0x16c   : > { %v4798_v52 = vpop.eup %4797  ;;  %4075 = vst [vmem:[%s5554_s6 + $0x58] sm:$0xff] %v3823_v63   ;;  %v1788_v14 = vadd.f32 1.0, %v4796_v8  ;;  %4817 = vpow2.f32 %v3476_v54  ;;  %v4254_v56 = vpop.f32.mrb[65].mxu0  ;;  %v5819_v20 = vadd.f32 %v5747_v31, %v1226_v16 }
 0x16d   : > { %v4800_v7 = vpop.eup %4799  ;;  %4106 = vst [vmem:[%s5554_s6 + $0x150] sm:$0xff] %v3978_v12   ;;  %4819 = vrcp.f32 %v1726_v28  ;;  %v1727_v9 = vadd.f32 1.0, %v4798_v52  ;;  %v4378_v53 = vpop.f32.mrb[65].mxu1  ;;  %v3416_v44 = vmul.f32 -1.442695, %v5815_v40 }
 0x16e   : > { %v4802_v50 = vpop.eup %4801  ;;  %4821 = vrcp.f32 %v1788_v14  ;;  %v1789_v18 = vadd.f32 1.0, %v4800_v7  ;;  %v981_v23 = vpop.f32.mrb[66].mxu0  ;;  %v3478_v58 = vmul.f32 -1.442695, %v5819_v20 }
 0x16f   : > { %v4804_v25 = vpop.eup %4803  ;;  %4823 = vrcp.f32 %v1727_v9  ;;  %v5823_v26 = vadd.f32 %v5747_v31, %v981_v23  ;;  %v1229_v27 = vpop.f32.mrb[66].mxu1  ;;  %v2148_v47 = vmul.f32 %v4802_v50, %v5729_v46 }
 0x170   : > { %v4255_v29 = vpop.f32.mrb[67].mxu0  ;;  %v4806_v32 = vpop.eup %4805  ;;  %v2087_v33 = vmul.f32 %v4804_v25, %v5734_v55  ;;  %4825 = vrcp.f32 %v1789_v18  ;;  %v5832_v0 = vadd.f32 %v5747_v31, %v1229_v27 }
 0x171   : > { %v4379_v36 = vpop.f32.mrb[67].mxu1  ;;  %v4808_v15 = vpop.eup %4807  ;;  %v2149_v39 = vmul.f32 %v4806_v32, %v5737_v42  ;;  %4827 = vpow2.f32 %v3415_v11  ;;  %v3417_v41 = vmul.f32 -1.442695, %v5823_v26 }
 0x172   : > { %v4810_v21 = vpop.eup %4809  ;;  %v3828_v10 = vpack.c.bf16 %v2087_v33, %v2086_v51  ;;  %4829 = vpow2.f32 %v3477_v13  ;;  %v986_v46 = vpop.f32.mrb[68].mxu0  ;;  %v3479_v45 = vmul.f32 -1.442695, %v5832_v0  ;;  %v2088_v9 = vmul.f32 %v4808_v15, %v5750_v2 }
 0x173   : > { %v4812_v55 = vpop.eup %4811  ;;  %v3983_v6 = vpack.c.bf16 %v2149_v39, %v2148_v47  ;;  %4831 = vpow2.f32 %v3416_v44  ;;  %v5837_v49 = vadd.f32 %v5747_v31, %v986_v46  ;;  %v1234_v19 = vpop.f32.mrb[68].mxu1  ;;  %v2150_v18 = vmul.f32 %v4810_v21, %v5754_v22 }
 0x174   : > { %v4814_v43 = vpop.eup %4813  ;;  %4076 = vst [vmem:[%s5554_s6 + $0x60] sm:$0xff] %v3828_v10   ;;  %v1728_v4 = vadd.f32 1.0, %v4812_v55  ;;  %4833 = vpow2.f32 %v3478_v58  ;;  %v4258_v54 = vpop.f32.mrb[69].mxu0  ;;  %v5841_v48 = vadd.f32 %v5747_v31, %v1234_v19 }
 0x175   : > { %v4816_v62 = vpop.eup %4815  ;;  %4107 = vst [vmem:[%s5554_s6 + $0x158] sm:$0xff] %v3983_v6   ;;  %v1790_v42 = vadd.f32 1.0, %v4814_v43  ;;  %4835 = vpow2.f32 %v3417_v41  ;;  %v4382_v35 = vpop.f32.mrb[69].mxu1  ;;  %v3418_v28 = vmul.f32 -1.442695, %v5837_v49 }
 0x176   : > { %v4818_v30 = vpop.eup %4817  ;;  %4837 = vrcp.f32 %v1728_v4  ;;  %v1729_v60 = vadd.f32 1.0, %v4816_v62  ;;  %v989_v63 = vpop.f32.mrb[70].mxu0  ;;  %v3480_v16 = vmul.f32 -1.442695, %v5841_v48 }
 0x177   : > { %v4820_v8 = vpop.eup %4819  ;;  %4839 = vrcp.f32 %v1790_v42  ;;  %v1791_v12 = vadd.f32 1.0, %v4818_v30  ;;  %v5845_v52 = vadd.f32 %v5747_v31, %v989_v63  ;;  %v1237_v14 = vpop.f32.mrb[70].mxu1 }
 0x178   : > { %v4259_v59 = vpop.f32.mrb[71].mxu0  ;;  %v4822_v7 = vpop.eup %4821  ;;  %v2089_v11 = vmul.f32 %v4820_v8, %v5762_v38  ;;  %4841 = vrcp.f32 %v1729_v60  ;;  %v5854_v38 = vadd.f32 %v5747_v31, %v1237_v14 }
 0x179   : > { %v4383_v56 = vpop.f32.mrb[71].mxu1  ;;  %v4824_v50 = vpop.eup %4823  ;;  %v2151_v13 = vmul.f32 %v4822_v7, %v5765_v5  ;;  %4843 = vrcp.f32 %v1791_v12  ;;  %v3419_v53 = vmul.f32 -1.442695, %v5845_v52 }
 0x17a   : > { %v4826_v23 = vpop.eup %4825  ;;  %v3833_v25 = vpack.c.bf16 %v2089_v11, %v2088_v9  ;;  %4845 = vpow2.f32 %v3479_v45  ;;  %v994_v22 = vpop.f32.mrb[72].mxu0  ;;  %v3481_v55 = vmul.f32 -1.442695, %v5854_v38  ;;  %v2090_v30 = vmul.f32 %v4824_v50, %v5772_v3 }
 0x17b   : > { %v4828_v2 = vpop.eup %4827  ;;  %v3988_v44 = vpack.c.bf16 %v2151_v13, %v2150_v18  ;;  %4847 = vpow2.f32 %v3418_v28  ;;  %v5859_v51 = vadd.f32 %v5747_v31, %v994_v22  ;;  %v1242_v33 = vpop.f32.mrb[72].mxu1  ;;  %v2152_v63 = vmul.f32 %v4826_v23, %v5775_v61 }
 0x17c   : > { %v4830_v27 = vpop.eup %4829  ;;  %4077 = vst [vmem:[%s5554_s6 + $0x68] sm:$0xff] %v3833_v25   ;;  %v1730_v29 = vadd.f32 1.0, %v4828_v2  ;;  %4849 = vpow2.f32 %v3480_v16  ;;  %v4262_v58 = vpop.f32.mrb[73].mxu0  ;;  %v5862_v47 = vadd.f32 %v5747_v31, %v1242_v33 }
 0x17d   : > { %v4832_v32 = vpop.eup %4831  ;;  %4108 = vst [vmem:[%s5554_s6 + $0x160] sm:$0xff] %v3988_v44   ;;  %v1792_v5 = vadd.f32 1.0, %v4830_v27  ;;  %4851 = vpow2.f32 %v3419_v53  ;;  %v4386_v39 = vpop.f32.mrb[73].mxu1  ;;  %v3420_v42 = vmul.f32 -1.442695, %v5859_v51 }
 0x17e   : > { %v4834_v36 = vpop.eup %4833  ;;  %4853 = vrcp.f32 %v1730_v29  ;;  %v1731_v15 = vadd.f32 1.0, %v4832_v32  ;;  %v997_v41 = vpop.f32.mrb[74].mxu0  ;;  %v3482_v45 = vmul.f32 -1.442695, %v5862_v47 }
 0x17f   : > { %v4836_v21 = vpop.eup %4835  ;;  %4855 = vrcp.f32 %v1792_v5  ;;  %v1793_v10 = vadd.f32 1.0, %v4834_v36  ;;  %v5866_v6 = vadd.f32 %v5747_v31, %v997_v41  ;;  %v1245_v43 = vpop.f32.mrb[74].mxu1 }
 0x180   : > { %v4263_v4 = vpop.f32.mrb[75].mxu0  ;;  %v4838_v46 = vpop.eup %4837  ;;  %4857 = vrcp.f32 %v1731_v15  ;;  %v1732_v62 = vadd.f32 1.0, %v4836_v21  ;;  %v5876_v3 = vadd.f32 %v5747_v31, %v1245_v43 }
 0x181   : > { %v4387_v19 = vpop.f32.mrb[75].mxu1  ;;  %v4840_v54 = vpop.eup %4839  ;;  %v2091_v60 = vmul.f32 %v4838_v46, %v5784_v34  ;;  %4859 = vrcp.f32 %v1793_v10  ;;  %v3421_v12 = vmul.f32 -1.442695, %v5866_v6 }
 0x182   : > { %v4842_v35 = vpop.eup %4841  ;;  %v2153_v8 = vmul.f32 %v4840_v54, %v5787_v24  ;;  %4861 = vrcp.f32 %v1732_v62  ;;  %v1002_v7 = vpop.f32.mrb[76].mxu0  ;;  %v3483_v2 = vmul.f32 -1.442695, %v5876_v3 }
 0x183   : > { %v4844_v28 = vpop.eup %4843  ;;  %v3838_v14 = vpack.c.bf16 %v2091_v60, %v2090_v30  ;;  %4863 = vpow2.f32 %v3481_v55  ;;  %v5880_v61 = vadd.f32 %v5747_v31, %v1002_v7  ;;  %v1250_v24 = vpop.f32.mrb[76].mxu1  ;;  %v2092_v15 = vmul.f32 %v4842_v35, %v5793_v37 }
 0x184   : > { %v4846_v34 = vpop.eup %4845  ;;  %v3993_v59 = vpack.c.bf16 %v2153_v8, %v2152_v63  ;;  %4865 = vpow2.f32 %v3420_v42  ;;  %v4266_v16 = vpop.f32.mrb[77].mxu0  ;;  %v5884_v18 = vadd.f32 %v5747_v31, %v1250_v24  ;;  %v2154_v10 = vmul.f32 %v4844_v28, %v5797_v1 }
 0x185   : > { %v4848_v9 = vpop.eup %4847  ;;  %4078 = vst [vmem:[%s5554_s6 + $0x70] sm:$0xff] %v3838_v14   ;;  %v1794_v11 = vadd.f32 1.0, %v4846_v34  ;;  %4867 = vpow2.f32 %v3482_v45  ;;  %v4390_v13 = vpop.f32.mrb[77].mxu1  ;;  %v3422_v5 = vmul.f32 -1.442695, %v5880_v61 }
 0x186   : > { %v4850_v56 = vpop.eup %4849  ;;  %4109 = vst [vmem:[%s5554_s6 + $0x168] sm:$0xff] %v3993_v59   ;;  %v1733_v50 = vadd.f32 1.0, %v4848_v9  ;;  %4869 = vpow2.f32 %v3421_v12  ;;  %v1005_v53 = vpop.f32.mrb[78].mxu0  ;;  %v3484_v41 = vmul.f32 -1.442695, %v5884_v18 }
 0x187   : > { %v4852_v23 = vpop.eup %4851  ;;  %4871 = vrcp.f32 %v1794_v11  ;;  %v1795_v25 = vadd.f32 1.0, %v4850_v56  ;;  %v5888_v44 = vadd.f32 %v5747_v31, %v1005_v53  ;;  %v1253_v27 = vpop.f32.mrb[78].mxu1 }
 0x188   : > { %v4267_v29 = vpop.f32.mrb[79].mxu0  ;;  %v4854_v22 = vpop.eup %4853  ;;  %4873 = vrcp.f32 %v1733_v50  ;;  %v1734_v32 = vadd.f32 1.0, %v4852_v23  ;;  %v5892_v33 = vadd.f32 %v5747_v31, %v1253_v27 }
 0x189   : > { %v4391_v58 = vpop.f32.mrb[79].mxu1  ;;  %v4856_v36 = vpop.eup %4855  ;;  %v2093_v39 = vmul.f32 %v4854_v22, %v5806_v17  ;;  %4875 = vrcp.f32 %v1795_v25  ;;  %v3423_v43 = vmul.f32 -1.442695, %v5888_v44 }
 0x18a   : > { %v4858_v21 = vpop.eup %4857  ;;  %v2155_v55 = vmul.f32 %v4856_v36, %v5809_v57  ;;  %4877 = vrcp.f32 %v1734_v32  ;;  %v3485_v37 = vmul.f32 -1.442695, %v5892_v33  ;;  %v1010_v42 = vpop.f32.mrb[80].mxu0 }
 0x18b   : > { %v4860_v4 = vpop.eup %4859  ;;  %v3843_v46 = vpack.c.bf16 %v2093_v39, %v2092_v15  ;;  %4879 = vpow2.f32 %v3483_v2  ;;  %v2094_v54 = vmul.f32 %v4858_v21, %v5815_v40  ;;  %v5905_v57 = vadd.f32 %v5747_v31, %v1010_v42  ;;  %v1258_v30 = vpop.f32.mrb[80].mxu1 }
 0x18c   : > { %v4862_v62 = vpop.eup %4861  ;;  %v3998_v17 = vpack.c.bf16 %v2155_v55, %v2154_v10  ;;  %4881 = vpow2.f32 %v3422_v5  ;;  %v4270_v60 = vpop.f32.mrb[81].mxu0  ;;  %v5909_v63 = vadd.f32 %v5747_v31, %v1258_v30  ;;  %v2156_v23 = vmul.f32 %v4860_v4, %v5819_v20 }
 0x18d   : > { %v4864_v19 = vpop.eup %4863  ;;  %4079 = vst [vmem:[%s5554_s6 + $0x78] sm:$0xff] %v3843_v46   ;;  %v2095_v1 = vmul.f32 %v4862_v62, %v5823_v26  ;;  %4883 = vpow2.f32 %v3484_v41  ;;  %v4394_v8 = vpop.f32.mrb[81].mxu1  ;;  %v3424_v9 = vmul.f32 -1.442695, %v5905_v57 }
 0x18e   : > { %v4866_v45 = vpop.eup %4865  ;;  %4110 = vst [vmem:[%s5554_s6 + $0x170] sm:$0xff] %v3998_v17   ;;  %v1796_v35 = vadd.f32 1.0, %v4864_v19  ;;  %4885 = vpow2.f32 %v3423_v43  ;;  %v1013_v12 = vpop.f32.mrb[82].mxu0  ;;  %v3486_v50 = vmul.f32 -1.442695, %v5909_v63 }
 0x18f   : > { %v4868_v28 = vpop.eup %4867  ;;  %v3848_v40 = vpack.c.bf16 %v2095_v1, %v2094_v54  ;;  %v1735_v14 = vadd.f32 1.0, %v4866_v45  ;;  %4887 = vpow2.f32 %v3485_v37  ;;  %v1261_v26 = vpop.f32.mrb[82].mxu1  ;;  %v5913_v11 = vadd.f32 %v5747_v31, %v1013_v12 }
 0x190   : > { %v4271_v34 = vpop.f32.mrb[83].mxu0  ;;  %v4870_v59 = vpop.eup %4869  ;;  %4889 = vrcp.f32 %v1796_v35  ;;  %v1797_v7 = vadd.f32 1.0, %v4868_v28  ;;  %v5918_v13 = vadd.f32 %v5747_v31, %v1261_v26 }
 0x191   : > { %v4395_v24 = vpop.f32.mrb[83].mxu1  ;;  %v4872_v16 = vpop.eup %4871  ;;  %4080 = vst [vmem:[%s5554_s6 + $0x80] sm:$0xff] %v3848_v40   ;;  %4891 = vrcp.f32 %v1735_v14  ;;  %v1736_v56 = vadd.f32 1.0, %v4870_v59  ;;  %v3425_v2 = vmul.f32 -1.442695, %v5913_v11 }
 0x192   : > { %v4874_v53 = vpop.eup %4873  ;;  %v2157_v25 = vmul.f32 %v4872_v16, %v5832_v0  ;;  %4893 = vrcp.f32 %v1797_v7  ;;  %v3487_v29 = vmul.f32 -1.442695, %v5918_v13  ;;  %v1018_v5 = vpop.f32.mrb[84].mxu0 }
 0x193   : > { %v4876_v27 = vpop.eup %4875  ;;  %4895 = vrcp.f32 %v1736_v56  ;;  %v2096_v36 = vmul.f32 %v4874_v53, %v5837_v49  ;;  %v5927_v20 = vadd.f32 %v5747_v31, %v1018_v5  ;;  %v1266_v0 = vpop.f32.mrb[84].mxu1 }
 0x194   : > { %v4878_v22 = vpop.eup %4877  ;;  %v4003_v32 = vpack.c.bf16 %v2157_v25, %v2156_v23  ;;  %4897 = vpow2.f32 %v3424_v9  ;;  %v4274_v39 = vpop.f32.mrb[85].mxu0  ;;  %v5931_v10 = vadd.f32 %v5747_v31, %v1266_v0  ;;  %v2158_v28 = vmul.f32 %v4876_v27, %v5841_v48 }
 0x195   : > { %v4880_v58 = vpop.eup %4879  ;;  %v2097_v15 = vmul.f32 %v4878_v22, %v5845_v52  ;;  %4899 = vpow2.f32 %v3486_v50  ;;  %v4398_v55 = vpop.f32.mrb[85].mxu1  ;;  %v3426_v30 = vmul.f32 -1.442695, %v5927_v20 }
 0x196   : > { %v4882_v41 = vpop.eup %4881  ;;  %4111 = vst [vmem:[%s5554_s6 + $0x178] sm:$0xff] %v4003_v32   ;;  %v1798_v21 = vadd.f32 1.0, %v4880_v58  ;;  %4901 = vpow2.f32 %v3425_v2  ;;  %v1021_v43 = vpop.f32.mrb[86].mxu0  ;;  %v3488_v8 = vmul.f32 -1.442695, %v5931_v10 }
 0x197   : > { %v4884_v4 = vpop.eup %4883  ;;  %v3853_v49 = vpack.c.bf16 %v2097_v15, %v2096_v36  ;;  %v1737_v46 = vadd.f32 1.0, %v4882_v41  ;;  %4903 = vpow2.f32 %v3487_v29  ;;  %v1269_v52 = vpop.f32.mrb[86].mxu1  ;;  %v5934_v42 = vadd.f32 %v5747_v31, %v1021_v43 }
 0x198   : > { %v4275_v37 = vpop.f32.mrb[87].mxu0  ;;  %v4886_v62 = vpop.eup %4885  ;;  %4905 = vrcp.f32 %v1798_v21  ;;  %v1799_v17 = vadd.f32 1.0, %v4884_v4  ;;  %v5939_v60 = vadd.f32 %v5747_v31, %v1269_v52 }
 0x199   : > { %v4399_v19 = vpop.f32.mrb[87].mxu1  ;;  %v4888_v54 = vpop.eup %4887  ;;  %4081 = vst [vmem:[%s5554_s6 + $0x88] sm:$0xff] %v3853_v49   ;;  %4907 = vrcp.f32 %v1737_v46  ;;  %v1738_v1 = vadd.f32 1.0, %v4886_v62  ;;  %v3427_v14 = vmul.f32 -1.442695, %v5934_v42 }
 0x19a   : > { %v4890_v45 = vpop.eup %4889  ;;  %4909 = vrcp.f32 %v1799_v17  ;;  %v1800_v35 = vadd.f32 1.0, %v4888_v54  ;;  %v3489_v34 = vmul.f32 -1.442695, %v5939_v60  ;;  %v1026_v59 = vpop.f32.mrb[88].mxu0 }
 0x19b   : > { %v4892_v12 = vpop.eup %4891  ;;  %v2159_v40 = vmul.f32 %v4890_v45, %v5854_v38  ;;  %4911 = vrcp.f32 %v1738_v1  ;;  %v5947_v24 = vadd.f32 %v5747_v31, %v1026_v59  ;;  %v1274_v16 = vpop.f32.mrb[88].mxu1 }
 0x19c   : > { %v4894_v26 = vpop.eup %4893  ;;  %4913 = vrcp.f32 %v1800_v35  ;;  %v4278_v56 = vpop.f32.mrb[89].mxu0  ;;  %v2098_v38 = vmul.f32 %v4892_v12, %v5859_v51  ;;  %v5952_v53 = vadd.f32 %v5747_v31, %v1274_v16 }
 0x19d   : > { %v4896_v7 = vpop.eup %4895  ;;  %v4008_v9 = vpack.c.bf16 %v2159_v40, %v2158_v28  ;;  %4915 = vpow2.f32 %v3426_v30  ;;  %v4402_v23 = vpop.f32.mrb[89].mxu1  ;;  %v3428_v0 = vmul.f32 -1.442695, %v5947_v24  ;;  %v2160_v4 = vmul.f32 %v4894_v26, %v5862_v47 }
 0x19e   : > { %v4898_v48 = vpop.eup %4897  ;;  %v2099_v50 = vmul.f32 %v4896_v7, %v5866_v6  ;;  %4917 = vpow2.f32 %v3488_v8  ;;  %v1029_v25 = vpop.f32.mrb[90].mxu0  ;;  %v3490_v55 = vmul.f32 -1.442695, %v5952_v53 }
 0x19f   : > { %v4900_v2 = vpop.eup %4899  ;;  %4112 = vst [vmem:[%s5554_s6 + $0x180] sm:$0xff] %v4008_v9   ;;  %v1739_v27 = vadd.f32 1.0, %v4898_v48  ;;  %4919 = vpow2.f32 %v3427_v14  ;;  %v5956_v29 = vadd.f32 %v5747_v31, %v1029_v25  ;;  %v1277_v22 = vpop.f32.mrb[90].mxu1 }
 0x1a0   : > { %v4279_v32 = vpop.f32.mrb[91].mxu0  ;;  %v4902_v5 = vpop.eup %4901  ;;  %v3858_v51 = vpack.c.bf16 %v2099_v50, %v2098_v38  ;;  %v1801_v58 = vadd.f32 1.0, %v4900_v2  ;;  %4921 = vpow2.f32 %v3489_v34  ;;  %v5960_v39 = vadd.f32 %v5747_v31, %v1277_v22 }
 0x1a1   : > { %v4403_v6 = vpop.f32.mrb[91].mxu1  ;;  %v4904_v36 = vpop.eup %4903  ;;  %4923 = vrcp.f32 %v1739_v27  ;;  %v1740_v15 = vadd.f32 1.0, %v4902_v5  ;;  %v3429_v46 = vmul.f32 -1.442695, %v5956_v29 }
 0x1a2   : > { %v4906_v41 = vpop.eup %4905  ;;  %4082 = vst [vmem:[%s5554_s6 + $0x90] sm:$0xff] %v3858_v51   ;;  %4925 = vrcp.f32 %v1801_v58  ;;  %v1802_v21 = vadd.f32 1.0, %v4904_v36  ;;  %v3491_v37 = vmul.f32 -1.442695, %v5960_v39  ;;  %v1034_v62 = vpop.f32.mrb[92].mxu0 }
 0x1a3   : > { %v4908_v43 = vpop.eup %4907  ;;  %v2161_v49 = vmul.f32 %v4906_v41, %v5876_v3  ;;  %4927 = vrcp.f32 %v1740_v15  ;;  %v5970_v1 = vadd.f32 %v5747_v31, %v1034_v62  ;;  %v1282_v47 = vpop.f32.mrb[92].mxu1 }
 0x1a4   : > { %v4910_v52 = vpop.eup %4909  ;;  %4929 = vrcp.f32 %v1802_v21  ;;  %v2100_v54 = vmul.f32 %v4908_v43, %v5880_v61  ;;  %v4282_v30 = vpop.f32.mrb[93].mxu0  ;;  %v5975_v8 = vadd.f32 %v5747_v31, %v1282_v47 }
 0x1a5   : > { %v4912_v17 = vpop.eup %4911  ;;  %v4013_v19 = vpack.c.bf16 %v2161_v49, %v2160_v4  ;;  %4931 = vpow2.f32 %v3428_v0  ;;  %v2162_v45 = vmul.f32 %v4910_v52, %v5884_v18  ;;  %v4406_v12 = vpop.f32.mrb[93].mxu1  ;;  %v3430_v14 = vmul.f32 -1.442695, %v5970_v1 }
 0x1a6   : > { %v4914_v3 = vpop.eup %4913  ;;  %v2101_v35 = vmul.f32 %v4912_v17, %v5888_v44  ;;  %4933 = vpow2.f32 %v3490_v55  ;;  %v1037_v28 = vpop.f32.mrb[94].mxu0  ;;  %v3492_v50 = vmul.f32 -1.442695, %v5975_v8 }
 0x1a7   : > { %v4916_v40 = vpop.eup %4915  ;;  %4113 = vst [vmem:[%s5554_s6 + $0x188] sm:$0xff] %v4013_v19   ;;  %v2163_v61 = vmul.f32 %v4914_v3, %v5892_v33  ;;  %4935 = vpow2.f32 %v3429_v46  ;;  %v5981_v26 = vadd.f32 %v5747_v31, %v1037_v28  ;;  %v1285_v18 = vpop.f32.mrb[94].mxu1 }
 0x1a8   : > { %v4283_v34 = vpop.f32.mrb[95].mxu0  ;;  %v4918_v44 = vpop.eup %4917  ;;  %v3863_v59 = vpack.c.bf16 %v2101_v35, %v2100_v54  ;;  %v1741_v7 = vadd.f32 1.0, %v4916_v40  ;;  %4937 = vpow2.f32 %v3491_v37  ;;  %v5986_v23 = vadd.f32 %v5747_v31, %v1285_v18 }
 0x1a9   : > { %v4407_v9 = vpop.f32.mrb[95].mxu1  ;;  %v4920_v16 = vpop.eup %4919  ;;  %v4018_v56 = vpack.c.bf16 %v2163_v61, %v2162_v45  ;;  %v1803_v48 = vadd.f32 1.0, %v4918_v44  ;;  %4939 = vpow2.f32 %v3430_v14  ;;  %v3431_v27 = vmul.f32 -1.442695, %v5981_v26  ;;  %v6009_v45 = vld [vmem:[%s6359_s2] ss:$0 sm:$0xff] }
 0x1aa   : > { %v4922_v33 = vpop.eup %4921  ;;  %4083 = vst [vmem:[%s5554_s6 + $0x98] sm:$0xff] %v3863_v59   ;;  %4941 = vrcp.f32 %v1741_v7  ;;  %v1742_v38 = vadd.f32 1.0, %v4920_v16  ;;  %v3493_v32 = vmul.f32 -1.442695, %v5986_v23  ;;  %v1042_v5 = vpop.f32.mrb[96].mxu0 }
 0x1ab   : > { %v4924_v25 = vpop.eup %4923  ;;  %4114 = vst [vmem:[%s5554_s6 + $0x190] sm:$0xff] %v4018_v56   ;;  %4943 = vrcp.f32 %v1803_v48  ;;  %v1804_v2 = vadd.f32 1.0, %v4922_v33  ;;  %v5992_v58 = vadd.f32 %v5747_v31, %v1042_v5  ;;  %v1290_v6 = vpop.f32.mrb[96].mxu1 }
 0x1ac   : > { %v4926_v22 = vpop.eup %4925  ;;  %4945 = vrcp.f32 %v1742_v38  ;;  %v4286_v36 = vpop.f32.mrb[97].mxu0  ;;  %v2102_v0 = vmul.f32 %v4924_v25, %v5905_v57  ;;  %v6000_v52 = vadd.f32 %v5747_v31, %v1290_v6 }
 0x1ad   : > { %v4928_v51 = vpop.eup %4927  ;;  %4947 = vrcp.f32 %v1804_v2  ;;  %v2164_v41 = vmul.f32 %v4926_v22, %v5909_v63  ;;  %v4410_v55 = vpop.f32.mrb[97].mxu1  ;;  %v3432_v46 = vmul.f32 -1.442695, %v5992_v58 }
 0x1ae   : > { %v4930_v15 = vpop.eup %4929  ;;  %v2103_v21 = vmul.f32 %v4928_v51, %v5913_v11  ;;  %4949 = vpow2.f32 %v3492_v50  ;;  %v1045_v43 = vpop.f32.mrb[98].mxu0  ;;  %v3494_v28 = vmul.f32 -1.442695, %v6000_v52 }
 0x1af   : > { %v4932_v4 = vpop.eup %4931  ;;  %v2165_v49 = vmul.f32 %v4930_v15, %v5918_v13  ;;  %4951 = vpow2.f32 %v3431_v27  ;;  %v1293_v37 = vpop.f32.mrb[98].mxu1  ;;  %v6003_v11 = vadd.f32 %v5747_v31, %v1045_v43 }
 0x1b0   : > { %v4287_v62 = vpop.f32.mrb[99].mxu0  ;;  %v4934_v57 = vpop.eup %4933  ;;  %v3868_v17 = vpack.c.bf16 %v2103_v21, %v2102_v0  ;;  %v1743_v63 = vadd.f32 1.0, %v4932_v4  ;;  %4953 = vpow2.f32 %v3493_v32  ;;  %v6012_v35 = vadd.f32 %v6009_v45, %v1293_v37 }
 0x1b1   : > { %v4411_v19 = vpop.f32.mrb[99].mxu1  ;;  %v4936_v54 = vpop.eup %4935  ;;  %v4023_v13 = vpack.c.bf16 %v2165_v49, %v2164_v41  ;;  %v1805_v47 = vadd.f32 1.0, %v4934_v57  ;;  %4955 = vpow2.f32 %v3432_v46  ;;  %v3433_v14 = vmul.f32 -1.442695, %v6003_v11 }
 0x1b2   : > { %v4938_v30 = vpop.eup %4937  ;;  %4084 = vst [vmem:[%s5554_s6 + $0xa0] sm:$0xff] %v3868_v17   ;;  %4957 = vrcp.f32 %v1743_v63  ;;  %v1744_v3 = vadd.f32 1.0, %v4936_v54  ;;  %v1050_v18 = vpop.f32.mrb[100].mxu0  ;;  %v3495_v44 = vmul.f32 -1.442695, %v6012_v35 }
 0x1b3   : > { %v4940_v12 = vpop.eup %4939  ;;  %4115 = vst [vmem:[%s5554_s6 + $0x198] sm:$0xff] %v4023_v13   ;;  %4959 = vrcp.f32 %v1805_v47  ;;  %v1806_v31 = vadd.f32 1.0, %v4938_v30  ;;  %v6019_v59 = vadd.f32 %v6009_v45, %v1050_v18  ;;  %v1298_v7 = vpop.f32.mrb[100].mxu1 }
 0x1b4   : > { %v4942_v40 = vpop.eup %4941  ;;  %4961 = vrcp.f32 %v1744_v3  ;;  %v1745_v61 = vadd.f32 1.0, %v4940_v12  ;;  %v4290_v9 = vpop.f32.mrb[101].mxu0  ;;  %v6025_v2 = vadd.f32 %v6009_v45, %v1298_v7 }
 0x1b5   : > { %v4944_v34 = vpop.eup %4943  ;;  %4963 = vrcp.f32 %v1806_v31  ;;  %v2104_v56 = vmul.f32 %v4942_v40, %v5927_v20  ;;  %v4414_v48 = vpop.f32.mrb[101].mxu1  ;;  %v3434_v25 = vmul.f32 -1.442695, %v6019_v59 }
 0x1b6   : > { %v4946_v16 = vpop.eup %4945  ;;  %4965 = vrcp.f32 %v1745_v61  ;;  %v1053_v33 = vpop.f32.mrb[102].mxu0  ;;  %v2166_v5 = vmul.f32 %v4944_v34, %v5931_v10  ;;  %v3496_v43 = vmul.f32 -1.442695, %v6025_v2 }
 0x1b7   : > { %v4948_v38 = vpop.eup %4947  ;;  %v2105_v50 = vmul.f32 %v4946_v16, %v5934_v42  ;;  %4967 = vpow2.f32 %v3494_v28  ;;  %v1301_v27 = vpop.f32.mrb[102].mxu1  ;;  %v6030_v51 = vadd.f32 %v6009_v45, %v1053_v33 }
 0x1b8   : > { %v4291_v22 = vpop.f32.mrb[103].mxu0  ;;  %v4950_v32 = vpop.eup %4949  ;;  %v2167_v20 = vmul.f32 %v4948_v38, %v5939_v60  ;;  %4969 = vpow2.f32 %v3433_v14  ;;  %v6033_v0 = vadd.f32 %v6009_v45, %v1301_v27 }
 0x1b9   : > { %v4415_v6 = vpop.f32.mrb[103].mxu1  ;;  %v4952_v42 = vpop.eup %4951  ;;  %v3873_v36 = vpack.c.bf16 %v2105_v50, %v2104_v56  ;;  %v1807_v15 = vadd.f32 1.0, %v4950_v32  ;;  %4971 = vpow2.f32 %v3495_v44  ;;  %v3435_v46 = vmul.f32 -1.442695, %v6030_v51 }
 0x1ba   : > { %v4954_v41 = vpop.eup %4953  ;;  %v4028_v21 = vpack.c.bf16 %v2167_v20, %v2166_v5  ;;  %v1746_v55 = vadd.f32 1.0, %v4952_v42  ;;  %4973 = vpow2.f32 %v3434_v25  ;;  %v1058_v37 = vpop.f32.mrb[104].mxu0  ;;  %v3497_v57 = vmul.f32 -1.442695, %v6033_v0 }
 0x1bb   : > { %v4956_v10 = vpop.eup %4955  ;;  %4085 = vst [vmem:[%s5554_s6 + $0xa8] sm:$0xff] %v3873_v36   ;;  %4975 = vrcp.f32 %v1807_v15  ;;  %v1808_v60 = vadd.f32 1.0, %v4954_v41  ;;  %v6041_v17 = vadd.f32 %v6009_v45, %v1058_v37  ;;  %v1306_v63 = vpop.f32.mrb[104].mxu1 }
 0x1bc   : > { %v4958_v4 = vpop.eup %4957  ;;  %4116 = vst [vmem:[%s5554_s6 + $0x1a0] sm:$0xff] %v4028_v21   ;;  %4977 = vrcp.f32 %v1746_v55  ;;  %v1747_v49 = vadd.f32 1.0, %v4956_v10  ;;  %v4294_v19 = vpop.f32.mrb[105].mxu0  ;;  %v6045_v47 = vadd.f32 %v6009_v45, %v1306_v63 }
 0x1bd   : > { %v4960_v62 = vpop.eup %4959  ;;  %4979 = vrcp.f32 %v1808_v60  ;;  %v2106_v13 = vmul.f32 %v4958_v4, %v5947_v24  ;;  %v4418_v30 = vpop.f32.mrb[105].mxu1  ;;  %v3436_v40 = vmul.f32 -1.442695, %v6041_v17 }
 0x1be   : > { %v4962_v54 = vpop.eup %4961  ;;  %4981 = vrcp.f32 %v1747_v49  ;;  %v1061_v3 = vpop.f32.mrb[106].mxu0  ;;  %v2168_v31 = vmul.f32 %v4960_v62, %v5952_v53  ;;  %v3498_v34 = vmul.f32 -1.442695, %v6045_v47 }
 0x1bf   : > { %v4964_v12 = vpop.eup %4963  ;;  %v2107_v28 = vmul.f32 %v4962_v54, %v5956_v29  ;;  %4983 = vpow2.f32 %v3496_v43  ;;  %v1309_v61 = vpop.f32.mrb[106].mxu1  ;;  %v6053_v44 = vadd.f32 %v6009_v45, %v1061_v3 }
 0x1c0   : > { %v4295_v14 = vpop.f32.mrb[107].mxu0  ;;  %v4966_v18 = vpop.eup %4965  ;;  %v2169_v24 = vmul.f32 %v4964_v12, %v5960_v39  ;;  %4985 = vpow2.f32 %v3435_v46  ;;  %v6056_v29 = vadd.f32 %v6009_v45, %v1309_v61 }
 0x1c1   : > { %v4419_v7 = vpop.f32.mrb[107].mxu1  ;;  %v4968_v53 = vpop.eup %4967  ;;  %v3878_v9 = vpack.c.bf16 %v2107_v28, %v2106_v13  ;;  %4987 = vpow2.f32 %v3497_v57  ;;  %v3437_v25 = vmul.f32 -1.442695, %v6053_v44  ;;  %v2108_v10 = vmul.f32 %v4966_v18, %v5970_v1 }
 0x1c2   : > { %v4970_v16 = vpop.eup %4969  ;;  %v4033_v56 = vpack.c.bf16 %v2169_v24, %v2168_v31  ;;  %v1809_v48 = vadd.f32 1.0, %v4968_v53  ;;  %4989 = vpow2.f32 %v3436_v40  ;;  %v1066_v27 = vpop.f32.mrb[108].mxu0  ;;  %v3499_v5 = vmul.f32 -1.442695, %v6056_v29 }
 0x1c3   : > { %v4972_v33 = vpop.eup %4971  ;;  %4086 = vst [vmem:[%s5554_s6 + $0xb0] sm:$0xff] %v3878_v9   ;;  %v1748_v39 = vadd.f32 1.0, %v4970_v16  ;;  %4991 = vpow2.f32 %v3498_v34  ;;  %v6063_v20 = vadd.f32 %v6009_v45, %v1066_v27  ;;  %v1314_v6 = vpop.f32.mrb[108].mxu1 }
 0x1c4   : > { %v4974_v38 = vpop.eup %4973  ;;  %4117 = vst [vmem:[%s5554_s6 + $0x1a8] sm:$0xff] %v4033_v56   ;;  %4993 = vrcp.f32 %v1809_v48  ;;  %v1810_v50 = vadd.f32 1.0, %v4972_v33  ;;  %v4298_v42 = vpop.f32.mrb[109].mxu0  ;;  %v6066_v15 = vadd.f32 %v6009_v45, %v1314_v6 }
 0x1c5   : > { %v4976_v22 = vpop.eup %4975  ;;  %4995 = vrcp.f32 %v1748_v39  ;;  %v1749_v32 = vadd.f32 1.0, %v4974_v38  ;;  %v4422_v41 = vpop.f32.mrb[109].mxu1  ;;  %v3438_v43 = vmul.f32 -1.442695, %v6063_v20 }
 0x1c6   : > { %v4978_v36 = vpop.eup %4977  ;;  %4997 = vrcp.f32 %v1810_v50  ;;  %v1069_v21 = vpop.f32.mrb[110].mxu0  ;;  %v2170_v37 = vmul.f32 %v4976_v22, %v5975_v8  ;;  %v3500_v57 = vmul.f32 -1.442695, %v6066_v15 }
 0x1c7   : > { %v4980_v55 = vpop.eup %4979  ;;  %v2109_v60 = vmul.f32 %v4978_v36, %v5981_v26  ;;  %4999 = vrcp.f32 %v1749_v32  ;;  %v1317_v4 = vpop.f32.mrb[110].mxu1  ;;  %v6075_v26 = vadd.f32 %v6009_v45, %v1069_v21 }
 0x1c8   : > { %v4299_v49 = vpop.f32.mrb[111].mxu0  ;;  %v4982_v46 = vpop.eup %4981  ;;  %v2171_v62 = vmul.f32 %v4980_v55, %v5986_v23  ;;  %5001 = vpow2.f32 %v3437_v25  ;;  %v6078_v3 = vadd.f32 %v6009_v45, %v1317_v4 }
 0x1c9   : > { %v4423_v63 = vpop.f32.mrb[111].mxu1  ;;  %v4984_v19 = vpop.eup %4983  ;;  %v3883_v1 = vpack.c.bf16 %v2109_v60, %v2108_v10  ;;  %5003 = vpow2.f32 %v3499_v5  ;;  %v3439_v14 = vmul.f32 -1.442695, %v6075_v26  ;;  %v2110_v27 = vmul.f32 %v4982_v46, %v5992_v58 }
 0x1ca   : > { %v4986_v54 = vpop.eup %4985  ;;  %v4038_v13 = vpack.c.bf16 %v2171_v62, %v2170_v37  ;;  %v1811_v30 = vadd.f32 1.0, %v4984_v19  ;;  %5005 = vpow2.f32 %v3438_v43  ;;  %v1074_v28 = vpop.f32.mrb[112].mxu0  ;;  %v3501_v9 = vmul.f32 -1.442695, %v6078_v3 }
 0x1cb   : > { %v4988_v8 = vpop.eup %4987  ;;  %4087 = vst [vmem:[%s5554_s6 + $0xb8] sm:$0xff] %v3883_v1   ;;  %v1750_v23 = vadd.f32 1.0, %v4986_v54  ;;  %5007 = vpow2.f32 %v3500_v57  ;;  %v6084_v18 = vadd.f32 %v6009_v45, %v1074_v28  ;;  %v1322_v24 = vpop.f32.mrb[112].mxu1 }
 0x1cc   : > { %v4990_v12 = vpop.eup %4989  ;;  %4118 = vst [vmem:[%s5554_s6 + $0x1b0] sm:$0xff] %v4038_v13   ;;  %5009 = vrcp.f32 %v1811_v30  ;;  %v1812_v31 = vadd.f32 1.0, %v4988_v8  ;;  %v4302_v34 = vpop.f32.mrb[113].mxu0  ;;  %v6088_v16 = vadd.f32 %v6009_v45, %v1322_v24 }
 0x1cd   : > { %v4992_v40 = vpop.eup %4991  ;;  %5011 = vrcp.f32 %v1750_v23  ;;  %v1751_v61 = vadd.f32 1.0, %v4990_v12  ;;  %v4426_v56 = vpop.f32.mrb[113].mxu1  ;;  %v3440_v39 = vmul.f32 -1.442695, %v6084_v18 }
 0x1ce   : > { %v4994_v7 = vpop.eup %4993  ;;  %5013 = vrcp.f32 %v1812_v31  ;;  %v1813_v53 = vadd.f32 1.0, %v4992_v40  ;;  %v1077_v48 = vpop.f32.mrb[114].mxu0  ;;  %v3502_v32 = vmul.f32 -1.442695, %v6088_v16 }
 0x1cf   : > { %v4996_v33 = vpop.eup %4995  ;;  %5015 = vrcp.f32 %v1751_v61  ;;  %v1325_v38 = vpop.f32.mrb[114].mxu1  ;;  %v2172_v42 = vmul.f32 %v4994_v7, %v6000_v52  ;;  %v6097_v41 = vadd.f32 %v6009_v45, %v1077_v48 }
 0x1d0   : > { %v4303_v50 = vpop.f32.mrb[115].mxu0  ;;  %v4998_v25 = vpop.eup %4997  ;;  %v2111_v22 = vmul.f32 %v4996_v33, %v6003_v11  ;;  %5017 = vrcp.f32 %v1813_v53  ;;  %v6100_v58 = vadd.f32 %v6009_v45, %v1325_v38 }
 0x1d1   : > { %v4427_v5 = vpop.f32.mrb[115].mxu1  ;;  %v5000_v6 = vpop.eup %4999  ;;  %v2173_v36 = vmul.f32 %v4998_v25, %v6012_v35  ;;  %5019 = vpow2.f32 %v3439_v14  ;;  %v3441_v46 = vmul.f32 -1.442695, %v6097_v41 }
 0x1d2   : > { %v5002_v21 = vpop.eup %5001  ;;  %v3888_v55 = vpack.c.bf16 %v2111_v22, %v2110_v27  ;;  %5021 = vpow2.f32 %v3501_v9  ;;  %v1082_v35 = vpop.f32.mrb[116].mxu0  ;;  %v3503_v1 = vmul.f32 -1.442695, %v6100_v58  ;;  %v2112_v61 = vmul.f32 %v5000_v6, %v6019_v59 }
 0x1d3   : > { %v5004_v11 = vpop.eup %5003  ;;  %v4043_v10 = vpack.c.bf16 %v2173_v36, %v2172_v42  ;;  %v1752_v60 = vadd.f32 1.0, %v5002_v21  ;;  %5023 = vpow2.f32 %v3440_v39  ;;  %v6106_v37 = vadd.f32 %v6009_v45, %v1082_v35  ;;  %v1330_v62 = vpop.f32.mrb[116].mxu1 }
 0x1d4   : > { %v5006_v43 = vpop.eup %5005  ;;  %4088 = vst [vmem:[%s5554_s6 + $0xc0] sm:$0xff] %v3888_v55   ;;  %v1814_v52 = vadd.f32 1.0, %v5004_v11  ;;  %5025 = vpow2.f32 %v3502_v32  ;;  %v4306_v57 = vpop.f32.mrb[117].mxu0  ;;  %v6110_v54 = vadd.f32 %v6009_v45, %v1330_v62 }
 0x1d5   : > { %v5008_v4 = vpop.eup %5007  ;;  %4119 = vst [vmem:[%s5554_s6 + $0x1b8] sm:$0xff] %v4043_v10   ;;  %5027 = vrcp.f32 %v1752_v60  ;;  %v1753_v49 = vadd.f32 1.0, %v5006_v43  ;;  %v1085_v13 = vpop.f32.mrb[118].mxu0  ;;  %v3442_v23 = vmul.f32 -1.442695, %v6106_v37 }
 0x1d6   : > { %v5010_v63 = vpop.eup %5009  ;;  %5029 = vrcp.f32 %v1814_v52  ;;  %v1815_v19 = vadd.f32 1.0, %v5008_v4  ;;  %v4430_v30 = vpop.f32.mrb[117].mxu1  ;;  %v6114_v12 = vadd.f32 %v6009_v45, %v1085_v13  ;;  %v3504_v24 = vmul.f32 -1.442695, %v6110_v54 }
 0x1d7   : > { %v5012_v8 = vpop.eup %5011  ;;  %5031 = vrcp.f32 %v1753_v49  ;;  %v4307_v31 = vpop.f32.mrb[119].mxu0  ;;  %v2174_v53 = vmul.f32 %v5010_v63, %v6025_v2 }
 0x1d8   : > { %v1333_v28 = vpop.f32.mrb[118].mxu1  ;;  %v5014_v40 = vpop.eup %5013  ;;  %v2113_v14 = vmul.f32 %v5012_v8, %v6030_v51  ;;  %5033 = vrcp.f32 %v1815_v19  ;;  %v3443_v56 = vmul.f32 -1.442695, %v6114_v12 }
 0x1d9   : > { %v4431_v34 = vpop.f32.mrb[119].mxu1  ;;  %v5016_v7 = vpop.eup %5015  ;;  %v2175_v9 = vmul.f32 %v5014_v40, %v6033_v0  ;;  %5035 = vpow2.f32 %v3441_v46 }
 0x1da   : > { %v5018_v48 = vpop.eup %5017  ;;  %v3893_v33 = vpack.c.bf16 %v2113_v14, %v2112_v61  ;;  %5037 = vpow2.f32 %v3503_v1  ;;  %v1090_v50 = vpop.f32.mrb[120].mxu0  ;;  %v2114_v55 = vmul.f32 %v5016_v7, %v6041_v17 }
 0x1db   : > { %v5020_v59 = vpop.eup %5019  ;;  %v4048_v39 = vpack.c.bf16 %v2175_v9, %v2174_v53  ;;  %5039 = vpow2.f32 %v3442_v23  ;;  %v6125_v0 = vadd.f32 %v6009_v45, %v1090_v50  ;;  %v4310_v27 = vpop.f32.mrb[121].mxu0  ;;  %v2176_v43 = vmul.f32 %v5018_v48, %v6045_v47 }
 0x1dc   : > { %v5022_v51 = vpop.eup %5021  ;;  %4089 = vst [vmem:[%s5554_s6 + $0xc8] sm:$0xff] %v3893_v33   ;;  %v1754_v38 = vadd.f32 1.0, %v5020_v59  ;;  %5041 = vpow2.f32 %v3504_v24  ;;  %v1093_v32 = vpop.f32.mrb[122].mxu0 }
 0x1dd   : > { %v5024_v25 = vpop.eup %5023  ;;  %4120 = vst [vmem:[%s5554_s6 + $0x1c0] sm:$0xff] %v4048_v39   ;;  %v1816_v2 = vadd.f32 1.0, %v5022_v51  ;;  %5043 = vpow2.f32 %v3443_v56  ;;  %v3444_v6 = vmul.f32 -1.442695, %v6125_v0  ;;  %v6129_v42 = vadd.f32 %v6009_v45, %v1093_v32  ;;  %v4311_v36 = vpop.f32.mrb[123].mxu0 }
 0x1de   : > { %v5026_v22 = vpop.eup %5025  ;;  %5045 = vrcp.f32 %v1754_v38  ;;  %v1755_v10 = vadd.f32 1.0, %v5024_v25 }
 0x1df   : > { %v5028_v5 = vpop.eup %5027  ;;  %5047 = vrcp.f32 %v1816_v2  ;;  %v1817_v35 = vadd.f32 1.0, %v5026_v22  ;;  %v3445_v4 = vmul.f32 -1.442695, %v6129_v42 }
 0x1e0   : > { %v5030_v21 = vpop.eup %5029  ;;  %v2115_v11 = vmul.f32 %v5028_v5, %v6053_v44  ;;  %5049 = vpow2.f32 %v3444_v6 }
 0x1e1   : > { %v5032_v60 = vpop.eup %5031  ;;  %v2177_v52 = vmul.f32 %v5030_v21, %v6056_v29  ;;  %5051 = vpow2.f32 %v3445_v4 }
 0x1e2   : > { %v5034_v49 = vpop.eup %5033  ;;  %v3898_v45 = vpack.c.bf16 %v2115_v11, %v2114_v55  ;;  %5053 = vrcp.f32 %v1755_v10  ;;  %v2116_v23 = vmul.f32 %v5032_v60, %v6063_v20 }
 0x1e3   : > { %v5036_v46 = vpop.eup %5035  ;;  %v4053_v62 = vpack.c.bf16 %v2177_v52, %v2176_v43  ;;  %5055 = vrcp.f32 %v1817_v35  ;;  %v2178_v28 = vmul.f32 %v5034_v49, %v6066_v15 }
 0x1e4   : > { %v5038_v57 = vpop.eup %5037  ;;  %4090 = vst [vmem:[%s5554_s6 + $0xd0] sm:$0xff] %v3898_v45   ;;  %v1756_v17 = vadd.f32 1.0, %v5036_v46 }
 0x1e5   : > { %v5040_v44 = vpop.eup %5039  ;;  %4121 = vst [vmem:[%s5554_s6 + $0x1c8] sm:$0xff] %v4053_v62   ;;  %v1818_v63 = vadd.f32 1.0, %v5038_v57 }
 0x1e6   : > { %v5042_v47 = vpop.eup %5041  ;;  %5057 = vrcp.f32 %v1756_v17  ;;  %v1757_v29 = vadd.f32 1.0, %v5040_v44 }
 0x1e7   : > { %v5044_v19 = vpop.eup %5043  ;;  %5059 = vrcp.f32 %v1818_v63  ;;  %v1819_v1 = vadd.f32 1.0, %v5042_v47 }
 0x1e8   : > { %v5046_v13 = vpop.eup %5045  ;;  %5061 = vrcp.f32 %v1757_v29  ;;  %v1758_v30 = vadd.f32 1.0, %v5044_v19 }
 0x1e9   : > { %v5048_v8 = vpop.eup %5047  ;;  %v2117_v31 = vmul.f32 %v5046_v13, %v6075_v26  ;;  %5063 = vrcp.f32 %v1819_v1 }
 0x1ea   : > { %v2179_v40 = vmul.f32 %v5048_v8, %v6078_v3  ;;  %5065 = vrcp.f32 %v1758_v30  ;;  %v5050_v14 = vpop.eup %5049 }
 0x1eb   : > { %v3903_v61 = vpack.c.bf16 %v2117_v31, %v2116_v23  ;;  %v5052_v34 = vpop.eup %5051  ;;  %v1759_v7 = vadd.f32 1.0, %v5050_v14 }
 0x1ec   : > { %v4058_v24 = vpack.c.bf16 %v2179_v40, %v2178_v28  ;;  %v5054_v53 = vpop.eup %5053  ;;  %v1760_v9 = vadd.f32 1.0, %v5052_v34 }
 0x1ed   : > { %4091 = vst [vmem:[%s5554_s6 + $0xd8] sm:$0xff] %v3903_v61   ;;  %v5056_v56 = vpop.eup %5055  ;;  %5067 = vrcp.f32 %v1759_v7  ;;  %v2118_v15 = vmul.f32 %v5054_v53, %v6084_v18 }
 0x1ee   : > { %4122 = vst [vmem:[%s5554_s6 + $0x1d0] sm:$0xff] %v4058_v24   ;;  %5069 = vrcp.f32 %v1760_v9  ;;  %v2180_v33 = vmul.f32 %v5056_v56, %v6088_v16 }
 0x1f0   : > { %v5058_v20 = vpop.eup %5057 }
 0x1f1   : > { %v5060_v26 = vpop.eup %5059  ;;  %v2119_v3 = vmul.f32 %v5058_v20, %v6097_v41 }
 0x1f2   : > { %v5062_v48 = vpop.eup %5061  ;;  %v2181_v59 = vmul.f32 %v5060_v26, %v6100_v58 }
 0x1f3   : > { %v5064_v39 = vpop.eup %5063  ;;  %v3908_v51 = vpack.c.bf16 %v2119_v3, %v2118_v15  ;;  %v2120_v2 = vmul.f32 %v5062_v48, %v6106_v37 }
 0x1f4   : > { %v5066_v38 = vpop.eup %5065  ;;  %v4063_v50 = vpack.c.bf16 %v2181_v59, %v2180_v33  ;;  %v2182_v25 = vmul.f32 %v5064_v39, %v6110_v54 }
 0x1f5   : > { %4092 = vst [vmem:[%s5554_s6 + $0xe0] sm:$0xff] %v3908_v51   ;;  %v2121_v18 = vmul.f32 %v5066_v38, %v6114_v12 }
 0x1f6   : > { %4123 = vst [vmem:[%s5554_s6 + $0x1d8] sm:$0xff] %v4063_v50   ;;  %v3761_v41 = vpack.c.bf16 %v2182_v25, %v2182_v25 }
 0x1f7   : > { %v3913_v27 = vpack.c.bf16 %v2121_v18, %v2120_v2  ;;  %v5068_v22 = vpop.eup %5067  ;;  %2795 = sbr.rel (!%p5208_p4) target bundleno = 601 (0x259), region = 36 }
 0x1f8   : > { %2788 = vst [vmem:[%s5554_s6 + $0x1e0] sm:$0xf] %v3761_v41  ;;  %v5070_v16 = vpop.eup %5069  ;;  %v2122_v58 = vmul.f32 %v5068_v22, %v6125_v0 }
 0x1f9   : > { %4093 = vst [vmem:[%s5554_s6 + $0xe8] sm:$0xff] %v3913_v27   ;;  %v2123_v32 = vmul.f32 %v5070_v16, %v6129_v42 }
 0x1fb   : > { %v3918_v5 = vpack.c.bf16 %v2123_v32, %v2122_v58 }
 0x1fd   : > { %4094 = vst [vmem:[%s5554_s6 + $0xf0] sm:$0xff] %v3918_v5  }
 0x1fe   : > { %s6369_s11 = smov (!%p2798_p8, %s2797_s11), 121 }
 0x1ff   : > { %s3626_s21 = sshll.u32 %s6369_s11, 6 }
 0x200   : > { %p3629_p9 = scmp.eq.s32.totalorder %s3626_s21, 0 }
 0x201   : > { %s6171_s22 = sshrl.u32 (!%p3629_p9), %s6369_s11, 6 }
 0x202   : > { %2806 = sbr.rel (%p3629_p9) target bundleno = 601 (0x259), region = 40  ;;  %p3630_p10 = scmp.le.s32.totalorder (!%p3629_p9), %s6171_s22, 0 }
 0x209   : > { %3211 = sbr.rel (%p3630_p10) target bundleno = 580 (0x244), region = 112  ;;  %s6362_s15 = smov (!%p3630_p10), %s6165_s18 }
 0x20a   : > { %s6363_s20 = smov (!%p3630_p10), %s5554_s6  ;;  %s6180_s23 = smov (!%p3630_p10), 0  }
 0x20b   : > { %s6182_s24 = smov (!%p3630_p10), 0  }
 0x210 LB: >> { %v2822_v37 = vld [vmem:[%s5135_s20] sm:$0xf]  ;;  %v2824_v54 = vld [vmem:[%s5135_s20 + $0x4] sm:$0xf]  ;;  %v2826_v12 = vld [vmem:[%s5135_s20 + $0x8] sm:$0xf]  ;;  %s5143_s24 = sphi %s6182_s24, %s2816_s24   ;;  %s5139_s23 = sphi %s6180_s23, %s6364_s23   ;;  %s5135_s20 = sphi %s6363_s20, %s2955_s20   ;;  %s5131_s15 = sphi %s6362_s15, %s2956_s15  }
 0x211   : >> { %2823 = vst [vmem:[%s5131_s15] sm:$0xf] %v2822_v37  ;;  %2825 = vst [vmem:[%s5131_s15 + $0x4] sm:$0xf] %v2824_v54  ;;  %v2828_v0 = vld [vmem:[%s5135_s20 + $0xc] sm:$0xf]  ;;  %s2950_s25 = sadd.s32 1, %s5139_s23 }
 0x212   : >> { %2827 = vst [vmem:[%s5131_s15 + $0x8] sm:$0xf] %v2826_v12  ;;  %v2830_v6 = vld [vmem:[%s5135_s20 + $0x10] sm:$0xf]  ;;  %v2832_v42 = vld [vmem:[%s5135_s20 + $0x14] sm:$0xf]  ;;  %p2951_p11 = scmp.ge.s32.totalorder %s2950_s25, %s6171_s22 }
 0x213   : >> { %2829 = vst [vmem:[%s5131_s15 + $0xc] sm:$0xf] %v2828_v0  ;;  %2831 = vst [vmem:[%s5131_s15 + $0x10] sm:$0xf] %v2830_v6  ;;  %v2834_v36 = vld [vmem:[%s5135_s20 + $0x18] sm:$0xf] }
 0x214   : >> { %2833 = vst [vmem:[%s5131_s15 + $0x14] sm:$0xf] %v2832_v42  ;;  %v2836_v21 = vld [vmem:[%s5135_s20 + $0x1c] sm:$0xf]  ;;  %v2838_v55 = vld [vmem:[%s5135_s20 + $0x20] sm:$0xf] }
 0x215   : >> { %2835 = vst [vmem:[%s5131_s15 + $0x18] sm:$0xf] %v2834_v36  ;;  %2837 = vst [vmem:[%s5131_s15 + $0x1c] sm:$0xf] %v2836_v21  ;;  %v2840_v11 = vld [vmem:[%s5135_s20 + $0x24] sm:$0xf] }
 0x216   : >> { %2839 = vst [vmem:[%s5131_s15 + $0x20] sm:$0xf] %v2838_v55  ;;  %v2842_v10 = vld [vmem:[%s5135_s20 + $0x28] sm:$0xf]  ;;  %v2844_v60 = vld [vmem:[%s5135_s20 + $0x2c] sm:$0xf] }
 0x217   : >> { %2841 = vst [vmem:[%s5131_s15 + $0x24] sm:$0xf] %v2840_v11  ;;  %2843 = vst [vmem:[%s5131_s15 + $0x28] sm:$0xf] %v2842_v10  ;;  %v2846_v43 = vld [vmem:[%s5135_s20 + $0x30] sm:$0xf] }
 0x218   : >> { %2845 = vst [vmem:[%s5131_s15 + $0x2c] sm:$0xf] %v2844_v60  ;;  %v2848_v52 = vld [vmem:[%s5135_s20 + $0x34] sm:$0xf]  ;;  %v2850_v35 = vld [vmem:[%s5135_s20 + $0x38] sm:$0xf] }
 0x219   : >> { %2847 = vst [vmem:[%s5131_s15 + $0x30] sm:$0xf] %v2846_v43  ;;  %2849 = vst [vmem:[%s5131_s15 + $0x34] sm:$0xf] %v2848_v52  ;;  %v2852_v4 = vld [vmem:[%s5135_s20 + $0x3c] sm:$0xf] }
 0x21a   : >> { %2851 = vst [vmem:[%s5131_s15 + $0x38] sm:$0xf] %v2850_v35  ;;  %v2854_v49 = vld [vmem:[%s5135_s20 + $0x40] sm:$0xf]  ;;  %v2856_v45 = vld [vmem:[%s5135_s20 + $0x44] sm:$0xf] }
 0x21b   : >> { %2853 = vst [vmem:[%s5131_s15 + $0x3c] sm:$0xf] %v2852_v4  ;;  %2855 = vst [vmem:[%s5131_s15 + $0x40] sm:$0xf] %v2854_v49  ;;  %v2858_v46 = vld [vmem:[%s5135_s20 + $0x48] sm:$0xf] }
 0x21c   : >> { %2857 = vst [vmem:[%s5131_s15 + $0x44] sm:$0xf] %v2856_v45  ;;  %v2860_v62 = vld [vmem:[%s5135_s20 + $0x4c] sm:$0xf]  ;;  %v2862_v57 = vld [vmem:[%s5135_s20 + $0x50] sm:$0xf] }
 0x21d   : >> { %2859 = vst [vmem:[%s5131_s15 + $0x48] sm:$0xf] %v2858_v46  ;;  %2861 = vst [vmem:[%s5131_s15 + $0x4c] sm:$0xf] %v2860_v62  ;;  %v2864_v17 = vld [vmem:[%s5135_s20 + $0x54] sm:$0xf] }
 0x21e   : >> { %2863 = vst [vmem:[%s5131_s15 + $0x50] sm:$0xf] %v2862_v57  ;;  %v2866_v44 = vld [vmem:[%s5135_s20 + $0x58] sm:$0xf]  ;;  %v2868_v63 = vld [vmem:[%s5135_s20 + $0x5c] sm:$0xf] }
 0x21f   : >> { %2865 = vst [vmem:[%s5131_s15 + $0x54] sm:$0xf] %v2864_v17  ;;  %2867 = vst [vmem:[%s5131_s15 + $0x58] sm:$0xf] %v2866_v44  ;;  %v2870_v47 = vld [vmem:[%s5135_s20 + $0x60] sm:$0xf] }
 0x220   : >> { %2869 = vst [vmem:[%s5131_s15 + $0x5c] sm:$0xf] %v2868_v63  ;;  %v2872_v29 = vld [vmem:[%s5135_s20 + $0x64] sm:$0xf]  ;;  %v2874_v19 = vld [vmem:[%s5135_s20 + $0x68] sm:$0xf] }
 0x221   : >> { %2871 = vst [vmem:[%s5131_s15 + $0x60] sm:$0xf] %v2870_v47  ;;  %2873 = vst [vmem:[%s5131_s15 + $0x64] sm:$0xf] %v2872_v29  ;;  %v2876_v1 = vld [vmem:[%s5135_s20 + $0x6c] sm:$0xf] }
 0x222   : >> { %2875 = vst [vmem:[%s5131_s15 + $0x68] sm:$0xf] %v2874_v19  ;;  %v2878_v13 = vld [vmem:[%s5135_s20 + $0x70] sm:$0xf]  ;;  %v2880_v30 = vld [vmem:[%s5135_s20 + $0x74] sm:$0xf] }
 0x223   : >> { %2877 = vst [vmem:[%s5131_s15 + $0x6c] sm:$0xf] %v2876_v1  ;;  %2879 = vst [vmem:[%s5131_s15 + $0x70] sm:$0xf] %v2878_v13  ;;  %v2882_v8 = vld [vmem:[%s5135_s20 + $0x78] sm:$0xf] }
 0x224   : >> { %2881 = vst [vmem:[%s5131_s15 + $0x74] sm:$0xf] %v2880_v30  ;;  %v2884_v23 = vld [vmem:[%s5135_s20 + $0x7c] sm:$0xf]  ;;  %v2886_v31 = vld [vmem:[%s5135_s20 + $0x80] sm:$0xf] }
 0x225   : >> { %2883 = vst [vmem:[%s5131_s15 + $0x78] sm:$0xf] %v2882_v8  ;;  %2885 = vst [vmem:[%s5131_s15 + $0x7c] sm:$0xf] %v2884_v23  ;;  %v2888_v28 = vld [vmem:[%s5135_s20 + $0x84] sm:$0xf] }
 0x226   : >> { %2887 = vst [vmem:[%s5131_s15 + $0x80] sm:$0xf] %v2886_v31  ;;  %v2890_v40 = vld [vmem:[%s5135_s20 + $0x88] sm:$0xf]  ;;  %v2892_v61 = vld [vmem:[%s5135_s20 + $0x8c] sm:$0xf] }
 0x227   : >> { %2889 = vst [vmem:[%s5131_s15 + $0x84] sm:$0xf] %v2888_v28  ;;  %2891 = vst [vmem:[%s5131_s15 + $0x88] sm:$0xf] %v2890_v40  ;;  %v2894_v14 = vld [vmem:[%s5135_s20 + $0x90] sm:$0xf] }
 0x228   : >> { %2893 = vst [vmem:[%s5131_s15 + $0x8c] sm:$0xf] %v2892_v61  ;;  %v2896_v24 = vld [vmem:[%s5135_s20 + $0x94] sm:$0xf]  ;;  %v2898_v34 = vld [vmem:[%s5135_s20 + $0x98] sm:$0xf] }
 0x229   : >> { %2895 = vst [vmem:[%s5131_s15 + $0x90] sm:$0xf] %v2894_v14  ;;  %2897 = vst [vmem:[%s5131_s15 + $0x94] sm:$0xf] %v2896_v24  ;;  %v2900_v7 = vld [vmem:[%s5135_s20 + $0x9c] sm:$0xf] }
 0x22a   : >> { %2899 = vst [vmem:[%s5131_s15 + $0x98] sm:$0xf] %v2898_v34  ;;  %v2902_v53 = vld [vmem:[%s5135_s20 + $0xa0] sm:$0xf]  ;;  %v2904_v9 = vld [vmem:[%s5135_s20 + $0xa4] sm:$0xf] }
 0x22b   : >> { %2901 = vst [vmem:[%s5131_s15 + $0x9c] sm:$0xf] %v2900_v7  ;;  %2903 = vst [vmem:[%s5131_s15 + $0xa0] sm:$0xf] %v2902_v53  ;;  %v2906_v56 = vld [vmem:[%s5135_s20 + $0xa8] sm:$0xf] }
 0x22c   : >> { %2905 = vst [vmem:[%s5131_s15 + $0xa4] sm:$0xf] %v2904_v9  ;;  %v2908_v20 = vld [vmem:[%s5135_s20 + $0xac] sm:$0xf]  ;;  %v2910_v26 = vld [vmem:[%s5135_s20 + $0xb0] sm:$0xf] }
 0x22d   : >> { %2907 = vst [vmem:[%s5131_s15 + $0xa8] sm:$0xf] %v2906_v56  ;;  %2909 = vst [vmem:[%s5131_s15 + $0xac] sm:$0xf] %v2908_v20  ;;  %v2912_v15 = vld [vmem:[%s5135_s20 + $0xb4] sm:$0xf] }
 0x22e   : >> { %2911 = vst [vmem:[%s5131_s15 + $0xb0] sm:$0xf] %v2910_v26  ;;  %v2914_v3 = vld [vmem:[%s5135_s20 + $0xb8] sm:$0xf]  ;;  %v2916_v48 = vld [vmem:[%s5135_s20 + $0xbc] sm:$0xf] }
 0x22f   : >> { %2913 = vst [vmem:[%s5131_s15 + $0xb4] sm:$0xf] %v2912_v15  ;;  %2915 = vst [vmem:[%s5131_s15 + $0xb8] sm:$0xf] %v2914_v3  ;;  %v2918_v33 = vld [vmem:[%s5135_s20 + $0xc0] sm:$0xf] }
 0x230   : >> { %2917 = vst [vmem:[%s5131_s15 + $0xbc] sm:$0xf] %v2916_v48  ;;  %v2920_v59 = vld [vmem:[%s5135_s20 + $0xc4] sm:$0xf]  ;;  %v2922_v39 = vld [vmem:[%s5135_s20 + $0xc8] sm:$0xf] }
 0x231   : >> { %2919 = vst [vmem:[%s5131_s15 + $0xc0] sm:$0xf] %v2918_v33  ;;  %2921 = vst [vmem:[%s5131_s15 + $0xc4] sm:$0xf] %v2920_v59  ;;  %v2924_v51 = vld [vmem:[%s5135_s20 + $0xcc] sm:$0xf] }
 0x232   : >> { %2923 = vst [vmem:[%s5131_s15 + $0xc8] sm:$0xf] %v2922_v39  ;;  %v2926_v38 = vld [vmem:[%s5135_s20 + $0xd0] sm:$0xf]  ;;  %v2928_v50 = vld [vmem:[%s5135_s20 + $0xd4] sm:$0xf] }
 0x233   : >> { %2925 = vst [vmem:[%s5131_s15 + $0xcc] sm:$0xf] %v2924_v51  ;;  %2927 = vst [vmem:[%s5131_s15 + $0xd0] sm:$0xf] %v2926_v38  ;;  %v2930_v25 = vld [vmem:[%s5135_s20 + $0xd8] sm:$0xf] }
 0x234   : >> { %2929 = vst [vmem:[%s5131_s15 + $0xd4] sm:$0xf] %v2928_v50  ;;  %v2932_v2 = vld [vmem:[%s5135_s20 + $0xdc] sm:$0xf]  ;;  %v2934_v18 = vld [vmem:[%s5135_s20 + $0xe0] sm:$0xf] }
 0x235   : >> { %2931 = vst [vmem:[%s5131_s15 + $0xd8] sm:$0xf] %v2930_v25  ;;  %2933 = vst [vmem:[%s5131_s15 + $0xdc] sm:$0xf] %v2932_v2  ;;  %v2936_v41 = vld [vmem:[%s5135_s20 + $0xe4] sm:$0xf] }
 0x236   : >> { %2935 = vst [vmem:[%s5131_s15 + $0xe0] sm:$0xf] %v2934_v18  ;;  %v2938_v27 = vld [vmem:[%s5135_s20 + $0xe8] sm:$0xf]  ;;  %v2940_v22 = vld [vmem:[%s5135_s20 + $0xec] sm:$0xf] }
 0x237   : >> { %2937 = vst [vmem:[%s5131_s15 + $0xe4] sm:$0xf] %v2936_v41  ;;  %2939 = vst [vmem:[%s5131_s15 + $0xe8] sm:$0xf] %v2938_v27  ;;  %v2942_v16 = vld [vmem:[%s5135_s20 + $0xf0] sm:$0xf] }
 0x238   : >> { %2941 = vst [vmem:[%s5131_s15 + $0xec] sm:$0xf] %v2940_v22  ;;  %v2944_v58 = vld [vmem:[%s5135_s20 + $0xf4] sm:$0xf]  ;;  %v2946_v32 = vld [vmem:[%s5135_s20 + $0xf8] sm:$0xf] }
 0x239   : >> { %2943 = vst [vmem:[%s5131_s15 + $0xf0] sm:$0xf] %v2942_v16  ;;  %2945 = vst [vmem:[%s5131_s15 + $0xf4] sm:$0xf] %v2944_v58  ;;  %v2948_v5 = vld [vmem:[%s5135_s20 + $0xfc] sm:$0xf] }
 0x23a   : >> { %2947 = vst [vmem:[%s5131_s15 + $0xf8] sm:$0xf] %v2946_v32  ;;  %2949 = vst [vmem:[%s5131_s15 + $0xfc] sm:$0xf] %v2948_v5  ;;  %s6371_s25 = smov (%p2951_p11, %s2950_s25), 0  ;;  %s2816_s24 = sadd.s32 1, %s5143_s24  }
 0x23b   : >> { %s3631_s26 = sshll.u32 %s6371_s25, 8  ;;  %p2815_p12 = scmp.ge.s32.totalorder %s2816_s24, %s6171_s22 }
 0x23c   : >> { %s2955_s20 = scalar_lea.vmem %s5554_s6, %s3631_s26 [#allocation2]   ;;  %s2956_s15 = scalar_lea.vmem %s6165_s18, %s3631_s26  }
 0x23d   : >> { %s6364_s23 = smov %s6371_s25  ;;  %2818 = sbr.rel (!%p2815_p12) target bundleno = 528 (0x210), region = 118 }
 0x244 PF: > { %s6339_s27 = sand.u32 63, %s6369_s11   ;;  %s3763_s28 = sshll.u32 %s6171_s22, 8 }
 0x245   : > { %s2961_s29 = scalar_lea.vmem %s5554_s6, %s3763_s28 [#allocation2]   ;;  %s2963_s30 = scalar_lea.vmem %s6165_s18, %s3763_s28  }
 0x246   : > { %p3636_p13 = scmp.le.s32.totalorder %s6339_s27, 0 }
 0x247   : > { %s5145_s4 = smov (!%p3636_p13), %s2963_s30   ;;  %s5149_s5 = smov (!%p3636_p13), %s2961_s29  }
 0x248   : > { %3225 = sbr.rel (%p3636_p13) target bundleno = 601 (0x259), region = 123  ;;  %s5153_s7 = smov (!%p3636_p13), 0  }
 0x249   : > { %s5157_s8 = smov (!%p3636_p13), 0  }
 0x24f LB: >> { %v2973_v37 = vld [vmem:[%s5151_s5] sm:$0xf]  ;;  %s2975_s9 = sadd.s32 1, %s5155_s7  ;;  %s2967_s8 = sadd.s32 1, %s5159_s8   ;;  %s5159_s8 = sphi %s5157_s8, %s2967_s8   ;;  %s5155_s7 = sphi %s5153_s7, %s5154_s7   ;;  %s5151_s5 = sphi %s5149_s5, %s2980_s5   ;;  %s5147_s4 = sphi %s5145_s4, %s2981_s4  }
 0x250   : >> { %2974 = vst [vmem:[%s5147_s4] sm:$0xf] %v2973_v37  ;;  %p2976_p0 = scmp.ge.s32.totalorder %s2975_s9, %s6339_s27  ;;  %p2966_p1 = scmp.ge.s32.totalorder %s2967_s8, %s6339_s27 }
 0x252   : >> { %s6373_s9 = smov (%p2976_p0, %s2975_s9), 0  ;;  %2969 = sbr.rel (!%p2966_p1) target bundleno = 591 (0x24f), region = 129 }
 0x253   : >> { %s3637_s6 = sshll.u32 %s6373_s9, 2  ;;  %s5154_s7 = smov %s6373_s9  }
 0x254   : >> { %s2980_s5 = scalar_lea.vmem %s2961_s29, %s3637_s6 [#allocation2]   ;;  %s2981_s4 = scalar_lea.vmem %s2963_s30, %s3637_s6  }
 0x259 PF: > { %p10_p2 = scmp.ge.s32.totalorder %s5198_s16, 4   ;;  %s6365_s12 = smov %s5123_s13 }
 0x25a   : > { %s6366_s13 = smov %s5206_s19  ;;  %s6367_s14 = smov %s5198_s16 }
 0x25b   :  { %12 = sbr.rel (!%p10_p2) target bundleno = 2 (0x2), region = 140 }

// kernel: stem_layer_forward.6
= control target key start
LH: loop header
LB: loop body
LE: loop exit
PB: predicated region body
PF: predicated region fallthrough
CT: control target
= control target key end

     0   :  { %s6404_s12 = smov 0   ;;  %s6406_s13 = smov 0   ;;  %s7937_s0 = inlined_call_operand.vmem [shape: bf16[1682,288], index: 0, kind: input, shape index: {}]   ;;  %s7938_s1 = inlined_call_operand.vmem [shape: bf16[288,128], index: 1, kind: input, shape index: {}]   ;;  %s7939_s2 = inlined_call_operand.vmem [shape: f32[1,128], index: 2, kind: input, shape index: {}]   ;;  %s7940_s3 = inlined_call_operand.vmem [shape: bf16[1682,128], index: 3, kind: output, shape index: {}]  }
   0x1   :  { %s6408_s14 = smov 0  }
   0x2 LB: > { %s6417_s15 = sadd.s32 4294967295, %s6347_s14   ;;  %s6419_s16 = sadd.s32 1, %s6347_s14   ;;  %s6347_s14 = sphi %s6408_s14, %s7947_s14   ;;  %s6343_s13 = sphi %s6406_s13, %s7946_s13   ;;  %s6339_s12 = sphi %s6404_s12, %s7945_s12  }
   0x3   : > { %s85_s17 = ssub.s32 %s6347_s14, %s6419_s16  ;;  %s88_s18 = sadd.s32 1, %s6343_s13 }
   0x4   : > { %p86_p0 = scmp.eq.s32.totalorder %s85_s17, 0  ;;  %p98_p1 = scmp.ne.s32.totalorder %s6343_s13, %s6339_s12 }
   0x5   : > { %p99_p2 = scmp.eq.s32.totalorder %s6417_s15, 1  ;;  %p4174_p3 = scmp.ge.s32.totalorder %s6347_s14, 1 }
   0x6   : > { %s6427_s19 = scalar_select %p86_p0, %s6343_s13, %s88_s18  }
   0x7   : > { %p6429_p4 = por %p99_p2, %p98_p1  ;;  %p149_p5 = scmp.lt.s32.totalorder %s6347_s14, 3 }
   0x9   : > { %p150_p6 = pnand %p4174_p3, %p149_p5 }
   0xa   : > { %v5636_v0 = vld [vmem:[%s7938_s1] sm:$0xff] (!%p150_p6)   ;;  %v6381_v1 = vmov (!%p150_p6), 0   ;;  %v5637_v2 = vld [vmem:[%s7938_s1 + $0x8] sm:$0xff] (!%p150_p6)   ;;  %v6382_v3 = vmov (!%p150_p6), 0.0   ;;  %vm6383_vm0 = vmmov (!%p150_p6), 0   ;;  %s6445_s25 = smul.u32 (!%p150_p6), 106, %s6417_s15 }
   0xb   : > { %153 = sbr.rel (%p150_p6) target bundleno = 831 (0x33f), region = 32  ;;  %1519 = vmatprep.subr.bf16.mxu1 (!%p150_p6), %v6381_v1  ;;  %5115 = vmatprep.subr.bf16.mxu0 (!%p150_p6), %v6382_v3  ;;  %v5638_v4 = vld [vmem:[%s7938_s1 + $0x10] sm:$0xff] (!%p150_p6)   ;;  %v5639_v5 = vld [vmem:[%s7938_s1 + $0x18] sm:$0xff] (!%p150_p6)   ;;  %v5640_v6 = vld [vmem:[%s7938_s1 + $0x20] sm:$0xff] (!%p150_p6)   ;;  %vm1359_vm1 = vcmask (!%p150_p6), 261120   ;;  %s175_s26 = sand.u32 (!%p150_p6), 1, %s6339_s12  }
   0xc   : > { %1520 = vmatpush1.bf16.msra.mxu1 (!%p150_p6), %v5636_v0  ;;  %5119 = vmatprep.mubr.msk.bf16.mxu0 (!%p150_p6), %vm6383_vm0, %v6382_v3  ;;  %p184_p7 = scmp.lt.s32.totalorder (!%p150_p6), %s6445_s25, 210  ;;  %v5650_v7 = vld [vmem:[%s7938_s1 + $0x80] sm:$0xff] (!%p150_p6)   ;;  %v5652_v8 = vld [vmem:[%s7938_s1 + $0x88] sm:$0xff] (!%p150_p6)   ;;  %v5642_v12 = vld [vmem:[%s7938_s1 + $0x30] sm:$0xff] (!%p150_p6)   ;;  %s6805_s12 = smul.u32 (!%p150_p6), 424, %s175_s26 }
   0xd   : > { %1521 = vmatprep.subr.bf16.mxu1 (!%p150_p6), %v6381_v1  ;;  %5116 = vmatpush3.bf16.msra.mxu0 (!%p150_p6), %v5650_v7  ;;  %v5641_v9 = vld [vmem:[%s7938_s1 + $0x28] sm:$0xff] (!%p150_p6)   ;;  %v5643_v13 = vld [vmem:[%s7938_s1 + $0x38] sm:$0xff] (!%p150_p6)   ;;  %v5644_v15 = vld [vmem:[%s7938_s1 + $0x40] sm:$0xff] (!%p150_p6)  }
   0xe   : > { %5117 = vmatprep.subr.bf16.mxu0 (!%p150_p6), %v6382_v3  ;;  %v5645_v16 = vld [vmem:[%s7938_s1 + $0x48] sm:$0xff] (!%p150_p6)   ;;  %v5646_v18 = vld [vmem:[%s7938_s1 + $0x50] sm:$0xff] (!%p150_p6)   ;;  %v5647_v19 = vld [vmem:[%s7938_s1 + $0x58] sm:$0xff] (!%p150_p6)   ;;  %s6826_s27 = scalar_lea.vmem (!%p150_p6), [#allocation2], %s6805_s12  }
   0xf   : > { %v5648_v21 = vld [vmem:[%s7938_s1 + $0x60] sm:$0xff] (!%p150_p6)   ;;  %v5649_v22 = vld [vmem:[%s7938_s1 + $0x68] sm:$0xff] (!%p150_p6)   ;;  %v5651_v24 = vld [vmem:[%s7938_s1 + $0x70] sm:$0xff] (!%p150_p6)  }
  0x10   : > { %1522 = vmatpush1.bf16.msra.mxu1 (!%p150_p6), %v5637_v2  ;;  %v5653_v25 = vld [vmem:[%s7938_s1 + $0x78] sm:$0xff] (!%p150_p6)  }
  0x11   : > { %1523 = vmatprep.subr.bf16.mxu1 (!%p150_p6), %v6381_v1  ;;  %5118 = vmatpush3.bf16.msra.mxu0 (!%p150_p6), %v5652_v8 }
  0x12   : > { %s185_s28 = scalar_select %p184_p7, %s6445_s25, 210 }
  0x13   : > { %s3713_s6 = ssub.s32 (%p6429_p4), 211, %s6445_s25  ;;  %s4740_s7 = smul.u32 (%p6429_p4), 424, %s6417_s15 }
  0x14   : > { %1524 = vmatpush1.bf16.msra.mxu1 %v5638_v4  ;;  %s5544_s4 = smul.u32 12, %s185_s28  ;;  %p3714_p8 = scmp.lt.s32.totalorder (%p6429_p4), %s3713_s6, 106 }
  0x15   : > { %1525 = vmatprep.subr.bf16.mxu1 %v6381_v1  ;;  %s7745_s10 = scalar_lea.vmem (%p6429_p4), %s7940_s3, %s4740_s7  }
  0x16   : > { %s6470_s17 = scalar_lea.vmem %s7937_s0, %s5544_s4 }
  0x17   : > { %v5656_v10 = vld [vmem:[%s6470_s17 + $0x4] ss:$12 sps:$4 sm:$0xff]   ;;  %v5657_v11 = vld [vmem:[%s6470_s17 + $0x8] ss:$12 sps:$4 sm:$0xff]   ;;  %v5660_v14 = vld [vmem:[%s6470_s17 + $0x20] ss:$12 sps:$4 sm:$0xff]  }
  0x18   : > { %1526 = vmatpush1.bf16.msra.mxu1 %v5639_v5  ;;  %1551 = vmatprep.mubr.bf16.mxu1 %v5656_v10  ;;  %v5664_v17 = vld [vmem:[%s6470_s17 + $0x38] ss:$12 sps:$4 sm:$0xff]   ;;  %v5668_v20 = vld [vmem:[%s6470_s17 + $0x50] ss:$12 sps:$4 sm:$0xff]   ;;  %v5672_v23 = vld [vmem:[%s6470_s17 + $0x68] ss:$12 sps:$4 sm:$0xff]  }
  0x19   : > { %1527 = vmatprep.subr.bf16.mxu1 %v6381_v1  ;;  %5120 = vmatmul.mubr.msk.bf16.vlgmr.msra.gmra.mrb[0].mxu0 %vm1359_vm1, %v5657_v11  ;;  %v5676_v26 = vld [vmem:[%s6470_s17 + $0x80] ss:$12 sps:$4 sm:$0xff]   ;;  %v5658_v28 = vld [vmem:[%s6470_s17 + $0x1c] ss:$12 sps:$4 sm:$0xff]   ;;  %v5680_v29 = vld [vmem:[%s6470_s17 + $0x98] ss:$12 sps:$4 sm:$0xff]  }
  0x1a   : > { %5123 = vmatprep.mubr.msk.bf16.mxu0 %vm6383_vm0, %v6382_v3  ;;  %v5654_v27 = vld [vmem:[%s6470_s17] ss:$12 sps:$4 sm:$0xff]   ;;  %v5661_v30 = vld [vmem:[%s6470_s17 + $0x18] ss:$12 sps:$4 sm:$0xff]   ;;  %v5684_v32 = vld [vmem:[%s6470_s17 + $0xb0] ss:$12 sps:$4 sm:$0xff]  }
  0x1b   : > { %v5662_v31 = vld [vmem:[%s6470_s17 + $0x34] ss:$12 sps:$4 sm:$0xff]   ;;  %v5665_v33 = vld [vmem:[%s6470_s17 + $0x30] ss:$12 sps:$4 sm:$0xff]   ;;  %v5666_v34 = vld [vmem:[%s6470_s17 + $0x4c] ss:$12 sps:$4 sm:$0xff]  }
  0x1c   : > { %1528 = vmatpush1.bf16.msra.mxu1 %v5640_v6  ;;  %v5688_v35 = vld [vmem:[%s6470_s17 + $0xc8] ss:$12 sps:$4 sm:$0xff]   ;;  %v5670_v37 = vld [vmem:[%s6470_s17 + $0x64] ss:$12 sps:$4 sm:$0xff]   ;;  %v5692_v38 = vld [vmem:[%s6470_s17 + $0xe0] ss:$12 sps:$4 sm:$0xff]  }
  0x1d   : > { %1529 = vmatprep.subr.bf16.mxu1 %v6381_v1  ;;  %v5669_v36 = vld [vmem:[%s6470_s17 + $0x48] ss:$12 sps:$4 sm:$0xff]   ;;  %v5673_v39 = vld [vmem:[%s6470_s17 + $0x60] ss:$12 sps:$4 sm:$0xff]   ;;  %v5696_v41 = vld [vmem:[%s6470_s17 + $0xf8] ss:$12 sps:$4 sm:$0xff]  }
  0x1e   : > { %v5674_v40 = vld [vmem:[%s6470_s17 + $0x7c] ss:$12 sps:$4 sm:$0xff]   ;;  %v5677_v42 = vld [vmem:[%s6470_s17 + $0x78] ss:$12 sps:$4 sm:$0xff]   ;;  %v5678_v43 = vld [vmem:[%s6470_s17 + $0x94] ss:$12 sps:$4 sm:$0xff]  }
  0x1f   : > { %v5700_v44 = vld [vmem:[%s6470_s17 + $0x110] ss:$12 sps:$4 sm:$0xff]   ;;  %v5682_v46 = vld [vmem:[%s6470_s17 + $0xac] ss:$12 sps:$4 sm:$0xff]   ;;  %v5704_v47 = vld [vmem:[%s6470_s17 + $0x128] ss:$12 sps:$4 sm:$0xff]  }
  0x20   : > { %1530 = vmatpush1.bf16.msra.mxu1 %v5641_v9  ;;  %v5681_v45 = vld [vmem:[%s6470_s17 + $0x90] ss:$12 sps:$4 sm:$0xff]   ;;  %v5685_v48 = vld [vmem:[%s6470_s17 + $0xa8] ss:$12 sps:$4 sm:$0xff]   ;;  %v5708_v50 = vld [vmem:[%s6470_s17 + $0x140] ss:$12 sps:$4 sm:$0xff]  }
  0x21   : > { %1531 = vmatprep.subr.bf16.mxu1 %v6381_v1  ;;  %5124 = vmatmul.mubr.msk.bf16.gmra.mrb[4].mxu0 %vm1359_vm1, %v5660_v14  ;;  %v5686_v49 = vld [vmem:[%s6470_s17 + $0xc4] ss:$12 sps:$4 sm:$0xff]   ;;  %v5689_v51 = vld [vmem:[%s6470_s17 + $0xc0] ss:$12 sps:$4 sm:$0xff]   ;;  %v5690_v52 = vld [vmem:[%s6470_s17 + $0xdc] ss:$12 sps:$4 sm:$0xff]  }
  0x22   : > { %5127 = vmatprep.mubr.msk.bf16.mxu0 %vm6383_vm0, %v6382_v3  ;;  %v5712_v53 = vld [vmem:[%s6470_s17 + $0x158] ss:$12 sps:$4 sm:$0xff]   ;;  %v5694_v55 = vld [vmem:[%s6470_s17 + $0xf4] ss:$12 sps:$4 sm:$0xff]   ;;  %v5716_v56 = vld [vmem:[%s6470_s17 + $0x170] ss:$12 sps:$4 sm:$0xff]  }
  0x23   : > { %v5693_v54 = vld [vmem:[%s6470_s17 + $0xd8] ss:$12 sps:$4 sm:$0xff]   ;;  %v5697_v57 = vld [vmem:[%s6470_s17 + $0xf0] ss:$12 sps:$4 sm:$0xff]   ;;  %v5720_v59 = vld [vmem:[%s6470_s17 + $0x188] ss:$12 sps:$4 sm:$0xff]  }
  0x24   : > { %1532 = vmatpush1.bf16.msra.mxu1 %v5642_v12  ;;  %v5698_v58 = vld [vmem:[%s6470_s17 + $0x10c] ss:$12 sps:$4 sm:$0xff]   ;;  %v5701_v60 = vld [vmem:[%s6470_s17 + $0x108] ss:$12 sps:$4 sm:$0xff]   ;;  %v5702_v61 = vld [vmem:[%s6470_s17 + $0x124] ss:$12 sps:$4 sm:$0xff]  }
  0x25   : > { %1533 = vmatprep.subr.bf16.mxu1 %v6381_v1  ;;  %v5724_v62 = vld [vmem:[%s6470_s17 + $0x1a0] ss:$12 sps:$4 sm:$0xff]   ;;  %v5706_v0 = vld [vmem:[%s6470_s17 + $0x13c] ss:$12 sps:$4 sm:$0xff]   ;;  %v5709_v2 = vld [vmem:[%s6470_s17 + $0x138] ss:$12 sps:$4 sm:$0xff]  }
  0x26   : > { %v5705_v63 = vld [vmem:[%s6470_s17 + $0x120] ss:$12 sps:$4 sm:$0xff]   ;;  %v5732_v5 = vld [vmem:[%s6470_s17 + $0x1d0] ss:$12 sps:$4 sm:$0xff]   ;;  %v5736_v8 = vld [vmem:[%s6470_s17 + $0x1e8] ss:$12 sps:$4 sm:$0xff]  }
  0x27   : > { %v5710_v4 = vld [vmem:[%s6470_s17 + $0x154] ss:$12 sps:$4 sm:$0xff]   ;;  %v5713_v6 = vld [vmem:[%s6470_s17 + $0x150] ss:$12 sps:$4 sm:$0xff]   ;;  %v5714_v7 = vld [vmem:[%s6470_s17 + $0x16c] ss:$12 sps:$4 sm:$0xff]  }
  0x28   : > { %1534 = vmatpush1.bf16.msra.mxu1 %v5643_v13  ;;  %v5717_v9 = vld [vmem:[%s6470_s17 + $0x168] ss:$12 sps:$4 sm:$0xff]   ;;  %v5718_v10 = vld [vmem:[%s6470_s17 + $0x184] ss:$12 sps:$4 sm:$0xff]   ;;  %v5740_v11 = vld [vmem:[%s6470_s17 + $0x200] ss:$12 sps:$4 sm:$0xff]  }
  0x29   : > { %1535 = vmatprep.subr.bf16.mxu1 %v6381_v1  ;;  %5128 = vmatmul.mubr.msk.bf16.gmra.mrb[8].mxu0 %vm1359_vm1, %v5664_v17  ;;  %v5721_v12 = vld [vmem:[%s6470_s17 + $0x180] ss:$12 sps:$4 sm:$0xff]   ;;  %v5722_v13 = vld [vmem:[%s6470_s17 + $0x19c] ss:$12 sps:$4 sm:$0xff]   ;;  %v5744_v14 = vld [vmem:[%s6470_s17 + $0x218] ss:$12 sps:$4 sm:$0xff]  }
  0x2a   : > { %5131 = vmatprep.mubr.msk.bf16.mxu0 %vm6383_vm0, %v6382_v3  ;;  %v5748_v17 = vld [vmem:[%s6470_s17 + $0x230] ss:$12 sps:$4 sm:$0xff]  }
  0x2c   : > { %1536 = vmatpush1.bf16.msra.mxu1 %v5644_v15  ;;  %v5725_v15 = vld [vmem:[%s6470_s17 + $0x198] ss:$12 sps:$4 sm:$0xff]  }
  0x2d   : > { %1537 = vmatprep.subr.bf16.mxu1 %v6381_v1 }
  0x30   : > { %1538 = vmatpush1.bf16.msra.mxu1 %v5645_v16  ;;  %v5726_v16 = vld [vmem:[%s6470_s17 + $0x1b4] ss:$12 sps:$4 sm:$0xff]  }
  0x31   : > { %1539 = vmatprep.subr.bf16.mxu1 %v6381_v1  ;;  %5132 = vmatmul.mubr.msk.bf16.gmra.mrb[12].mxu0 %vm1359_vm1, %v5668_v20  ;;  %v5752_v20 = vld [vmem:[%s6470_s17 + $0x248] ss:$12 sps:$4 sm:$0xff]  }
  0x32   : > { %5135 = vmatprep.mubr.msk.bf16.mxu0 %vm6383_vm0, %v6382_v3 }
  0x34   : > { %1540 = vmatpush1.bf16.msra.mxu1 %v5646_v18  ;;  %v5729_v18 = vld [vmem:[%s6470_s17 + $0x1b0] ss:$12 sps:$4 sm:$0xff]  }
  0x35   : > { %1541 = vmatprep.subr.bf16.mxu1 %v6381_v1 }
  0x38   : > { %1542 = vmatpush1.bf16.msra.mxu1 %v5647_v19  ;;  %v5730_v19 = vld [vmem:[%s6470_s17 + $0x1cc] ss:$12 sps:$4 sm:$0xff]  }
  0x39   : > { %1543 = vmatprep.subr.bf16.mxu1 %v6381_v1  ;;  %5136 = vmatmul.mubr.msk.bf16.gmra.mrb[16].mxu0 %vm1359_vm1, %v5672_v23  ;;  %v5756_v23 = vld [vmem:[%s6470_s17 + $0x260] ss:$12 sps:$4 sm:$0xff]  }
  0x3a   : > { %5139 = vmatprep.mubr.msk.bf16.mxu0 %vm6383_vm0, %v6382_v3 }
  0x3c   : > { %1544 = vmatpush1.bf16.msra.mxu1 %v5648_v21  ;;  %v5733_v21 = vld [vmem:[%s6470_s17 + $0x1c8] ss:$12 sps:$4 sm:$0xff]  }
  0x3d   : > { %1545 = vmatprep.subr.bf16.mxu1 %v6381_v1 }
  0x40   : > { %1546 = vmatpush1.bf16.msra.mxu1 %v5649_v22  ;;  %v5734_v22 = vld [vmem:[%s6470_s17 + $0x1e4] ss:$12 sps:$4 sm:$0xff]  }
  0x41   : > { %1547 = vmatprep.subr.bf16.mxu1 %v6381_v1  ;;  %5140 = vmatmul.mubr.msk.bf16.gmra.mrb[20].mxu0 %vm1359_vm1, %v5676_v26  ;;  %v5760_v26 = vld [vmem:[%s6470_s17 + $0x278] ss:$12 sps:$4 sm:$0xff]  }
  0x42   : > { %5143 = vmatprep.mubr.msk.bf16.mxu0 %vm6383_vm0, %v6382_v3 }
  0x44   : > { %1548 = vmatpush1.bf16.msra.mxu1 %v5651_v24  ;;  %v5737_v24 = vld [vmem:[%s6470_s17 + $0x1e0] ss:$12 sps:$4 sm:$0xff]  }
  0x45   : > { %1549 = vmatprep.subr.bf16.mxu1 %v6381_v1  ;;  %v5728_v1 = vld [vmem:[%s6470_s17 + $0x1b8] ss:$12 sps:$4 sm:$0xff]  }
  0x48   : > { %1550 = vmatpush1.bf16.msra.mxu1 %v5653_v25  ;;  %v5738_v25 = vld [vmem:[%s6470_s17 + $0x1fc] ss:$12 sps:$4 sm:$0xff]  }
  0x49   : > { %5144 = vmatmul.mubr.msk.bf16.gmra.mrb[24].mxu0 %vm1359_vm1, %v5680_v29 }
  0x4a   : > { %5147 = vmatprep.mubr.msk.bf16.mxu0 %vm6383_vm0, %v6382_v3 }
  0x4b   : > { %1552 = vmatmul.mubr.bf16.vlgmr.msra.gmra.mrb[0].mxu1 %v5654_v27  ;;  %v5741_v27 = vld [vmem:[%s6470_s17 + $0x1f8] ss:$12 sps:$4 sm:$0xff]  }
  0x4c   : > { %1559 = vmatprep.mubr.bf16.mxu1 %v5658_v28  ;;  %v5742_v28 = vld [vmem:[%s6470_s17 + $0x214] ss:$12 sps:$4 sm:$0xff]  }
  0x51   : > { %5148 = vmatmul.mubr.msk.bf16.gmra.mrb[28].mxu0 %vm1359_vm1, %v5684_v32 }
  0x52   : > { %5151 = vmatprep.mubr.msk.bf16.mxu0 %vm6383_vm0, %v6382_v3 }
  0x53   : > { %1560 = vmatmul.mubr.bf16.gmra.mrb[4].mxu1 %v5661_v30 }
  0x54   : > { %1567 = vmatprep.mubr.bf16.mxu1 %v5662_v31  ;;  %v5764_v31 = vld [vmem:[%s6470_s17 + $0x290] ss:$12 sps:$4 sm:$0xff]  }
  0x59   : > { %5152 = vmatmul.mubr.msk.bf16.gmra.mrb[32].mxu0 %vm1359_vm1, %v5688_v35  ;;  %v5746_v35 = vld [vmem:[%s6470_s17 + $0x22c] ss:$12 sps:$4 sm:$0xff]  }
  0x5a   : > { %5155 = vmatprep.mubr.msk.bf16.mxu0 %vm6383_vm0, %v6382_v3 }
  0x5b   : > { %1568 = vmatmul.mubr.bf16.gmra.mrb[8].mxu1 %v5665_v33  ;;  %v5745_v33 = vld [vmem:[%s6470_s17 + $0x210] ss:$12 sps:$4 sm:$0xff]  }
  0x5c   : > { %1575 = vmatprep.mubr.bf16.mxu1 %v5666_v34 }
  0x61   : > { %5156 = vmatmul.mubr.msk.bf16.gmra.mrb[36].mxu0 %vm1359_vm1, %v5692_v38  ;;  %v5768_v38 = vld [vmem:[%s6470_s17 + $0x2a8] ss:$12 sps:$4 sm:$0xff]  }
  0x62   : > { %5159 = vmatprep.mubr.msk.bf16.mxu0 %vm6383_vm0, %v6382_v3 }
  0x63   : > { %1576 = vmatmul.mubr.bf16.gmra.mrb[12].mxu1 %v5669_v36 }
  0x64   : > { %1583 = vmatprep.mubr.bf16.mxu1 %v5670_v37 }
  0x69   : > { %5160 = vmatmul.mubr.msk.bf16.gmra.mrb[40].mxu0 %vm1359_vm1, %v5696_v41 }
  0x6a   : > { %5163 = vmatprep.mubr.msk.bf16.mxu0 %vm6383_vm0, %v6382_v3 }
  0x6b   : > { %1584 = vmatmul.mubr.bf16.gmra.mrb[16].mxu1 %v5673_v39 }
  0x6c   : > { %1591 = vmatprep.mubr.bf16.mxu1 %v5674_v40  ;;  %v5749_v40 = vld [vmem:[%s6470_s17 + $0x228] ss:$12 sps:$4 sm:$0xff]  }
  0x71   : > { %5164 = vmatmul.mubr.msk.bf16.gmra.mrb[44].mxu0 %vm1359_vm1, %v5700_v44 }
  0x72   : > { %5167 = vmatprep.mubr.msk.bf16.mxu0 %vm6383_vm0, %v6382_v3 }
  0x73   : > { %1592 = vmatmul.mubr.bf16.gmra.mrb[20].mxu1 %v5677_v42  ;;  %v5750_v42 = vld [vmem:[%s6470_s17 + $0x244] ss:$12 sps:$4 sm:$0xff]  }
  0x74   : > { %1599 = vmatprep.mubr.bf16.mxu1 %v5678_v43 }
  0x79   : > { %5168 = vmatmul.mubr.msk.bf16.gmra.mrb[48].mxu0 %vm1359_vm1, %v5704_v47  ;;  %v5753_v47 = vld [vmem:[%s6470_s17 + $0x240] ss:$12 sps:$4 sm:$0xff]  }
  0x7a   : > { %5171 = vmatprep.mubr.msk.bf16.mxu0 %vm6383_vm0, %v6382_v3 }
  0x7b   : > { %1600 = vmatmul.mubr.bf16.gmra.mrb[24].mxu1 %v5681_v45  ;;  %v5772_v45 = vld [vmem:[%s6470_s17 + $0x2c0] ss:$12 sps:$4 sm:$0xff]  }
  0x7c   : > { %1607 = vmatprep.mubr.bf16.mxu1 %v5682_v46 }
  0x81   : > { %5172 = vmatmul.mubr.msk.bf16.gmra.mrb[52].mxu0 %vm1359_vm1, %v5708_v50 }
  0x82   : > { %5175 = vmatprep.mubr.msk.bf16.mxu0 %vm6383_vm0, %v6382_v3 }
  0x83   : > { %1608 = vmatmul.mubr.bf16.gmra.mrb[28].mxu1 %v5685_v48 }
  0x84   : > { %1615 = vmatprep.mubr.bf16.mxu1 %v5686_v49  ;;  %v5754_v49 = vld [vmem:[%s6470_s17 + $0x25c] ss:$12 sps:$4 sm:$0xff]  }
  0x89   : > { %5176 = vmatmul.mubr.msk.bf16.gmra.mrb[56].mxu0 %vm1359_vm1, %v5712_v53 }
  0x8a   : > { %5179 = vmatprep.mubr.msk.bf16.mxu0 %vm6383_vm0, %v6382_v3 }
  0x8b   : > { %1616 = vmatmul.mubr.bf16.gmra.mrb[32].mxu1 %v5689_v51 }
  0x8c   : > { %1623 = vmatprep.mubr.bf16.mxu1 %v5690_v52  ;;  %v5776_v52 = vld [vmem:[%s6470_s17 + $0x2d8] ss:$12 sps:$4 sm:$0xff]  }
  0x91   : > { %5180 = vmatmul.mubr.msk.bf16.gmra.mrb[60].mxu0 %vm1359_vm1, %v5716_v56  ;;  %v5758_v56 = vld [vmem:[%s6470_s17 + $0x274] ss:$12 sps:$4 sm:$0xff]  }
  0x92   : > { %5183 = vmatprep.mubr.msk.bf16.mxu0 %vm6383_vm0, %v6382_v3 }
  0x93   : > { %1624 = vmatmul.mubr.bf16.gmra.mrb[36].mxu1 %v5693_v54  ;;  %v5757_v54 = vld [vmem:[%s6470_s17 + $0x258] ss:$12 sps:$4 sm:$0xff]  }
  0x94   : > { %1631 = vmatprep.mubr.bf16.mxu1 %v5694_v55 }
  0x99   : > { %5184 = vmatmul.mubr.msk.bf16.gmra.mrb[64].mxu0 %vm1359_vm1, %v5720_v59  ;;  %v5780_v59 = vld [vmem:[%s6470_s17 + $0x2f0] ss:$12 sps:$4 sm:$0xff]  }
  0x9a   : > { %5187 = vmatprep.mubr.msk.bf16.mxu0 %vm6383_vm0, %v6382_v3 }
  0x9b   : > { %1632 = vmatmul.mubr.bf16.gmra.mrb[40].mxu1 %v5697_v57 }
  0x9c   : > { %1639 = vmatprep.mubr.bf16.mxu1 %v5698_v58 }
  0xa1   : > { %5188 = vmatmul.mubr.msk.bf16.gmra.mrb[68].mxu0 %vm1359_vm1, %v5724_v62 }
  0xa2   : > { %5191 = vmatprep.mubr.msk.bf16.mxu0 %vm6383_vm0, %v6382_v3 }
  0xa3   : > { %1640 = vmatmul.mubr.bf16.gmra.mrb[44].mxu1 %v5701_v60 }
  0xa4   : > { %1647 = vmatprep.mubr.bf16.mxu1 %v5702_v61  ;;  %v5761_v61 = vld [vmem:[%s6470_s17 + $0x270] ss:$12 sps:$4 sm:$0xff]  }
  0xa9   : > { %5192 = vmatmul.mubr.msk.bf16.gmra.mrb[72].mxu0 %vm1359_vm1, %v5728_v1 }
  0xaa   : > { %5195 = vmatprep.mubr.msk.bf16.mxu0 %vm6383_vm0, %v6382_v3 }
  0xab   : > { %1648 = vmatmul.mubr.bf16.gmra.mrb[48].mxu1 %v5705_v63  ;;  %v5762_v63 = vld [vmem:[%s6470_s17 + $0x28c] ss:$12 sps:$4 sm:$0xff]  }
  0xac   : > { %1655 = vmatprep.mubr.bf16.mxu1 %v5706_v0  ;;  %v6723_v0 = vld [vmem:[%s7939_s2] ss:$0 sm:$0xff] }
  0xb1   : > { %5196 = vmatmul.mubr.msk.bf16.gmra.mrb[76].mxu0 %vm1359_vm1, %v5732_v5 }
  0xb2   : > { %5199 = vmatprep.mubr.msk.bf16.mxu0 %vm6383_vm0, %v6382_v3 }
  0xb3   : > { %1656 = vmatmul.mubr.bf16.gmra.mrb[52].mxu1 %v5709_v2 }
  0xb4   : > { %1663 = vmatprep.mubr.bf16.mxu1 %v5710_v4  ;;  %v5784_v4 = vld [vmem:[%s6470_s17 + $0x308] ss:$12 sps:$4 sm:$0xff]  }
  0xb9   : > { %5200 = vmatmul.mubr.msk.bf16.gmra.mrb[80].mxu0 %vm1359_vm1, %v5736_v8 }
  0xba   : > { %5203 = vmatprep.mubr.msk.bf16.mxu0 %vm6383_vm0, %v6382_v3 }
  0xbb   : > { %1664 = vmatmul.mubr.bf16.gmra.mrb[56].mxu1 %v5713_v6 }
  0xbc   : > { %1671 = vmatprep.mubr.bf16.mxu1 %v5714_v7 }
  0xc1   : > { %5204 = vmatmul.mubr.msk.bf16.gmra.mrb[84].mxu0 %vm1359_vm1, %v5740_v11 }
  0xc2   : > { %5207 = vmatprep.mubr.msk.bf16.mxu0 %vm6383_vm0, %v6382_v3 }
  0xc3   : > { %1672 = vmatmul.mubr.bf16.gmra.mrb[60].mxu1 %v5717_v9  ;;  %v5765_v9 = vld [vmem:[%s6470_s17 + $0x288] ss:$12 sps:$4 sm:$0xff]  }
  0xc4   : > { %1679 = vmatprep.mubr.bf16.mxu1 %v5718_v10 }
  0xc9   : > { %5208 = vmatmul.mubr.msk.bf16.gmra.mrb[88].mxu0 %vm1359_vm1, %v5744_v14 }
  0xca   : > { %5211 = vmatprep.mubr.msk.bf16.mxu0 %vm6383_vm0, %v6382_v3 }
  0xcb   : > { %1680 = vmatmul.mubr.bf16.gmra.mrb[64].mxu1 %v5721_v12  ;;  %v5766_v12 = vld [vmem:[%s6470_s17 + $0x2a4] ss:$12 sps:$4 sm:$0xff]  }
  0xcc   : > { %1687 = vmatprep.mubr.bf16.mxu1 %v5722_v13 }
  0xd1   : > { %5212 = vmatmul.mubr.msk.bf16.gmra.mrb[92].mxu0 %vm1359_vm1, %v5748_v17 }
  0xd2   : > { %5215 = vmatprep.mubr.msk.bf16.mxu0 %vm6383_vm0, %v6382_v3 }
  0xd3   : > { %1688 = vmatmul.mubr.bf16.gmra.mrb[68].mxu1 %v5725_v15 }
  0xd4   : > { %1695 = vmatprep.mubr.bf16.mxu1 %v5726_v16 }
  0xd9   : > { %5216 = vmatmul.mubr.msk.bf16.gmra.mrb[96].mxu0 %vm1359_vm1, %v5752_v20 }
  0xda   : > { %5219 = vmatprep.mubr.msk.bf16.mxu0 %vm6383_vm0, %v6382_v3 }
  0xdb   : > { %1696 = vmatmul.mubr.bf16.gmra.mrb[72].mxu1 %v5729_v18 }
  0xdc   : > { %1703 = vmatprep.mubr.bf16.mxu1 %v5730_v19 }
  0xe1   : > { %5220 = vmatmul.mubr.msk.bf16.gmra.mrb[100].mxu0 %vm1359_vm1, %v5756_v23 }
  0xe2   : > { %5223 = vmatprep.mubr.msk.bf16.mxu0 %vm6383_vm0, %v6382_v3 }
  0xe3   : > { %1704 = vmatmul.mubr.bf16.gmra.mrb[76].mxu1 %v5733_v21  ;;  %v5788_v21 = vld [vmem:[%s6470_s17 + $0x320] ss:$12 sps:$4 sm:$0xff]  }
  0xe4   : > { %1711 = vmatprep.mubr.bf16.mxu1 %v5734_v22 }
  0xe9   : > { %5224 = vmatmul.mubr.msk.bf16.gmra.mrb[104].mxu0 %vm1359_vm1, %v5760_v26  ;;  %v5769_v26 = vld [vmem:[%s6470_s17 + $0x2a0] ss:$12 sps:$4 sm:$0xff]  }
  0xea   : > { %5227 = vmatprep.mubr.msk.bf16.mxu0 %vm6383_vm0, %v6382_v3 }
  0xeb   : > { %1712 = vmatmul.mubr.bf16.gmra.mrb[80].mxu1 %v5737_v24 }
  0xec   : > { %1719 = vmatprep.mubr.bf16.mxu1 %v5738_v25  ;;  %v6670_v29 = vpop.f32.mrb[0].mxu0 }
  0xed   : > { %v5121_v30 = vpop.f32.mrb[1].mxu0 }
  0xee   : > { %v6673_v32 = vpop.f32.mrb[2].mxu0 }
  0xef   : > { %v5122_v34 = vpop.f32.mrb[3].mxu0 }
  0xf1   : > { %5228 = vmatmul.mubr.msk.bf16.gmra.mrb[108].mxu0 %vm1359_vm1, %v5764_v31 }
  0xf2   : > { %5231 = vmatprep.mubr.msk.bf16.mxu0 %vm6383_vm0, %v6382_v3 }
  0xf3   : > { %1720 = vmatmul.mubr.bf16.gmra.mrb[84].mxu1 %v5741_v27 }
  0xf4   : > { %1727 = vmatprep.mubr.bf16.mxu1 %v5742_v28  ;;  %v6680_v36 = vpop.f32.mrb[4].mxu0 }
  0xf5   : > { %v5125_v37 = vpop.f32.mrb[5].mxu0 }
  0xf6   : > { %v6683_v39 = vpop.f32.mrb[6].mxu0 }
  0xf7   : > { %v5126_v41 = vpop.f32.mrb[7].mxu0 }
  0xf9   : > { %5232 = vmatmul.mubr.msk.bf16.gmra.mrb[112].mxu0 %vm1359_vm1, %v5768_v38  ;;  %v5792_v38 = vld [vmem:[%s6470_s17 + $0x338] ss:$12 sps:$4 sm:$0xff]  }
  0xfa   : > { %5235 = vmatprep.mubr.msk.bf16.mxu0 %vm6383_vm0, %v6382_v3 }
  0xfb   : > { %1728 = vmatmul.mubr.bf16.gmra.mrb[88].mxu1 %v5745_v33 }
  0xfc   : > { %1735 = vmatprep.mubr.bf16.mxu1 %v5746_v35  ;;  %v6690_v43 = vpop.f32.mrb[8].mxu0 }
  0xfd   : > { %v5129_v44 = vpop.f32.mrb[9].mxu0 }
  0xfe   : > { %v6693_v46 = vpop.f32.mrb[10].mxu0 }
  0xff   : > { %v5130_v48 = vpop.f32.mrb[11].mxu0 }
 0x101   : > { %5236 = vmatmul.mubr.msk.bf16.gmra.mrb[116].mxu0 %vm1359_vm1, %v5772_v45 }
 0x102   : > { %5239 = vmatprep.mubr.msk.bf16.mxu0 %vm6383_vm0, %v6382_v3 }
 0x103   : > { %1736 = vmatmul.mubr.bf16.gmra.mrb[92].mxu1 %v5749_v40 }
 0x104   : > { %1743 = vmatprep.mubr.bf16.mxu1 %v5750_v42  ;;  %v6700_v50 = vpop.f32.mrb[12].mxu0 }
 0x105   : > { %v5133_v51 = vpop.f32.mrb[13].mxu0 }
 0x106   : > { %v6703_v53 = vpop.f32.mrb[14].mxu0  ;;  %v5774_v51 = vld [vmem:[%s6470_s17 + $0x2d4] ss:$12 sps:$4 sm:$0xff]  }
 0x107   : > { %v5134_v55 = vpop.f32.mrb[15].mxu0 }
 0x109   : > { %5240 = vmatmul.mubr.msk.bf16.gmra.mrb[120].mxu0 %vm1359_vm1, %v5776_v52 }
 0x10a   : > { %5243 = vmatprep.mubr.msk.bf16.mxu0 %vm6383_vm0, %v6382_v3 }
 0x10b   : > { %1744 = vmatmul.mubr.bf16.gmra.mrb[96].mxu1 %v5753_v47 }
 0x10c   : > { %1751 = vmatprep.mubr.bf16.mxu1 %v5754_v49  ;;  %v6710_v57 = vpop.f32.mrb[16].mxu0 }
 0x10d   : > { %v5137_v58 = vpop.f32.mrb[17].mxu0 }
 0x10e   : > { %v6713_v60 = vpop.f32.mrb[18].mxu0 }
 0x10f   : > { %v5138_v62 = vpop.f32.mrb[19].mxu0 }
 0x111   : > { %5244 = vmatmul.mubr.msk.bf16.gmra.mrb[124].mxu0 %vm1359_vm1, %v5780_v59 }
 0x112   : > { %5247 = vmatprep.mubr.msk.bf16.mxu0 %vm6383_vm0, %v6382_v3 }
 0x113   : > { %1752 = vmatmul.mubr.bf16.gmra.mrb[100].mxu1 %v5757_v54 }
 0x114   : > { %1759 = vmatprep.mubr.bf16.mxu1 %v5758_v56  ;;  %v6725_v1 = vpop.f32.mrb[20].mxu0 }
 0x115   : > { %v5141_v2 = vpop.f32.mrb[21].mxu0 }
 0x116   : > { %v6728_v6 = vpop.f32.mrb[22].mxu0  ;;  %v5796_v2 = vld [vmem:[%s6470_s17 + $0x350] ss:$12 sps:$4 sm:$0xff]  }
 0x117   : > { %v5142_v10 = vpop.f32.mrb[23].mxu0 }
 0x119   : > { %5248 = vmatmul.mubr.msk.bf16.gmra.mrb[128].mxu0 %vm1359_vm1, %v5784_v4 }
 0x11a   : > { %5251 = vmatprep.mubr.msk.bf16.mxu0 %vm6383_vm0, %v6382_v3 }
 0x11b   : > { %1760 = vmatmul.mubr.bf16.gmra.mrb[104].mxu1 %v5761_v61 }
 0x11c   : > { %1767 = vmatprep.mubr.bf16.mxu1 %v5762_v63  ;;  %v6744_v18 = vpop.f32.mrb[24].mxu0 }
 0x11d   : > { %v5145_v20 = vpop.f32.mrb[25].mxu0 }
 0x11e   : > { %v1553_v5 = vpop.f32.mrb[0].mxu1  ;;  %v6748_v23 = vpop.f32.mrb[26].mxu0 }
 0x11f   : > { %v1554_v7 = vadd.f32 %v6723_v0, %v1553_v5  ;;  %v1555_v8 = vpop.f32.mrb[1].mxu1  ;;  %v5146_v27 = vpop.f32.mrb[27].mxu0 }
 0x120   : > { %v1556_v11 = vpop.f32.mrb[2].mxu1 }
 0x121   : > { %v6734_v13 = vadd.f32 %v6670_v29, %v1554_v7  ;;  %v1557_v14 = vadd.f32 %v6723_v0, %v1556_v11  ;;  %v1558_v15 = vpop.f32.mrb[3].mxu1  ;;  %v5770_v29 = vld [vmem:[%s6470_s17 + $0x2bc] ss:$12 sps:$4 sm:$0xff]   ;;  %5252 = vmatmul.mubr.msk.bf16.gmra.mrb[132].mxu0 %vm1359_vm1, %v5788_v21 }
 0x122   : > { %5255 = vmatprep.mubr.msk.bf16.mxu0 %vm6383_vm0, %v6382_v3 }
 0x123   : > { %v4407_v16 = vmul.f32 -1.442695, %v6734_v13  ;;  %v6742_v17 = vadd.f32 %v6673_v32, %v1557_v14  ;;  %1768 = vmatmul.mubr.bf16.gmra.mrb[108].mxu1 %v5765_v9  ;;  %v5777_v9 = vld [vmem:[%s6470_s17 + $0x2d0] ss:$12 sps:$4 sm:$0xff]   ;;  %v5778_v14 = vld [vmem:[%s6470_s17 + $0x2ec] ss:$12 sps:$4 sm:$0xff]  }
 0x124   : > { %1775 = vmatprep.mubr.bf16.mxu1 %v5766_v12  ;;  %v6764_v35 = vpop.f32.mrb[28].mxu0 }
 0x125   : > { %5866 = vpow2.f32 %v4407_v16  ;;  %v4408_v19 = vmul.f32 -1.442695, %v6742_v17  ;;  %v5149_v37 = vpop.f32.mrb[29].mxu0 }
 0x126   : > { %v1561_v22 = vpop.f32.mrb[4].mxu1  ;;  %v6768_v41 = vpop.f32.mrb[30].mxu0 }
 0x127   : > { %5868 = vpow2.f32 %v4408_v19  ;;  %v1562_v24 = vadd.f32 %v6723_v0, %v1561_v22  ;;  %v1563_v25 = vpop.f32.mrb[5].mxu1  ;;  %v5150_v47 = vpop.f32.mrb[31].mxu0 }
 0x128   : > { %v1564_v28 = vpop.f32.mrb[6].mxu1 }
 0x129   : > { %v6754_v30 = vadd.f32 %v6680_v36, %v1562_v24  ;;  %v1565_v31 = vadd.f32 %v6723_v0, %v1564_v28  ;;  %v1566_v32 = vpop.f32.mrb[7].mxu1  ;;  %5256 = vmatmul.mubr.msk.bf16.gmra.mrb[136].mxu0 %vm1359_vm1, %v5792_v38  ;;  %v5800_v28 = vld [vmem:[%s6470_s17 + $0x368] ss:$12 sps:$4 sm:$0xff]  }
 0x12a   : > { %5259 = vmatprep.mubr.msk.bf16.mxu0 %vm6383_vm0, %v6382_v3 }
 0x12b   : > { %v4409_v33 = vmul.f32 -1.442695, %v6754_v30  ;;  %v6762_v34 = vadd.f32 %v6683_v39, %v1565_v31  ;;  %1776 = vmatmul.mubr.bf16.gmra.mrb[112].mxu1 %v5769_v26  ;;  %v5773_v39 = vld [vmem:[%s6470_s17 + $0x2b8] ss:$12 sps:$4 sm:$0xff]  }
 0x12c   : > { %1783 = vmatprep.mubr.bf16.mxu1 %v5770_v29 }
 0x12d   : > { %5870 = vpow2.f32 %v4409_v33  ;;  %v4410_v36 = vmul.f32 -1.442695, %v6762_v34 }
 0x12e   : > { %v1569_v40 = vpop.f32.mrb[8].mxu1 }
 0x12f   : > { %v5867_v42 = vpop.eup %5866  ;;  %5872 = vpow2.f32 %v4410_v36  ;;  %v1570_v44 = vadd.f32 %v6723_v0, %v1569_v40  ;;  %v1571_v45 = vpop.f32.mrb[9].mxu1  ;;  %v5781_v40 = vld [vmem:[%s6470_s17 + $0x2e8] ss:$12 sps:$4 sm:$0xff]  }
 0x130   : > { %v2751_v48 = vadd.f32 1.0, %v5867_v42  ;;  %v1572_v49 = vpop.f32.mrb[10].mxu1 }
 0x131   : > { %v5869_v52 = vpop.eup %5868  ;;  %v6774_v54 = vadd.f32 %v6690_v43, %v1570_v44  ;;  %v1573_v55 = vadd.f32 %v6723_v0, %v1572_v49  ;;  %v1574_v56 = vpop.f32.mrb[11].mxu1  ;;  %5260 = vmatmul.mubr.msk.bf16.gmra.mrb[140].mxu0 %vm1359_vm1, %v5796_v2 }
 0x132   : > { %5874 = vrcp.f32 %v2751_v48  ;;  %v2752_v58 = vadd.f32 1.0, %v5869_v52  ;;  %v6784_v43 = vpop.f32.mrb[32].mxu0  ;;  %5263 = vmatprep.mubr.msk.bf16.mxu0 %vm6383_vm0, %v6382_v3 }
 0x133   : > { %v4411_v59 = vmul.f32 -1.442695, %v6774_v54  ;;  %v6782_v61 = vadd.f32 %v6693_v46, %v1573_v55  ;;  %1784 = vmatmul.mubr.bf16.gmra.mrb[116].mxu1 %v5773_v39  ;;  %v5153_v63 = vpop.f32.mrb[33].mxu0  ;;  %v5782_v39 = vld [vmem:[%s6470_s17 + $0x304] ss:$12 sps:$4 sm:$0xff]  }
 0x134   : > { %5876 = vrcp.f32 %v2752_v58  ;;  %1791 = vmatprep.mubr.bf16.mxu1 %v5774_v51  ;;  %v6788_v5 = vpop.f32.mrb[34].mxu0 }
 0x135   : > { %5878 = vpow2.f32 %v4411_v59  ;;  %v4412_v62 = vmul.f32 -1.442695, %v6782_v61  ;;  %v5154_v10 = vpop.f32.mrb[35].mxu0 }
 0x136   : > { %v1577_v4 = vpop.f32.mrb[12].mxu1  ;;  %v5785_v10 = vld [vmem:[%s6470_s17 + $0x300] ss:$12 sps:$4 sm:$0xff]  }
 0x137   : > { %v5871_v7 = vpop.eup %5870  ;;  %5880 = vpow2.f32 %v4412_v62  ;;  %v1578_v46 = vadd.f32 %v6723_v0, %v1577_v4  ;;  %v1579_v8 = vpop.f32.mrb[13].mxu1  ;;  %v5804_v62 = vld [vmem:[%s6470_s17 + $0x380] ss:$12 sps:$4 sm:$0xff]  }
 0x138   : > { %v2753_v11 = vadd.f32 1.0, %v5871_v7  ;;  %v1580_v12 = vpop.f32.mrb[14].mxu1 }
 0x139   : > { %v5873_v15 = vpop.eup %5872  ;;  %v6795_v16 = vadd.f32 %v6700_v50, %v1578_v46  ;;  %v1581_v19 = vadd.f32 %v6723_v0, %v1580_v12  ;;  %v1582_v20 = vpop.f32.mrb[15].mxu1  ;;  %5264 = vmatmul.mubr.msk.bf16.gmra.mrb[144].mxu0 %vm1359_vm1, %v5800_v28 }
 0x13a   : > { %5882 = vrcp.f32 %v2753_v11  ;;  %v2754_v21 = vadd.f32 1.0, %v5873_v15  ;;  %v6807_v50 = vpop.f32.mrb[36].mxu0  ;;  %5267 = vmatprep.mubr.msk.bf16.mxu0 %vm6383_vm0, %v6382_v3  ;;  %v5786_v15 = vld [vmem:[%s6470_s17 + $0x31c] ss:$12 sps:$4 sm:$0xff]  }
 0x13b   : > { %v4413_v22 = vmul.f32 -1.442695, %v6795_v16  ;;  %v6803_v24 = vadd.f32 %v6703_v53, %v1581_v19  ;;  %1792 = vmatmul.mubr.bf16.gmra.mrb[120].mxu1 %v5777_v9  ;;  %v5157_v27 = vpop.f32.mrb[37].mxu0 }
 0x13c   : > { %v5875_v25 = vpop.eup %5874  ;;  %5884 = vrcp.f32 %v2754_v21  ;;  %1799 = vmatprep.mubr.bf16.mxu1 %v5778_v14  ;;  %v6811_v32 = vpop.f32.mrb[38].mxu0 }
 0x13d   : > { %5886 = vpow2.f32 %v4413_v22  ;;  %v4414_v26 = vmul.f32 -1.442695, %v6803_v24  ;;  %v3069_v33 = vmul.f32 %v5875_v25, %v6734_v13  ;;  %v5158_v42 = vpop.f32.mrb[39].mxu0 }
 0x13e   : > { %v5877_v29 = vpop.eup %5876  ;;  %v1585_v31 = vpop.f32.mrb[16].mxu1 }
 0x13f   : > { %v5879_v53 = vpop.eup %5878  ;;  %v3070_v36 = vmul.f32 %v5877_v29, %v6742_v17  ;;  %5888 = vpow2.f32 %v4414_v26  ;;  %v1586_v37 = vadd.f32 %v6723_v0, %v1585_v31  ;;  %v1587_v38 = vpop.f32.mrb[17].mxu1  ;;  %v5808_v31 = vld [vmem:[%s6470_s17 + $0x398] ss:$12 sps:$4 sm:$0xff]  }
 0x140   : > { %v2755_v44 = vadd.f32 1.0, %v5879_v53  ;;  %v1588_v45 = vpop.f32.mrb[18].mxu1  ;;  %v6833_v56 = vpop.f32.mrb[40].mxu0 }
 0x141   : > { %v5881_v47 = vpop.eup %5880  ;;  %v4746_v48 = vpack.c.bf16 %v3070_v36, %v3069_v33  ;;  %v6819_v49 = vadd.f32 %v6710_v57, %v1586_v37  ;;  %v1589_v51 = vadd.f32 %v6723_v0, %v1588_v45  ;;  %v1590_v13 = vpop.f32.mrb[19].mxu1  ;;  %5268 = vmatmul.mubr.msk.bf16.gmra.mrb[148].mxu0 %vm1359_vm1, %v5804_v62 }
 0x142   : > { %5890 = vrcp.f32 %v2755_v44  ;;  %v2756_v17 = vadd.f32 1.0, %v5881_v47  ;;  %v5161_v59 = vpop.f32.mrb[41].mxu0  ;;  %5271 = vmatprep.mubr.msk.bf16.mxu0 %vm6383_vm0, %v6382_v3  ;;  %v5789_v44 = vld [vmem:[%s6470_s17 + $0x318] ss:$12 sps:$4 sm:$0xff]  }
 0x143   : > { %4747 = vst [vmem:[%s6826_s27] sm:$0xff] %v4746_v48   ;;  %v4415_v52 = vmul.f32 -1.442695, %v6819_v49  ;;  %v6831_v57 = vadd.f32 %v6713_v60, %v1589_v51  ;;  %1800 = vmatmul.mubr.bf16.gmra.mrb[124].mxu1 %v5781_v40  ;;  %v6837_v4 = vpop.f32.mrb[42].mxu0  ;;  %v5790_v48 = vld [vmem:[%s6470_s17 + $0x334] ss:$12 sps:$4 sm:$0xff]  }
 0x144   : > { %v5883_v55 = vpop.eup %5882  ;;  %5892 = vrcp.f32 %v2756_v17  ;;  %1807 = vmatprep.mubr.bf16.mxu1 %v5782_v39  ;;  %v5162_v11 = vpop.f32.mrb[43].mxu0 }
 0x145   : > { %5894 = vpow2.f32 %v4415_v52  ;;  %v4416_v58 = vmul.f32 -1.442695, %v6831_v57  ;;  %v3071_v60 = vmul.f32 %v5883_v55, %v6754_v30  ;;  %v6856_v27 = vpop.f32.mrb[44].mxu0 }
 0x146   : > { %v5885_v63 = vpop.eup %5884  ;;  %v1593_v2 = vpop.f32.mrb[20].mxu1 }
 0x147   : > { %v5887_v7 = vpop.eup %5886  ;;  %v3072_v46 = vmul.f32 %v5885_v63, %v6762_v34  ;;  %5896 = vpow2.f32 %v4416_v58  ;;  %v1594_v8 = vadd.f32 %v6723_v0, %v1593_v2  ;;  %v1595_v9 = vpop.f32.mrb[21].mxu1  ;;  %v5812_v2 = vld [vmem:[%s6470_s17 + $0x3b0] ss:$12 sps:$4 sm:$0xff]  }
 0x148   : > { %v2757_v12 = vadd.f32 1.0, %v5887_v7  ;;  %v1596_v14 = vpop.f32.mrb[22].mxu1  ;;  %v5165_v29 = vpop.f32.mrb[45].mxu0 }
 0x149   : > { %v5889_v19 = vpop.eup %5888  ;;  %v4751_v20 = vpack.c.bf16 %v3072_v46, %v3071_v60  ;;  %v6845_v21 = vadd.f32 %v6725_v1, %v1594_v8  ;;  %v1597_v22 = vadd.f32 %v6723_v0, %v1596_v14  ;;  %v1598_v30 = vpop.f32.mrb[23].mxu1  ;;  %5272 = vmatmul.mubr.msk.bf16.gmra.mrb[152].mxu0 %vm1359_vm1, %v5808_v31 }
 0x14a   : > { %5898 = vrcp.f32 %v2757_v12  ;;  %v2758_v34 = vadd.f32 1.0, %v5889_v19  ;;  %v6860_v36 = vpop.f32.mrb[46].mxu0  ;;  %5275 = vmatprep.mubr.msk.bf16.mxu0 %vm6383_vm0, %v6382_v3  ;;  %v5793_v12 = vld [vmem:[%s6470_s17 + $0x330] ss:$12 sps:$4 sm:$0xff]  }
 0x14b   : > { %5008 = vst [vmem:[%s6826_s27 + $0x8] sm:$0xff] %v4751_v20   ;;  %v4417_v25 = vmul.f32 -1.442695, %v6845_v21  ;;  %v6854_v26 = vadd.f32 %v6728_v6, %v1597_v22  ;;  %1808 = vmatmul.mubr.bf16.gmra.mrb[128].mxu1 %v5785_v10  ;;  %v5166_v45 = vpop.f32.mrb[47].mxu0  ;;  %v5794_v20 = vld [vmem:[%s6470_s17 + $0x34c] ss:$12 sps:$4 sm:$0xff]  }
 0x14c   : > { %v5891_v1 = vpop.eup %5890  ;;  %5900 = vrcp.f32 %v2758_v34  ;;  %1815 = vmatprep.mubr.bf16.mxu1 %v5786_v15  ;;  %v6879_v59 = vpop.f32.mrb[48].mxu0 }
 0x14d   : > { %5902 = vpow2.f32 %v4417_v25  ;;  %v4418_v28 = vmul.f32 -1.442695, %v6854_v26  ;;  %v3073_v6 = vmul.f32 %v5891_v1, %v6774_v54  ;;  %v5169_v63 = vpop.f32.mrb[49].mxu0 }
 0x14e   : > { %v5893_v53 = vpop.eup %5892  ;;  %v1601_v33 = vpop.f32.mrb[24].mxu1 }
 0x14f   : > { %v5895_v37 = vpop.eup %5894  ;;  %v3074_v38 = vmul.f32 %v5893_v53, %v6782_v61  ;;  %5904 = vpow2.f32 %v4418_v28  ;;  %v1602_v40 = vadd.f32 %v6723_v0, %v1601_v33  ;;  %v1603_v42 = vpop.f32.mrb[25].mxu1  ;;  %v5816_v33 = vld [vmem:[%s6470_s17 + $0x3c8] ss:$12 sps:$4 sm:$0xff]  }
 0x150   : > { %v2759_v39 = vadd.f32 1.0, %v5895_v37  ;;  %v1604_v47 = vpop.f32.mrb[26].mxu1  ;;  %v6883_v46 = vpop.f32.mrb[50].mxu0 }
 0x151   : > { %v5897_v51 = vpop.eup %5896  ;;  %v4756_v13 = vpack.c.bf16 %v3074_v38, %v3073_v6  ;;  %v6868_v17 = vadd.f32 %v6744_v18, %v1602_v40  ;;  %v1605_v52 = vadd.f32 %v6723_v0, %v1604_v47  ;;  %v1606_v54 = vpop.f32.mrb[27].mxu1  ;;  %5276 = vmatmul.mubr.msk.bf16.gmra.mrb[156].mxu0 %vm1359_vm1, %v5812_v2 }
 0x152   : > { %5906 = vrcp.f32 %v2759_v39  ;;  %v2760_v61 = vadd.f32 1.0, %v5897_v51  ;;  %v5170_v14 = vpop.f32.mrb[51].mxu0  ;;  %5279 = vmatprep.mubr.msk.bf16.mxu0 %vm6383_vm0, %v6382_v3  ;;  %v5797_v39 = vld [vmem:[%s6470_s17 + $0x348] ss:$12 sps:$4 sm:$0xff]  }
 0x153   : > { %5009 = vst [vmem:[%s6826_s27 + $0x10] sm:$0xff] %v4756_v13   ;;  %v4419_v55 = vmul.f32 -1.442695, %v6868_v17  ;;  %v6877_v58 = vadd.f32 %v6748_v23, %v1605_v52  ;;  %1816 = vmatmul.mubr.bf16.gmra.mrb[132].mxu1 %v5789_v44  ;;  %v5798_v13 = vld [vmem:[%s6470_s17 + $0x364] ss:$12 sps:$4 sm:$0xff]  }
 0x154   : > { %v5899_v18 = vpop.eup %5898  ;;  %5908 = vrcp.f32 %v2760_v61  ;;  %1823 = vmatprep.mubr.bf16.mxu1 %v5790_v48  ;;  %v6902_v29 = vpop.f32.mrb[52].mxu0 }
 0x155   : > { %5910 = vpow2.f32 %v4419_v55  ;;  %v4420_v62 = vmul.f32 -1.442695, %v6877_v58  ;;  %v3075_v23 = vmul.f32 %v5899_v18, %v6795_v16  ;;  %v5173_v53 = vpop.f32.mrb[53].mxu0 }
 0x156   : > { %v5901_v7 = vpop.eup %5900  ;;  %v1609_v60 = vpop.f32.mrb[28].mxu1 }
 0x157   : > { %v5903_v8 = vpop.eup %5902  ;;  %v3076_v9 = vmul.f32 %v5901_v7, %v6803_v24  ;;  %5912 = vpow2.f32 %v4420_v62  ;;  %v1610_v10 = vadd.f32 %v6723_v0, %v1609_v60  ;;  %v1611_v11 = vpop.f32.mrb[29].mxu1  ;;  %v5820_v60 = vld [vmem:[%s6470_s17 + $0x3e0] ss:$12 sps:$4 sm:$0xff]  }
 0x158   : > { %v2761_v15 = vadd.f32 1.0, %v5903_v8  ;;  %v1612_v19 = vpop.f32.mrb[30].mxu1  ;;  %v6906_v38 = vpop.f32.mrb[54].mxu0 }
 0x159   : > { %v5905_v22 = vpop.eup %5904  ;;  %v4761_v30 = vpack.c.bf16 %v3076_v9, %v3075_v23  ;;  %v6891_v34 = vadd.f32 %v6764_v35, %v1610_v10  ;;  %v1613_v25 = vadd.f32 %v6723_v0, %v1612_v19  ;;  %v1614_v16 = vpop.f32.mrb[31].mxu1  ;;  %5280 = vmatmul.mubr.msk.bf16.gmra.mrb[160].mxu0 %vm1359_vm1, %v5816_v33 }
 0x15a   : > { %5914 = vrcp.f32 %v2761_v15  ;;  %v2762_v24 = vadd.f32 1.0, %v5905_v22  ;;  %v5174_v47 = vpop.f32.mrb[55].mxu0  ;;  %5283 = vmatprep.mubr.msk.bf16.mxu0 %vm6383_vm0, %v6382_v3  ;;  %v5801_v15 = vld [vmem:[%s6470_s17 + $0x360] ss:$12 sps:$4 sm:$0xff]  }
 0x15b   : > { %5010 = vst [vmem:[%s6826_s27 + $0x18] sm:$0xff] %v4761_v30   ;;  %v4421_v1 = vmul.f32 -1.442695, %v6891_v34  ;;  %v6900_v28 = vadd.f32 %v6768_v41, %v1613_v25  ;;  %1824 = vmatmul.mubr.bf16.gmra.mrb[136].mxu1 %v5793_v12  ;;  %v5802_v30 = vld [vmem:[%s6470_s17 + $0x37c] ss:$12 sps:$4 sm:$0xff]  }
 0x15c   : > { %v5907_v35 = vpop.eup %5906  ;;  %5916 = vrcp.f32 %v2762_v24  ;;  %1831 = vmatprep.mubr.bf16.mxu1 %v5794_v20  ;;  %v6925_v63 = vpop.f32.mrb[56].mxu0 }
 0x15d   : > { %5918 = vpow2.f32 %v4421_v1  ;;  %v4422_v31 = vmul.f32 -1.442695, %v6900_v28  ;;  %v3077_v41 = vmul.f32 %v5907_v35, %v6819_v49  ;;  %v5177_v7 = vpop.f32.mrb[57].mxu0 }
 0x15e   : > { %v5909_v37 = vpop.eup %5908  ;;  %v1617_v6 = vpop.f32.mrb[32].mxu1 }
 0x15f   : > { %v5911_v40 = vpop.eup %5910  ;;  %v3078_v42 = vmul.f32 %v5909_v37, %v6831_v57  ;;  %5920 = vpow2.f32 %v4422_v31  ;;  %v1618_v44 = vadd.f32 %v6723_v0, %v1617_v6  ;;  %v1619_v45 = vpop.f32.mrb[33].mxu1  ;;  %v5824_v6 = vld [vmem:[%s6470_s17 + $0x3f8] ss:$12 sps:$4 sm:$0xff]  }
 0x160   : > { %v2763_v48 = vadd.f32 1.0, %v5911_v40  ;;  %v1620_v51 = vpop.f32.mrb[34].mxu1  ;;  %v6929_v9 = vpop.f32.mrb[58].mxu0 }
 0x161   : > { %v5913_v52 = vpop.eup %5912  ;;  %v4766_v54 = vpack.c.bf16 %v3078_v42, %v3077_v41  ;;  %v6914_v61 = vadd.f32 %v6784_v43, %v1618_v44  ;;  %v1621_v55 = vadd.f32 %v6723_v0, %v1620_v51  ;;  %v1622_v49 = vpop.f32.mrb[35].mxu1  ;;  %5284 = vmatmul.mubr.msk.bf16.gmra.mrb[164].mxu0 %vm1359_vm1, %v5820_v60 }
 0x162   : > { %5922 = vrcp.f32 %v2763_v48  ;;  %v2764_v57 = vadd.f32 1.0, %v5913_v52  ;;  %v5178_v19 = vpop.f32.mrb[59].mxu0  ;;  %5287 = vmatprep.mubr.msk.bf16.mxu0 %vm6383_vm0, %v6382_v3  ;;  %v5805_v48 = vld [vmem:[%s6470_s17 + $0x378] ss:$12 sps:$4 sm:$0xff]  }
 0x163   : > { %5011 = vst [vmem:[%s6826_s27 + $0x20] sm:$0xff] %v4766_v54   ;;  %v4423_v18 = vmul.f32 -1.442695, %v6914_v61  ;;  %v6923_v62 = vadd.f32 %v6788_v5, %v1621_v55  ;;  %1832 = vmatmul.mubr.bf16.gmra.mrb[140].mxu1 %v5797_v39  ;;  %v5806_v54 = vld [vmem:[%s6470_s17 + $0x394] ss:$12 sps:$4 sm:$0xff]  }
 0x164   : > { %v5915_v43 = vpop.eup %5914  ;;  %5924 = vrcp.f32 %v2764_v57  ;;  %1839 = vmatprep.mubr.bf16.mxu1 %v5798_v13  ;;  %v6948_v53 = vpop.f32.mrb[60].mxu0 }
 0x165   : > { %5926 = vpow2.f32 %v4423_v18  ;;  %v4424_v2 = vmul.f32 -1.442695, %v6923_v62  ;;  %v3079_v5 = vmul.f32 %v5915_v43, %v6845_v21  ;;  %v5181_v37 = vpop.f32.mrb[61].mxu0 }
 0x166   : > { %v5917_v8 = vpop.eup %5916  ;;  %v1625_v23 = vpop.f32.mrb[36].mxu1 }
 0x167   : > { %v5919_v10 = vpop.eup %5918  ;;  %v3080_v11 = vmul.f32 %v5917_v8, %v6854_v26  ;;  %5928 = vpow2.f32 %v4424_v2  ;;  %v1626_v12 = vadd.f32 %v6723_v0, %v1625_v23  ;;  %v1627_v14 = vpop.f32.mrb[37].mxu1  ;;  %v5828_v23 = vld [vmem:[%s6470_s17 + $0x410] ss:$12 sps:$4 sm:$0xff]  }
 0x168   : > { %v2765_v20 = vadd.f32 1.0, %v5919_v10  ;;  %v1628_v22 = vpop.f32.mrb[38].mxu1  ;;  %v6952_v42 = vpop.f32.mrb[62].mxu0 }
 0x169   : > { %v5921_v25 = vpop.eup %5920  ;;  %v4771_v16 = vpack.c.bf16 %v3080_v11, %v3079_v5  ;;  %v6937_v24 = vadd.f32 %v6807_v50, %v1626_v12  ;;  %v1629_v1 = vadd.f32 %v6723_v0, %v1628_v22  ;;  %v1630_v21 = vpop.f32.mrb[39].mxu1  ;;  %5288 = vmatmul.mubr.msk.bf16.gmra.mrb[168].mxu0 %vm1359_vm1, %v5824_v6 }
 0x16a   : > { %5930 = vrcp.f32 %v2765_v20  ;;  %v2766_v26 = vadd.f32 1.0, %v5921_v25  ;;  %v5182_v51 = vpop.f32.mrb[63].mxu0  ;;  %5291 = vmatprep.mubr.msk.bf16.mxu0 %vm6383_vm0, %v6382_v3  ;;  %v5809_v20 = vld [vmem:[%s6470_s17 + $0x390] ss:$12 sps:$4 sm:$0xff]  }
 0x16b   : > { %5012 = vst [vmem:[%s6826_s27 + $0x28] sm:$0xff] %v4771_v16   ;;  %v4425_v35 = vmul.f32 -1.442695, %v6937_v24  ;;  %v6946_v31 = vadd.f32 %v6811_v32, %v1629_v1  ;;  %1840 = vmatmul.mubr.bf16.gmra.mrb[144].mxu1 %v5801_v15  ;;  %v5810_v16 = vld [vmem:[%s6470_s17 + $0x3ac] ss:$12 sps:$4 sm:$0xff]  }
 0x16c   : > { %v5923_v50 = vpop.eup %5922  ;;  %5932 = vrcp.f32 %v2766_v26  ;;  %1847 = vmatprep.mubr.bf16.mxu1 %v5802_v30  ;;  %v6971_v7 = vpop.f32.mrb[64].mxu0 }
 0x16d   : > { %5934 = vpow2.f32 %v4425_v35  ;;  %v4426_v33 = vmul.f32 -1.442695, %v6946_v31  ;;  %v3081_v32 = vmul.f32 %v5923_v50, %v6868_v17  ;;  %v5185_v8 = vpop.f32.mrb[65].mxu0 }
 0x16e   : > { %v5925_v40 = vpop.eup %5924  ;;  %v1633_v41 = vpop.f32.mrb[40].mxu1 }
 0x16f   : > { %v5927_v44 = vpop.eup %5926  ;;  %v3082_v45 = vmul.f32 %v5925_v40, %v6877_v58  ;;  %5936 = vpow2.f32 %v4426_v33  ;;  %v1634_v39 = vadd.f32 %v6723_v0, %v1633_v41  ;;  %v1635_v47 = vpop.f32.mrb[41].mxu1  ;;  %v5832_v41 = vld [vmem:[%s6470_s17 + $0x428] ss:$12 sps:$4 sm:$0xff]  }
 0x170   : > { %v2767_v13 = vadd.f32 1.0, %v5927_v44  ;;  %v1636_v52 = vpop.f32.mrb[42].mxu1  ;;  %v6975_v11 = vpop.f32.mrb[66].mxu0 }
 0x171   : > { %v5929_v55 = vpop.eup %5928  ;;  %v4776_v49 = vpack.c.bf16 %v3082_v45, %v3081_v32  ;;  %v6960_v57 = vadd.f32 %v6833_v56, %v1634_v39  ;;  %v1637_v18 = vadd.f32 %v6723_v0, %v1636_v52  ;;  %v1638_v17 = vpop.f32.mrb[43].mxu1  ;;  %5292 = vmatmul.mubr.msk.bf16.gmra.mrb[172].mxu0 %vm1359_vm1, %v5828_v23 }
 0x172   : > { %5938 = vrcp.f32 %v2767_v13  ;;  %v2768_v58 = vadd.f32 1.0, %v5929_v55  ;;  %v5186_v22 = vpop.f32.mrb[67].mxu0  ;;  %5295 = vmatprep.mubr.msk.bf16.mxu0 %vm6383_vm0, %v6382_v3  ;;  %v5813_v13 = vld [vmem:[%s6470_s17 + $0x3a8] ss:$12 sps:$4 sm:$0xff]  }
 0x173   : > { %5013 = vst [vmem:[%s6826_s27 + $0x30] sm:$0xff] %v4776_v49   ;;  %v4427_v43 = vmul.f32 -1.442695, %v6960_v57  ;;  %v6969_v2 = vadd.f32 %v6837_v4, %v1637_v18  ;;  %1848 = vmatmul.mubr.bf16.gmra.mrb[148].mxu1 %v5805_v48  ;;  %v5814_v49 = vld [vmem:[%s6470_s17 + $0x3c4] ss:$12 sps:$4 sm:$0xff]  }
 0x174   : > { %v5931_v56 = vpop.eup %5930  ;;  %5940 = vrcp.f32 %v2768_v58  ;;  %1855 = vmatprep.mubr.bf16.mxu1 %v5806_v54  ;;  %v6994_v37 = vpop.f32.mrb[68].mxu0 }
 0x175   : > { %5942 = vpow2.f32 %v4427_v43  ;;  %v4428_v60 = vmul.f32 -1.442695, %v6969_v2  ;;  %v3083_v4 = vmul.f32 %v5931_v56, %v6891_v34  ;;  %v5189_v40 = vpop.f32.mrb[69].mxu0 }
 0x176   : > { %v5933_v10 = vpop.eup %5932  ;;  %v1641_v5 = vpop.f32.mrb[44].mxu1 }
 0x177   : > { %v5935_v12 = vpop.eup %5934  ;;  %v3084_v14 = vmul.f32 %v5933_v10, %v6900_v28  ;;  %5944 = vpow2.f32 %v4428_v60  ;;  %v1642_v15 = vadd.f32 %v6723_v0, %v1641_v5  ;;  %v1643_v19 = vpop.f32.mrb[45].mxu1  ;;  %v5836_v5 = vld [vmem:[%s6470_s17 + $0x440] ss:$12 sps:$4 sm:$0xff]  }
 0x178   : > { %v2769_v30 = vadd.f32 1.0, %v5935_v12  ;;  %v1644_v25 = vpop.f32.mrb[46].mxu1  ;;  %v6998_v45 = vpop.f32.mrb[70].mxu0 }
 0x179   : > { %v5937_v1 = vpop.eup %5936  ;;  %v4781_v21 = vpack.c.bf16 %v3084_v14, %v3083_v4  ;;  %v6983_v26 = vadd.f32 %v6856_v27, %v1642_v15  ;;  %v1645_v35 = vadd.f32 %v6723_v0, %v1644_v25  ;;  %v1646_v34 = vpop.f32.mrb[47].mxu1  ;;  %5296 = vmatmul.mubr.msk.bf16.gmra.mrb[176].mxu0 %vm1359_vm1, %v5832_v41 }
 0x17a   : > { %5946 = vrcp.f32 %v2769_v30  ;;  %v2770_v28 = vadd.f32 1.0, %v5937_v1  ;;  %v5190_v52 = vpop.f32.mrb[71].mxu0  ;;  %5299 = vmatprep.mubr.msk.bf16.mxu0 %vm6383_vm0, %v6382_v3  ;;  %v5817_v30 = vld [vmem:[%s6470_s17 + $0x3c0] ss:$12 sps:$4 sm:$0xff]  }
 0x17b   : > { %5014 = vst [vmem:[%s6826_s27 + $0x38] sm:$0xff] %v4781_v21   ;;  %v4429_v50 = vmul.f32 -1.442695, %v6983_v26  ;;  %v6992_v33 = vadd.f32 %v6860_v36, %v1645_v35  ;;  %1856 = vmatmul.mubr.bf16.gmra.mrb[152].mxu1 %v5809_v20  ;;  %v5818_v21 = vld [vmem:[%s6470_s17 + $0x3dc] ss:$12 sps:$4 sm:$0xff]  }
 0x17c   : > { %v5939_v27 = vpop.eup %5938  ;;  %5948 = vrcp.f32 %v2770_v28  ;;  %1863 = vmatprep.mubr.bf16.mxu1 %v5810_v16  ;;  %v7017_v8 = vpop.f32.mrb[72].mxu0 }
 0x17d   : > { %5950 = vpow2.f32 %v4429_v50  ;;  %v4430_v6 = vmul.f32 -1.442695, %v6992_v33  ;;  %v3085_v36 = vmul.f32 %v5939_v27, %v6914_v61  ;;  %v5193_v10 = vpop.f32.mrb[73].mxu0 }
 0x17e   : > { %v5941_v44 = vpop.eup %5940  ;;  %v1649_v32 = vpop.f32.mrb[48].mxu1 }
 0x17f   : > { %v5943_v39 = vpop.eup %5942  ;;  %v3086_v47 = vmul.f32 %v5941_v44, %v6923_v62  ;;  %5952 = vpow2.f32 %v4430_v6  ;;  %v1650_v48 = vadd.f32 %v6723_v0, %v1649_v32  ;;  %v1651_v51 = vpop.f32.mrb[49].mxu1  ;;  %v5840_v32 = vld [vmem:[%s6470_s17 + $0x458] ss:$12 sps:$4 sm:$0xff]  }
 0x180   : > { %v2771_v54 = vadd.f32 1.0, %v5943_v39  ;;  %v1652_v55 = vpop.f32.mrb[50].mxu1  ;;  %v7021_v14 = vpop.f32.mrb[74].mxu0 }
 0x181   : > { %v5945_v18 = vpop.eup %5944  ;;  %v4786_v17 = vpack.c.bf16 %v3086_v47, %v3085_v36  ;;  %v7006_v58 = vadd.f32 %v6879_v59, %v1650_v48  ;;  %v1653_v43 = vadd.f32 %v6723_v0, %v1652_v55  ;;  %v1654_v61 = vpop.f32.mrb[51].mxu1  ;;  %5300 = vmatmul.mubr.msk.bf16.gmra.mrb[180].mxu0 %vm1359_vm1, %v5836_v5 }
 0x182   : > { %5954 = vrcp.f32 %v2771_v54  ;;  %v2772_v62 = vadd.f32 1.0, %v5945_v18  ;;  %v5194_v25 = vpop.f32.mrb[75].mxu0  ;;  %5303 = vmatprep.mubr.msk.bf16.mxu0 %vm6383_vm0, %v6382_v3  ;;  %v5821_v54 = vld [vmem:[%s6470_s17 + $0x3d8] ss:$12 sps:$4 sm:$0xff]  }
 0x183   : > { %5015 = vst [vmem:[%s6826_s27 + $0x40] sm:$0xff] %v4786_v17   ;;  %v4431_v56 = vmul.f32 -1.442695, %v7006_v58  ;;  %v7015_v60 = vadd.f32 %v6883_v46, %v1653_v43  ;;  %1864 = vmatmul.mubr.bf16.gmra.mrb[156].mxu1 %v5813_v13  ;;  %v5822_v17 = vld [vmem:[%s6470_s17 + $0x3f4] ss:$12 sps:$4 sm:$0xff]  }
 0x184   : > { %v5947_v59 = vpop.eup %5946  ;;  %5956 = vrcp.f32 %v2772_v62  ;;  %1871 = vmatprep.mubr.bf16.mxu1 %v5814_v49  ;;  %v7040_v40 = vpop.f32.mrb[76].mxu0 }
 0x185   : > { %5958 = vpow2.f32 %v4431_v56  ;;  %v4432_v23 = vmul.f32 -1.442695, %v7015_v60  ;;  %v3087_v46 = vmul.f32 %v5947_v59, %v6937_v24  ;;  %v5197_v44 = vpop.f32.mrb[77].mxu0 }
 0x186   : > { %v5949_v12 = vpop.eup %5948  ;;  %v1657_v4 = vpop.f32.mrb[52].mxu1 }
 0x187   : > { %v5951_v15 = vpop.eup %5950  ;;  %v3088_v19 = vmul.f32 %v5949_v12, %v6946_v31  ;;  %5960 = vpow2.f32 %v4432_v23  ;;  %v1658_v20 = vadd.f32 %v6723_v0, %v1657_v4  ;;  %v1659_v22 = vpop.f32.mrb[53].mxu1  ;;  %v5844_v4 = vld [vmem:[%s6470_s17 + $0x470] ss:$12 sps:$4 sm:$0xff]  }
 0x188   : > { %v2773_v16 = vadd.f32 1.0, %v5951_v15  ;;  %v1660_v1 = vpop.f32.mrb[54].mxu1  ;;  %v7044_v47 = vpop.f32.mrb[78].mxu0 }
 0x189   : > { %v5953_v35 = vpop.eup %5952  ;;  %v4791_v34 = vpack.c.bf16 %v3088_v19, %v3087_v46  ;;  %v7029_v28 = vadd.f32 %v6902_v29, %v1658_v20  ;;  %v1661_v50 = vadd.f32 %v6723_v0, %v1660_v1  ;;  %v1662_v24 = vpop.f32.mrb[55].mxu1  ;;  %5304 = vmatmul.mubr.msk.bf16.gmra.mrb[184].mxu0 %vm1359_vm1, %v5840_v32 }
 0x18a   : > { %5962 = vrcp.f32 %v2773_v16  ;;  %v2774_v31 = vadd.f32 1.0, %v5953_v35  ;;  %v5198_v55 = vpop.f32.mrb[79].mxu0  ;;  %5307 = vmatprep.mubr.msk.bf16.mxu0 %vm6383_vm0, %v6382_v3  ;;  %v5825_v16 = vld [vmem:[%s6470_s17 + $0x3f0] ss:$12 sps:$4 sm:$0xff]  }
 0x18b   : > { %5016 = vst [vmem:[%s6826_s27 + $0x48] sm:$0xff] %v4791_v34   ;;  %v4433_v27 = vmul.f32 -1.442695, %v7029_v28  ;;  %v7038_v6 = vadd.f32 %v6906_v38, %v1661_v50  ;;  %1872 = vmatmul.mubr.bf16.gmra.mrb[160].mxu1 %v5817_v30  ;;  %v5826_v34 = vld [vmem:[%s6470_s17 + $0x40c] ss:$12 sps:$4 sm:$0xff]  }
 0x18c   : > { %v5955_v29 = vpop.eup %5954  ;;  %5964 = vrcp.f32 %v2774_v31  ;;  %1879 = vmatprep.mubr.bf16.mxu1 %v5818_v21  ;;  %v7063_v10 = vpop.f32.mrb[80].mxu0 }
 0x18d   : > { %5966 = vpow2.f32 %v4433_v27  ;;  %v4434_v41 = vmul.f32 -1.442695, %v7038_v6  ;;  %v3089_v38 = vmul.f32 %v5955_v29, %v6960_v57  ;;  %v5201_v12 = vpop.f32.mrb[81].mxu0 }
 0x18e   : > { %v5957_v39 = vpop.eup %5956  ;;  %v1665_v36 = vpop.f32.mrb[56].mxu1 }
 0x18f   : > { %v5959_v48 = vpop.eup %5958  ;;  %v3090_v51 = vmul.f32 %v5957_v39, %v6969_v2  ;;  %5968 = vpow2.f32 %v4434_v41  ;;  %v1666_v13 = vadd.f32 %v6723_v0, %v1665_v36  ;;  %v1667_v52 = vpop.f32.mrb[57].mxu1  ;;  %v5848_v36 = vld [vmem:[%s6470_s17 + $0x488] ss:$12 sps:$4 sm:$0xff]  }
 0x190   : > { %v2775_v49 = vadd.f32 1.0, %v5959_v48  ;;  %v1668_v18 = vpop.f32.mrb[58].mxu1  ;;  %v7067_v19 = vpop.f32.mrb[82].mxu0 }
 0x191   : > { %v5961_v43 = vpop.eup %5960  ;;  %v4796_v61 = vpack.c.bf16 %v3090_v51, %v3089_v38  ;;  %v7052_v62 = vadd.f32 %v6925_v63, %v1666_v13  ;;  %v1669_v56 = vadd.f32 %v6723_v0, %v1668_v18  ;;  %v1670_v57 = vpop.f32.mrb[59].mxu1  ;;  %5308 = vmatmul.mubr.msk.bf16.gmra.mrb[188].mxu0 %vm1359_vm1, %v5844_v4 }
 0x192   : > { %5970 = vrcp.f32 %v2775_v49  ;;  %v2776_v2 = vadd.f32 1.0, %v5961_v43  ;;  %v5202_v1 = vpop.f32.mrb[83].mxu0  ;;  %5311 = vmatprep.mubr.msk.bf16.mxu0 %vm6383_vm0, %v6382_v3  ;;  %v5829_v49 = vld [vmem:[%s6470_s17 + $0x408] ss:$12 sps:$4 sm:$0xff]  }
 0x193   : > { %5017 = vst [vmem:[%s6826_s27 + $0x50] sm:$0xff] %v4796_v61   ;;  %v4435_v59 = vmul.f32 -1.442695, %v7052_v62  ;;  %v7061_v23 = vadd.f32 %v6929_v9, %v1669_v56  ;;  %1880 = vmatmul.mubr.bf16.gmra.mrb[164].mxu1 %v5821_v54  ;;  %v5830_v61 = vld [vmem:[%s6470_s17 + $0x424] ss:$12 sps:$4 sm:$0xff]  }
 0x194   : > { %v5963_v63 = vpop.eup %5962  ;;  %5972 = vrcp.f32 %v2776_v2  ;;  %1887 = vmatprep.mubr.bf16.mxu1 %v5822_v17  ;;  %v7091_v44 = vpop.f32.mrb[84].mxu0 }
 0x195   : > { %5974 = vpow2.f32 %v4435_v59  ;;  %v4436_v5 = vmul.f32 -1.442695, %v7061_v23  ;;  %v3091_v9 = vmul.f32 %v5963_v63, %v6983_v26  ;;  %v7080_v26 = vld [vmem:[%s7939_s2] ss:$0 sm:$0xff]  ;;  %v5205_v39 = vpop.f32.mrb[85].mxu0 }
 0x196   : > { %v5965_v15 = vpop.eup %5964  ;;  %v1673_v46 = vpop.f32.mrb[60].mxu1 }
 0x197   : > { %v5967_v20 = vpop.eup %5966  ;;  %v3092_v22 = vmul.f32 %v5965_v15, %v6992_v33  ;;  %5976 = vpow2.f32 %v4436_v5  ;;  %v1674_v30 = vadd.f32 %v6723_v0, %v1673_v46  ;;  %v1675_v25 = vpop.f32.mrb[61].mxu1  ;;  %v5852_v46 = vld [vmem:[%s6470_s17 + $0x4a0] ss:$12 sps:$4 sm:$0xff]  }
 0x198   : > { %v2777_v21 = vadd.f32 1.0, %v5967_v20  ;;  %v1676_v35 = vpop.f32.mrb[62].mxu1  ;;  %v7095_v51 = vpop.f32.mrb[86].mxu0 }
 0x199   : > { %v5969_v50 = vpop.eup %5968  ;;  %v4801_v24 = vpack.c.bf16 %v3092_v22, %v3091_v9  ;;  %v7075_v31 = vadd.f32 %v6948_v53, %v1674_v30  ;;  %v1677_v33 = vadd.f32 %v7080_v26, %v1676_v35  ;;  %v1678_v0 = vpop.f32.mrb[63].mxu1  ;;  %5312 = vmatmul.mubr.msk.bf16.gmra.mrb[192].mxu0 %vm1359_vm1, %v5848_v36 }
 0x19a   : > { %5978 = vrcp.f32 %v2777_v21  ;;  %v2778_v27 = vadd.f32 1.0, %v5969_v50  ;;  %v5206_v18 = vpop.f32.mrb[87].mxu0  ;;  %5315 = vmatprep.mubr.msk.bf16.mxu0 %vm6383_vm0, %v6382_v3  ;;  %v5833_v21 = vld [vmem:[%s6470_s17 + $0x420] ss:$12 sps:$4 sm:$0xff]  }
 0x19b   : > { %5018 = vst [vmem:[%s6826_s27 + $0x58] sm:$0xff] %v4801_v24   ;;  %v4437_v53 = vmul.f32 -1.442695, %v7075_v31  ;;  %v7089_v29 = vadd.f32 %v6952_v42, %v1677_v33  ;;  %1888 = vmatmul.mubr.bf16.gmra.mrb[168].mxu1 %v5825_v16  ;;  %v5834_v24 = vld [vmem:[%s6470_s17 + $0x43c] ss:$12 sps:$4 sm:$0xff]  }
 0x19c   : > { %v5971_v41 = vpop.eup %5970  ;;  %5980 = vrcp.f32 %v2778_v27  ;;  %1895 = vmatprep.mubr.bf16.mxu1 %v5826_v34  ;;  %v7114_v12 = vpop.f32.mrb[88].mxu0 }
 0x19d   : > { %5982 = vpow2.f32 %v4437_v53  ;;  %v4438_v32 = vmul.f32 -1.442695, %v7089_v29  ;;  %v3093_v42 = vmul.f32 %v5971_v41, %v7006_v58  ;;  %v5209_v15 = vpop.f32.mrb[89].mxu0 }
 0x19e   : > { %v5973_v48 = vpop.eup %5972  ;;  %v1681_v38 = vpop.f32.mrb[64].mxu1 }
 0x19f   : > { %v5975_v13 = vpop.eup %5974  ;;  %v3094_v52 = vmul.f32 %v5973_v48, %v7015_v60  ;;  %5984 = vpow2.f32 %v4438_v32  ;;  %v1682_v54 = vadd.f32 %v7080_v26, %v1681_v38  ;;  %v1683_v55 = vpop.f32.mrb[65].mxu1  ;;  %v5856_v38 = vld [vmem:[%s6470_s17 + $0x4b8] ss:$12 sps:$4 sm:$0xff]  }
 0x1a0   : > { %v2779_v17 = vadd.f32 1.0, %v5975_v13  ;;  %v1684_v43 = vpop.f32.mrb[66].mxu1  ;;  %v7118_v22 = vpop.f32.mrb[90].mxu0 }
 0x1a1   : > { %v5977_v56 = vpop.eup %5976  ;;  %v4806_v57 = vpack.c.bf16 %v3094_v52, %v3093_v42  ;;  %v7103_v2 = vadd.f32 %v6971_v7, %v1682_v54  ;;  %v1685_v59 = vadd.f32 %v7080_v26, %v1684_v43  ;;  %v1686_v58 = vpop.f32.mrb[67].mxu1  ;;  %5316 = vmatmul.mubr.msk.bf16.gmra.mrb[196].mxu0 %vm1359_vm1, %v5852_v46 }
 0x1a2   : > { %5986 = vrcp.f32 %v2779_v17  ;;  %v2780_v60 = vadd.f32 1.0, %v5977_v56  ;;  %v5210_v35 = vpop.f32.mrb[91].mxu0  ;;  %5319 = vmatprep.mubr.msk.bf16.mxu0 %vm6383_vm0, %v6382_v3  ;;  %v5837_v17 = vld [vmem:[%s6470_s17 + $0x438] ss:$12 sps:$4 sm:$0xff]  }
 0x1a3   : > { %5019 = vst [vmem:[%s6826_s27 + $0x60] sm:$0xff] %v4806_v57   ;;  %v4439_v63 = vmul.f32 -1.442695, %v7103_v2  ;;  %v7112_v5 = vadd.f32 %v6975_v11, %v1685_v59  ;;  %1896 = vmatmul.mubr.bf16.gmra.mrb[172].mxu1 %v5829_v49  ;;  %v5838_v57 = vld [vmem:[%s6470_s17 + $0x454] ss:$12 sps:$4 sm:$0xff]  }
 0x1a4   : > { %v5979_v7 = vpop.eup %5978  ;;  %5988 = vrcp.f32 %v2780_v60  ;;  %1903 = vmatprep.mubr.bf16.mxu1 %v5830_v61  ;;  %v7137_v39 = vpop.f32.mrb[92].mxu0 }
 0x1a5   : > { %5990 = vpow2.f32 %v4439_v63  ;;  %v4440_v4 = vmul.f32 -1.442695, %v7112_v5  ;;  %v3095_v11 = vmul.f32 %v5979_v7, %v7029_v28  ;;  %v5213_v48 = vpop.f32.mrb[93].mxu0 }
 0x1a6   : > { %v5981_v20 = vpop.eup %5980  ;;  %v1689_v9 = vpop.f32.mrb[68].mxu1 }
 0x1a7   : > { %v5983_v30 = vpop.eup %5982  ;;  %v3096_v25 = vmul.f32 %v5981_v20, %v7038_v6  ;;  %5992 = vpow2.f32 %v4440_v4  ;;  %v1690_v16 = vadd.f32 %v7080_v26, %v1689_v9  ;;  %v1691_v1 = vpop.f32.mrb[69].mxu1  ;;  %v5860_v9 = vld [vmem:[%s6470_s17 + $0x4d0] ss:$12 sps:$4 sm:$0xff]  }
 0x1a8   : > { %v2781_v34 = vadd.f32 1.0, %v5983_v30  ;;  %v1692_v50 = vpop.f32.mrb[70].mxu1  ;;  %v7141_v52 = vpop.f32.mrb[94].mxu0 }
 0x1a9   : > { %v5985_v33 = vpop.eup %5984  ;;  %v4811_v0 = vpack.c.bf16 %v3096_v25, %v3095_v11  ;;  %v7126_v27 = vadd.f32 %v6994_v37, %v1690_v16  ;;  %v1693_v53 = vadd.f32 %v7080_v26, %v1692_v50  ;;  %v1694_v28 = vpop.f32.mrb[71].mxu1  ;;  %5320 = vmatmul.mubr.msk.bf16.gmra.mrb[200].mxu0 %vm1359_vm1, %v5856_v38 }
 0x1aa   : > { %5994 = vrcp.f32 %v2781_v34  ;;  %v2782_v6 = vadd.f32 1.0, %v5985_v33  ;;  %v5214_v43 = vpop.f32.mrb[95].mxu0  ;;  %5323 = vmatprep.mubr.msk.bf16.mxu0 %vm6383_vm0, %v6382_v3  ;;  %v5841_v34 = vld [vmem:[%s6470_s17 + $0x450] ss:$12 sps:$4 sm:$0xff]  }
 0x1ab   : > { %5020 = vst [vmem:[%s6826_s27 + $0x68] sm:$0xff] %v4811_v0   ;;  %v4441_v41 = vmul.f32 -1.442695, %v7126_v27  ;;  %v7135_v32 = vadd.f32 %v6998_v45, %v1693_v53  ;;  %1904 = vmatmul.mubr.bf16.gmra.mrb[176].mxu1 %v5833_v21  ;;  %v5842_v0 = vld [vmem:[%s6470_s17 + $0x46c] ss:$12 sps:$4 sm:$0xff]  }
 0x1ac   : > { %v5987_v37 = vpop.eup %5986  ;;  %5996 = vrcp.f32 %v2782_v6  ;;  %1911 = vmatprep.mubr.bf16.mxu1 %v5834_v24  ;;  %v7160_v15 = vpop.f32.mrb[96].mxu0  ;;  %v5845_v43 = vld [vmem:[%s6470_s17 + $0x468] ss:$12 sps:$4 sm:$0xff]  }
 0x1ad   : > { %5998 = vpow2.f32 %v4441_v41  ;;  %v4442_v36 = vmul.f32 -1.442695, %v7135_v32  ;;  %v3097_v45 = vmul.f32 %v5987_v37, %v7052_v62  ;;  %v5217_v20 = vpop.f32.mrb[97].mxu0 }
 0x1ae   : > { %v5989_v13 = vpop.eup %5988  ;;  %v1697_v42 = vpop.f32.mrb[72].mxu1 }
 0x1af   : > { %v5991_v54 = vpop.eup %5990  ;;  %v3098_v55 = vmul.f32 %v5989_v13, %v7061_v23  ;;  %6000 = vpow2.f32 %v4442_v36  ;;  %v1698_v49 = vadd.f32 %v7080_v26, %v1697_v42  ;;  %v1699_v18 = vpop.f32.mrb[73].mxu1  ;;  %v5864_v42 = vld [vmem:[%s6470_s17 + $0x4e8] ss:$12 sps:$4 sm:$0xff]  }
 0x1b0   : > { %v2783_v61 = vadd.f32 1.0, %v5991_v54  ;;  %v1700_v56 = vpop.f32.mrb[74].mxu1  ;;  %v7164_v25 = vpop.f32.mrb[98].mxu0 }
 0x1b1   : > { %v5993_v59 = vpop.eup %5992  ;;  %v4816_v58 = vpack.c.bf16 %v3098_v55, %v3097_v45  ;;  %v7149_v60 = vadd.f32 %v7017_v8, %v1698_v49  ;;  %v1701_v63 = vadd.f32 %v7080_v26, %v1700_v56  ;;  %v1702_v62 = vpop.f32.mrb[75].mxu1  ;;  %5324 = vmatmul.mubr.msk.bf16.gmra.mrb[204].mxu0 %vm1359_vm1, %v5860_v9 }
 0x1b2   : > { %6002 = vrcp.f32 %v2783_v61  ;;  %v2784_v23 = vadd.f32 1.0, %v5993_v59  ;;  %v5218_v50 = vpop.f32.mrb[99].mxu0  ;;  %5327 = vmatprep.mubr.msk.bf16.mxu0 %vm6383_vm0, %v6382_v3  ;;  %v5846_v59 = vld [vmem:[%s6470_s17 + $0x484] ss:$12 sps:$4 sm:$0xff]  }
 0x1b3   : > { %5021 = vst [vmem:[%s6826_s27 + $0x70] sm:$0xff] %v4816_v58   ;;  %v4443_v7 = vmul.f32 -1.442695, %v7149_v60  ;;  %v7158_v4 = vadd.f32 %v7021_v14, %v1701_v63  ;;  %1912 = vmatmul.mubr.bf16.gmra.mrb[180].mxu1 %v5837_v17 }
 0x1b4   : > { %v5995_v8 = vpop.eup %5994  ;;  %6004 = vrcp.f32 %v2784_v23  ;;  %1919 = vmatprep.mubr.bf16.mxu1 %v5838_v57  ;;  %v7183_v48 = vpop.f32.mrb[100].mxu0 }
 0x1b5   : > { %6006 = vpow2.f32 %v4443_v7  ;;  %v4444_v46 = vmul.f32 -1.442695, %v7158_v4  ;;  %v3099_v14 = vmul.f32 %v5995_v8, %v7075_v31  ;;  %v5221_v13 = vpop.f32.mrb[101].mxu0 }
 0x1b6   : > { %v5997_v30 = vpop.eup %5996  ;;  %v1705_v11 = vpop.f32.mrb[76].mxu1 }
 0x1b7   : > { %v5999_v16 = vpop.eup %5998  ;;  %v3100_v1 = vmul.f32 %v5997_v30, %v7089_v29  ;;  %6008 = vpow2.f32 %v4444_v46  ;;  %v1706_v21 = vadd.f32 %v7080_v26, %v1705_v11  ;;  %v1707_v35 = vpop.f32.mrb[77].mxu1 }
 0x1b8   : > { %v2785_v24 = vadd.f32 1.0, %v5999_v16  ;;  %v1708_v33 = vpop.f32.mrb[78].mxu1  ;;  %v7187_v45 = vpop.f32.mrb[102].mxu0 }
 0x1b9   : > { %v6001_v53 = vpop.eup %6000  ;;  %v4821_v28 = vpack.c.bf16 %v3100_v1, %v3099_v14  ;;  %v7172_v6 = vadd.f32 %v7040_v40, %v1706_v21  ;;  %v1709_v41 = vadd.f32 %v7080_v26, %v1708_v33  ;;  %v1710_v31 = vpop.f32.mrb[79].mxu1  ;;  %5328 = vmatmul.mubr.msk.bf16.gmra.mrb[208].mxu0 %vm1359_vm1, %v5864_v42 }
 0x1ba   : > { %6010 = vrcp.f32 %v2785_v24  ;;  %v2786_v29 = vadd.f32 1.0, %v6001_v53  ;;  %v5222_v61 = vpop.f32.mrb[103].mxu0 }
 0x1bb   : > { %5022 = vst [vmem:[%s6826_s27 + $0x78] sm:$0xff] %v4821_v28   ;;  %v4445_v37 = vmul.f32 -1.442695, %v7172_v6  ;;  %v7181_v36 = vadd.f32 %v7044_v47, %v1709_v41  ;;  %1920 = vmatmul.mubr.bf16.gmra.mrb[184].mxu1 %v5841_v34  ;;  %v5849_v34 = vld [vmem:[%s6470_s17 + $0x480] ss:$12 sps:$4 sm:$0xff]  }
 0x1bc   : > { %v6003_v40 = vpop.eup %6002  ;;  %6012 = vrcp.f32 %v2786_v29  ;;  %1927 = vmatprep.mubr.bf16.mxu1 %v5842_v0  ;;  %v5850_v0 = vld [vmem:[%s6470_s17 + $0x49c] ss:$12 sps:$4 sm:$0xff]  }
 0x1bd   : > { %6014 = vpow2.f32 %v4445_v37  ;;  %v4446_v38 = vmul.f32 -1.442695, %v7181_v36  ;;  %v3101_v47 = vmul.f32 %v6003_v40, %v7103_v2 }
 0x1be   : > { %v6005_v3 = vpop.eup %6004  ;;  %v1713_v54 = vpop.f32.mrb[80].mxu1 }
 0x1bf   : > { %v6007_v55 = vpop.eup %6006  ;;  %v3102_v49 = vmul.f32 %v6005_v3, %v7112_v5  ;;  %6016 = vpow2.f32 %v4446_v38  ;;  %v1714_v18 = vadd.f32 %v7080_v26, %v1713_v54  ;;  %v1715_v17 = vpop.f32.mrb[81].mxu1 }
 0x1c0   : > { %v2787_v56 = vadd.f32 1.0, %v6007_v55  ;;  %v1716_v57 = vpop.f32.mrb[82].mxu1  ;;  %v5853_v17 = vld [vmem:[%s6470_s17 + $0x498] ss:$12 sps:$4 sm:$0xff]  }
 0x1c1   : > { %v6009_v58 = vpop.eup %6008  ;;  %v4826_v63 = vpack.c.bf16 %v3102_v49, %v3101_v47  ;;  %v7195_v62 = vadd.f32 %v7063_v10, %v1714_v18  ;;  %v1717_v23 = vadd.f32 %v7080_v26, %v1716_v57  ;;  %v1718_v2 = vpop.f32.mrb[83].mxu1  ;;  %v5854_v57 = vld [vmem:[%s6470_s17 + $0x4b4] ss:$12 sps:$4 sm:$0xff]  }
 0x1c2   : > { %6018 = vrcp.f32 %v2787_v56  ;;  %v2788_v5 = vadd.f32 1.0, %v6009_v58  ;;  %v7204_v10 = vpop.f32.mrb[104].mxu0 }
 0x1c3   : > { %5023 = vst [vmem:[%s6826_s27 + $0x80] sm:$0xff] %v4826_v63   ;;  %v4447_v7 = vmul.f32 -1.442695, %v7195_v62  ;;  %v7202_v8 = vadd.f32 %v7067_v19, %v1717_v23  ;;  %1928 = vmatmul.mubr.bf16.gmra.mrb[188].mxu1 %v5845_v43  ;;  %v5225_v9 = vpop.f32.mrb[105].mxu0 }
 0x1c4   : > { %v6011_v46 = vpop.eup %6010  ;;  %6020 = vrcp.f32 %v2788_v5  ;;  %1935 = vmatprep.mubr.bf16.mxu1 %v5846_v59  ;;  %v7207_v16 = vpop.f32.mrb[106].mxu0 }
 0x1c5   : > { %6022 = vpow2.f32 %v4447_v7  ;;  %v4448_v20 = vmul.f32 -1.442695, %v7202_v8  ;;  %v3103_v19 = vmul.f32 %v6011_v46, %v7126_v27  ;;  %v5226_v50 = vpop.f32.mrb[107].mxu0 }
 0x1c6   : > { %v6013_v30 = vpop.eup %6012  ;;  %v1721_v11 = vpop.f32.mrb[84].mxu1 }
 0x1c7   : > { %v6015_v14 = vpop.eup %6014  ;;  %v3104_v1 = vmul.f32 %v6013_v30, %v7135_v32  ;;  %6024 = vpow2.f32 %v4448_v20  ;;  %v1722_v21 = vadd.f32 %v7080_v26, %v1721_v11  ;;  %v1723_v35 = vpop.f32.mrb[85].mxu1 }
 0x1c8   : > { %v2789_v24 = vadd.f32 1.0, %v6015_v14  ;;  %v1724_v33 = vpop.f32.mrb[86].mxu1  ;;  %v7223_v38 = vpop.f32.mrb[108].mxu0  ;;  %v5857_v35 = vld [vmem:[%s6470_s17 + $0x4b0] ss:$12 sps:$4 sm:$0xff]  }
 0x1c9   : > { %v6017_v53 = vpop.eup %6016  ;;  %v4831_v28 = vpack.c.bf16 %v3104_v1, %v3103_v19  ;;  %v7215_v41 = vadd.f32 %v7091_v44, %v1722_v21  ;;  %v1725_v31 = vadd.f32 %v7080_v26, %v1724_v33  ;;  %v1726_v27 = vpop.f32.mrb[87].mxu1  ;;  %v5858_v33 = vld [vmem:[%s6470_s17 + $0x4cc] ss:$12 sps:$4 sm:$0xff]  }
 0x1ca   : > { %6026 = vrcp.f32 %v2789_v24  ;;  %v2790_v32 = vadd.f32 1.0, %v6017_v53  ;;  %v5229_v13 = vpop.f32.mrb[109].mxu0 }
 0x1cb   : > { %5024 = vst [vmem:[%s6826_s27 + $0x88] sm:$0xff] %v4831_v28   ;;  %v4449_v29 = vmul.f32 -1.442695, %v7215_v41  ;;  %v7221_v37 = vadd.f32 %v7095_v51, %v1725_v31  ;;  %1936 = vmatmul.mubr.bf16.gmra.mrb[192].mxu1 %v5849_v34  ;;  %v7226_v54 = vpop.f32.mrb[110].mxu0 }
 0x1cc   : > { %v6019_v40 = vpop.eup %6018  ;;  %6028 = vrcp.f32 %v2790_v32  ;;  %1943 = vmatprep.mubr.bf16.mxu1 %v5850_v0  ;;  %v5230_v43 = vpop.f32.mrb[111].mxu0 }
 0x1cd   : > { %6030 = vpow2.f32 %v4449_v29  ;;  %v4450_v44 = vmul.f32 -1.442695, %v7221_v37  ;;  %v3105_v51 = vmul.f32 %v6019_v40, %v7149_v60  ;;  %v7242_v46 = vpop.f32.mrb[112].mxu0 }
 0x1ce   : > { %v6021_v42 = vpop.eup %6020  ;;  %v1729_v3 = vpop.f32.mrb[88].mxu1 }
 0x1cf   : > { %v6023_v55 = vpop.eup %6022  ;;  %v3106_v47 = vmul.f32 %v6021_v42, %v7158_v4  ;;  %6032 = vpow2.f32 %v4450_v44  ;;  %v1730_v49 = vadd.f32 %v7080_v26, %v1729_v3  ;;  %v1731_v18 = vpop.f32.mrb[89].mxu1 }
 0x1d0   : > { %v2791_v61 = vadd.f32 1.0, %v6023_v55  ;;  %v1732_v56 = vpop.f32.mrb[90].mxu1  ;;  %v5233_v20 = vpop.f32.mrb[113].mxu0  ;;  %v5861_v18 = vld [vmem:[%s6470_s17 + $0x4c8] ss:$12 sps:$4 sm:$0xff]  }
 0x1d1   : > { %v6025_v59 = vpop.eup %6024  ;;  %v4836_v58 = vpack.c.bf16 %v3106_v47, %v3105_v51  ;;  %v7234_v63 = vadd.f32 %v7114_v12, %v1730_v49  ;;  %v1733_v23 = vadd.f32 %v7080_v26, %v1732_v56  ;;  %v1734_v60 = vpop.f32.mrb[91].mxu1  ;;  %v5862_v56 = vld [vmem:[%s6470_s17 + $0x4e4] ss:$12 sps:$4 sm:$0xff]  }
 0x1d2   : > { %6034 = vrcp.f32 %v2791_v61  ;;  %v2792_v4 = vadd.f32 1.0, %v6025_v59  ;;  %v7245_v11 = vpop.f32.mrb[114].mxu0 }
 0x1d3   : > { %5025 = vst [vmem:[%s6826_s27 + $0x90] sm:$0xff] %v4836_v58   ;;  %v4451_v2 = vmul.f32 -1.442695, %v7234_v63  ;;  %v7240_v5 = vadd.f32 %v7118_v22, %v1733_v23  ;;  %1944 = vmatmul.mubr.bf16.gmra.mrb[196].mxu1 %v5853_v17  ;;  %v5234_v34 = vpop.f32.mrb[115].mxu0 }
 0x1d4   : > { %v6027_v7 = vpop.eup %6026  ;;  %6036 = vrcp.f32 %v2792_v4  ;;  %1951 = vmatprep.mubr.bf16.mxu1 %v5854_v57  ;;  %v7261_v40 = vpop.f32.mrb[116].mxu0 }
 0x1d5   : > { %6038 = vpow2.f32 %v4451_v2  ;;  %v4452_v12 = vmul.f32 -1.442695, %v7240_v5  ;;  %v3107_v22 = vmul.f32 %v6027_v7, %v7172_v6  ;;  %v5237_v44 = vpop.f32.mrb[117].mxu0 }
 0x1d6   : > { %v6029_v9 = vpop.eup %6028  ;;  %v1737_v30 = vpop.f32.mrb[92].mxu1 }
 0x1d7   : > { %v6031_v14 = vpop.eup %6030  ;;  %v3108_v19 = vmul.f32 %v6029_v9, %v7181_v36  ;;  %6040 = vpow2.f32 %v4452_v12  ;;  %v1738_v1 = vadd.f32 %v7080_v26, %v1737_v30  ;;  %v1739_v21 = vpop.f32.mrb[93].mxu1 }
 0x1d8   : > { %v2793_v50 = vadd.f32 1.0, %v6031_v14  ;;  %v1740_v24 = vpop.f32.mrb[94].mxu1  ;;  %v7264_v3 = vpop.f32.mrb[118].mxu0  ;;  %v5865_v21 = vld [vmem:[%s6470_s17 + $0x4e0] ss:$12 sps:$4 sm:$0xff]  }
 0x1d9   : > { %v6033_v0 = vpop.eup %6032  ;;  %v4841_v53 = vpack.c.bf16 %v3108_v19, %v3107_v22  ;;  %v7253_v28 = vadd.f32 %v7137_v39, %v1738_v1  ;;  %v1741_v31 = vadd.f32 %v7080_v26, %v1740_v24  ;;  %v1742_v6 = vpop.f32.mrb[95].mxu1 }
 0x1da   : > { %6042 = vrcp.f32 %v2793_v50  ;;  %v2794_v36 = vadd.f32 1.0, %v6033_v0  ;;  %v5238_v17 = vpop.f32.mrb[119].mxu0 }
 0x1db   : > { %5026 = vst [vmem:[%s6826_s27 + $0x98] sm:$0xff] %v4841_v53   ;;  %v4453_v27 = vmul.f32 -1.442695, %v7253_v28  ;;  %v7259_v32 = vadd.f32 %v7141_v52, %v1741_v31  ;;  %1952 = vmatmul.mubr.bf16.gmra.mrb[200].mxu1 %v5857_v35 }
 0x1dc   : > { %v6035_v29 = vpop.eup %6034  ;;  %6044 = vrcp.f32 %v2794_v36  ;;  %1959 = vmatprep.mubr.bf16.mxu1 %v5858_v33  ;;  %v7280_v7 = vpop.f32.mrb[120].mxu0 }
 0x1dd   : > { %6046 = vpow2.f32 %v4453_v27  ;;  %v4454_v39 = vmul.f32 -1.442695, %v7259_v32  ;;  %v3109_v52 = vmul.f32 %v6035_v29, %v7195_v62  ;;  %v5241_v12 = vpop.f32.mrb[121].mxu0 }
 0x1de   : > { %v6037_v13 = vpop.eup %6036  ;;  %v1745_v42 = vpop.f32.mrb[96].mxu1 }
 0x1df   : > { %v6039_v55 = vpop.eup %6038  ;;  %v3110_v51 = vmul.f32 %v6037_v13, %v7202_v8  ;;  %6048 = vpow2.f32 %v4454_v39  ;;  %v1746_v47 = vadd.f32 %v7080_v26, %v1745_v42  ;;  %v1747_v49 = vpop.f32.mrb[97].mxu1 }
 0x1e0   : > { %v2795_v43 = vadd.f32 1.0, %v6039_v55  ;;  %v1748_v61 = vpop.f32.mrb[98].mxu1  ;;  %v7283_v30 = vpop.f32.mrb[122].mxu0 }
 0x1e1   : > { %v6041_v57 = vpop.eup %6040  ;;  %v4846_v59 = vpack.c.bf16 %v3110_v51, %v3109_v52  ;;  %v7272_v58 = vadd.f32 %v7160_v15, %v1746_v47  ;;  %v1749_v23 = vadd.f32 %v7080_v26, %v1748_v61  ;;  %v1750_v62 = vpop.f32.mrb[99].mxu1 }
 0x1e2   : > { %6050 = vrcp.f32 %v2795_v43  ;;  %v2796_v8 = vadd.f32 1.0, %v6041_v57  ;;  %v5242_v35 = vpop.f32.mrb[123].mxu0 }
 0x1e3   : > { %5027 = vst [vmem:[%s6826_s27 + $0xa0] sm:$0xff] %v4846_v59   ;;  %v4455_v60 = vmul.f32 -1.442695, %v7272_v58  ;;  %v7278_v4 = vadd.f32 %v7164_v25, %v1749_v23  ;;  %1960 = vmatmul.mubr.bf16.gmra.mrb[204].mxu1 %v5861_v18 }
 0x1e4   : > { %v6043_v2 = vpop.eup %6042  ;;  %6052 = vrcp.f32 %v2796_v8  ;;  %1967 = vmatprep.mubr.bf16.mxu1 %v5862_v56  ;;  %v7298_v27 = vpop.f32.mrb[124].mxu0 }
 0x1e5   : > { %6054 = vpow2.f32 %v4455_v60  ;;  %v4456_v15 = vmul.f32 -1.442695, %v7278_v4  ;;  %v3111_v22 = vmul.f32 %v6043_v2, %v7215_v41  ;;  %v5245_v29 = vpop.f32.mrb[125].mxu0 }
 0x1e6   : > { %v6045_v20 = vpop.eup %6044  ;;  %v1753_v9 = vpop.f32.mrb[100].mxu1 }
 0x1e7   : > { %v6047_v14 = vpop.eup %6046  ;;  %v3112_v25 = vmul.f32 %v6045_v20, %v7221_v37  ;;  %6056 = vpow2.f32 %v4456_v15  ;;  %v1754_v19 = vadd.f32 %v7080_v26, %v1753_v9  ;;  %v1755_v1 = vpop.f32.mrb[101].mxu1 }
 0x1e8   : > { %v2797_v34 = vadd.f32 1.0, %v6047_v14  ;;  %v1756_v50 = vpop.f32.mrb[102].mxu1  ;;  %v7301_v13 = vpop.f32.mrb[126].mxu0 }
 0x1e9   : > { %v6049_v24 = vpop.eup %6048  ;;  %v4851_v33 = vpack.c.bf16 %v3112_v25, %v3111_v22  ;;  %v7290_v0 = vadd.f32 %v7183_v48, %v1754_v19  ;;  %v1757_v53 = vadd.f32 %v7080_v26, %v1756_v50  ;;  %v1758_v31 = vpop.f32.mrb[103].mxu1 }
 0x1ea   : > { %6058 = vrcp.f32 %v2797_v34  ;;  %v2798_v41 = vadd.f32 1.0, %v6049_v24  ;;  %v5246_v47 = vpop.f32.mrb[127].mxu0 }
 0x1eb   : > { %5028 = vst [vmem:[%s6826_s27 + $0xa8] sm:$0xff] %v4851_v33   ;;  %v4457_v37 = vmul.f32 -1.442695, %v7290_v0  ;;  %v7296_v6 = vadd.f32 %v7187_v45, %v1757_v53  ;;  %1968 = vmatmul.mubr.bf16.gmra.mrb[208].mxu1 %v5865_v21 }
 0x1ec   : > { %v6051_v36 = vpop.eup %6050  ;;  %6060 = vrcp.f32 %v2798_v41  ;;  %v7315_v62 = vpop.f32.mrb[128].mxu0 }
 0x1ed   : > { %6062 = vpow2.f32 %v4457_v37  ;;  %v4458_v48 = vmul.f32 -1.442695, %v7296_v6  ;;  %v3113_v55 = vmul.f32 %v6051_v36, %v7234_v63 }
 0x1ee   : > { %v6053_v39 = vpop.eup %6052  ;;  %v1761_v44 = vpop.f32.mrb[104].mxu1 }
 0x1ef   : > { %v6055_v42 = vpop.eup %6054  ;;  %v3114_v45 = vmul.f32 %v6053_v39, %v7240_v5  ;;  %6064 = vpow2.f32 %v4458_v48  ;;  %v1762_v52 = vadd.f32 %v7080_v26, %v1761_v44  ;;  %v1763_v51 = vpop.f32.mrb[105].mxu1 }
 0x1f0   : > { %v2799_v49 = vadd.f32 1.0, %v6055_v42  ;;  %v1764_v18 = vpop.f32.mrb[106].mxu1 }
 0x1f1   : > { %v6057_v17 = vpop.eup %6056  ;;  %v4856_v43 = vpack.c.bf16 %v3114_v45, %v3113_v55  ;;  %v7307_v61 = vadd.f32 %v7204_v10, %v1762_v52  ;;  %v1765_v56 = vadd.f32 %v7080_v26, %v1764_v18  ;;  %v1766_v57 = vpop.f32.mrb[107].mxu1 }
 0x1f2   : > { %6066 = vrcp.f32 %v2799_v49  ;;  %v2800_v59 = vadd.f32 1.0, %v6057_v17  ;;  %v5249_v10 = vpop.f32.mrb[129].mxu0 }
 0x1f3   : > { %5029 = vst [vmem:[%s6826_s27 + $0xb0] sm:$0xff] %v4856_v43   ;;  %v4459_v63 = vmul.f32 -1.442695, %v7307_v61  ;;  %v7313_v5 = vadd.f32 %v7207_v16, %v1765_v56  ;;  %v7318_v15 = vpop.f32.mrb[130].mxu0 }
 0x1f4   : > { %v6059_v23 = vpop.eup %6058  ;;  %6068 = vrcp.f32 %v2800_v59  ;;  %v5250_v22 = vpop.f32.mrb[131].mxu0 }
 0x1f5   : > { %6070 = vpow2.f32 %v4459_v63  ;;  %v4460_v8 = vmul.f32 -1.442695, %v7313_v5  ;;  %v3115_v20 = vmul.f32 %v6059_v23, %v7253_v28  ;;  %v7332_v53 = vpop.f32.mrb[132].mxu0 }
 0x1f6   : > { %v6061_v60 = vpop.eup %6060  ;;  %v1769_v2 = vpop.f32.mrb[108].mxu1 }
 0x1f7   : > { %v6063_v12 = vpop.eup %6062  ;;  %v3116_v9 = vmul.f32 %v6061_v60, %v7259_v32  ;;  %6072 = vpow2.f32 %v4460_v8  ;;  %v1770_v16 = vadd.f32 %v7080_v26, %v1769_v2  ;;  %v1771_v14 = vpop.f32.mrb[109].mxu1 }
 0x1f8   : > { %v2801_v25 = vadd.f32 1.0, %v6063_v12  ;;  %v1772_v19 = vpop.f32.mrb[110].mxu1 }
 0x1f9   : > { %v6065_v1 = vpop.eup %6064  ;;  %v4861_v21 = vpack.c.bf16 %v3116_v9, %v3115_v20  ;;  %v7324_v35 = vadd.f32 %v7223_v38, %v1770_v16  ;;  %v1773_v34 = vadd.f32 %v7080_v26, %v1772_v19  ;;  %v1774_v50 = vpop.f32.mrb[111].mxu1 }
 0x1fa   : > { %6074 = vrcp.f32 %v2801_v25  ;;  %v2802_v24 = vadd.f32 1.0, %v6065_v1  ;;  %v5253_v38 = vpop.f32.mrb[133].mxu0 }
 0x1fb   : > { %5030 = vst [vmem:[%s6826_s27 + $0xb8] sm:$0xff] %v4861_v21   ;;  %v4461_v28 = vmul.f32 -1.442695, %v7324_v35  ;;  %v7330_v32 = vadd.f32 %v7226_v54, %v1773_v34  ;;  %v7335_v36 = vpop.f32.mrb[134].mxu0 }
 0x1fc   : > { %v6067_v33 = vpop.eup %6066  ;;  %6076 = vrcp.f32 %v2802_v24  ;;  %v5254_v42 = vpop.f32.mrb[135].mxu0 }
 0x1fd   : > { %6078 = vpow2.f32 %v4461_v28  ;;  %v4462_v31 = vmul.f32 -1.442695, %v7330_v32  ;;  %v3117_v29 = vmul.f32 %v6067_v33, %v7272_v58  ;;  %v7349_v56 = vpop.f32.mrb[136].mxu0 }
 0x1fe   : > { %v6069_v41 = vpop.eup %6068  ;;  %v1777_v37 = vpop.f32.mrb[112].mxu1 }
 0x1ff   : > { %v6071_v48 = vpop.eup %6070  ;;  %v3118_v39 = vmul.f32 %v6069_v41, %v7278_v4  ;;  %6080 = vpow2.f32 %v4462_v31  ;;  %v1778_v54 = vadd.f32 %v7080_v26, %v1777_v37  ;;  %v1779_v44 = vpop.f32.mrb[113].mxu1 }
 0x200   : > { %v2803_v55 = vadd.f32 1.0, %v6071_v48  ;;  %v1780_v45 = vpop.f32.mrb[114].mxu1 }
 0x201   : > { %v6073_v52 = vpop.eup %6072  ;;  %v4866_v51 = vpack.c.bf16 %v3118_v39, %v3117_v29  ;;  %v7341_v47 = vadd.f32 %v7242_v46, %v1778_v54  ;;  %v1781_v49 = vadd.f32 %v7080_v26, %v1780_v45  ;;  %v1782_v18 = vpop.f32.mrb[115].mxu1 }
 0x202   : > { %6082 = vrcp.f32 %v2803_v55  ;;  %v2804_v17 = vadd.f32 1.0, %v6073_v52  ;;  %v5257_v46 = vpop.f32.mrb[137].mxu0 }
 0x203   : > { %5031 = vst [vmem:[%s6826_s27 + $0xc0] sm:$0xff] %v4866_v51   ;;  %v4463_v58 = vmul.f32 -1.442695, %v7341_v47  ;;  %v7347_v4 = vadd.f32 %v7245_v11, %v1781_v49  ;;  %v7352_v23 = vpop.f32.mrb[138].mxu0 }
 0x204   : > { %v6075_v43 = vpop.eup %6074  ;;  %6084 = vrcp.f32 %v2804_v17  ;;  %v5258_v12 = vpop.f32.mrb[139].mxu0 }
 0x205   : > { %6086 = vpow2.f32 %v4463_v58  ;;  %v4464_v57 = vmul.f32 -1.442695, %v7347_v4  ;;  %v3119_v10 = vmul.f32 %v6075_v43, %v7290_v0  ;;  %v7366_v34 = vpop.f32.mrb[140].mxu0 }
 0x206   : > { %v6077_v59 = vpop.eup %6076  ;;  %v1785_v63 = vpop.f32.mrb[116].mxu1 }
 0x207   : > { %v6079_v8 = vpop.eup %6078  ;;  %v3120_v60 = vmul.f32 %v6077_v59, %v7296_v6  ;;  %6088 = vpow2.f32 %v4464_v57  ;;  %v1786_v11 = vadd.f32 %v7080_v26, %v1785_v63  ;;  %v1787_v2 = vpop.f32.mrb[117].mxu1 }
 0x208   : > { %v2805_v20 = vadd.f32 1.0, %v6079_v8  ;;  %v1788_v9 = vpop.f32.mrb[118].mxu1 }
 0x209   : > { %v6081_v16 = vpop.eup %6080  ;;  %v4871_v14 = vpack.c.bf16 %v3120_v60, %v3119_v10  ;;  %v7358_v22 = vadd.f32 %v7261_v40, %v1786_v11  ;;  %v1789_v25 = vadd.f32 %v7080_v26, %v1788_v9  ;;  %v1790_v19 = vpop.f32.mrb[119].mxu1 }
 0x20a   : > { %6090 = vrcp.f32 %v2805_v20  ;;  %v2806_v1 = vadd.f32 1.0, %v6081_v16  ;;  %v5261_v40 = vpop.f32.mrb[141].mxu0 }
 0x20b   : > { %5032 = vst [vmem:[%s6826_s27 + $0xc8] sm:$0xff] %v4871_v14   ;;  %v4465_v0 = vmul.f32 -1.442695, %v7358_v22  ;;  %v7364_v6 = vadd.f32 %v7264_v3, %v1789_v25  ;;  %v7369_v33 = vpop.f32.mrb[142].mxu0 }
 0x20c   : > { %v6083_v21 = vpop.eup %6082  ;;  %6092 = vrcp.f32 %v2806_v1  ;;  %v5262_v48 = vpop.f32.mrb[143].mxu0 }
 0x20d   : > { %6094 = vpow2.f32 %v4465_v0  ;;  %v4466_v50 = vmul.f32 -1.442695, %v7364_v6  ;;  %v3121_v38 = vmul.f32 %v6083_v21, %v7307_v61  ;;  %v7383_v49 = vpop.f32.mrb[144].mxu0 }
 0x20e   : > { %v6085_v24 = vpop.eup %6084  ;;  %v1793_v28 = vpop.f32.mrb[120].mxu1 }
 0x20f   : > { %v6087_v31 = vpop.eup %6086  ;;  %v3122_v41 = vmul.f32 %v6085_v24, %v7313_v5  ;;  %6096 = vpow2.f32 %v4466_v50  ;;  %v1794_v3 = vadd.f32 %v7080_v26, %v1793_v28  ;;  %v1795_v37 = vpop.f32.mrb[121].mxu1 }
 0x210   : > { %v2807_v29 = vadd.f32 1.0, %v6087_v31  ;;  %v1796_v39 = vpop.f32.mrb[122].mxu1 }
 0x211   : > { %v6089_v54 = vpop.eup %6088  ;;  %v4876_v44 = vpack.c.bf16 %v3122_v41, %v3121_v38  ;;  %v7375_v42 = vadd.f32 %v7280_v7, %v1794_v3  ;;  %v1797_v55 = vadd.f32 %v7080_v26, %v1796_v39  ;;  %v1798_v45 = vpop.f32.mrb[123].mxu1 }
 0x212   : > { %6098 = vrcp.f32 %v2807_v29  ;;  %v2808_v52 = vadd.f32 1.0, %v6089_v54  ;;  %v5265_v7 = vpop.f32.mrb[145].mxu0 }
 0x213   : > { %5033 = vst [vmem:[%s6826_s27 + $0xd0] sm:$0xff] %v4876_v44   ;;  %v4467_v61 = vmul.f32 -1.442695, %v7375_v42  ;;  %v7381_v5 = vadd.f32 %v7283_v30, %v1797_v55  ;;  %v7386_v43 = vpop.f32.mrb[146].mxu0 }
 0x214   : > { %v6091_v51 = vpop.eup %6090  ;;  %6100 = vrcp.f32 %v2808_v52  ;;  %v5266_v8 = vpop.f32.mrb[147].mxu0 }
 0x215   : > { %6102 = vpow2.f32 %v4467_v61  ;;  %v4468_v18 = vmul.f32 -1.442695, %v7381_v5  ;;  %v3123_v46 = vmul.f32 %v6091_v51, %v7324_v35  ;;  %v7400_v25 = vpop.f32.mrb[148].mxu0 }
 0x216   : > { %v6093_v17 = vpop.eup %6092  ;;  %v1801_v58 = vpop.f32.mrb[124].mxu1 }
 0x217   : > { %v6095_v57 = vpop.eup %6094  ;;  %v3124_v59 = vmul.f32 %v6093_v17, %v7330_v32  ;;  %6104 = vpow2.f32 %v4468_v18  ;;  %v1802_v30 = vadd.f32 %v7080_v26, %v1801_v58  ;;  %v1803_v63 = vpop.f32.mrb[125].mxu1 }
 0x218   : > { %v2809_v10 = vadd.f32 1.0, %v6095_v57  ;;  %v1804_v60 = vpop.f32.mrb[126].mxu1 }
 0x219   : > { %v6097_v11 = vpop.eup %6096  ;;  %v4881_v2 = vpack.c.bf16 %v3124_v59, %v3123_v46  ;;  %v7392_v12 = vadd.f32 %v7298_v27, %v1802_v30  ;;  %v1805_v20 = vadd.f32 %v7080_v26, %v1804_v60  ;;  %v1806_v9 = vpop.f32.mrb[127].mxu1 }
 0x21a   : > { %6106 = vrcp.f32 %v2809_v10  ;;  %v2810_v16 = vadd.f32 1.0, %v6097_v11  ;;  %v5269_v27 = vpop.f32.mrb[149].mxu0 }
 0x21b   : > { %5034 = vst [vmem:[%s6826_s27 + $0xd8] sm:$0xff] %v4881_v2   ;;  %v4469_v35 = vmul.f32 -1.442695, %v7392_v12  ;;  %v7398_v32 = vadd.f32 %v7301_v13, %v1805_v20  ;;  %v7403_v26 = vpop.f32.mrb[150].mxu0  ;;  %v7410_v13 = vld [vmem:[%s7939_s2] ss:$0 sm:$0xff] }
 0x21c   : > { %v6099_v14 = vpop.eup %6098  ;;  %6108 = vrcp.f32 %v2810_v16  ;;  %v5270_v31 = vpop.f32.mrb[151].mxu0 }
 0x21d   : > { %6110 = vpow2.f32 %v4469_v35  ;;  %v4470_v19 = vmul.f32 -1.442695, %v7398_v32  ;;  %v3125_v50 = vmul.f32 %v6099_v14, %v7341_v47  ;;  %v7422_v55 = vpop.f32.mrb[152].mxu0 }
 0x21e   : > { %v6101_v1 = vpop.eup %6100  ;;  %v1809_v0 = vpop.f32.mrb[128].mxu1 }
 0x21f   : > { %v6103_v21 = vpop.eup %6102  ;;  %v3126_v40 = vmul.f32 %v6101_v1, %v7347_v4  ;;  %6112 = vpow2.f32 %v4470_v19  ;;  %v1810_v24 = vadd.f32 %v7410_v13, %v1809_v0  ;;  %v1811_v28 = vpop.f32.mrb[129].mxu1 }
 0x220   : > { %v2811_v38 = vadd.f32 1.0, %v6103_v21  ;;  %v1812_v41 = vpop.f32.mrb[130].mxu1 }
 0x221   : > { %v6105_v3 = vpop.eup %6104  ;;  %v4886_v37 = vpack.c.bf16 %v3126_v40, %v3125_v50  ;;  %v7414_v48 = vadd.f32 %v7315_v62, %v1810_v24  ;;  %v1813_v47 = vadd.f32 %v7410_v13, %v1812_v41  ;;  %v1814_v4 = vpop.f32.mrb[131].mxu1 }
 0x222   : > { %6114 = vrcp.f32 %v2811_v38  ;;  %v2812_v29 = vadd.f32 1.0, %v6105_v3  ;;  %v5273_v62 = vpop.f32.mrb[153].mxu0 }
 0x223   : > { %5035 = vst [vmem:[%s6826_s27 + $0xe0] sm:$0xff] %v4886_v37   ;;  %v4471_v39 = vmul.f32 -1.442695, %v7414_v48  ;;  %v7420_v54 = vadd.f32 %v7318_v15, %v1813_v47  ;;  %v7425_v51 = vpop.f32.mrb[154].mxu0 }
 0x224   : > { %v6107_v44 = vpop.eup %6106  ;;  %6116 = vrcp.f32 %v2812_v29  ;;  %v5274_v57 = vpop.f32.mrb[155].mxu0 }
 0x225   : > { %6118 = vpow2.f32 %v4471_v39  ;;  %v4472_v45 = vmul.f32 -1.442695, %v7420_v54  ;;  %v3127_v7 = vmul.f32 %v6107_v44, %v7358_v22  ;;  %v7439_v20 = vpop.f32.mrb[156].mxu0 }
 0x226   : > { %v6109_v52 = vpop.eup %6108  ;;  %v1817_v61 = vpop.f32.mrb[132].mxu1 }
 0x227   : > { %v6111_v18 = vpop.eup %6110  ;;  %v3128_v17 = vmul.f32 %v6109_v52, %v7364_v6  ;;  %6120 = vpow2.f32 %v4472_v45  ;;  %v1818_v15 = vadd.f32 %v7410_v13, %v1817_v61  ;;  %v1819_v58 = vpop.f32.mrb[133].mxu1 }
 0x228   : > { %v2813_v46 = vadd.f32 1.0, %v6111_v18  ;;  %v1820_v59 = vpop.f32.mrb[134].mxu1 }
 0x229   : > { %v6113_v30 = vpop.eup %6112  ;;  %v4891_v63 = vpack.c.bf16 %v3128_v17, %v3127_v7  ;;  %v7431_v8 = vadd.f32 %v7332_v53, %v1818_v15  ;;  %v1821_v10 = vadd.f32 %v7410_v13, %v1820_v59  ;;  %v1822_v60 = vpop.f32.mrb[135].mxu1 }
 0x22a   : > { %6122 = vrcp.f32 %v2813_v46  ;;  %v2814_v11 = vadd.f32 1.0, %v6113_v30  ;;  %v5277_v53 = vpop.f32.mrb[157].mxu0 }
 0x22b   : > { %5036 = vst [vmem:[%s6826_s27 + $0xe8] sm:$0xff] %v4891_v63   ;;  %v4473_v22 = vmul.f32 -1.442695, %v7431_v8  ;;  %v7437_v6 = vadd.f32 %v7335_v36, %v1821_v10  ;;  %v7442_v14 = vpop.f32.mrb[158].mxu0 }
 0x22c   : > { %v6115_v2 = vpop.eup %6114  ;;  %6124 = vrcp.f32 %v2814_v11  ;;  %v5278_v21 = vpop.f32.mrb[159].mxu0 }
 0x22d   : > { %6126 = vpow2.f32 %v4473_v22  ;;  %v4474_v9 = vmul.f32 -1.442695, %v7437_v6  ;;  %v3129_v27 = vmul.f32 %v6115_v2, %v7375_v42  ;;  %v7456_v47 = vpop.f32.mrb[160].mxu0 }
 0x22e   : > { %v6117_v16 = vpop.eup %6116  ;;  %v1825_v35 = vpop.f32.mrb[136].mxu1 }
 0x22f   : > { %v6119_v19 = vpop.eup %6118  ;;  %v3130_v1 = vmul.f32 %v6117_v16, %v7381_v5  ;;  %6128 = vpow2.f32 %v4474_v9  ;;  %v1826_v36 = vadd.f32 %v7410_v13, %v1825_v35  ;;  %v1827_v0 = vpop.f32.mrb[137].mxu1 }
 0x230   : > { %v2815_v50 = vadd.f32 1.0, %v6119_v19  ;;  %v1828_v40 = vpop.f32.mrb[138].mxu1 }
 0x231   : > { %v6121_v24 = vpop.eup %6120  ;;  %v4896_v28 = vpack.c.bf16 %v3130_v1, %v3129_v27  ;;  %v7448_v31 = vadd.f32 %v7349_v56, %v1826_v36  ;;  %v1829_v38 = vadd.f32 %v7410_v13, %v1828_v40  ;;  %v1830_v41 = vpop.f32.mrb[139].mxu1 }
 0x232   : > { %6130 = vrcp.f32 %v2815_v50  ;;  %v2816_v3 = vadd.f32 1.0, %v6121_v24  ;;  %v5281_v56 = vpop.f32.mrb[161].mxu0 }
 0x233   : > { %5037 = vst [vmem:[%s6826_s27 + $0xf0] sm:$0xff] %v4896_v28   ;;  %v4475_v42 = vmul.f32 -1.442695, %v7448_v31  ;;  %v7454_v5 = vadd.f32 %v7352_v23, %v1829_v38  ;;  %v7459_v44 = vpop.f32.mrb[162].mxu0 }
 0x234   : > { %v6123_v37 = vpop.eup %6122  ;;  %6132 = vrcp.f32 %v2816_v3  ;;  %v5282_v18 = vpop.f32.mrb[163].mxu0 }
 0x235   : > { %6134 = vpow2.f32 %v4475_v42  ;;  %v4476_v4 = vmul.f32 -1.442695, %v7454_v5  ;;  %v3131_v62 = vmul.f32 %v6123_v37, %v7392_v12  ;;  %v7473_v10 = vpop.f32.mrb[164].mxu0 }
 0x236   : > { %v6125_v29 = vpop.eup %6124  ;;  %v1833_v39 = vpop.f32.mrb[140].mxu1 }
 0x237   : > { %v6127_v45 = vpop.eup %6126  ;;  %v3132_v52 = vmul.f32 %v6125_v29, %v7398_v32  ;;  %6136 = vpow2.f32 %v4476_v4  ;;  %v1834_v23 = vadd.f32 %v7410_v13, %v1833_v39  ;;  %v1835_v61 = vpop.f32.mrb[141].mxu1 }
 0x238   : > { %v2817_v7 = vadd.f32 1.0, %v6127_v45  ;;  %v1836_v17 = vpop.f32.mrb[142].mxu1 }
 0x239   : > { %v6129_v15 = vpop.eup %6128  ;;  %v4901_v58 = vpack.c.bf16 %v3132_v52, %v3131_v62  ;;  %v7465_v57 = vadd.f32 %v7366_v34, %v1834_v23  ;;  %v1837_v46 = vadd.f32 %v7410_v13, %v1836_v17  ;;  %v1838_v59 = vpop.f32.mrb[143].mxu1 }
 0x23a   : > { %6138 = vrcp.f32 %v2817_v7  ;;  %v2818_v30 = vadd.f32 1.0, %v6129_v15  ;;  %v5285_v34 = vpop.f32.mrb[165].mxu0 }
 0x23b   : > { %5038 = vst [vmem:[%s6826_s27 + $0xf8] sm:$0xff] %v4901_v58   ;;  %v4477_v12 = vmul.f32 -1.442695, %v7465_v57  ;;  %v7471_v32 = vadd.f32 %v7369_v33, %v1837_v46  ;;  %v7476_v2 = vpop.f32.mrb[166].mxu0 }
 0x23c   : > { %v6131_v63 = vpop.eup %6130  ;;  %6140 = vrcp.f32 %v2818_v30  ;;  %v5286_v19 = vpop.f32.mrb[167].mxu0 }
 0x23d   : > { %6142 = vpow2.f32 %v4477_v12  ;;  %v4478_v60 = vmul.f32 -1.442695, %v7471_v32  ;;  %v3133_v53 = vmul.f32 %v6131_v63, %v7414_v48  ;;  %v7490_v38 = vpop.f32.mrb[168].mxu0 }
 0x23e   : > { %v6133_v11 = vpop.eup %6132  ;;  %v1841_v22 = vpop.f32.mrb[144].mxu1 }
 0x23f   : > { %v6135_v9 = vpop.eup %6134  ;;  %v3134_v16 = vmul.f32 %v6133_v11, %v7420_v54  ;;  %6144 = vpow2.f32 %v4478_v60  ;;  %v1842_v33 = vadd.f32 %v7410_v13, %v1841_v22  ;;  %v1843_v35 = vpop.f32.mrb[145].mxu1 }
 0x240   : > { %v2819_v27 = vadd.f32 1.0, %v6135_v9  ;;  %v1844_v1 = vpop.f32.mrb[146].mxu1 }
 0x241   : > { %v6137_v36 = vpop.eup %6136  ;;  %v4906_v0 = vpack.c.bf16 %v3134_v16, %v3133_v53  ;;  %v7482_v21 = vadd.f32 %v7383_v49, %v1842_v33  ;;  %v1845_v50 = vadd.f32 %v7410_v13, %v1844_v1  ;;  %v1846_v40 = vpop.f32.mrb[147].mxu1 }
 0x242   : > { %6146 = vrcp.f32 %v2819_v27  ;;  %v2820_v24 = vadd.f32 1.0, %v6137_v36  ;;  %v5289_v49 = vpop.f32.mrb[169].mxu0 }
 0x243   : > { %5039 = vst [vmem:[%s6826_s27 + $0x100] sm:$0xff] %v4906_v0   ;;  %v4479_v48 = vmul.f32 -1.442695, %v7482_v21  ;;  %v7488_v54 = vadd.f32 %v7386_v43, %v1845_v50  ;;  %v7493_v37 = vpop.f32.mrb[170].mxu0 }
 0x244   : > { %v6139_v28 = vpop.eup %6138  ;;  %6148 = vrcp.f32 %v2820_v24  ;;  %v5290_v45 = vpop.f32.mrb[171].mxu0 }
 0x245   : > { %6150 = vpow2.f32 %v4479_v48  ;;  %v4480_v41 = vmul.f32 -1.442695, %v7488_v54  ;;  %v3135_v56 = vmul.f32 %v6139_v28, %v7431_v8  ;;  %v7507_v46 = vpop.f32.mrb[172].mxu0 }
 0x246   : > { %v6141_v3 = vpop.eup %6140  ;;  %v1849_v42 = vpop.f32.mrb[148].mxu1 }
 0x247   : > { %v6143_v4 = vpop.eup %6142  ;;  %v3136_v29 = vmul.f32 %v6141_v3, %v7437_v6  ;;  %6152 = vpow2.f32 %v4480_v41  ;;  %v1850_v43 = vadd.f32 %v7410_v13, %v1849_v42  ;;  %v1851_v39 = vpop.f32.mrb[149].mxu1 }
 0x248   : > { %v2821_v62 = vadd.f32 1.0, %v6143_v4  ;;  %v1852_v52 = vpop.f32.mrb[150].mxu1 }
 0x249   : > { %v6145_v23 = vpop.eup %6144  ;;  %v4911_v61 = vpack.c.bf16 %v3136_v29, %v3135_v56  ;;  %v7499_v18 = vadd.f32 %v7400_v25, %v1850_v43  ;;  %v1853_v7 = vadd.f32 %v7410_v13, %v1852_v52  ;;  %v1854_v17 = vpop.f32.mrb[151].mxu1 }
 0x24a   : > { %6154 = vrcp.f32 %v2821_v62  ;;  %v2822_v15 = vadd.f32 1.0, %v6145_v23  ;;  %v5293_v25 = vpop.f32.mrb[173].mxu0 }
 0x24b   : > { %5040 = vst [vmem:[%s6826_s27 + $0x108] sm:$0xff] %v4911_v61   ;;  %v4481_v8 = vmul.f32 -1.442695, %v7499_v18  ;;  %v7505_v6 = vadd.f32 %v7403_v26, %v1853_v7  ;;  %v7510_v63 = vpop.f32.mrb[174].mxu0 }
 0x24c   : > { %v6147_v58 = vpop.eup %6146  ;;  %6156 = vrcp.f32 %v2822_v15  ;;  %v5294_v9 = vpop.f32.mrb[175].mxu0 }
 0x24d   : > { %6158 = vpow2.f32 %v4481_v8  ;;  %v4482_v59 = vmul.f32 -1.442695, %v7505_v6  ;;  %v3137_v34 = vmul.f32 %v6147_v58, %v7448_v31  ;;  %v7524_v50 = vpop.f32.mrb[176].mxu0 }
 0x24e   : > { %v6149_v30 = vpop.eup %6148  ;;  %v1857_v12 = vpop.f32.mrb[152].mxu1 }
 0x24f   : > { %v6151_v60 = vpop.eup %6150  ;;  %v3138_v11 = vmul.f32 %v6149_v30, %v7454_v5  ;;  %6160 = vpow2.f32 %v4482_v59  ;;  %v1858_v26 = vadd.f32 %v7410_v13, %v1857_v12  ;;  %v1859_v22 = vpop.f32.mrb[153].mxu1 }
 0x250   : > { %v2823_v53 = vadd.f32 1.0, %v6151_v60  ;;  %v1860_v16 = vpop.f32.mrb[154].mxu1 }
 0x251   : > { %v6153_v33 = vpop.eup %6152  ;;  %v4916_v35 = vpack.c.bf16 %v3138_v11, %v3137_v34  ;;  %v7516_v19 = vadd.f32 %v7422_v55, %v1858_v26  ;;  %v1861_v27 = vadd.f32 %v7410_v13, %v1860_v16  ;;  %v1862_v1 = vpop.f32.mrb[155].mxu1 }
 0x252   : > { %6162 = vrcp.f32 %v2823_v53  ;;  %v2824_v36 = vadd.f32 1.0, %v6153_v33  ;;  %v5297_v55 = vpop.f32.mrb[177].mxu0 }
 0x253   : > { %5041 = vst [vmem:[%s6826_s27 + $0x110] sm:$0xff] %v4916_v35   ;;  %v4483_v31 = vmul.f32 -1.442695, %v7516_v19  ;;  %v7522_v5 = vadd.f32 %v7425_v51, %v1861_v27  ;;  %v7527_v28 = vpop.f32.mrb[178].mxu0 }
 0x254   : > { %v6155_v0 = vpop.eup %6154  ;;  %6164 = vrcp.f32 %v2824_v36  ;;  %v5298_v4 = vpop.f32.mrb[179].mxu0 }
 0x255   : > { %6166 = vpow2.f32 %v4483_v31  ;;  %v4484_v40 = vmul.f32 -1.442695, %v7522_v5  ;;  %v3139_v49 = vmul.f32 %v6155_v0, %v7465_v57  ;;  %v7541_v7 = vpop.f32.mrb[180].mxu0 }
 0x256   : > { %v6157_v24 = vpop.eup %6156  ;;  %v1865_v48 = vpop.f32.mrb[156].mxu1 }
 0x257   : > { %v6159_v41 = vpop.eup %6158  ;;  %v3140_v3 = vmul.f32 %v6157_v24, %v7471_v32  ;;  %6168 = vpow2.f32 %v4484_v40  ;;  %v1866_v51 = vadd.f32 %v7410_v13, %v1865_v48  ;;  %v1867_v42 = vpop.f32.mrb[157].mxu1 }
 0x258   : > { %v2825_v56 = vadd.f32 1.0, %v6159_v41  ;;  %v1868_v29 = vpop.f32.mrb[158].mxu1 }
 0x259   : > { %v6161_v43 = vpop.eup %6160  ;;  %v4921_v39 = vpack.c.bf16 %v3140_v3, %v3139_v49  ;;  %v7533_v45 = vadd.f32 %v7439_v20, %v1866_v51  ;;  %v1869_v62 = vadd.f32 %v7410_v13, %v1868_v29  ;;  %v1870_v52 = vpop.f32.mrb[159].mxu1 }
 0x25a   : > { %6170 = vrcp.f32 %v2825_v56  ;;  %v2826_v23 = vadd.f32 1.0, %v6161_v43  ;;  %v5301_v20 = vpop.f32.mrb[181].mxu0 }
 0x25b   : > { %5042 = vst [vmem:[%s6826_s27 + $0x118] sm:$0xff] %v4921_v39   ;;  %v4485_v57 = vmul.f32 -1.442695, %v7533_v45  ;;  %v7539_v32 = vadd.f32 %v7442_v14, %v1869_v62  ;;  %v7544_v58 = vpop.f32.mrb[182].mxu0 }
 0x25c   : > { %v6163_v61 = vpop.eup %6162  ;;  %6172 = vrcp.f32 %v2826_v23  ;;  %v5302_v60 = vpop.f32.mrb[183].mxu0 }
 0x25d   : > { %6174 = vpow2.f32 %v4485_v57  ;;  %v4486_v17 = vmul.f32 -1.442695, %v7539_v32  ;;  %v3141_v25 = vmul.f32 %v6163_v61, %v7482_v21  ;;  %v7558_v27 = vpop.f32.mrb[184].mxu0 }
 0x25e   : > { %v6165_v15 = vpop.eup %6164  ;;  %v1873_v8 = vpop.f32.mrb[160].mxu1 }
 0x25f   : > { %v6167_v59 = vpop.eup %6166  ;;  %v3142_v30 = vmul.f32 %v6165_v15, %v7488_v54  ;;  %6176 = vpow2.f32 %v4486_v17  ;;  %v1874_v14 = vadd.f32 %v7410_v13, %v1873_v8  ;;  %v1875_v12 = vpop.f32.mrb[161].mxu1 }
 0x260   : > { %v2827_v34 = vadd.f32 1.0, %v6167_v59  ;;  %v1876_v11 = vpop.f32.mrb[162].mxu1 }
 0x261   : > { %v6169_v26 = vpop.eup %6168  ;;  %v4926_v22 = vpack.c.bf16 %v3142_v30, %v3141_v25  ;;  %v7550_v9 = vadd.f32 %v7456_v47, %v1874_v14  ;;  %v1877_v53 = vadd.f32 %v7410_v13, %v1876_v11  ;;  %v1878_v16 = vpop.f32.mrb[163].mxu1 }
 0x262   : > { %6178 = vrcp.f32 %v2827_v34  ;;  %v2828_v33 = vadd.f32 1.0, %v6169_v26  ;;  %v5305_v47 = vpop.f32.mrb[185].mxu0 }
 0x263   : > { %5043 = vst [vmem:[%s6826_s27 + $0x120] sm:$0xff] %v4926_v22   ;;  %v4487_v21 = vmul.f32 -1.442695, %v7550_v9  ;;  %v7556_v54 = vadd.f32 %v7459_v44, %v1877_v53  ;;  %v7561_v0 = vpop.f32.mrb[186].mxu0 }
 0x264   : > { %v6171_v35 = vpop.eup %6170  ;;  %6180 = vrcp.f32 %v2828_v33  ;;  %v5306_v41 = vpop.f32.mrb[187].mxu0 }
 0x265   : > { %6182 = vpow2.f32 %v4487_v21  ;;  %v4488_v1 = vmul.f32 -1.442695, %v7556_v54  ;;  %v3143_v55 = vmul.f32 %v6171_v35, %v7499_v18  ;;  %v7575_v62 = vpop.f32.mrb[188].mxu0 }
 0x266   : > { %v6173_v36 = vpop.eup %6172  ;;  %v1881_v31 = vpop.f32.mrb[164].mxu1 }
 0x267   : > { %v6175_v40 = vpop.eup %6174  ;;  %v3144_v24 = vmul.f32 %v6173_v36, %v7505_v6  ;;  %6184 = vpow2.f32 %v4488_v1  ;;  %v1882_v44 = vadd.f32 %v7410_v13, %v1881_v31  ;;  %v1883_v48 = vpop.f32.mrb[165].mxu1 }
 0x268   : > { %v2829_v49 = vadd.f32 1.0, %v6175_v40  ;;  %v1884_v3 = vpop.f32.mrb[166].mxu1 }
 0x269   : > { %v6177_v51 = vpop.eup %6176  ;;  %v4931_v42 = vpack.c.bf16 %v3144_v24, %v3143_v55  ;;  %v7567_v4 = vadd.f32 %v7473_v10, %v1882_v44  ;;  %v1885_v56 = vadd.f32 %v7410_v13, %v1884_v3  ;;  %v1886_v29 = vpop.f32.mrb[167].mxu1 }
 0x26a   : > { %6186 = vrcp.f32 %v2829_v49  ;;  %v2830_v43 = vadd.f32 1.0, %v6177_v51  ;;  %v5309_v10 = vpop.f32.mrb[189].mxu0 }
 0x26b   : > { %5044 = vst [vmem:[%s6826_s27 + $0x128] sm:$0xff] %v4931_v42   ;;  %v4489_v18 = vmul.f32 -1.442695, %v7567_v4  ;;  %v7573_v6 = vadd.f32 %v7476_v2, %v1885_v56  ;;  %v7578_v61 = vpop.f32.mrb[190].mxu0 }
 0x26c   : > { %v6179_v39 = vpop.eup %6178  ;;  %6188 = vrcp.f32 %v2830_v43  ;;  %v5310_v59 = vpop.f32.mrb[191].mxu0 }
 0x26d   : > { %6190 = vpow2.f32 %v4489_v18  ;;  %v4490_v52 = vmul.f32 -1.442695, %v7573_v6  ;;  %v3145_v20 = vmul.f32 %v6179_v39, %v7516_v19  ;;  %v7592_v53 = vpop.f32.mrb[192].mxu0 }
 0x26e   : > { %v6181_v23 = vpop.eup %6180  ;;  %v1889_v57 = vpop.f32.mrb[168].mxu1 }
 0x26f   : > { %v6183_v17 = vpop.eup %6182  ;;  %v3146_v15 = vmul.f32 %v6181_v23, %v7522_v5  ;;  %6192 = vpow2.f32 %v4490_v52  ;;  %v1890_v2 = vadd.f32 %v7410_v13, %v1889_v57  ;;  %v1891_v8 = vpop.f32.mrb[169].mxu1 }
 0x270   : > { %v2831_v25 = vadd.f32 1.0, %v6183_v17  ;;  %v1892_v30 = vpop.f32.mrb[170].mxu1 }
 0x271   : > { %v6185_v14 = vpop.eup %6184  ;;  %v4936_v12 = vpack.c.bf16 %v3146_v15, %v3145_v20  ;;  %v7584_v60 = vadd.f32 %v7490_v38, %v1890_v2  ;;  %v1893_v34 = vadd.f32 %v7410_v13, %v1892_v30  ;;  %v1894_v11 = vpop.f32.mrb[171].mxu1 }
 0x272   : > { %6194 = vrcp.f32 %v2831_v25  ;;  %v2832_v26 = vadd.f32 1.0, %v6185_v14  ;;  %v5313_v38 = vpop.f32.mrb[193].mxu0 }
 0x273   : > { %5045 = vst [vmem:[%s6826_s27 + $0x130] sm:$0xff] %v4936_v12   ;;  %v4491_v19 = vmul.f32 -1.442695, %v7584_v60  ;;  %v7590_v5 = vadd.f32 %v7493_v37, %v1893_v34  ;;  %v7595_v35 = vpop.f32.mrb[194].mxu0 }
 0x274   : > { %v6187_v22 = vpop.eup %6186  ;;  %6196 = vrcp.f32 %v2832_v26  ;;  %v5314_v40 = vpop.f32.mrb[195].mxu0 }
 0x275   : > { %6198 = vpow2.f32 %v4491_v19  ;;  %v4492_v16 = vmul.f32 -1.442695, %v7590_v5  ;;  %v3147_v47 = vmul.f32 %v6187_v22, %v7533_v45  ;;  %v7609_v56 = vpop.f32.mrb[196].mxu0 }
 0x276   : > { %v6189_v33 = vpop.eup %6188  ;;  %v1897_v21 = vpop.f32.mrb[172].mxu1 }
 0x277   : > { %v6191_v1 = vpop.eup %6190  ;;  %v3148_v36 = vmul.f32 %v6189_v33, %v7539_v32  ;;  %6200 = vpow2.f32 %v4492_v16  ;;  %v1898_v37 = vadd.f32 %v7410_v13, %v1897_v21  ;;  %v1899_v31 = vpop.f32.mrb[173].mxu1 }
 0x278   : > { %v2833_v55 = vadd.f32 1.0, %v6191_v1  ;;  %v1900_v24 = vpop.f32.mrb[174].mxu1 }
 0x279   : > { %v6193_v44 = vpop.eup %6192  ;;  %v4941_v48 = vpack.c.bf16 %v3148_v36, %v3147_v47  ;;  %v7601_v41 = vadd.f32 %v7507_v46, %v1898_v37  ;;  %v1901_v49 = vadd.f32 %v7410_v13, %v1900_v24  ;;  %v1902_v3 = vpop.f32.mrb[175].mxu1 }
 0x27a   : > { %6202 = vrcp.f32 %v2833_v55  ;;  %v2834_v51 = vadd.f32 1.0, %v6193_v44  ;;  %v5317_v46 = vpop.f32.mrb[197].mxu0 }
 0x27b   : > { %5046 = vst [vmem:[%s6826_s27 + $0x138] sm:$0xff] %v4941_v48   ;;  %v4493_v45 = vmul.f32 -1.442695, %v7601_v41  ;;  %v7607_v32 = vadd.f32 %v7510_v63, %v1901_v49  ;;  %v7612_v39 = vpop.f32.mrb[198].mxu0 }
 0x27c   : > { %v6195_v42 = vpop.eup %6194  ;;  %6204 = vrcp.f32 %v2834_v51  ;;  %v5318_v17 = vpop.f32.mrb[199].mxu0 }
 0x27d   : > { %6206 = vpow2.f32 %v4493_v45  ;;  %v4494_v29 = vmul.f32 -1.442695, %v7607_v32  ;;  %v3149_v10 = vmul.f32 %v6195_v42, %v7550_v9  ;;  %v7626_v34 = vpop.f32.mrb[200].mxu0 }
 0x27e   : > { %v6197_v43 = vpop.eup %6196  ;;  %v1905_v18 = vpop.f32.mrb[176].mxu1 }
 0x27f   : > { %v6199_v52 = vpop.eup %6198  ;;  %v3150_v23 = vmul.f32 %v6197_v43, %v7556_v54  ;;  %6208 = vpow2.f32 %v4494_v29  ;;  %v1906_v63 = vadd.f32 %v7410_v13, %v1905_v18  ;;  %v1907_v57 = vpop.f32.mrb[177].mxu1 }
 0x280   : > { %v2835_v20 = vadd.f32 1.0, %v6199_v52  ;;  %v1908_v15 = vpop.f32.mrb[178].mxu1 }
 0x281   : > { %v6201_v2 = vpop.eup %6200  ;;  %v4946_v8 = vpack.c.bf16 %v3150_v23, %v3149_v10  ;;  %v7618_v59 = vadd.f32 %v7524_v50, %v1906_v63  ;;  %v1909_v25 = vadd.f32 %v7410_v13, %v1908_v15  ;;  %v1910_v30 = vpop.f32.mrb[179].mxu1 }
 0x282   : > { %6210 = vrcp.f32 %v2835_v20  ;;  %v2836_v14 = vadd.f32 1.0, %v6201_v2  ;;  %v5321_v50 = vpop.f32.mrb[201].mxu0 }
 0x283   : > { %5047 = vst [vmem:[%s6826_s27 + $0x140] sm:$0xff] %v4946_v8   ;;  %v4495_v9 = vmul.f32 -1.442695, %v7618_v59  ;;  %v7624_v54 = vadd.f32 %v7527_v28, %v1909_v25  ;;  %v7629_v22 = vpop.f32.mrb[202].mxu0 }
 0x284   : > { %v6203_v12 = vpop.eup %6202  ;;  %6212 = vrcp.f32 %v2836_v14  ;;  %v5322_v1 = vpop.f32.mrb[203].mxu0 }
 0x285   : > { %6214 = vpow2.f32 %v4495_v9  ;;  %v4496_v11 = vmul.f32 -1.442695, %v7624_v54  ;;  %v3151_v38 = vmul.f32 %v6203_v12, %v7567_v4  ;;  %v7643_v49 = vpop.f32.mrb[204].mxu0 }
 0x286   : > { %v6205_v26 = vpop.eup %6204  ;;  %v1913_v19 = vpop.f32.mrb[180].mxu1 }
 0x287   : > { %v6207_v16 = vpop.eup %6206  ;;  %v3152_v33 = vmul.f32 %v6205_v26, %v7573_v6  ;;  %6216 = vpow2.f32 %v4496_v11  ;;  %v1914_v28 = vadd.f32 %v7410_v13, %v1913_v19  ;;  %v1915_v21 = vpop.f32.mrb[181].mxu1 }
 0x288   : > { %v2837_v47 = vadd.f32 1.0, %v6207_v16  ;;  %v1916_v36 = vpop.f32.mrb[182].mxu1 }
 0x289   : > { %v6209_v37 = vpop.eup %6208  ;;  %v4951_v31 = vpack.c.bf16 %v3152_v33, %v3151_v38  ;;  %v7635_v40 = vadd.f32 %v7541_v7, %v1914_v28  ;;  %v1917_v55 = vadd.f32 %v7410_v13, %v1916_v36  ;;  %v1918_v24 = vpop.f32.mrb[183].mxu1 }
 0x28a   : > { %6218 = vrcp.f32 %v2837_v47  ;;  %v2838_v44 = vadd.f32 1.0, %v6209_v37  ;;  %v5325_v7 = vpop.f32.mrb[205].mxu0 }
 0x28b   : > { %5048 = vst [vmem:[%s6826_s27 + $0x148] sm:$0xff] %v4951_v31   ;;  %v4497_v4 = vmul.f32 -1.442695, %v7635_v40  ;;  %v7641_v6 = vadd.f32 %v7544_v58, %v1917_v55  ;;  %v7646_v42 = vpop.f32.mrb[206].mxu0 }
 0x28c   : > { %v6211_v48 = vpop.eup %6210  ;;  %6220 = vrcp.f32 %v2838_v44  ;;  %v5326_v52 = vpop.f32.mrb[207].mxu0 }
 0x28d   : > { %6222 = vpow2.f32 %v4497_v4  ;;  %v4498_v3 = vmul.f32 -1.442695, %v7641_v6  ;;  %v3153_v46 = vmul.f32 %v6211_v48, %v7584_v60  ;;  %v7660_v25 = vpop.f32.mrb[208].mxu0 }
 0x28e   : > { %v6213_v51 = vpop.eup %6212  ;;  %v1921_v45 = vpop.f32.mrb[184].mxu1 }
 0x28f   : > { %v6215_v29 = vpop.eup %6214  ;;  %v3154_v43 = vmul.f32 %v6213_v51, %v7590_v5  ;;  %6224 = vpow2.f32 %v4498_v3  ;;  %v1922_v58 = vadd.f32 %v7410_v13, %v1921_v45  ;;  %v1923_v18 = vpop.f32.mrb[185].mxu1 }
 0x290   : > { %v2839_v10 = vadd.f32 1.0, %v6215_v29  ;;  %v1924_v23 = vpop.f32.mrb[186].mxu1 }
 0x291   : > { %v6217_v63 = vpop.eup %6216  ;;  %v4956_v57 = vpack.c.bf16 %v3154_v43, %v3153_v46  ;;  %v7652_v17 = vadd.f32 %v7558_v27, %v1922_v58  ;;  %v1925_v20 = vadd.f32 %v7410_v13, %v1924_v23  ;;  %v1926_v15 = vpop.f32.mrb[187].mxu1 }
 0x292   : > { %6226 = vrcp.f32 %v2839_v10  ;;  %v2840_v2 = vadd.f32 1.0, %v6217_v63  ;;  %v5329_v27 = vpop.f32.mrb[209].mxu0 }
 0x293   : > { %5049 = vst [vmem:[%s6826_s27 + $0x150] sm:$0xff] %v4956_v57   ;;  %v4499_v60 = vmul.f32 -1.442695, %v7652_v17  ;;  %v7658_v5 = vadd.f32 %v7561_v0, %v1925_v20  ;;  %v7663_v12 = vpop.f32.mrb[210].mxu0 }
 0x294   : > { %v6219_v8 = vpop.eup %6218  ;;  %6228 = vrcp.f32 %v2840_v2  ;;  %v5330_v16 = vpop.f32.mrb[211].mxu0 }
 0x295   : > { %6230 = vpow2.f32 %v4499_v60  ;;  %v4500_v30 = vmul.f32 -1.442695, %v7658_v5  ;;  %v3155_v50 = vmul.f32 %v6219_v8, %v7601_v41 }
 0x296   : > { %v6221_v14 = vpop.eup %6220  ;;  %v1929_v9 = vpop.f32.mrb[188].mxu1 }
 0x297   : > { %v6223_v11 = vpop.eup %6222  ;;  %v3156_v26 = vmul.f32 %v6221_v14, %v7607_v32  ;;  %6232 = vpow2.f32 %v4500_v30  ;;  %v1930_v0 = vadd.f32 %v7410_v13, %v1929_v9  ;;  %v1931_v19 = vpop.f32.mrb[189].mxu1 }
 0x298   : > { %v2841_v38 = vadd.f32 1.0, %v6223_v11  ;;  %v1932_v33 = vpop.f32.mrb[190].mxu1 }
 0x299   : > { %v6225_v28 = vpop.eup %6224  ;;  %v4961_v21 = vpack.c.bf16 %v3156_v26, %v3155_v50  ;;  %v7669_v1 = vadd.f32 %v7575_v62, %v1930_v0  ;;  %v1933_v47 = vadd.f32 %v7410_v13, %v1932_v33  ;;  %v1934_v36 = vpop.f32.mrb[191].mxu1 }
 0x29a   : > { %6234 = vrcp.f32 %v2841_v38  ;;  %v2842_v37 = vadd.f32 1.0, %v6225_v28 }
 0x29b   : > { %5050 = vst [vmem:[%s6826_s27 + $0x158] sm:$0xff] %v4961_v21   ;;  %v4501_v41 = vmul.f32 -1.442695, %v7669_v1  ;;  %v7675_v32 = vadd.f32 %v7578_v61, %v1933_v47 }
 0x29c   : > { %v6227_v31 = vpop.eup %6226  ;;  %6236 = vrcp.f32 %v2842_v37 }
 0x29d   : > { %6238 = vpow2.f32 %v4501_v41  ;;  %v4502_v55 = vmul.f32 -1.442695, %v7675_v32  ;;  %v3157_v4 = vmul.f32 %v6227_v31, %v7618_v59 }
 0x29e   : > { %v6229_v24 = vpop.eup %6228  ;;  %v1937_v44 = vpop.f32.mrb[192].mxu1 }
 0x29f   : > { %v6231_v62 = vpop.eup %6230  ;;  %v3158_v48 = vmul.f32 %v6229_v24, %v7624_v54  ;;  %6240 = vpow2.f32 %v4502_v55  ;;  %v1938_v3 = vadd.f32 %v7410_v13, %v1937_v44  ;;  %v1939_v7 = vpop.f32.mrb[193].mxu1 }
 0x2a0   : > { %v2843_v51 = vadd.f32 1.0, %v6231_v62  ;;  %v1940_v61 = vpop.f32.mrb[194].mxu1 }
 0x2a1   : > { %v6233_v45 = vpop.eup %6232  ;;  %v4966_v29 = vpack.c.bf16 %v3158_v48, %v3157_v4  ;;  %v7682_v46 = vadd.f32 %v7592_v53, %v1938_v3  ;;  %v1941_v43 = vadd.f32 %v7410_v13, %v1940_v61  ;;  %v1942_v58 = vpop.f32.mrb[195].mxu1  ;;  %v6292_v3 = vld [vmem:[%s7939_s2] ss:$0 sm:$0xff] }
 0x2a2   : > { %6242 = vrcp.f32 %v2843_v51  ;;  %v2844_v18 = vadd.f32 1.0, %v6233_v45 }
 0x2a3   : > { %5051 = vst [vmem:[%s6826_s27 + $0x160] sm:$0xff] %v4966_v29   ;;  %v4503_v59 = vmul.f32 -1.442695, %v7682_v46  ;;  %v7688_v54 = vadd.f32 %v7595_v35, %v1941_v43 }
 0x2a4   : > { %v6235_v52 = vpop.eup %6234  ;;  %6244 = vrcp.f32 %v2844_v18 }
 0x2a5   : > { %6246 = vpow2.f32 %v4503_v59  ;;  %v4504_v10 = vmul.f32 -1.442695, %v7688_v54  ;;  %v3159_v57 = vmul.f32 %v6235_v52, %v7635_v40 }
 0x2a6   : > { %v6237_v23 = vpop.eup %6236  ;;  %v1945_v63 = vpop.f32.mrb[196].mxu1 }
 0x2a7   : > { %v6239_v53 = vpop.eup %6238  ;;  %v3160_v20 = vmul.f32 %v6237_v23, %v7641_v6  ;;  %6248 = vpow2.f32 %v4504_v10  ;;  %v1946_v15 = vadd.f32 %v7410_v13, %v1945_v63  ;;  %v1947_v2 = vpop.f32.mrb[197].mxu1 }
 0x2a8   : > { %v2845_v60 = vadd.f32 1.0, %v6239_v53  ;;  %v1948_v35 = vpop.f32.mrb[198].mxu1 }
 0x2a9   : > { %v6241_v8 = vpop.eup %6240  ;;  %v4971_v30 = vpack.c.bf16 %v3160_v20, %v3159_v57  ;;  %v7695_v27 = vadd.f32 %v7609_v56, %v1946_v15  ;;  %v1949_v14 = vadd.f32 %v7410_v13, %v1948_v35  ;;  %v1950_v9 = vpop.f32.mrb[199].mxu1 }
 0x2aa   : > { %6250 = vrcp.f32 %v2845_v60  ;;  %v2846_v11 = vadd.f32 1.0, %v6241_v8 }
 0x2ab   : > { %5052 = vst [vmem:[%s6826_s27 + $0x168] sm:$0xff] %v4971_v30   ;;  %v4505_v40 = vmul.f32 -1.442695, %v7695_v27  ;;  %v7701_v6 = vadd.f32 %v7612_v39, %v1949_v14 }
 0x2ac   : > { %v6243_v50 = vpop.eup %6242  ;;  %6252 = vrcp.f32 %v2846_v11 }
 0x2ad   : > { %6254 = vpow2.f32 %v4505_v40  ;;  %v4506_v26 = vmul.f32 -1.442695, %v7701_v6  ;;  %v3161_v16 = vmul.f32 %v6243_v50, %v7652_v17 }
 0x2ae   : > { %v6245_v0 = vpop.eup %6244  ;;  %v1953_v19 = vpop.f32.mrb[200].mxu1 }
 0x2af   : > { %v6247_v56 = vpop.eup %6246  ;;  %v3162_v38 = vmul.f32 %v6245_v0, %v7658_v5  ;;  %6256 = vpow2.f32 %v4506_v26  ;;  %v1954_v33 = vadd.f32 %v7410_v13, %v1953_v19  ;;  %v1955_v28 = vpop.f32.mrb[201].mxu1 }
 0x2b0   : > { %v2847_v21 = vadd.f32 1.0, %v6247_v56  ;;  %v1956_v39 = vpop.f32.mrb[202].mxu1 }
 0x2b1   : > { %v6249_v47 = vpop.eup %6248  ;;  %v4976_v36 = vpack.c.bf16 %v3162_v38, %v3161_v16  ;;  %v7708_v37 = vadd.f32 %v7626_v34, %v1954_v33  ;;  %v1957_v41 = vadd.f32 %v7410_v13, %v1956_v39  ;;  %v1958_v31 = vpop.f32.mrb[203].mxu1 }
 0x2b2   : > { %6258 = vrcp.f32 %v2847_v21  ;;  %v2848_v55 = vadd.f32 1.0, %v6249_v47 }
 0x2b3   : > { %5053 = vst [vmem:[%s6826_s27 + $0x170] sm:$0xff] %v4976_v36   ;;  %v4507_v17 = vmul.f32 -1.442695, %v7708_v37  ;;  %v7714_v5 = vadd.f32 %v7629_v22, %v1957_v41 }
 0x2b4   : > { %v6251_v24 = vpop.eup %6250  ;;  %6260 = vrcp.f32 %v2848_v55 }
 0x2b5   : > { %6262 = vpow2.f32 %v4507_v17  ;;  %v4508_v44 = vmul.f32 -1.442695, %v7714_v5  ;;  %v3163_v13 = vmul.f32 %v6251_v24, %v7669_v1 }
 0x2b6   : > { %v6253_v62 = vpop.eup %6252  ;;  %v1961_v4 = vpop.f32.mrb[204].mxu1 }
 0x2b7   : > { %v6255_v34 = vpop.eup %6254  ;;  %v3164_v48 = vmul.f32 %v6253_v62, %v7675_v32  ;;  %6264 = vpow2.f32 %v4508_v44  ;;  %v1962_v22 = vadd.f32 %v6292_v3, %v1961_v4  ;;  %v1963_v7 = vpop.f32.mrb[205].mxu1 }
 0x2b8   : > { %v2849_v51 = vadd.f32 1.0, %v6255_v34  ;;  %v1964_v61 = vpop.f32.mrb[206].mxu1 }
 0x2b9   : > { %v6257_v45 = vpop.eup %6256  ;;  %v4981_v29 = vpack.c.bf16 %v3164_v48, %v3163_v13  ;;  %v2419_v43 = vadd.f32 %v7643_v49, %v1962_v22  ;;  %v1965_v58 = vadd.f32 %v6292_v3, %v1964_v61  ;;  %v1966_v18 = vpop.f32.mrb[207].mxu1 }
 0x2ba   : > { %6266 = vrcp.f32 %v2849_v51  ;;  %v2850_v59 = vadd.f32 1.0, %v6257_v45 }
 0x2bb   : > { %5054 = vst [vmem:[%s6826_s27 + $0x178] sm:$0xff] %v4981_v29   ;;  %v4509_v1 = vmul.f32 -1.442695, %v2419_v43  ;;  %v2422_v32 = vadd.f32 %v7646_v42, %v1965_v58 }
 0x2bc   : > { %v6259_v52 = vpop.eup %6258  ;;  %6268 = vrcp.f32 %v2850_v59 }
 0x2bd   : > { %6270 = vpow2.f32 %v4509_v1  ;;  %v4510_v10 = vmul.f32 -1.442695, %v2422_v32  ;;  %v3165_v57 = vmul.f32 %v6259_v52, %v7682_v46 }
 0x2be   : > { %v6261_v23 = vpop.eup %6260  ;;  %v1969_v63 = vpop.f32.mrb[208].mxu1 }
 0x2bf   : > { %v6263_v53 = vpop.eup %6262  ;;  %v3166_v49 = vmul.f32 %v6261_v23, %v7688_v54  ;;  %6272 = vpow2.f32 %v4510_v10  ;;  %v1970_v20 = vadd.f32 %v6292_v3, %v1969_v63  ;;  %v1971_v15 = vpop.f32.mrb[209].mxu1 }
 0x2c0   : > { %v2851_v2 = vadd.f32 1.0, %v6263_v53  ;;  %v1972_v60 = vpop.f32.mrb[210].mxu1 }
 0x2c1   : > { %v6265_v35 = vpop.eup %6264  ;;  %v4986_v8 = vpack.c.bf16 %v3166_v49, %v3165_v57  ;;  %v2427_v42 = vadd.f32 %v7660_v25, %v1970_v20  ;;  %v1973_v30 = vadd.f32 %v6292_v3, %v1972_v60  ;;  %v1974_v14 = vpop.f32.mrb[211].mxu1 }
 0x2c2   : > { %6274 = vrcp.f32 %v2851_v2  ;;  %v2852_v9 = vadd.f32 1.0, %v6265_v35 }
 0x2c3   : > { %5055 = vst [vmem:[%s6826_s27 + $0x180] sm:$0xff] %v4986_v8   ;;  %v4511_v11 = vmul.f32 -1.442695, %v2427_v42  ;;  %v2430_v46 = vadd.f32 %v7663_v12, %v1973_v30 }
 0x2c4   : > { %v6267_v40 = vpop.eup %6266  ;;  %6276 = vrcp.f32 %v2852_v9 }
 0x2c5   : > { %6278 = vpow2.f32 %v4511_v11  ;;  %v4512_v54 = vmul.f32 -1.442695, %v2430_v46  ;;  %v3167_v0 = vmul.f32 %v6267_v40, %v7695_v27 }
 0x2c6   : > { %v6269_v50 = vpop.eup %6268 }
 0x2c7   : > { %v6271_v26 = vpop.eup %6270  ;;  %v3168_v19 = vmul.f32 %v6269_v50, %v7701_v6  ;;  %6280 = vpow2.f32 %v4512_v54 }
 0x2c8   : > { %v2853_v25 = vadd.f32 1.0, %v6271_v26 }
 0x2c9   : > { %v6273_v56 = vpop.eup %6272  ;;  %v4991_v16 = vpack.c.bf16 %v3168_v19, %v3167_v0 }
 0x2ca   : > { %6282 = vrcp.f32 %v2853_v25  ;;  %v2854_v38 = vadd.f32 1.0, %v6273_v56 }
 0x2cb   : > { %5056 = vst [vmem:[%s6826_s27 + $0x188] sm:$0xff] %v4991_v16  }
 0x2cc   : > { %v6275_v33 = vpop.eup %6274  ;;  %6284 = vrcp.f32 %v2854_v38 }
 0x2cd   : > { %v3169_v21 = vmul.f32 %v6275_v33, %v7708_v37 }
 0x2ce   : > { %v6277_v12 = vpop.eup %6276 }
 0x2cf   : > { %v6279_v28 = vpop.eup %6278  ;;  %v3170_v39 = vmul.f32 %v6277_v12, %v7714_v5 }
 0x2d0   : > { %v2855_v27 = vadd.f32 1.0, %v6279_v28 }
 0x2d1   : > { %v6281_v47 = vpop.eup %6280  ;;  %v4996_v6 = vpack.c.bf16 %v3170_v39, %v3169_v21 }
 0x2d2   : > { %6286 = vrcp.f32 %v2855_v27  ;;  %v2856_v36 = vadd.f32 1.0, %v6281_v47 }
 0x2d3   : > { %5057 = vst [vmem:[%s6826_s27 + $0x190] sm:$0xff] %v4996_v6  }
 0x2d4   : > { %v6283_v41 = vpop.eup %6282  ;;  %6288 = vrcp.f32 %v2856_v36 }
 0x2d5   : > { %v3171_v55 = vmul.f32 %v6283_v41, %v2419_v43 }
 0x2d6   : > { %v6285_v31 = vpop.eup %6284 }
 0x2d7   : > { %v3172_v17 = vmul.f32 %v6285_v31, %v2422_v32 }
 0x2d9   : > { %v5001_v24 = vpack.c.bf16 %v3172_v17, %v3171_v55 }
 0x2db   : > { %5058 = vst [vmem:[%s6826_s27 + $0x198] sm:$0xff] %v5001_v24  }
 0x2dc   : > { %v6287_v44 = vpop.eup %6286 }
 0x2dd   : > { %v3173_v4 = vmul.f32 %v6287_v44, %v2427_v42  ;;  %3711 = sbr.rel (!%p6429_p4) target bundleno = 831 (0x33f), region = 36 }
 0x2de   : > { %v6289_v62 = vpop.eup %6288 }
 0x2df   : > { %v3174_v37 = vmul.f32 %v6289_v62, %v2430_v46 }
 0x2e1   : > { %v5006_v34 = vpack.c.bf16 %v3174_v37, %v3173_v4 }
 0x2e3   : > { %5059 = vst [vmem:[%s6826_s27 + $0x1a0] sm:$0xff] %v5006_v34  }
 0x2e4   : > { %s7949_s6 = smov (!%p3714_p8, %s3713_s6), 106 }
 0x2e5   : > { %s4619_s11 = sshll.u32 %s7949_s6, 6 }
 0x2e6   : > { %p4622_p9 = scmp.eq.s32.totalorder %s4619_s11, 0 }
 0x2e7   : > { %s7751_s14 = sshrl.u32 (!%p4622_p9), %s7949_s6, 6 }
 0x2e8   : > { %3722 = sbr.rel (%p4622_p9) target bundleno = 831 (0x33f), region = 40  ;;  %p4623_p10 = scmp.le.s32.totalorder (!%p4622_p9), %s7751_s14, 0 }
 0x2ef   : > { %4127 = sbr.rel (%p4623_p10) target bundleno = 810 (0x32a), region = 112  ;;  %s7942_s15 = smov (!%p4623_p10), %s7745_s10 }
 0x2f0   : > { %s7943_s20 = smov (!%p4623_p10), %s6826_s27  ;;  %s7760_s25 = smov (!%p4623_p10), 0  }
 0x2f1   : > { %s7762_s18 = smov (!%p4623_p10), 0  }
 0x2f6 LB: >> { %v3738_v5 = vld [vmem:[%s6355_s20] sm:$0xf]  ;;  %v3740_v13 = vld [vmem:[%s6355_s20 + $0x4] sm:$0xf]  ;;  %v3742_v48 = vld [vmem:[%s6355_s20 + $0x8] sm:$0xf]  ;;  %s6363_s18 = sphi %s7762_s18, %s3732_s18   ;;  %s6359_s25 = sphi %s7760_s25, %s7944_s25   ;;  %s6355_s20 = sphi %s7943_s20, %s3871_s20   ;;  %s6351_s15 = sphi %s7942_s15, %s3872_s15  }
 0x2f7   : >> { %3739 = vst [vmem:[%s6351_s15] sm:$0xf] %v3738_v5  ;;  %3741 = vst [vmem:[%s6351_s15 + $0x4] sm:$0xf] %v3740_v13  ;;  %v3744_v3 = vld [vmem:[%s6355_s20 + $0xc] sm:$0xf]  ;;  %s3866_s21 = sadd.s32 1, %s6359_s25 }
 0x2f8   : >> { %3743 = vst [vmem:[%s6351_s15 + $0x8] sm:$0xf] %v3742_v48  ;;  %v3746_v22 = vld [vmem:[%s6355_s20 + $0x10] sm:$0xf]  ;;  %v3748_v7 = vld [vmem:[%s6355_s20 + $0x14] sm:$0xf]  ;;  %p3867_p11 = scmp.ge.s32.totalorder %s3866_s21, %s7751_s14 }
 0x2f9   : >> { %3745 = vst [vmem:[%s6351_s15 + $0xc] sm:$0xf] %v3744_v3  ;;  %3747 = vst [vmem:[%s6351_s15 + $0x10] sm:$0xf] %v3746_v22  ;;  %v3750_v51 = vld [vmem:[%s6355_s20 + $0x18] sm:$0xf] }
 0x2fa   : >> { %3749 = vst [vmem:[%s6351_s15 + $0x14] sm:$0xf] %v3748_v7  ;;  %v3752_v61 = vld [vmem:[%s6355_s20 + $0x1c] sm:$0xf]  ;;  %v3754_v45 = vld [vmem:[%s6355_s20 + $0x20] sm:$0xf] }
 0x2fb   : >> { %3751 = vst [vmem:[%s6351_s15 + $0x18] sm:$0xf] %v3750_v51  ;;  %3753 = vst [vmem:[%s6351_s15 + $0x1c] sm:$0xf] %v3752_v61  ;;  %v3756_v29 = vld [vmem:[%s6355_s20 + $0x24] sm:$0xf] }
 0x2fc   : >> { %3755 = vst [vmem:[%s6351_s15 + $0x20] sm:$0xf] %v3754_v45  ;;  %v3758_v43 = vld [vmem:[%s6355_s20 + $0x28] sm:$0xf]  ;;  %v3760_v58 = vld [vmem:[%s6355_s20 + $0x2c] sm:$0xf] }
 0x2fd   : >> { %3757 = vst [vmem:[%s6351_s15 + $0x24] sm:$0xf] %v3756_v29  ;;  %3759 = vst [vmem:[%s6351_s15 + $0x28] sm:$0xf] %v3758_v43  ;;  %v3762_v18 = vld [vmem:[%s6355_s20 + $0x30] sm:$0xf] }
 0x2fe   : >> { %3761 = vst [vmem:[%s6351_s15 + $0x2c] sm:$0xf] %v3760_v58  ;;  %v3764_v59 = vld [vmem:[%s6355_s20 + $0x34] sm:$0xf]  ;;  %v3766_v1 = vld [vmem:[%s6355_s20 + $0x38] sm:$0xf] }
 0x2ff   : >> { %3763 = vst [vmem:[%s6351_s15 + $0x30] sm:$0xf] %v3762_v18  ;;  %3765 = vst [vmem:[%s6351_s15 + $0x34] sm:$0xf] %v3764_v59  ;;  %v3768_v32 = vld [vmem:[%s6355_s20 + $0x3c] sm:$0xf] }
 0x300   : >> { %3767 = vst [vmem:[%s6351_s15 + $0x38] sm:$0xf] %v3766_v1  ;;  %v3770_v52 = vld [vmem:[%s6355_s20 + $0x40] sm:$0xf]  ;;  %v3772_v10 = vld [vmem:[%s6355_s20 + $0x44] sm:$0xf] }
 0x301   : >> { %3769 = vst [vmem:[%s6351_s15 + $0x3c] sm:$0xf] %v3768_v32  ;;  %3771 = vst [vmem:[%s6351_s15 + $0x40] sm:$0xf] %v3770_v52  ;;  %v3774_v23 = vld [vmem:[%s6355_s20 + $0x48] sm:$0xf] }
 0x302   : >> { %3773 = vst [vmem:[%s6351_s15 + $0x44] sm:$0xf] %v3772_v10  ;;  %v3776_v63 = vld [vmem:[%s6355_s20 + $0x4c] sm:$0xf]  ;;  %v3778_v53 = vld [vmem:[%s6355_s20 + $0x50] sm:$0xf] }
 0x303   : >> { %3775 = vst [vmem:[%s6351_s15 + $0x48] sm:$0xf] %v3774_v23  ;;  %3777 = vst [vmem:[%s6351_s15 + $0x4c] sm:$0xf] %v3776_v63  ;;  %v3780_v57 = vld [vmem:[%s6355_s20 + $0x54] sm:$0xf] }
 0x304   : >> { %3779 = vst [vmem:[%s6351_s15 + $0x50] sm:$0xf] %v3778_v53  ;;  %v3782_v49 = vld [vmem:[%s6355_s20 + $0x58] sm:$0xf]  ;;  %v3784_v20 = vld [vmem:[%s6355_s20 + $0x5c] sm:$0xf] }
 0x305   : >> { %3781 = vst [vmem:[%s6351_s15 + $0x54] sm:$0xf] %v3780_v57  ;;  %3783 = vst [vmem:[%s6351_s15 + $0x58] sm:$0xf] %v3782_v49  ;;  %v3786_v15 = vld [vmem:[%s6355_s20 + $0x60] sm:$0xf] }
 0x306   : >> { %3785 = vst [vmem:[%s6351_s15 + $0x5c] sm:$0xf] %v3784_v20  ;;  %v3788_v2 = vld [vmem:[%s6355_s20 + $0x64] sm:$0xf]  ;;  %v3790_v60 = vld [vmem:[%s6355_s20 + $0x68] sm:$0xf] }
 0x307   : >> { %3787 = vst [vmem:[%s6351_s15 + $0x60] sm:$0xf] %v3786_v15  ;;  %3789 = vst [vmem:[%s6351_s15 + $0x64] sm:$0xf] %v3788_v2  ;;  %v3792_v35 = vld [vmem:[%s6355_s20 + $0x6c] sm:$0xf] }
 0x308   : >> { %3791 = vst [vmem:[%s6351_s15 + $0x68] sm:$0xf] %v3790_v60  ;;  %v3794_v8 = vld [vmem:[%s6355_s20 + $0x70] sm:$0xf]  ;;  %v3796_v42 = vld [vmem:[%s6355_s20 + $0x74] sm:$0xf] }
 0x309   : >> { %3793 = vst [vmem:[%s6351_s15 + $0x6c] sm:$0xf] %v3792_v35  ;;  %3795 = vst [vmem:[%s6351_s15 + $0x70] sm:$0xf] %v3794_v8  ;;  %v3798_v30 = vld [vmem:[%s6355_s20 + $0x78] sm:$0xf] }
 0x30a   : >> { %3797 = vst [vmem:[%s6351_s15 + $0x74] sm:$0xf] %v3796_v42  ;;  %v3800_v14 = vld [vmem:[%s6355_s20 + $0x7c] sm:$0xf]  ;;  %v3802_v9 = vld [vmem:[%s6355_s20 + $0x80] sm:$0xf] }
 0x30b   : >> { %3799 = vst [vmem:[%s6351_s15 + $0x78] sm:$0xf] %v3798_v30  ;;  %3801 = vst [vmem:[%s6351_s15 + $0x7c] sm:$0xf] %v3800_v14  ;;  %v3804_v11 = vld [vmem:[%s6355_s20 + $0x84] sm:$0xf] }
 0x30c   : >> { %3803 = vst [vmem:[%s6351_s15 + $0x80] sm:$0xf] %v3802_v9  ;;  %v3806_v46 = vld [vmem:[%s6355_s20 + $0x88] sm:$0xf]  ;;  %v3808_v40 = vld [vmem:[%s6355_s20 + $0x8c] sm:$0xf] }
 0x30d   : >> { %3805 = vst [vmem:[%s6351_s15 + $0x84] sm:$0xf] %v3804_v11  ;;  %3807 = vst [vmem:[%s6351_s15 + $0x88] sm:$0xf] %v3806_v46  ;;  %v3810_v54 = vld [vmem:[%s6355_s20 + $0x90] sm:$0xf] }
 0x30e   : >> { %3809 = vst [vmem:[%s6351_s15 + $0x8c] sm:$0xf] %v3808_v40  ;;  %v3812_v50 = vld [vmem:[%s6355_s20 + $0x94] sm:$0xf]  ;;  %v3814_v26 = vld [vmem:[%s6355_s20 + $0x98] sm:$0xf] }
 0x30f   : >> { %3811 = vst [vmem:[%s6351_s15 + $0x90] sm:$0xf] %v3810_v54  ;;  %3813 = vst [vmem:[%s6351_s15 + $0x94] sm:$0xf] %v3812_v50  ;;  %v3816_v0 = vld [vmem:[%s6355_s20 + $0x9c] sm:$0xf] }
 0x310   : >> { %3815 = vst [vmem:[%s6351_s15 + $0x98] sm:$0xf] %v3814_v26  ;;  %v3818_v19 = vld [vmem:[%s6355_s20 + $0xa0] sm:$0xf]  ;;  %v3820_v25 = vld [vmem:[%s6355_s20 + $0xa4] sm:$0xf] }
 0x311   : >> { %3817 = vst [vmem:[%s6351_s15 + $0x9c] sm:$0xf] %v3816_v0  ;;  %3819 = vst [vmem:[%s6351_s15 + $0xa0] sm:$0xf] %v3818_v19  ;;  %v3822_v56 = vld [vmem:[%s6355_s20 + $0xa8] sm:$0xf] }
 0x312   : >> { %3821 = vst [vmem:[%s6351_s15 + $0xa4] sm:$0xf] %v3820_v25  ;;  %v3824_v16 = vld [vmem:[%s6355_s20 + $0xac] sm:$0xf]  ;;  %v3826_v38 = vld [vmem:[%s6355_s20 + $0xb0] sm:$0xf] }
 0x313   : >> { %3823 = vst [vmem:[%s6351_s15 + $0xa8] sm:$0xf] %v3822_v56  ;;  %3825 = vst [vmem:[%s6351_s15 + $0xac] sm:$0xf] %v3824_v16  ;;  %v3828_v33 = vld [vmem:[%s6355_s20 + $0xb4] sm:$0xf] }
 0x314   : >> { %3827 = vst [vmem:[%s6351_s15 + $0xb0] sm:$0xf] %v3826_v38  ;;  %v3830_v12 = vld [vmem:[%s6355_s20 + $0xb8] sm:$0xf]  ;;  %v3832_v28 = vld [vmem:[%s6355_s20 + $0xbc] sm:$0xf] }
 0x315   : >> { %3829 = vst [vmem:[%s6351_s15 + $0xb4] sm:$0xf] %v3828_v33  ;;  %3831 = vst [vmem:[%s6351_s15 + $0xb8] sm:$0xf] %v3830_v12  ;;  %v3834_v21 = vld [vmem:[%s6355_s20 + $0xc0] sm:$0xf] }
 0x316   : >> { %3833 = vst [vmem:[%s6351_s15 + $0xbc] sm:$0xf] %v3832_v28  ;;  %v3836_v39 = vld [vmem:[%s6355_s20 + $0xc4] sm:$0xf]  ;;  %v3838_v27 = vld [vmem:[%s6355_s20 + $0xc8] sm:$0xf] }
 0x317   : >> { %3835 = vst [vmem:[%s6351_s15 + $0xc0] sm:$0xf] %v3834_v21  ;;  %3837 = vst [vmem:[%s6351_s15 + $0xc4] sm:$0xf] %v3836_v39  ;;  %v3840_v47 = vld [vmem:[%s6355_s20 + $0xcc] sm:$0xf] }
 0x318   : >> { %3839 = vst [vmem:[%s6351_s15 + $0xc8] sm:$0xf] %v3838_v27  ;;  %v3842_v6 = vld [vmem:[%s6355_s20 + $0xd0] sm:$0xf]  ;;  %v3844_v36 = vld [vmem:[%s6355_s20 + $0xd4] sm:$0xf] }
 0x319   : >> { %3841 = vst [vmem:[%s6351_s15 + $0xcc] sm:$0xf] %v3840_v47  ;;  %3843 = vst [vmem:[%s6351_s15 + $0xd0] sm:$0xf] %v3842_v6  ;;  %v3846_v41 = vld [vmem:[%s6355_s20 + $0xd8] sm:$0xf] }
 0x31a   : >> { %3845 = vst [vmem:[%s6351_s15 + $0xd4] sm:$0xf] %v3844_v36  ;;  %v3848_v31 = vld [vmem:[%s6355_s20 + $0xdc] sm:$0xf]  ;;  %v3850_v55 = vld [vmem:[%s6355_s20 + $0xe0] sm:$0xf] }
 0x31b   : >> { %3847 = vst [vmem:[%s6351_s15 + $0xd8] sm:$0xf] %v3846_v41  ;;  %3849 = vst [vmem:[%s6351_s15 + $0xdc] sm:$0xf] %v3848_v31  ;;  %v3852_v17 = vld [vmem:[%s6355_s20 + $0xe4] sm:$0xf] }
 0x31c   : >> { %3851 = vst [vmem:[%s6351_s15 + $0xe0] sm:$0xf] %v3850_v55  ;;  %v3854_v24 = vld [vmem:[%s6355_s20 + $0xe8] sm:$0xf]  ;;  %v3856_v44 = vld [vmem:[%s6355_s20 + $0xec] sm:$0xf] }
 0x31d   : >> { %3853 = vst [vmem:[%s6351_s15 + $0xe4] sm:$0xf] %v3852_v17  ;;  %3855 = vst [vmem:[%s6351_s15 + $0xe8] sm:$0xf] %v3854_v24  ;;  %v3858_v62 = vld [vmem:[%s6355_s20 + $0xf0] sm:$0xf] }
 0x31e   : >> { %3857 = vst [vmem:[%s6351_s15 + $0xec] sm:$0xf] %v3856_v44  ;;  %v3860_v4 = vld [vmem:[%s6355_s20 + $0xf4] sm:$0xf]  ;;  %v3862_v37 = vld [vmem:[%s6355_s20 + $0xf8] sm:$0xf] }
 0x31f   : >> { %3859 = vst [vmem:[%s6351_s15 + $0xf0] sm:$0xf] %v3858_v62  ;;  %3861 = vst [vmem:[%s6351_s15 + $0xf4] sm:$0xf] %v3860_v4  ;;  %v3864_v34 = vld [vmem:[%s6355_s20 + $0xfc] sm:$0xf] }
 0x320   : >> { %3863 = vst [vmem:[%s6351_s15 + $0xf8] sm:$0xf] %v3862_v37  ;;  %3865 = vst [vmem:[%s6351_s15 + $0xfc] sm:$0xf] %v3864_v34  ;;  %s7951_s21 = smov (%p3867_p11, %s3866_s21), 0  ;;  %s3732_s18 = sadd.s32 1, %s6363_s18  }
 0x321   : >> { %s4624_s22 = sshll.u32 %s7951_s21, 8  ;;  %p3731_p12 = scmp.ge.s32.totalorder %s3732_s18, %s7751_s14 }
 0x322   : >> { %s3871_s20 = scalar_lea.vmem %s6826_s27, %s4624_s22 [#allocation2]   ;;  %s3872_s15 = scalar_lea.vmem %s7745_s10, %s4624_s22  }
 0x323   : >> { %s7944_s25 = smov %s7951_s21  ;;  %3734 = sbr.rel (!%p3731_p12) target bundleno = 758 (0x2f6), region = 118 }
 0x32a PF: > { %s7919_s23 = sand.u32 63, %s7949_s6   ;;  %s4741_s24 = sshll.u32 %s7751_s14, 8 }
 0x32b   : > { %s3877_s26 = scalar_lea.vmem %s6826_s27, %s4741_s24 [#allocation2]   ;;  %s3879_s12 = scalar_lea.vmem %s7745_s10, %s4741_s24  }
 0x32c   : > { %p4629_p13 = scmp.le.s32.totalorder %s7919_s23, 0 }
 0x32d   : > { %s6365_s28 = smov (!%p4629_p13), %s3879_s12   ;;  %s6369_s29 = smov (!%p4629_p13), %s3877_s26  }
 0x32e   : > { %4141 = sbr.rel (%p4629_p13) target bundleno = 831 (0x33f), region = 123  ;;  %s6373_s17 = smov (!%p4629_p13), 0  }
 0x32f   : > { %s6377_s30 = smov (!%p4629_p13), 0  }
 0x335 LB: >> { %v3889_v5 = vld [vmem:[%s6371_s29] sm:$0xf]  ;;  %s3891_s4 = sadd.s32 1, %s6375_s17  ;;  %s3883_s30 = sadd.s32 1, %s6379_s30   ;;  %s6379_s30 = sphi %s6377_s30, %s3883_s30   ;;  %s6375_s17 = sphi %s6373_s17, %s6374_s17   ;;  %s6371_s29 = sphi %s6369_s29, %s3896_s29   ;;  %s6367_s28 = sphi %s6365_s28, %s3897_s28  }
 0x336   : >> { %3890 = vst [vmem:[%s6367_s28] sm:$0xf] %v3889_v5  ;;  %p3892_p0 = scmp.ge.s32.totalorder %s3891_s4, %s7919_s23  ;;  %p3882_p1 = scmp.ge.s32.totalorder %s3883_s30, %s7919_s23 }
 0x338   : >> { %s7953_s4 = smov (%p3892_p0, %s3891_s4), 0  ;;  %3885 = sbr.rel (!%p3882_p1) target bundleno = 821 (0x335), region = 129 }
 0x339   : >> { %s4630_s27 = sshll.u32 %s7953_s4, 2  ;;  %s6374_s17 = smov %s7953_s4  }
 0x33a   : >> { %s3896_s29 = scalar_lea.vmem %s3877_s26, %s4630_s27 [#allocation2]   ;;  %s3897_s28 = scalar_lea.vmem %s3879_s12, %s4630_s27  }
 0x33f PF: > { %p10_p2 = scmp.ge.s32.totalorder %s6419_s16, 4   ;;  %s7945_s12 = smov %s6343_s13 }
 0x340   : > { %s7946_s13 = smov %s6427_s19  ;;  %s7947_s14 = smov %s6419_s16 }
 0x341   :  { %12 = sbr.rel (!%p10_p2) target bundleno = 2 (0x2), region = 140 }

// kernel: stem_layer_forward.7
= control target key start
LH: loop header
LB: loop body
LE: loop exit
PB: predicated region body
PF: predicated region fallthrough
CT: control target
= control target key end

     0   :  { %s5461_s12 = smov 0   ;;  %s5463_s13 = smov 0   ;;  %s6743_s0 = inlined_call_operand.vmem [shape: bf16[1458,288], index: 0, kind: input, shape index: {}]   ;;  %s6744_s1 = inlined_call_operand.vmem [shape: bf16[288,128], index: 1, kind: input, shape index: {}]   ;;  %s6745_s2 = inlined_call_operand.vmem [shape: f32[1,128], index: 2, kind: input, shape index: {}]   ;;  %s6746_s3 = inlined_call_operand.vmem [shape: bf16[1458,128], index: 3, kind: output, shape index: {}]  }
   0x1   :  { %s5465_s14 = smov 0  }
   0x2 LB: > { %s5474_s15 = sadd.s32 4294967295, %s5406_s14   ;;  %s5476_s16 = sadd.s32 1, %s5406_s14   ;;  %s5406_s14 = sphi %s5465_s14, %s6769_s14   ;;  %s5402_s13 = sphi %s5463_s13, %s6768_s13   ;;  %s5398_s12 = sphi %s5461_s12, %s6767_s12  }
   0x3   : > { %s85_s17 = ssub.s32 %s5406_s14, %s5476_s16  ;;  %s88_s18 = sadd.s32 1, %s5402_s13 }
   0x4   : > { %p86_p0 = scmp.eq.s32.totalorder %s85_s17, 0  ;;  %p98_p1 = scmp.ne.s32.totalorder %s5402_s13, %s5398_s12 }
   0x5   : > { %p99_p2 = scmp.eq.s32.totalorder %s5474_s15, 1  ;;  %p3740_p3 = scmp.ge.s32.totalorder %s5406_s14, 1 }
   0x6   : > { %s5484_s19 = scalar_select %p86_p0, %s5402_s13, %s88_s18  }
   0x7   : > { %p5486_p4 = por %p99_p2, %p98_p1  ;;  %p149_p5 = scmp.lt.s32.totalorder %s5406_s14, 3 }
   0x9   : > { %p150_p6 = pnand %p3740_p3, %p149_p5 }
   0xb   : > { %153 = sbr.rel (%p150_p6) target bundleno = 715 (0x2cb), region = 32 }
  0x12   : > { %v4781_v0 = vld [vmem:[%s6744_s1] sm:$0xff]   ;;  %v5440_v1 = vmov 0   ;;  %s5496_s23 = smul.u32 92, %s5474_s15  ;;  %v4782_v2 = vld [vmem:[%s6744_s1 + $0x8] sm:$0xff]   ;;  %v4783_v3 = vld [vmem:[%s6744_s1 + $0x10] sm:$0xff]   ;;  %vm1226_vm0 = vcmask 261120  }
  0x13   : > { %1365 = vmatprep.subr.bf16.mxu0 %v5440_v1  ;;  %4658 = vmatprep.subr.bf16.mxu1 %v5440_v1  ;;  %v4784_v4 = vld [vmem:[%s6744_s1 + $0x18] sm:$0xff]   ;;  %v4785_v5 = vld [vmem:[%s6744_s1 + $0x20] sm:$0xff]   ;;  %v4786_v7 = vld [vmem:[%s6744_s1 + $0x28] sm:$0xff]   ;;  %s175_s25 = sand.u32 1, %s5398_s12   ;;  %s4236_s30 = smul.u32 (%p5486_p4), 368, %s5474_s15 }
  0x14   : > { %1366 = vmatpush1.bf16.msra.mxu0 %v4781_v0  ;;  %4674 = vmatpush1.bf16.msra.mxu1 %v4781_v0  ;;  %p184_p7 = scmp.lt.s32.totalorder %s5496_s23, 182  ;;  %v4787_v9 = vld [vmem:[%s6744_s1 + $0x30] sm:$0xff]   ;;  %v4788_v10 = vld [vmem:[%s6744_s1 + $0x38] sm:$0xff]   ;;  %v4789_v11 = vld [vmem:[%s6744_s1 + $0x40] sm:$0xff]   ;;  %s5953_s12 = smul.u32 368, %s175_s25 }
  0x15   : > { %1367 = vmatprep.subr.bf16.mxu0 %v5440_v1  ;;  %4659 = vmatprep.subr.bf16.mxu1 %v5440_v1  ;;  %v4790_v12 = vld [vmem:[%s6744_s1 + $0x48] sm:$0xff]   ;;  %v4791_v13 = vld [vmem:[%s6744_s1 + $0x50] sm:$0xff]   ;;  %v4792_v14 = vld [vmem:[%s6744_s1 + $0x58] sm:$0xff]   ;;  %s3279_s29 = ssub.s32 (%p5486_p4), 183, %s5496_s23  ;;  %s6551_s6 = scalar_lea.vmem (%p5486_p4), %s6746_s3, %s4236_s30  }
  0x16   : > { %s185_s28 = scalar_select %p184_p7, %s5496_s23, 182  ;;  %v4793_v15 = vld [vmem:[%s6744_s1 + $0x60] sm:$0xff]   ;;  %v4794_v16 = vld [vmem:[%s6744_s1 + $0x68] sm:$0xff]   ;;  %v4795_v17 = vld [vmem:[%s6744_s1 + $0x70] sm:$0xff]  }
  0x17   : > { %v4796_v18 = vld [vmem:[%s6744_s1 + $0x78] sm:$0xff]   ;;  %v4809_v19 = vld [vmem:[%s6744_s1 + $0x80] sm:$0xff]   ;;  %v4840_v24 = vld [vmem:[%s6744_s1 + $0x88] sm:$0xff]   ;;  %s5983_s26 = scalar_lea.vmem [#allocation2], %s5953_s12   ;;  %p3280_p8 = scmp.lt.s32.totalorder (%p5486_p4), %s3279_s29, 92 }
  0x18   : > { %1368 = vmatpush1.bf16.msra.mxu0 %v4782_v2  ;;  %4675 = vmatpush1.bf16.msra.mxu1 %v4782_v2  ;;  %s4691_s4 = smul.u32 12, %s185_s28 }
  0x19   : > { %1369 = vmatprep.subr.bf16.mxu0 %v5440_v1  ;;  %4660 = vmatprep.subr.bf16.mxu1 %v5440_v1 }
  0x1a   : > { %s5521_s9 = scalar_lea.vmem %s6743_s0, %s4691_s4 }
  0x1b   : > { %v4799_v6 = vld [vmem:[%s5521_s9 + $0x4] ss:$12 sps:$4 sm:$0xff]   ;;  %v4802_v8 = vld [vmem:[%s5521_s9 + $0x34c] ss:$12 sps:$4 sm:$0xff]   ;;  %v4800_v21 = vld [vmem:[%s5521_s9 + $0x348] ss:$12 sps:$4 sm:$0xff]  }
  0x1c   : > { %1370 = vmatpush1.bf16.msra.mxu0 %v4783_v3  ;;  %4676 = vmatpush1.bf16.msra.mxu1 %v4783_v3  ;;  %v4797_v20 = vld [vmem:[%s5521_s9] ss:$12 sps:$4 sm:$0xff]   ;;  %v4803_v22 = vld [vmem:[%s5521_s9 + $0x1c] ss:$12 sps:$4 sm:$0xff]   ;;  %v4805_v23 = vld [vmem:[%s5521_s9 + $0x364] ss:$12 sps:$4 sm:$0xff]  }
  0x1d   : > { %1371 = vmatprep.subr.bf16.mxu0 %v5440_v1  ;;  %4661 = vmatprep.subr.bf16.mxu1 %v5440_v1  ;;  %v4807_v25 = vld [vmem:[%s5521_s9 + $0x18] ss:$12 sps:$4 sm:$0xff]   ;;  %v4808_v26 = vld [vmem:[%s5521_s9 + $0x360] ss:$12 sps:$4 sm:$0xff]   ;;  %v4812_v28 = vld [vmem:[%s5521_s9 + $0x37c] ss:$12 sps:$4 sm:$0xff]  }
  0x1e   : > { %1397 = vmatprep.mubr.bf16.mxu0 %v4799_v6  ;;  %1677 = vmatprep.mubr.bf16.mxu1 %v4802_v8  ;;  %v4810_v27 = vld [vmem:[%s5521_s9 + $0x34] ss:$12 sps:$4 sm:$0xff]   ;;  %v4814_v29 = vld [vmem:[%s5521_s9 + $0x30] ss:$12 sps:$4 sm:$0xff]   ;;  %v4815_v30 = vld [vmem:[%s5521_s9 + $0x378] ss:$12 sps:$4 sm:$0xff]  }
  0x1f   : > { %v4816_v31 = vld [vmem:[%s5521_s9 + $0x4c] ss:$12 sps:$4 sm:$0xff]   ;;  %v4818_v32 = vld [vmem:[%s5521_s9 + $0x394] ss:$12 sps:$4 sm:$0xff]   ;;  %v4821_v34 = vld [vmem:[%s5521_s9 + $0x390] ss:$12 sps:$4 sm:$0xff]  }
  0x20   : > { %1372 = vmatpush1.bf16.msra.mxu0 %v4784_v4  ;;  %4677 = vmatpush1.bf16.msra.mxu1 %v4784_v4  ;;  %v4820_v33 = vld [vmem:[%s5521_s9 + $0x48] ss:$12 sps:$4 sm:$0xff]   ;;  %v4822_v35 = vld [vmem:[%s5521_s9 + $0x64] ss:$12 sps:$4 sm:$0xff]   ;;  %v4824_v36 = vld [vmem:[%s5521_s9 + $0x3ac] ss:$12 sps:$4 sm:$0xff]  }
  0x21   : > { %1373 = vmatprep.subr.bf16.mxu0 %v5440_v1  ;;  %4662 = vmatprep.subr.bf16.mxu1 %v5440_v1  ;;  %v4826_v37 = vld [vmem:[%s5521_s9 + $0x60] ss:$12 sps:$4 sm:$0xff]   ;;  %v4827_v38 = vld [vmem:[%s5521_s9 + $0x3a8] ss:$12 sps:$4 sm:$0xff]   ;;  %v4830_v40 = vld [vmem:[%s5521_s9 + $0x3c4] ss:$12 sps:$4 sm:$0xff]  }
  0x22   : > { %v4828_v39 = vld [vmem:[%s5521_s9 + $0x7c] ss:$12 sps:$4 sm:$0xff]   ;;  %v4832_v41 = vld [vmem:[%s5521_s9 + $0x78] ss:$12 sps:$4 sm:$0xff]   ;;  %v4833_v42 = vld [vmem:[%s5521_s9 + $0x3c0] ss:$12 sps:$4 sm:$0xff]  }
  0x23   : > { %v4834_v43 = vld [vmem:[%s5521_s9 + $0x94] ss:$12 sps:$4 sm:$0xff]   ;;  %v4836_v44 = vld [vmem:[%s5521_s9 + $0x3dc] ss:$12 sps:$4 sm:$0xff]   ;;  %v4839_v46 = vld [vmem:[%s5521_s9 + $0x3d8] ss:$12 sps:$4 sm:$0xff]  }
  0x24   : > { %1374 = vmatpush1.bf16.msra.mxu0 %v4785_v5  ;;  %4678 = vmatpush1.bf16.msra.mxu1 %v4785_v5  ;;  %v4838_v45 = vld [vmem:[%s5521_s9 + $0x90] ss:$12 sps:$4 sm:$0xff]   ;;  %v4841_v47 = vld [vmem:[%s5521_s9 + $0xac] ss:$12 sps:$4 sm:$0xff]   ;;  %v4843_v48 = vld [vmem:[%s5521_s9 + $0x3f4] ss:$12 sps:$4 sm:$0xff]  }
  0x25   : > { %1375 = vmatprep.subr.bf16.mxu0 %v5440_v1  ;;  %4663 = vmatprep.subr.bf16.mxu1 %v5440_v1  ;;  %v4845_v49 = vld [vmem:[%s5521_s9 + $0xa8] ss:$12 sps:$4 sm:$0xff]   ;;  %v4846_v50 = vld [vmem:[%s5521_s9 + $0x3f0] ss:$12 sps:$4 sm:$0xff]   ;;  %v4849_v52 = vld [vmem:[%s5521_s9 + $0x40c] ss:$12 sps:$4 sm:$0xff]  }
  0x26   : > { %v4847_v51 = vld [vmem:[%s5521_s9 + $0xc4] ss:$12 sps:$4 sm:$0xff]   ;;  %v4851_v53 = vld [vmem:[%s5521_s9 + $0xc0] ss:$12 sps:$4 sm:$0xff]   ;;  %v4852_v54 = vld [vmem:[%s5521_s9 + $0x408] ss:$12 sps:$4 sm:$0xff]  }
  0x27   : > { %v4853_v55 = vld [vmem:[%s5521_s9 + $0xdc] ss:$12 sps:$4 sm:$0xff]   ;;  %v4855_v56 = vld [vmem:[%s5521_s9 + $0x424] ss:$12 sps:$4 sm:$0xff]   ;;  %v4858_v58 = vld [vmem:[%s5521_s9 + $0x420] ss:$12 sps:$4 sm:$0xff]  }
  0x28   : > { %1376 = vmatpush1.bf16.msra.mxu0 %v4786_v7  ;;  %4679 = vmatpush1.bf16.msra.mxu1 %v4786_v7  ;;  %v4857_v57 = vld [vmem:[%s5521_s9 + $0xd8] ss:$12 sps:$4 sm:$0xff]   ;;  %v4859_v59 = vld [vmem:[%s5521_s9 + $0xf4] ss:$12 sps:$4 sm:$0xff]   ;;  %v4861_v60 = vld [vmem:[%s5521_s9 + $0x43c] ss:$12 sps:$4 sm:$0xff]  }
  0x29   : > { %1377 = vmatprep.subr.bf16.mxu0 %v5440_v1  ;;  %4664 = vmatprep.subr.bf16.mxu1 %v5440_v1  ;;  %v4863_v61 = vld [vmem:[%s5521_s9 + $0xf0] ss:$12 sps:$4 sm:$0xff]   ;;  %v4864_v62 = vld [vmem:[%s5521_s9 + $0x438] ss:$12 sps:$4 sm:$0xff]   ;;  %v4867_v0 = vld [vmem:[%s5521_s9 + $0x8] ss:$12 sps:$4 sm:$0xff]  }
  0x2a   : > { %v4865_v63 = vld [vmem:[%s5521_s9 + $0x10c] ss:$12 sps:$4 sm:$0xff]   ;;  %v4870_v3 = vld [vmem:[%s5521_s9 + $0x124] ss:$12 sps:$4 sm:$0xff]   ;;  %v4875_v7 = vld [vmem:[%s5521_s9 + $0x13c] ss:$12 sps:$4 sm:$0xff]  }
  0x2b   : > { %v4869_v2 = vld [vmem:[%s5521_s9 + $0x20] ss:$12 sps:$4 sm:$0xff]   ;;  %v4872_v4 = vld [vmem:[%s5521_s9 + $0x38] ss:$12 sps:$4 sm:$0xff]   ;;  %v4874_v6 = vld [vmem:[%s5521_s9 + $0x50] ss:$12 sps:$4 sm:$0xff]  }
  0x2c   : > { %1378 = vmatpush1.bf16.msra.mxu0 %v4787_v9  ;;  %4680 = vmatpush1.bf16.msra.mxu1 %v4787_v9  ;;  %v4873_v5 = vld [vmem:[%s5521_s9 + $0x120] ss:$12 sps:$4 sm:$0xff]   ;;  %v4877_v8 = vld [vmem:[%s5521_s9 + $0x68] ss:$12 sps:$4 sm:$0xff]   ;;  %v4878_v9 = vld [vmem:[%s5521_s9 + $0x138] ss:$12 sps:$4 sm:$0xff]  }
  0x2d   : > { %1379 = vmatprep.subr.bf16.mxu0 %v5440_v1  ;;  %4665 = vmatprep.subr.bf16.mxu1 %v5440_v1 }
  0x30   : > { %1380 = vmatpush1.bf16.msra.mxu0 %v4788_v10  ;;  %4681 = vmatpush1.bf16.msra.mxu1 %v4788_v10  ;;  %v4879_v10 = vld [vmem:[%s5521_s9 + $0x80] ss:$12 sps:$4 sm:$0xff]  }
  0x31   : > { %1381 = vmatprep.subr.bf16.mxu0 %v5440_v1  ;;  %4666 = vmatprep.subr.bf16.mxu1 %v5440_v1 }
  0x34   : > { %1382 = vmatpush1.bf16.msra.mxu0 %v4789_v11  ;;  %4682 = vmatpush1.bf16.msra.mxu1 %v4789_v11  ;;  %v4880_v11 = vld [vmem:[%s5521_s9 + $0x154] ss:$12 sps:$4 sm:$0xff]  }
  0x35   : > { %1383 = vmatprep.subr.bf16.mxu0 %v5440_v1  ;;  %4667 = vmatprep.subr.bf16.mxu1 %v5440_v1 }
  0x38   : > { %1384 = vmatpush1.bf16.msra.mxu0 %v4790_v12  ;;  %4683 = vmatpush1.bf16.msra.mxu1 %v4790_v12  ;;  %v4882_v12 = vld [vmem:[%s5521_s9 + $0x98] ss:$12 sps:$4 sm:$0xff]  }
  0x39   : > { %1385 = vmatprep.subr.bf16.mxu0 %v5440_v1  ;;  %4668 = vmatprep.subr.bf16.mxu1 %v5440_v1 }
  0x3c   : > { %1386 = vmatpush1.bf16.msra.mxu0 %v4791_v13  ;;  %4684 = vmatpush1.bf16.msra.mxu1 %v4791_v13  ;;  %v4883_v13 = vld [vmem:[%s5521_s9 + $0x150] ss:$12 sps:$4 sm:$0xff]  }
  0x3d   : > { %1387 = vmatprep.subr.bf16.mxu0 %v5440_v1  ;;  %4669 = vmatprep.subr.bf16.mxu1 %v5440_v1 }
  0x40   : > { %1388 = vmatpush1.bf16.msra.mxu0 %v4792_v14  ;;  %4685 = vmatpush1.bf16.msra.mxu1 %v4792_v14  ;;  %v4884_v14 = vld [vmem:[%s5521_s9 + $0xb0] ss:$12 sps:$4 sm:$0xff]  }
  0x41   : > { %1389 = vmatprep.subr.bf16.mxu0 %v5440_v1  ;;  %4670 = vmatprep.subr.bf16.mxu1 %v5440_v1 }
  0x44   : > { %1390 = vmatpush1.bf16.msra.mxu0 %v4793_v15  ;;  %4686 = vmatpush1.bf16.msra.mxu1 %v4793_v15  ;;  %v4885_v15 = vld [vmem:[%s5521_s9 + $0x16c] ss:$12 sps:$4 sm:$0xff]  }
  0x45   : > { %1391 = vmatprep.subr.bf16.mxu0 %v5440_v1  ;;  %4671 = vmatprep.subr.bf16.mxu1 %v5440_v1 }
  0x48   : > { %1392 = vmatpush1.bf16.msra.mxu0 %v4794_v16  ;;  %4687 = vmatpush1.bf16.msra.mxu1 %v4794_v16  ;;  %v4887_v16 = vld [vmem:[%s5521_s9 + $0xc8] ss:$12 sps:$4 sm:$0xff]  }
  0x49   : > { %1393 = vmatprep.subr.bf16.mxu0 %v5440_v1  ;;  %4672 = vmatprep.subr.bf16.mxu1 %v5440_v1 }
  0x4c   : > { %1394 = vmatpush1.bf16.msra.mxu0 %v4795_v17  ;;  %4688 = vmatpush1.bf16.msra.mxu1 %v4795_v17  ;;  %v4888_v17 = vld [vmem:[%s5521_s9 + $0x168] ss:$12 sps:$4 sm:$0xff]  }
  0x4d   : > { %1395 = vmatprep.subr.bf16.mxu0 %v5440_v1  ;;  %4673 = vmatprep.subr.bf16.mxu1 %v5440_v1  ;;  %v4868_v1 = vld [vmem:[%s5521_s9 + $0x108] ss:$12 sps:$4 sm:$0xff]  }
  0x50   : > { %1396 = vmatpush1.bf16.msra.mxu0 %v4796_v18  ;;  %4689 = vmatpush1.bf16.msra.mxu1 %v4796_v18  ;;  %v4889_v18 = vld [vmem:[%s5521_s9 + $0xe0] ss:$12 sps:$4 sm:$0xff]  }
  0x51   : > { %4562 = vmatprep.subr.bf16.mxu1 %v4809_v19 }
  0x53   : > { %1398 = vmatmul.mubr.bf16.vlgmr.msra.gmra.mrb[0].mxu0 %v4797_v20  ;;  %1678 = vmatmul.mubr.bf16.vlgmr.msra.gmra.mrb[0].mxu1 %v4800_v21  ;;  %v4892_v20 = vld [vmem:[%s5521_s9 + $0xf8] ss:$12 sps:$4 sm:$0xff]   ;;  %v4893_v21 = vld [vmem:[%s5521_s9 + $0x180] ss:$12 sps:$4 sm:$0xff]  }
  0x54   : > { %1405 = vmatprep.mubr.bf16.mxu0 %v4803_v22  ;;  %1685 = vmatprep.mubr.bf16.mxu1 %v4805_v23  ;;  %v4894_v22 = vld [vmem:[%s5521_s9 + $0x110] ss:$12 sps:$4 sm:$0xff]  }
  0x55   : > { %4563 = vmatpush3.bf16.msra.mxu1 %v4809_v19  ;;  %v4890_v19 = vld [vmem:[%s5521_s9 + $0x184] ss:$12 sps:$4 sm:$0xff]   ;;  %v4895_v23 = vld [vmem:[%s5521_s9 + $0x19c] ss:$12 sps:$4 sm:$0xff]  }
  0x56   : > { %4564 = vmatprep.subr.bf16.mxu1 %v4840_v24 }
  0x59   : > { %4565 = vmatpush3.bf16.msra.mxu1 %v4840_v24  ;;  %v4897_v24 = vld [vmem:[%s5521_s9 + $0x128] ss:$12 sps:$4 sm:$0xff]  }
  0x5b   : > { %1406 = vmatmul.mubr.bf16.gmra.mrb[4].mxu0 %v4807_v25  ;;  %1686 = vmatmul.mubr.bf16.gmra.mrb[4].mxu1 %v4808_v26  ;;  %v4898_v25 = vld [vmem:[%s5521_s9 + $0x198] ss:$12 sps:$4 sm:$0xff]   ;;  %v4899_v26 = vld [vmem:[%s5521_s9 + $0x140] ss:$12 sps:$4 sm:$0xff]  }
  0x5c   : > { %1413 = vmatprep.mubr.bf16.mxu0 %v4810_v27  ;;  %1693 = vmatprep.mubr.bf16.mxu1 %v4812_v28  ;;  %v4900_v27 = vld [vmem:[%s5521_s9 + $0x1b4] ss:$12 sps:$4 sm:$0xff]   ;;  %v4902_v28 = vld [vmem:[%s5521_s9 + $0x158] ss:$12 sps:$4 sm:$0xff]  }
  0x63   : > { %1414 = vmatmul.mubr.bf16.gmra.mrb[8].mxu0 %v4814_v29  ;;  %1694 = vmatmul.mubr.bf16.gmra.mrb[8].mxu1 %v4815_v30  ;;  %v4903_v29 = vld [vmem:[%s5521_s9 + $0x1b0] ss:$12 sps:$4 sm:$0xff]  }
  0x64   : > { %1421 = vmatprep.mubr.bf16.mxu0 %v4816_v31  ;;  %1701 = vmatprep.mubr.bf16.mxu1 %v4818_v32  ;;  %v4904_v30 = vld [vmem:[%s5521_s9 + $0x170] ss:$12 sps:$4 sm:$0xff]   ;;  %v4905_v31 = vld [vmem:[%s5521_s9 + $0x1cc] ss:$12 sps:$4 sm:$0xff]   ;;  %v4907_v32 = vld [vmem:[%s5521_s9 + $0x188] ss:$12 sps:$4 sm:$0xff]  }
  0x6b   : > { %1422 = vmatmul.mubr.bf16.gmra.mrb[12].mxu0 %v4820_v33  ;;  %1702 = vmatmul.mubr.bf16.gmra.mrb[12].mxu1 %v4821_v34  ;;  %v4908_v33 = vld [vmem:[%s5521_s9 + $0x1c8] ss:$12 sps:$4 sm:$0xff]   ;;  %v4909_v34 = vld [vmem:[%s5521_s9 + $0x1a0] ss:$12 sps:$4 sm:$0xff]  }
  0x6c   : > { %1429 = vmatprep.mubr.bf16.mxu0 %v4822_v35  ;;  %1709 = vmatprep.mubr.bf16.mxu1 %v4824_v36  ;;  %v4910_v35 = vld [vmem:[%s5521_s9 + $0x1e4] ss:$12 sps:$4 sm:$0xff]  }
  0x6d   : > { %v4912_v36 = vld [vmem:[%s5521_s9 + $0x1b8] ss:$12 sps:$4 sm:$0xff]  }
  0x73   : > { %1430 = vmatmul.mubr.bf16.gmra.mrb[16].mxu0 %v4826_v37  ;;  %1710 = vmatmul.mubr.bf16.gmra.mrb[16].mxu1 %v4827_v38  ;;  %v4913_v37 = vld [vmem:[%s5521_s9 + $0x1e0] ss:$12 sps:$4 sm:$0xff]   ;;  %v4914_v38 = vld [vmem:[%s5521_s9 + $0x1d0] ss:$12 sps:$4 sm:$0xff]  }
  0x74   : > { %1437 = vmatprep.mubr.bf16.mxu0 %v4828_v39  ;;  %1717 = vmatprep.mubr.bf16.mxu1 %v4830_v40  ;;  %v4915_v39 = vld [vmem:[%s5521_s9 + $0x1fc] ss:$12 sps:$4 sm:$0xff]  }
  0x75   : > { %v4917_v40 = vld [vmem:[%s5521_s9 + $0x1e8] ss:$12 sps:$4 sm:$0xff]  }
  0x7b   : > { %1438 = vmatmul.mubr.bf16.gmra.mrb[20].mxu0 %v4832_v41  ;;  %1718 = vmatmul.mubr.bf16.gmra.mrb[20].mxu1 %v4833_v42  ;;  %v4918_v41 = vld [vmem:[%s5521_s9 + $0x1f8] ss:$12 sps:$4 sm:$0xff]   ;;  %v4919_v42 = vld [vmem:[%s5521_s9 + $0x200] ss:$12 sps:$4 sm:$0xff]  }
  0x7c   : > { %1445 = vmatprep.mubr.bf16.mxu0 %v4834_v43  ;;  %1725 = vmatprep.mubr.bf16.mxu1 %v4836_v44  ;;  %v4920_v43 = vld [vmem:[%s5521_s9 + $0x214] ss:$12 sps:$4 sm:$0xff]   ;;  %v4922_v44 = vld [vmem:[%s5521_s9 + $0x218] ss:$12 sps:$4 sm:$0xff]  }
  0x83   : > { %1446 = vmatmul.mubr.bf16.gmra.mrb[24].mxu0 %v4838_v45  ;;  %1726 = vmatmul.mubr.bf16.gmra.mrb[24].mxu1 %v4839_v46  ;;  %v4923_v45 = vld [vmem:[%s5521_s9 + $0x210] ss:$12 sps:$4 sm:$0xff]  }
  0x84   : > { %1453 = vmatprep.mubr.bf16.mxu0 %v4841_v47  ;;  %1733 = vmatprep.mubr.bf16.mxu1 %v4843_v48  ;;  %v4924_v46 = vld [vmem:[%s5521_s9 + $0x230] ss:$12 sps:$4 sm:$0xff]   ;;  %v4925_v47 = vld [vmem:[%s5521_s9 + $0x22c] ss:$12 sps:$4 sm:$0xff]   ;;  %v4927_v48 = vld [vmem:[%s5521_s9 + $0x248] ss:$12 sps:$4 sm:$0xff]  }
  0x8b   : > { %1454 = vmatmul.mubr.bf16.gmra.mrb[28].mxu0 %v4845_v49  ;;  %1734 = vmatmul.mubr.bf16.gmra.mrb[28].mxu1 %v4846_v50  ;;  %v4928_v49 = vld [vmem:[%s5521_s9 + $0x228] ss:$12 sps:$4 sm:$0xff]   ;;  %v4929_v50 = vld [vmem:[%s5521_s9 + $0x260] ss:$12 sps:$4 sm:$0xff]  }
  0x8c   : > { %1461 = vmatprep.mubr.bf16.mxu0 %v4847_v51  ;;  %1741 = vmatprep.mubr.bf16.mxu1 %v4849_v52  ;;  %v4930_v51 = vld [vmem:[%s5521_s9 + $0x244] ss:$12 sps:$4 sm:$0xff]  }
  0x8d   : > { %v4932_v52 = vld [vmem:[%s5521_s9 + $0x278] ss:$12 sps:$4 sm:$0xff]  }
  0x93   : > { %1462 = vmatmul.mubr.bf16.gmra.mrb[32].mxu0 %v4851_v53  ;;  %1742 = vmatmul.mubr.bf16.gmra.mrb[32].mxu1 %v4852_v54  ;;  %v4933_v53 = vld [vmem:[%s5521_s9 + $0x240] ss:$12 sps:$4 sm:$0xff]   ;;  %v4934_v54 = vld [vmem:[%s5521_s9 + $0x290] ss:$12 sps:$4 sm:$0xff]  }
  0x94   : > { %1469 = vmatprep.mubr.bf16.mxu0 %v4853_v55  ;;  %1749 = vmatprep.mubr.bf16.mxu1 %v4855_v56  ;;  %v4935_v55 = vld [vmem:[%s5521_s9 + $0x25c] ss:$12 sps:$4 sm:$0xff]  }
  0x95   : > { %v4937_v56 = vld [vmem:[%s5521_s9 + $0x2a8] ss:$12 sps:$4 sm:$0xff]  }
  0x9b   : > { %1470 = vmatmul.mubr.bf16.gmra.mrb[36].mxu0 %v4857_v57  ;;  %1750 = vmatmul.mubr.bf16.gmra.mrb[36].mxu1 %v4858_v58  ;;  %v4938_v57 = vld [vmem:[%s5521_s9 + $0x258] ss:$12 sps:$4 sm:$0xff]   ;;  %v4939_v58 = vld [vmem:[%s5521_s9 + $0x2c0] ss:$12 sps:$4 sm:$0xff]  }
  0x9c   : > { %1477 = vmatprep.mubr.bf16.mxu0 %v4859_v59  ;;  %1757 = vmatprep.mubr.bf16.mxu1 %v4861_v60  ;;  %v4940_v59 = vld [vmem:[%s5521_s9 + $0x274] ss:$12 sps:$4 sm:$0xff]   ;;  %v4942_v60 = vld [vmem:[%s5521_s9 + $0x2d8] ss:$12 sps:$4 sm:$0xff]  }
  0xa3   : > { %1478 = vmatmul.mubr.bf16.gmra.mrb[40].mxu0 %v4863_v61  ;;  %1758 = vmatmul.mubr.bf16.gmra.mrb[40].mxu1 %v4864_v62  ;;  %v4943_v61 = vld [vmem:[%s5521_s9 + $0x270] ss:$12 sps:$4 sm:$0xff]  }
  0xa4   : > { %1485 = vmatprep.mubr.bf16.mxu0 %v4865_v63  ;;  %4566 = vmatprep.mubr.msk.bf16.mxu1 %vm1226_vm0, %v4867_v0  ;;  %v4944_v62 = vld [vmem:[%s5521_s9 + $0x2f0] ss:$12 sps:$4 sm:$0xff]   ;;  %v4945_v63 = vld [vmem:[%s5521_s9 + $0x28c] ss:$12 sps:$4 sm:$0xff]   ;;  %v4947_v0 = vld [vmem:[%s5521_s9 + $0x308] ss:$12 sps:$4 sm:$0xff]  }
  0xab   : > { %1486 = vmatmul.mubr.bf16.gmra.mrb[44].mxu0 %v4868_v1  ;;  %4567 = vmatmul.mubr.msk.bf16.vlgmr.msra.gmra.mrb[44].mxu1 %vm1226_vm0, %v4869_v2 }
  0xac   : > { %1493 = vmatprep.mubr.bf16.mxu0 %v4870_v3  ;;  %4570 = vmatprep.mubr.msk.bf16.mxu1 %vm1226_vm0, %v4872_v4  ;;  %v4948_v4 = vld [vmem:[%s5521_s9 + $0x288] ss:$12 sps:$4 sm:$0xff]  }
  0xb3   : > { %1494 = vmatmul.mubr.bf16.gmra.mrb[48].mxu0 %v4873_v5  ;;  %4571 = vmatmul.mubr.msk.bf16.gmra.mrb[48].mxu1 %vm1226_vm0, %v4874_v6  ;;  %v4949_v5 = vld [vmem:[%s5521_s9 + $0x320] ss:$12 sps:$4 sm:$0xff]  }
  0xb4   : > { %1501 = vmatprep.mubr.bf16.mxu0 %v4875_v7  ;;  %4574 = vmatprep.mubr.msk.bf16.mxu1 %vm1226_vm0, %v4877_v8 }
  0xbb   : > { %1502 = vmatmul.mubr.bf16.gmra.mrb[52].mxu0 %v4878_v9  ;;  %4575 = vmatmul.mubr.msk.bf16.gmra.mrb[52].mxu1 %vm1226_vm0, %v4879_v10  ;;  %v4950_v9 = vld [vmem:[%s5521_s9 + $0x2a4] ss:$12 sps:$4 sm:$0xff]  }
  0xbc   : > { %1509 = vmatprep.mubr.bf16.mxu0 %v4880_v11  ;;  %4578 = vmatprep.mubr.msk.bf16.mxu1 %vm1226_vm0, %v4882_v12  ;;  %v4952_v10 = vld [vmem:[%s5521_s9 + $0x338] ss:$12 sps:$4 sm:$0xff]  }
  0xc3   : > { %1510 = vmatmul.mubr.bf16.gmra.mrb[56].mxu0 %v4883_v13  ;;  %4579 = vmatmul.mubr.msk.bf16.gmra.mrb[56].mxu1 %vm1226_vm0, %v4884_v14 }
  0xc4   : > { %1517 = vmatprep.mubr.bf16.mxu0 %v4885_v15  ;;  %4582 = vmatprep.mubr.msk.bf16.mxu1 %vm1226_vm0, %v4887_v16  ;;  %v4953_v16 = vld [vmem:[%s5521_s9 + $0x2a0] ss:$12 sps:$4 sm:$0xff]  }
  0xcb   : > { %1518 = vmatmul.mubr.bf16.gmra.mrb[60].mxu0 %v4888_v17  ;;  %4583 = vmatmul.mubr.msk.bf16.gmra.mrb[60].mxu1 %vm1226_vm0, %v4889_v18  ;;  %v4954_v17 = vld [vmem:[%s5521_s9 + $0x350] ss:$12 sps:$4 sm:$0xff]  }
  0xcc   : > { %1525 = vmatprep.mubr.bf16.mxu0 %v4890_v19  ;;  %4586 = vmatprep.mubr.msk.bf16.mxu1 %vm1226_vm0, %v4892_v20 }
  0xd3   : > { %1526 = vmatmul.mubr.bf16.gmra.mrb[64].mxu0 %v4893_v21  ;;  %4587 = vmatmul.mubr.msk.bf16.gmra.mrb[64].mxu1 %vm1226_vm0, %v4894_v22  ;;  %v4955_v21 = vld [vmem:[%s5521_s9 + $0x2bc] ss:$12 sps:$4 sm:$0xff]  }
  0xd4   : > { %1533 = vmatprep.mubr.bf16.mxu0 %v4895_v23  ;;  %4590 = vmatprep.mubr.msk.bf16.mxu1 %vm1226_vm0, %v4897_v24  ;;  %v4957_v22 = vld [vmem:[%s5521_s9 + $0x368] ss:$12 sps:$4 sm:$0xff]  }
  0xdb   : > { %1534 = vmatmul.mubr.bf16.gmra.mrb[68].mxu0 %v4898_v25  ;;  %4591 = vmatmul.mubr.msk.bf16.gmra.mrb[68].mxu1 %vm1226_vm0, %v4899_v26 }
  0xdc   : > { %1541 = vmatprep.mubr.bf16.mxu0 %v4900_v27  ;;  %4594 = vmatprep.mubr.msk.bf16.mxu1 %vm1226_vm0, %v4902_v28  ;;  %v4958_v28 = vld [vmem:[%s5521_s9 + $0x2b8] ss:$12 sps:$4 sm:$0xff]  }
  0xe3   : > { %1542 = vmatmul.mubr.bf16.gmra.mrb[72].mxu0 %v4903_v29  ;;  %4595 = vmatmul.mubr.msk.bf16.gmra.mrb[72].mxu1 %vm1226_vm0, %v4904_v30  ;;  %v4959_v29 = vld [vmem:[%s5521_s9 + $0x380] ss:$12 sps:$4 sm:$0xff]  }
  0xe4   : > { %1549 = vmatprep.mubr.bf16.mxu0 %v4905_v31  ;;  %4598 = vmatprep.mubr.msk.bf16.mxu1 %vm1226_vm0, %v4907_v32 }
  0xeb   : > { %1550 = vmatmul.mubr.bf16.gmra.mrb[76].mxu0 %v4908_v33  ;;  %4599 = vmatmul.mubr.msk.bf16.gmra.mrb[76].mxu1 %vm1226_vm0, %v4909_v34  ;;  %v4960_v33 = vld [vmem:[%s5521_s9 + $0x2d4] ss:$12 sps:$4 sm:$0xff]   ;;  %v4962_v34 = vld [vmem:[%s5521_s9 + $0x398] ss:$12 sps:$4 sm:$0xff]  }
  0xec   : > { %1557 = vmatprep.mubr.bf16.mxu0 %v4910_v35  ;;  %4602 = vmatprep.mubr.msk.bf16.mxu1 %vm1226_vm0, %v4912_v36 }
  0xf3   : > { %1558 = vmatmul.mubr.bf16.gmra.mrb[80].mxu0 %v4913_v37  ;;  %4603 = vmatmul.mubr.msk.bf16.gmra.mrb[80].mxu1 %vm1226_vm0, %v4914_v38 }
  0xf4   : > { %1565 = vmatprep.mubr.bf16.mxu0 %v4915_v39  ;;  %4606 = vmatprep.mubr.msk.bf16.mxu1 %vm1226_vm0, %v4917_v40  ;;  %v4963_v40 = vld [vmem:[%s5521_s9 + $0x2d0] ss:$12 sps:$4 sm:$0xff]  }
  0xfb   : > { %1566 = vmatmul.mubr.bf16.gmra.mrb[84].mxu0 %v4918_v41  ;;  %4607 = vmatmul.mubr.msk.bf16.gmra.mrb[84].mxu1 %vm1226_vm0, %v4919_v42  ;;  %v4964_v41 = vld [vmem:[%s5521_s9 + $0x3b0] ss:$12 sps:$4 sm:$0xff]  }
  0xfc   : > { %1573 = vmatprep.mubr.bf16.mxu0 %v4920_v43  ;;  %4610 = vmatprep.mubr.msk.bf16.mxu1 %vm1226_vm0, %v4922_v44 }
 0x103   : > { %1574 = vmatmul.mubr.bf16.gmra.mrb[88].mxu0 %v4923_v45  ;;  %4611 = vmatmul.mubr.msk.bf16.gmra.mrb[88].mxu1 %vm1226_vm0, %v4924_v46  ;;  %v4965_v45 = vld [vmem:[%s5521_s9 + $0x2ec] ss:$12 sps:$4 sm:$0xff]   ;;  %v4967_v46 = vld [vmem:[%s5521_s9 + $0x3c8] ss:$12 sps:$4 sm:$0xff]  }
 0x104   : > { %1581 = vmatprep.mubr.bf16.mxu0 %v4925_v47  ;;  %4614 = vmatprep.mubr.msk.bf16.mxu1 %vm1226_vm0, %v4927_v48 }
 0x10b   : > { %1582 = vmatmul.mubr.bf16.gmra.mrb[92].mxu0 %v4928_v49  ;;  %4615 = vmatmul.mubr.msk.bf16.gmra.mrb[92].mxu1 %vm1226_vm0, %v4929_v50 }
 0x10c   : > { %1589 = vmatprep.mubr.bf16.mxu0 %v4930_v51  ;;  %4618 = vmatprep.mubr.msk.bf16.mxu1 %vm1226_vm0, %v4932_v52  ;;  %v4968_v52 = vld [vmem:[%s5521_s9 + $0x2e8] ss:$12 sps:$4 sm:$0xff]  }
 0x113   : > { %1590 = vmatmul.mubr.bf16.gmra.mrb[96].mxu0 %v4933_v53  ;;  %4619 = vmatmul.mubr.msk.bf16.gmra.mrb[96].mxu1 %vm1226_vm0, %v4934_v54  ;;  %v4969_v53 = vld [vmem:[%s5521_s9 + $0x3e0] ss:$12 sps:$4 sm:$0xff]  }
 0x114   : > { %1597 = vmatprep.mubr.bf16.mxu0 %v4935_v55  ;;  %4622 = vmatprep.mubr.msk.bf16.mxu1 %vm1226_vm0, %v4937_v56 }
 0x11b   : > { %1598 = vmatmul.mubr.bf16.gmra.mrb[100].mxu0 %v4938_v57  ;;  %4623 = vmatmul.mubr.msk.bf16.gmra.mrb[100].mxu1 %vm1226_vm0, %v4939_v58  ;;  %v4970_v57 = vld [vmem:[%s5521_s9 + $0x304] ss:$12 sps:$4 sm:$0xff]  }
 0x11c   : > { %1605 = vmatprep.mubr.bf16.mxu0 %v4940_v59  ;;  %4626 = vmatprep.mubr.msk.bf16.mxu1 %vm1226_vm0, %v4942_v60  ;;  %v4972_v58 = vld [vmem:[%s5521_s9 + $0x3f8] ss:$12 sps:$4 sm:$0xff]  }
 0x123   : > { %1606 = vmatmul.mubr.bf16.gmra.mrb[104].mxu0 %v4943_v61  ;;  %4627 = vmatmul.mubr.msk.bf16.gmra.mrb[104].mxu1 %vm1226_vm0, %v4944_v62 }
 0x124   : > { %1613 = vmatprep.mubr.bf16.mxu0 %v4945_v63  ;;  %4630 = vmatprep.mubr.msk.bf16.mxu1 %vm1226_vm0, %v4947_v0  ;;  %v4973_v0 = vld [vmem:[%s5521_s9 + $0x300] ss:$12 sps:$4 sm:$0xff]  }
 0x126   : > { %v5729_v1 = vpop.f32.mrb[0].mxu0  ;;  %v5731_v2 = vpop.f32.mrb[0].mxu1 }
 0x127   : > { %v1401_v3 = vpop.f32.mrb[1].mxu0  ;;  %v1681_v6 = vpop.f32.mrb[1].mxu1 }
 0x128   : > { %v5735_v7 = vpop.f32.mrb[2].mxu0  ;;  %v5737_v8 = vpop.f32.mrb[2].mxu1  ;;  %v4974_v3 = vld [vmem:[%s5521_s9 + $0x410] ss:$12 sps:$4 sm:$0xff]  }
 0x129   : > { %v1404_v11 = vpop.f32.mrb[3].mxu0  ;;  %v1684_v12 = vpop.f32.mrb[3].mxu1 }
 0x12b   : > { %1614 = vmatmul.mubr.bf16.gmra.mrb[108].mxu0 %v4948_v4  ;;  %4631 = vmatmul.mubr.msk.bf16.gmra.mrb[108].mxu1 %vm1226_vm0, %v4949_v5 }
 0x12c   : > { %1621 = vmatprep.mubr.bf16.mxu0 %v4950_v9  ;;  %4634 = vmatprep.mubr.msk.bf16.mxu1 %vm1226_vm0, %v4952_v10  ;;  %v4975_v9 = vld [vmem:[%s5521_s9 + $0x31c] ss:$12 sps:$4 sm:$0xff]  }
 0x12d   : > { %v4977_v10 = vld [vmem:[%s5521_s9 + $0x428] ss:$12 sps:$4 sm:$0xff]  }
 0x12e   : > { %v5743_v13 = vpop.f32.mrb[4].mxu0  ;;  %v5745_v14 = vpop.f32.mrb[4].mxu1 }
 0x12f   : > { %v1409_v15 = vpop.f32.mrb[5].mxu0  ;;  %v1689_v18 = vpop.f32.mrb[5].mxu1 }
 0x130   : > { %v5749_v19 = vpop.f32.mrb[6].mxu0  ;;  %v5751_v20 = vpop.f32.mrb[6].mxu1  ;;  %v4978_v18 = vld [vmem:[%s5521_s9 + $0x318] ss:$12 sps:$4 sm:$0xff]  }
 0x131   : > { %v1412_v23 = vpop.f32.mrb[7].mxu0  ;;  %v1692_v24 = vpop.f32.mrb[7].mxu1 }
 0x133   : > { %1622 = vmatmul.mubr.bf16.gmra.mrb[112].mxu0 %v4953_v16  ;;  %4635 = vmatmul.mubr.msk.bf16.gmra.mrb[112].mxu1 %vm1226_vm0, %v4954_v17 }
 0x134   : > { %1629 = vmatprep.mubr.bf16.mxu0 %v4955_v21  ;;  %4638 = vmatprep.mubr.msk.bf16.mxu1 %vm1226_vm0, %v4957_v22  ;;  %v4979_v21 = vld [vmem:[%s5521_s9 + $0x440] ss:$12 sps:$4 sm:$0xff]  }
 0x136   : > { %v5757_v25 = vpop.f32.mrb[8].mxu0  ;;  %v5759_v26 = vpop.f32.mrb[8].mxu1 }
 0x137   : > { %v1417_v27 = vpop.f32.mrb[9].mxu0  ;;  %v1697_v30 = vpop.f32.mrb[9].mxu1 }
 0x138   : > { %v5763_v31 = vpop.f32.mrb[10].mxu0  ;;  %v5765_v32 = vpop.f32.mrb[10].mxu1  ;;  %v4980_v27 = vld [vmem:[%s5521_s9 + $0x334] ss:$12 sps:$4 sm:$0xff]  }
 0x139   : > { %v1420_v35 = vpop.f32.mrb[11].mxu0  ;;  %v1700_v36 = vpop.f32.mrb[11].mxu1 }
 0x13a   : > { %v4982_v35 = vld [vmem:[%s5521_s9 + $0x330] ss:$12 sps:$4 sm:$0xff]  }
 0x13b   : > { %1630 = vmatmul.mubr.bf16.gmra.mrb[116].mxu0 %v4958_v28  ;;  %4639 = vmatmul.mubr.msk.bf16.gmra.mrb[116].mxu1 %vm1226_vm0, %v4959_v29 }
 0x13c   : > { %1637 = vmatprep.mubr.bf16.mxu0 %v4960_v33  ;;  %4642 = vmatprep.mubr.msk.bf16.mxu1 %vm1226_vm0, %v4962_v34 }
 0x13e   : > { %v5771_v37 = vpop.f32.mrb[12].mxu0  ;;  %v5773_v38 = vpop.f32.mrb[12].mxu1 }
 0x13f   : > { %v1425_v39 = vpop.f32.mrb[13].mxu0  ;;  %v1705_v42 = vpop.f32.mrb[13].mxu1 }
 0x140   : > { %v5777_v43 = vpop.f32.mrb[14].mxu0  ;;  %v5779_v44 = vpop.f32.mrb[14].mxu1 }
 0x141   : > { %v1428_v47 = vpop.f32.mrb[15].mxu0  ;;  %v1708_v48 = vpop.f32.mrb[15].mxu1 }
 0x143   : > { %1638 = vmatmul.mubr.bf16.gmra.mrb[120].mxu0 %v4963_v40  ;;  %4643 = vmatmul.mubr.msk.bf16.gmra.mrb[120].mxu1 %vm1226_vm0, %v4964_v41 }
 0x144   : > { %1645 = vmatprep.mubr.bf16.mxu0 %v4965_v45  ;;  %4646 = vmatprep.mubr.msk.bf16.mxu1 %vm1226_vm0, %v4967_v46 }
 0x146   : > { %v5785_v49 = vpop.f32.mrb[16].mxu0  ;;  %v5787_v50 = vpop.f32.mrb[16].mxu1 }
 0x147   : > { %v1433_v51 = vpop.f32.mrb[17].mxu0  ;;  %v1713_v54 = vpop.f32.mrb[17].mxu1 }
 0x148   : > { %v5791_v55 = vpop.f32.mrb[18].mxu0  ;;  %v5793_v56 = vpop.f32.mrb[18].mxu1 }
 0x149   : > { %v1436_v59 = vpop.f32.mrb[19].mxu0  ;;  %v1716_v60 = vpop.f32.mrb[19].mxu1 }
 0x14b   : > { %1646 = vmatmul.mubr.bf16.gmra.mrb[124].mxu0 %v4968_v52  ;;  %4647 = vmatmul.mubr.msk.bf16.gmra.mrb[124].mxu1 %vm1226_vm0, %v4969_v53 }
 0x14c   : > { %1653 = vmatprep.mubr.bf16.mxu0 %v4970_v57  ;;  %4650 = vmatprep.mubr.msk.bf16.mxu1 %vm1226_vm0, %v4972_v58 }
 0x14e   : > { %v5799_v61 = vpop.f32.mrb[20].mxu0  ;;  %v5801_v62 = vpop.f32.mrb[20].mxu1 }
 0x14f   : > { %v1441_v63 = vpop.f32.mrb[21].mxu0  ;;  %v1721_v4 = vpop.f32.mrb[21].mxu1 }
 0x150   : > { %v5805_v5 = vpop.f32.mrb[22].mxu0  ;;  %v5807_v6 = vpop.f32.mrb[22].mxu1 }
 0x151   : > { %v1444_v11 = vpop.f32.mrb[23].mxu0  ;;  %v1724_v12 = vpop.f32.mrb[23].mxu1 }
 0x153   : > { %1654 = vmatmul.mubr.bf16.gmra.mrb[128].mxu0 %v4973_v0  ;;  %4651 = vmatmul.mubr.msk.bf16.gmra.mrb[128].mxu1 %vm1226_vm0, %v4974_v3 }
 0x154   : > { %1661 = vmatprep.mubr.bf16.mxu0 %v4975_v9  ;;  %4654 = vmatprep.mubr.msk.bf16.mxu1 %vm1226_vm0, %v4977_v10 }
 0x156   : > { %v5813_v15 = vpop.f32.mrb[24].mxu0  ;;  %v5815_v16 = vpop.f32.mrb[24].mxu1 }
 0x157   : > { %v1449_v17 = vpop.f32.mrb[25].mxu0  ;;  %v1729_v22 = vpop.f32.mrb[25].mxu1 }
 0x158   : > { %v5819_v23 = vpop.f32.mrb[26].mxu0  ;;  %v5821_v24 = vpop.f32.mrb[26].mxu1 }
 0x159   : > { %v1452_v28 = vpop.f32.mrb[27].mxu0  ;;  %v1732_v29 = vpop.f32.mrb[27].mxu1 }
 0x15b   : > { %1662 = vmatmul.mubr.bf16.gmra.mrb[132].mxu0 %v4978_v18  ;;  %4655 = vmatmul.mubr.msk.bf16.gmra.mrb[132].mxu1 %vm1226_vm0, %v4979_v21 }
 0x15c   : > { %1669 = vmatprep.mubr.bf16.mxu0 %v4980_v27  ;;  %v5861_v27 = vld [vmem:[%s6745_s2] ss:$0 sm:$0xff] }
 0x15d   : > { %v1408_v28 = vadd.f32 %v5861_v27, %v5743_v13  ;;  %v1400_v29 = vadd.f32 %v5861_v27, %v5729_v1 }
 0x15e   : > { %v5825_v30 = vpop.f32.mrb[28].mxu0  ;;  %v5827_v33 = vpop.f32.mrb[28].mxu1 }
 0x15f   : > { %6748 = vst [vmem:[#allocation3_spill] sm:$0xff] %v5827_v33  ;;  %v1457_v34 = vpop.f32.mrb[29].mxu0  ;;  %v1737_v36 = vpop.f32.mrb[29].mxu1 }
 0x160   : > { %v5830_v39 = vpop.f32.mrb[30].mxu0  ;;  %v5832_v40 = vpop.f32.mrb[30].mxu1  ;;  %v1411_v36 = vadd.f32 %v5861_v27, %v5749_v19 }
 0x161   : > { %6749 = vst [vmem:[#allocation4_spill] sm:$0xff] %v5832_v40  ;;  %v1460_v41 = vpop.f32.mrb[31].mxu0  ;;  %v1740_v42 = vpop.f32.mrb[31].mxu1 }
 0x163   : > { %1670 = vmatmul.mubr.bf16.gmra.mrb[136].mxu0 %v4982_v35 }
 0x166   : > { %v5834_v45 = vpop.f32.mrb[32].mxu0  ;;  %v5836_v46 = vpop.f32.mrb[32].mxu1 }
 0x167   : > { %6750 = vst [vmem:[#allocation5_spill] sm:$0xff] %v5836_v46  ;;  %v1465_v47 = vpop.f32.mrb[33].mxu0  ;;  %v1745_v48 = vpop.f32.mrb[33].mxu1 }
 0x168   : > { %v5838_v51 = vpop.f32.mrb[34].mxu0  ;;  %v5840_v52 = vpop.f32.mrb[34].mxu1  ;;  %v1403_v48 = vadd.f32 %v5861_v27, %v5735_v7 }
 0x169   : > { %6751 = vst [vmem:[#allocation6_spill] sm:$0xff] %v5840_v52  ;;  %v1468_v53 = vpop.f32.mrb[35].mxu0  ;;  %v1748_v54 = vpop.f32.mrb[35].mxu1  ;;  %v1467_v33 = vadd.f32 %v5861_v27, %v5838_v51 }
 0x16e   : > { %v5842_v57 = vpop.f32.mrb[36].mxu0  ;;  %v5844_v58 = vpop.f32.mrb[36].mxu1 }
 0x16f   : > { %6752 = vst [vmem:[#allocation7_spill] sm:$0xff] %v5844_v58  ;;  %v1473_v59 = vpop.f32.mrb[37].mxu0  ;;  %v1753_v60 = vpop.f32.mrb[37].mxu1 }
 0x170   : > { %v5846_v63 = vpop.f32.mrb[38].mxu0  ;;  %v5848_v0 = vpop.f32.mrb[38].mxu1 }
 0x171   : > { %6753 = vst [vmem:[#allocation8_spill] sm:$0xff] %v5848_v0  ;;  %v1476_v3 = vpop.f32.mrb[39].mxu0  ;;  %v1756_v4 = vpop.f32.mrb[39].mxu1 }
 0x176   : > { %v5850_v9 = vpop.f32.mrb[40].mxu0  ;;  %v5852_v10 = vpop.f32.mrb[40].mxu1 }
 0x177   : > { %6754 = vst [vmem:[#allocation9_spill] sm:$0xff] %v5852_v10  ;;  %v1481_v11 = vpop.f32.mrb[41].mxu0  ;;  %v1761_v12 = vpop.f32.mrb[41].mxu1 }
 0x178   : > { %v5854_v17 = vpop.f32.mrb[42].mxu0  ;;  %v5856_v18 = vpop.f32.mrb[42].mxu1  ;;  %v1424_v12 = vadd.f32 %v5861_v27, %v5771_v37 }
 0x179   : > { %6755 = vst [vmem:[#allocation10_spill] sm:$0xff] %v5856_v18  ;;  %v1484_v21 = vpop.f32.mrb[43].mxu0  ;;  %v1764_v22 = vpop.f32.mrb[43].mxu1 }
 0x17a   : > { %v1416_v21 = vadd.f32 %v5861_v27, %v5757_v25 }
 0x17e   : > { %v5867_v34 = vpop.f32.mrb[44].mxu0  ;;  %v4568_v35 = vpop.f32.mrb[44].mxu1 }
 0x17f   : > { %v5871_v41 = vadd.f32 %v4568_v35, %v1408_v28  ;;  %v1489_v42 = vpop.f32.mrb[45].mxu0  ;;  %v1800_v47 = vpop.f32.mrb[45].mxu1 }
 0x180   : > { %v5875_v53 = vadd.f32 %v1800_v47, %v1400_v29  ;;  %v5877_v54 = vpop.f32.mrb[46].mxu0  ;;  %v4569_v13 = vpop.f32.mrb[46].mxu1  ;;  %v1427_v29 = vadd.f32 %v5861_v27, %v5777_v43  ;;  %v1419_v47 = vadd.f32 %v5861_v27, %v5763_v31 }
 0x181   : > { %v3947_v1 = vmul.f32 -1.442695, %v5871_v41  ;;  %v5880_v59 = vadd.f32 %v4569_v13, %v1411_v36  ;;  %v1492_v60 = vpop.f32.mrb[47].mxu0  ;;  %v1803_v3 = vpop.f32.mrb[47].mxu1 }
 0x182   : > { %v3945_v19 = vmul.f32 -1.442695, %v5875_v53  ;;  %v5883_v4 = vadd.f32 %v1803_v3, %v1403_v48 }
 0x183   : > { %4983 = vpow2.f32 %v3947_v1  ;;  %v3948_v11 = vmul.f32 -1.442695, %v5880_v59 }
 0x184   : > { %4985 = vpow2.f32 %v3945_v19  ;;  %v3946_v7 = vmul.f32 -1.442695, %v5883_v4 }
 0x185   : > { %4987 = vpow2.f32 %v3948_v11 }
 0x186   : > { %4989 = vpow2.f32 %v3946_v7  ;;  %v5891_v22 = vpop.f32.mrb[48].mxu0  ;;  %v4572_v28 = vpop.f32.mrb[48].mxu1 }
 0x187   : > { %v5895_v35 = vadd.f32 %v4572_v28, %v1424_v12  ;;  %v1497_v36 = vpop.f32.mrb[49].mxu0  ;;  %v1816_v42 = vpop.f32.mrb[49].mxu1  ;;  %v1440_v12 = vadd.f32 %v5861_v27, %v5799_v61  ;;  %v1432_v28 = vadd.f32 %v5861_v27, %v5785_v49 }
 0x188   : > { %v5899_v48 = vadd.f32 %v1816_v42, %v1416_v21  ;;  %v5901_v37 = vpop.f32.mrb[50].mxu0  ;;  %v4573_v13 = vpop.f32.mrb[50].mxu1 }
 0x189   : > { %v3951_v25 = vmul.f32 -1.442695, %v5895_v35  ;;  %v5904_v1 = vadd.f32 %v4573_v13, %v1427_v29  ;;  %v1500_v60 = vpop.f32.mrb[51].mxu0  ;;  %v1819_v3 = vpop.f32.mrb[51].mxu1  ;;  %v1435_v13 = vadd.f32 %v5861_v27, %v5791_v55 }
 0x18a   : > { %v3949_v43 = vmul.f32 -1.442695, %v5899_v48  ;;  %v5907_v19 = vadd.f32 %v1819_v3, %v1419_v47 }
 0x18b   : > { %4991 = vpow2.f32 %v3951_v25  ;;  %v3952_v11 = vmul.f32 -1.442695, %v5904_v1 }
 0x18c   : > { %4993 = vpow2.f32 %v3949_v43  ;;  %v3950_v31 = vmul.f32 -1.442695, %v5907_v19 }
 0x18d   : > { %v4984_v7 = vpop.eup %4983  ;;  %4995 = vpow2.f32 %v3952_v11  ;;  %v1443_v11 = vadd.f32 %v5861_v27, %v5805_v5 }
 0x18e   : > { %v4986_v21 = vpop.eup %4985  ;;  %v2445_v29 = vadd.f32 1.0, %v4984_v7  ;;  %4997 = vpow2.f32 %v3950_v31  ;;  %v5915_v36 = vpop.f32.mrb[52].mxu0 }
 0x18f   : > { %v4576_v42 = vpop.f32.mrb[52].mxu1  ;;  %v4988_v47 = vpop.eup %4987  ;;  %v2443_v25 = vadd.f32 1.0, %v4986_v21 }
 0x190   : > { %v5919_v60 = vadd.f32 %v4576_v42, %v1440_v12  ;;  %v1505_v3 = vpop.f32.mrb[53].mxu0  ;;  %v1832_v43 = vpop.f32.mrb[53].mxu1  ;;  %4999 = vrcp.f32 %v2445_v29  ;;  %v2446_v49 = vadd.f32 1.0, %v4988_v47  ;;  %v1456_v47 = vadd.f32 %v5861_v27, %v5825_v30 }
 0x191   : > { %v4990_v61 = vpop.eup %4989  ;;  %v5923_v7 = vadd.f32 %v1832_v43, %v1432_v28  ;;  %v5925_v31 = vpop.f32.mrb[54].mxu0  ;;  %5001 = vrcp.f32 %v2443_v25  ;;  %v1448_v43 = vadd.f32 %v5861_v27, %v5813_v15  ;;  %v1459_v15 = vadd.f32 %v5861_v27, %v5830_v39 }
 0x192   : > { %v4577_v18 = vpop.f32.mrb[54].mxu1  ;;  %v2444_v10 = vadd.f32 1.0, %v4990_v61  ;;  %v3955_v55 = vmul.f32 -1.442695, %v5919_v60  ;;  %v1508_v21 = vpop.f32.mrb[55].mxu0  ;;  %5003 = vrcp.f32 %v2446_v49 }
 0x193   : > { %v1835_v12 = vpop.f32.mrb[55].mxu1  ;;  %v3953_v42 = vmul.f32 -1.442695, %v5923_v7  ;;  %v5929_v3 = vadd.f32 %v4577_v18, %v1443_v11  ;;  %v1451_v11 = vadd.f32 %v5861_v27, %v5819_v23 }
 0x194   : > { %v5931_v0 = vadd.f32 %v1835_v12, %v1435_v13  ;;  %5005 = vrcp.f32 %v2444_v10 }
 0x195   : > { %5007 = vpow2.f32 %v3955_v55  ;;  %v3956_v5 = vmul.f32 -1.442695, %v5929_v3  ;;  %v4992_v29 = vpop.eup %4991 }
 0x196   : > { %v3954_v28 = vmul.f32 -1.442695, %v5931_v0  ;;  %5009 = vpow2.f32 %v3953_v42  ;;  %v4994_v25 = vpop.eup %4993  ;;  %v2449_v18 = vadd.f32 1.0, %v4992_v29  ;;  %v5939_v13 = vpop.f32.mrb[56].mxu0 }
 0x197   : > { %5011 = vpow2.f32 %v3956_v5  ;;  %v4580_v61 = vpop.f32.mrb[56].mxu1  ;;  %v4996_v10 = vpop.eup %4995  ;;  %v2447_v49 = vadd.f32 1.0, %v4994_v25 }
 0x198   : > { %5013 = vpow2.f32 %v3954_v28  ;;  %v5944_v55 = vadd.f32 %v4580_v61, %v1456_v47  ;;  %v1513_v30 = vpop.f32.mrb[57].mxu0  ;;  %v1848_v21 = vpop.f32.mrb[57].mxu1  ;;  %v2450_v42 = vadd.f32 1.0, %v4996_v10 }
 0x199   : > { %v4998_v12 = vpop.eup %4997  ;;  %5015 = vrcp.f32 %v2449_v18  ;;  %v5948_v5 = vadd.f32 %v1848_v21, %v1448_v43  ;;  %v5950_v29 = vpop.f32.mrb[58].mxu0 }
 0x19a   : > { %v4581_v58 = vpop.f32.mrb[58].mxu1  ;;  %5017 = vrcp.f32 %v2447_v49  ;;  %v2448_v23 = vadd.f32 1.0, %v4998_v12  ;;  %v3959_v25 = vmul.f32 -1.442695, %v5944_v55  ;;  %v1516_v28 = vpop.f32.mrb[59].mxu0 }
 0x19b   : > { %v1851_v47 = vpop.f32.mrb[59].mxu1  ;;  %v5000_v61 = vpop.eup %4999  ;;  %5019 = vrcp.f32 %v2450_v42  ;;  %v3957_v30 = vmul.f32 -1.442695, %v5948_v5  ;;  %v5956_v39 = vadd.f32 %v4581_v58, %v1459_v15  ;;  %v1464_v28 = vadd.f32 %v5861_v27, %v5834_v45 }
 0x19c   : > { %v5958_v18 = vadd.f32 %v1851_v47, %v1451_v11  ;;  %v5002_v43 = vpop.eup %5001  ;;  %5021 = vrcp.f32 %v2448_v23  ;;  %v2721_v42 = vmul.f32 %v5000_v61, %v5871_v41  ;;  %v1472_v11 = vadd.f32 %v5861_v27, %v5842_v57 }
 0x19d   : > { %v5004_v10 = vpop.eup %5003  ;;  %5023 = vpow2.f32 %v3959_v25  ;;  %v3960_v49 = vmul.f32 -1.442695, %v5956_v39  ;;  %v2719_v15 = vmul.f32 %v5002_v43, %v5875_v53  ;;  %v1475_v45 = vadd.f32 %v5861_v27, %v5846_v63 }
 0x19e   : > { %v3958_v21 = vmul.f32 -1.442695, %v5958_v18  ;;  %v5006_v12 = vpop.eup %5005  ;;  %v2722_v52 = vmul.f32 %v5004_v10, %v5880_v59  ;;  %5025 = vpow2.f32 %v3957_v30  ;;  %v5970_v25 = vpop.f32.mrb[60].mxu0 }
 0x19f   : > { %v5008_v58 = vpop.eup %5007  ;;  %v2720_v23 = vmul.f32 %v5006_v12, %v5883_v4  ;;  %5027 = vpow2.f32 %v3960_v49  ;;  %v4584_v47 = vpop.f32.mrb[60].mxu1 }
 0x1a0   : > { %v5010_v46 = vpop.eup %5009  ;;  %v4247_v41 = vpack.c.bf16 %v2722_v52, %v2721_v42  ;;  %v2453_v59 = vadd.f32 1.0, %v5008_v58  ;;  %5029 = vpow2.f32 %v3958_v21  ;;  %v1521_v61 = vpop.f32.mrb[61].mxu0  ;;  %v5974_v53 = vadd.f32 %v4584_v47, %v1472_v11 }
 0x1a1   : > { %v1864_v30 = vpop.f32.mrb[61].mxu1  ;;  %v5012_v10 = vpop.eup %5011  ;;  %v4242_v57 = vpack.c.bf16 %v2720_v23, %v2719_v15  ;;  %v2451_v40 = vadd.f32 1.0, %v5010_v46 }
 0x1a2   : > { %v5976_v4 = vadd.f32 %v1864_v30, %v1464_v28  ;;  %v5978_v43 = vpop.f32.mrb[62].mxu0  ;;  %v4585_v49 = vpop.f32.mrb[62].mxu1  ;;  %4469 = vst [vmem:[%s5983_s26 + $0x8] sm:$0xff] %v4247_v41   ;;  %5031 = vrcp.f32 %v2453_v59  ;;  %v2454_v52 = vadd.f32 1.0, %v5012_v10  ;;  %v3963_v58 = vmul.f32 -1.442695, %v5974_v53 }
 0x1a3   : > { %v5014_v12 = vpop.eup %5013  ;;  %v5986_v63 = vadd.f32 %v4585_v49, %v1475_v45  ;;  %v1524_v46 = vpop.f32.mrb[63].mxu0  ;;  %4243 = vst [vmem:[%s5983_s26] sm:$0xff] %v4242_v57   ;;  %5033 = vrcp.f32 %v2451_v40  ;;  %v1480_v45 = vadd.f32 %v5861_v27, %v5850_v9  ;;  %v1488_v10 = vadd.f32 %v5861_v27, %v5867_v34 }
 0x1a4   : > { %v1867_v21 = vpop.f32.mrb[63].mxu1  ;;  %v5016_v28 = vpop.eup %5015  ;;  %v2452_v42 = vadd.f32 1.0, %v5014_v12  ;;  %v3961_v11 = vmul.f32 -1.442695, %v5976_v4  ;;  %5035 = vrcp.f32 %v2454_v52 }
 0x1a5   : > { %v5018_v51 = vpop.eup %5017  ;;  %v3964_v15 = vmul.f32 -1.442695, %v5986_v63  ;;  %v5992_v23 = vadd.f32 %v1867_v21, %v1467_v33  ;;  %v2725_v59 = vmul.f32 %v5016_v28, %v5895_v35  ;;  %v1491_v35 = vadd.f32 %v5861_v27, %v5877_v54 }
 0x1a6   : > { %v5020_v47 = vpop.eup %5019  ;;  %5037 = vrcp.f32 %v2452_v42  ;;  %v2723_v33 = vmul.f32 %v5018_v51, %v5899_v48  ;;  %v6003_v49 = vpop.f32.mrb[64].mxu0  ;;  %v1483_v51 = vadd.f32 %v5861_v27, %v5854_v17 }
 0x1a7   : > { %v5022_v41 = vpop.eup %5021  ;;  %v2726_v40 = vmul.f32 %v5020_v47, %v5904_v1  ;;  %5039 = vpow2.f32 %v3963_v58  ;;  %v3962_v61 = vmul.f32 -1.442695, %v5992_v23  ;;  %v4588_v9 = vpop.f32.mrb[64].mxu1 }
 0x1a8   : > { %v5024_v30 = vpop.eup %5023  ;;  %v2724_v57 = vmul.f32 %v5022_v41, %v5907_v19  ;;  %5041 = vpow2.f32 %v3961_v11  ;;  %v1529_v46 = vpop.f32.mrb[65].mxu0  ;;  %v6007_v19 = vadd.f32 %v4588_v9, %v1488_v10  ;;  %v1496_v9 = vadd.f32 %v5861_v27, %v5891_v22 }
 0x1a9   : > { %v5026_v12 = vpop.eup %5025  ;;  %v4257_v1 = vpack.c.bf16 %v2726_v40, %v2725_v59  ;;  %v2457_v52 = vadd.f32 1.0, %v5024_v30  ;;  %5043 = vpow2.f32 %v3964_v15  ;;  %v1880_v21 = vpop.f32.mrb[65].mxu1  ;;  %v1507_v46 = vadd.f32 %v5861_v27, %v5925_v31 }
 0x1aa   : > { %v5028_v34 = vpop.eup %5027  ;;  %v4252_v28 = vpack.c.bf16 %v2724_v57, %v2723_v33  ;;  %v2455_v48 = vadd.f32 1.0, %v5026_v12  ;;  %5045 = vpow2.f32 %v3962_v61  ;;  %v6009_v42 = vpop.f32.mrb[66].mxu0  ;;  %v6014_v15 = vadd.f32 %v1880_v21, %v1480_v45 }
 0x1ab   : > { %v4589_v58 = vpop.f32.mrb[66].mxu1  ;;  %v5030_v11 = vpop.eup %5029  ;;  %4471 = vst [vmem:[%s5983_s26 + $0x18] sm:$0xff] %v4257_v1   ;;  %5047 = vrcp.f32 %v2457_v52  ;;  %v2458_v54 = vadd.f32 1.0, %v5028_v34  ;;  %v3967_v40 = vmul.f32 -1.442695, %v6007_v19  ;;  %v1504_v12 = vadd.f32 %v5861_v27, %v5915_v36 }
 0x1ac   : > { %v1532_v47 = vpop.f32.mrb[67].mxu0  ;;  %v1883_v41 = vpop.f32.mrb[67].mxu1  ;;  %4470 = vst [vmem:[%s5983_s26 + $0x10] sm:$0xff] %v4252_v28   ;;  %5049 = vrcp.f32 %v2455_v48  ;;  %v2456_v59 = vadd.f32 1.0, %v5030_v11  ;;  %v6018_v61 = vadd.f32 %v4589_v58, %v1491_v35  ;;  %v3965_v10 = vmul.f32 -1.442695, %v6014_v15 }
 0x1ad   : > { %v5032_v30 = vpop.eup %5031  ;;  %5051 = vrcp.f32 %v2458_v54  ;;  %v6021_v33 = vadd.f32 %v1883_v41, %v1483_v51 }
 0x1ae   : > { %v5034_v17 = vpop.eup %5033  ;;  %5053 = vrcp.f32 %v2456_v59  ;;  %v3968_v45 = vmul.f32 -1.442695, %v6018_v61  ;;  %v2729_v52 = vmul.f32 %v5032_v30, %v5919_v60  ;;  %v6033_v34 = vpop.f32.mrb[68].mxu0 }
 0x1af   : > { %v5036_v57 = vpop.eup %5035  ;;  %5055 = vpow2.f32 %v3967_v40  ;;  %v3966_v35 = vmul.f32 -1.442695, %v6021_v33  ;;  %v4592_v28 = vpop.f32.mrb[68].mxu1  ;;  %v2727_v22 = vmul.f32 %v5034_v17, %v5923_v7 }
 0x1b0   : > { %v5038_v1 = vpop.eup %5037  ;;  %v2730_v21 = vmul.f32 %v5036_v57, %v5929_v3  ;;  %5057 = vpow2.f32 %v3965_v10  ;;  %v6037_v58 = vadd.f32 %v4592_v28, %v1504_v12  ;;  %v1537_v11 = vpop.f32.mrb[69].mxu0 }
 0x1b1   : > { %v5040_v48 = vpop.eup %5039  ;;  %v2728_v36 = vmul.f32 %v5038_v1, %v5931_v0  ;;  %5059 = vpow2.f32 %v3968_v45  ;;  %v1896_v60 = vpop.f32.mrb[69].mxu1  ;;  %v1499_v0 = vadd.f32 %v5861_v27, %v5901_v37 }
 0x1b2   : > { %v5042_v51 = vpop.eup %5041  ;;  %v4267_v54 = vpack.c.bf16 %v2730_v21, %v2729_v52  ;;  %v2461_v31 = vadd.f32 1.0, %v5040_v48  ;;  %5061 = vpow2.f32 %v3966_v35  ;;  %v6039_v3 = vadd.f32 %v1896_v60, %v1496_v9  ;;  %v6041_v47 = vpop.f32.mrb[70].mxu0 }
 0x1b3   : > { %v4593_v41 = vpop.f32.mrb[70].mxu1  ;;  %v5044_v59 = vpop.eup %5043  ;;  %v4262_v7 = vpack.c.bf16 %v2728_v36, %v2727_v22  ;;  %v2459_v40 = vadd.f32 1.0, %v5042_v51  ;;  %v3971_v57 = vmul.f32 -1.442695, %v6037_v58  ;;  %v1512_v48 = vadd.f32 %v5861_v27, %v5939_v13 }
 0x1b4   : > { %v1540_v30 = vpop.f32.mrb[71].mxu0  ;;  %v1899_v10 = vpop.f32.mrb[71].mxu1  ;;  %4473 = vst [vmem:[%s5983_s26 + $0x28] sm:$0xff] %v4267_v54   ;;  %5063 = vrcp.f32 %v2461_v31  ;;  %v2462_v45 = vadd.f32 1.0, %v5044_v59  ;;  %v6047_v9 = vadd.f32 %v4593_v41, %v1507_v46  ;;  %v3969_v1 = vmul.f32 -1.442695, %v6039_v3 }
 0x1b5   : > { %v5046_v17 = vpop.eup %5045  ;;  %4472 = vst [vmem:[%s5983_s26 + $0x20] sm:$0xff] %v4262_v7   ;;  %5065 = vrcp.f32 %v2459_v40  ;;  %v6051_v52 = vadd.f32 %v1899_v10, %v1499_v0  ;;  %v1520_v46 = vadd.f32 %v5861_v27, %v5970_v25  ;;  %v1515_v60 = vadd.f32 %v5861_v27, %v5950_v29 }
 0x1b6   : > { %v5048_v12 = vpop.eup %5047  ;;  %v2460_v35 = vadd.f32 1.0, %v5046_v17  ;;  %5067 = vrcp.f32 %v2462_v45  ;;  %v3972_v21 = vmul.f32 -1.442695, %v6047_v9  ;;  %v6063_v54 = vpop.f32.mrb[72].mxu0 }
 0x1b7   : > { %v5050_v37 = vpop.eup %5049  ;;  %v3970_v22 = vmul.f32 -1.442695, %v6051_v52  ;;  %v2733_v11 = vmul.f32 %v5048_v12, %v5944_v55  ;;  %v4596_v31 = vpop.f32.mrb[72].mxu1 }
 0x1b8   : > { %v5052_v28 = vpop.eup %5051  ;;  %5069 = vrcp.f32 %v2460_v35  ;;  %v2731_v13 = vmul.f32 %v5050_v37, %v5948_v5  ;;  %v6067_v59 = vadd.f32 %v4596_v31, %v1520_v46  ;;  %v1545_v0 = vpop.f32.mrb[73].mxu0 }
 0x1b9   : > { %v5054_v36 = vpop.eup %5053  ;;  %v2734_v51 = vmul.f32 %v5052_v28, %v5956_v39  ;;  %5071 = vpow2.f32 %v3971_v57  ;;  %v1912_v7 = vpop.f32.mrb[73].mxu1 }
 0x1ba   : > { %v5056_v41 = vpop.eup %5055  ;;  %v2732_v25 = vmul.f32 %v5054_v36, %v5958_v18  ;;  %5073 = vpow2.f32 %v3969_v1  ;;  %v6069_v39 = vadd.f32 %v1912_v7, %v1512_v48  ;;  %v6071_v30 = vpop.f32.mrb[74].mxu0  ;;  %v1523_v18 = vadd.f32 %v5861_v27, %v5978_v43 }
 0x1bb   : > { %v5058_v55 = vpop.eup %5057  ;;  %v4277_v40 = vpack.c.bf16 %v2734_v51, %v2733_v11  ;;  %v2465_v29 = vadd.f32 1.0, %v5056_v41  ;;  %5075 = vpow2.f32 %v3972_v21  ;;  %v4597_v10 = vpop.f32.mrb[74].mxu1  ;;  %v3975_v37 = vmul.f32 -1.442695, %v6067_v59 }
 0x1bc   : > { %v5060_v17 = vpop.eup %5059  ;;  %v4272_v5 = vpack.c.bf16 %v2732_v25, %v2731_v13  ;;  %v2463_v45 = vadd.f32 1.0, %v5058_v55  ;;  %5077 = vpow2.f32 %v3970_v22  ;;  %v1548_v57 = vpop.f32.mrb[75].mxu0  ;;  %v3973_v21 = vmul.f32 -1.442695, %v6069_v39 }
 0x1bd   : > { %v1915_v12 = vpop.f32.mrb[75].mxu1  ;;  %v5062_v35 = vpop.eup %5061  ;;  %4475 = vst [vmem:[%s5983_s26 + $0x38] sm:$0xff] %v4277_v40   ;;  %5079 = vrcp.f32 %v2465_v29  ;;  %v2466_v1 = vadd.f32 1.0, %v5060_v17  ;;  %v6079_v48 = vadd.f32 %v4597_v10, %v1523_v18  ;;  %v1536_v36 = vadd.f32 %v5861_v27, %v6033_v34 }
 0x1be   : > { %4474 = vst [vmem:[%s5983_s26 + $0x30] sm:$0xff] %v4272_v5   ;;  %5081 = vrcp.f32 %v2463_v45  ;;  %v2464_v28 = vadd.f32 1.0, %v5062_v35  ;;  %v6081_v46 = vadd.f32 %v1915_v12, %v1515_v60  ;;  %v5064_v43 = vpop.eup %5063  ;;  %v1528_v41 = vadd.f32 %v5861_v27, %v6003_v49  ;;  %v1551_v60 = vpop.f32.mrb[76].mxu0 }
 0x1bf   : > { %5083 = vrcp.f32 %v2466_v1  ;;  %v5066_v22 = vpop.eup %5065  ;;  %v3976_v11 = vmul.f32 -1.442695, %v6079_v48  ;;  %v1531_v13 = vadd.f32 %v5861_v27, %v6009_v42  ;;  %v4600_v25 = vpop.f32.mrb[76].mxu1  ;;  %v2737_v7 = vmul.f32 %v5064_v43, %v5974_v53 }
 0x1c0   : > { %5085 = vrcp.f32 %v2464_v28  ;;  %v3974_v51 = vmul.f32 -1.442695, %v6081_v46  ;;  %v5068_v31 = vpop.eup %5067  ;;  %v6093_v34 = vadd.f32 %v4600_v25, %v1536_v36  ;;  %v1553_v40 = vpop.f32.mrb[77].mxu0  ;;  %v2735_v17 = vmul.f32 %v5066_v22, %v5976_v4 }
 0x1c1   : > { %5087 = vpow2.f32 %v3975_v37  ;;  %v2738_v55 = vmul.f32 %v5068_v31, %v5986_v63  ;;  %v1928_v29 = vpop.f32.mrb[77].mxu1  ;;  %v1554_v5 = vpop.f32.mrb[78].mxu0  ;;  %v1539_v63 = vadd.f32 %v5861_v27, %v6041_v47  ;;  %v1552_v31 = vadd.f32 %v5861_v27, %v1551_v60 }
 0x1c2   : > { %v5070_v0 = vpop.eup %5069  ;;  %5089 = vpow2.f32 %v3973_v21  ;;  %v6097_v42 = vadd.f32 %v1928_v29, %v1528_v41  ;;  %v4601_v18 = vpop.f32.mrb[78].mxu1 }
 0x1c3   : > { %v5072_v10 = vpop.eup %5071  ;;  %v2736_v49 = vmul.f32 %v5070_v0, %v5992_v23  ;;  %5091 = vpow2.f32 %v3976_v11  ;;  %v4287_v53 = vpack.c.bf16 %v2738_v55, %v2737_v7  ;;  %v1556_v12 = vpop.f32.mrb[79].mxu0  ;;  %v3979_v23 = vmul.f32 -1.442695, %v6093_v34 }
 0x1c4   : > { %v5074_v45 = vpop.eup %5073  ;;  %v2469_v57 = vadd.f32 1.0, %v5072_v10  ;;  %5093 = vpow2.f32 %v3974_v51  ;;  %v1931_v35 = vpop.f32.mrb[79].mxu1  ;;  %v6103_v43 = vadd.f32 %v4601_v18, %v1539_v63  ;;  %v3977_v11 = vmul.f32 -1.442695, %v6097_v42 }
 0x1c5   : > { %v5076_v1 = vpop.eup %5075  ;;  %v4282_v4 = vpack.c.bf16 %v2736_v49, %v2735_v17  ;;  %v2467_v37 = vadd.f32 1.0, %v5074_v45  ;;  %4477 = vst [vmem:[%s5983_s26 + $0x48] sm:$0xff] %v4287_v53   ;;  %v6105_v22 = vadd.f32 %v1931_v35, %v1531_v13  ;;  %v1544_v0 = vadd.f32 %v5861_v27, %v6063_v54 }
 0x1c6   : > { %v5078_v21 = vpop.eup %5077  ;;  %5095 = vrcp.f32 %v2469_v57  ;;  %v2470_v28 = vadd.f32 1.0, %v5076_v1  ;;  %v3980_v41 = vmul.f32 -1.442695, %v6103_v43  ;;  %v1559_v7 = vpop.f32.mrb[80].mxu0 }
 0x1c7   : > { %v5080_v36 = vpop.eup %5079  ;;  %4476 = vst [vmem:[%s5983_s26 + $0x40] sm:$0xff] %v4282_v4   ;;  %5097 = vrcp.f32 %v2467_v37  ;;  %v2468_v47 = vadd.f32 1.0, %v5078_v21  ;;  %v3978_v13 = vmul.f32 -1.442695, %v6105_v22  ;;  %v4604_v55 = vpop.f32.mrb[80].mxu1 }
 0x1c8   : > { %v5082_v51 = vpop.eup %5081  ;;  %5099 = vrcp.f32 %v2470_v28  ;;  %v2741_v29 = vmul.f32 %v5080_v36, %v6007_v19  ;;  %v6116_v17 = vadd.f32 %v4604_v55, %v1552_v31  ;;  %v1561_v60 = vpop.f32.mrb[81].mxu0 }
 0x1c9   : > { %v5084_v25 = vpop.eup %5083  ;;  %5101 = vrcp.f32 %v2468_v47  ;;  %v1944_v49 = vpop.f32.mrb[81].mxu1  ;;  %v2739_v45 = vmul.f32 %v5082_v51, %v6014_v15 }
 0x1ca   : > { %v5086_v40 = vpop.eup %5085  ;;  %v2742_v10 = vmul.f32 %v5084_v25, %v6018_v61  ;;  %5103 = vpow2.f32 %v3979_v23  ;;  %v6120_v54 = vadd.f32 %v1944_v49, %v1544_v0  ;;  %v1562_v57 = vpop.f32.mrb[82].mxu0  ;;  %v1555_v61 = vadd.f32 %v5861_v27, %v1554_v5 }
 0x1cb   : > { %v5088_v18 = vpop.eup %5087  ;;  %v2740_v53 = vmul.f32 %v5086_v40, %v6021_v33  ;;  %5105 = vpow2.f32 %v3977_v11  ;;  %v4605_v63 = vpop.f32.mrb[82].mxu1  ;;  %v1547_v33 = vadd.f32 %v5861_v27, %v6071_v30  ;;  %v3983_v36 = vmul.f32 -1.442695, %v6116_v17 }
 0x1cc   : > { %v5090_v12 = vpop.eup %5089  ;;  %v4297_v19 = vpack.c.bf16 %v2742_v10, %v2741_v29  ;;  %v2473_v35 = vadd.f32 1.0, %v5088_v18  ;;  %5107 = vpow2.f32 %v3980_v41  ;;  %v1564_v1 = vpop.f32.mrb[83].mxu0  ;;  %v6127_v47 = vadd.f32 %v4605_v63, %v1555_v61 }
 0x1cd   : > { %v1947_v4 = vpop.f32.mrb[83].mxu1  ;;  %v5092_v37 = vpop.eup %5091  ;;  %v4292_v23 = vpack.c.bf16 %v2740_v53, %v2739_v45  ;;  %v2471_v15 = vadd.f32 1.0, %v5090_v12  ;;  %5109 = vpow2.f32 %v3978_v13  ;;  %v3981_v11 = vmul.f32 -1.442695, %v6120_v54 }
 0x1ce   : > { %v5094_v21 = vpop.eup %5093  ;;  %4479 = vst [vmem:[%s5983_s26 + $0x58] sm:$0xff] %v4297_v19   ;;  %5111 = vrcp.f32 %v2473_v35  ;;  %v2474_v28 = vadd.f32 1.0, %v5092_v37  ;;  %v6131_v51 = vadd.f32 %v1947_v4, %v1547_v33  ;;  %v3984_v30 = vmul.f32 -1.442695, %v6127_v47  ;;  %v1567_v13 = vpop.f32.mrb[84].mxu0 }
 0x1cf   : > { %4478 = vst [vmem:[%s5983_s26 + $0x50] sm:$0xff] %v4292_v23   ;;  %5113 = vrcp.f32 %v2471_v15  ;;  %v2472_v5 = vadd.f32 1.0, %v5094_v21  ;;  %v1560_v25 = vadd.f32 %v5861_v27, %v1559_v7  ;;  %v4608_v55 = vpop.f32.mrb[84].mxu1  ;;  %v1568_v10 = vadd.f32 %v5861_v27, %v1567_v13  ;;  %v1569_v60 = vpop.f32.mrb[85].mxu0 }
 0x1d0   : > { %v5096_v31 = vpop.eup %5095  ;;  %5115 = vrcp.f32 %v2474_v28  ;;  %v3982_v0 = vmul.f32 -1.442695, %v6131_v51  ;;  %v1960_v49 = vpop.f32.mrb[85].mxu1  ;;  %v1563_v23 = vadd.f32 %v5861_v27, %v1562_v57 }
 0x1d1   : > { %v5098_v41 = vpop.eup %5097  ;;  %5117 = vrcp.f32 %v2472_v5  ;;  %v2745_v29 = vmul.f32 %v5096_v31, %v6037_v58  ;;  %v6140_v63 = vadd.f32 %v1960_v49, %v1560_v25  ;;  %v1570_v7 = vpop.f32.mrb[86].mxu0  ;;  %v6143_v58 = vadd.f32 %v4608_v55, %v1568_v10 }
 0x1d2   : > { %v5100_v40 = vpop.eup %5099  ;;  %5119 = vpow2.f32 %v3983_v36  ;;  %v2743_v45 = vmul.f32 %v5098_v41, %v6039_v3  ;;  %v4609_v12 = vpop.f32.mrb[86].mxu1  ;;  %v1571_v61 = vadd.f32 %v5861_v27, %v1570_v7 }
 0x1d3   : > { %v5102_v18 = vpop.eup %5101  ;;  %v2746_v53 = vmul.f32 %v5100_v40, %v6047_v9  ;;  %5121 = vpow2.f32 %v3981_v11  ;;  %v1572_v1 = vpop.f32.mrb[87].mxu0  ;;  %v3987_v5 = vmul.f32 -1.442695, %v6143_v58  ;;  %v3985_v57 = vmul.f32 -1.442695, %v6140_v63 }
 0x1d4   : > { %v5104_v19 = vpop.eup %5103  ;;  %v2744_v35 = vmul.f32 %v5102_v18, %v6051_v52  ;;  %5123 = vpow2.f32 %v3984_v30  ;;  %v1963_v4 = vpop.f32.mrb[87].mxu1  ;;  %v6147_v28 = vadd.f32 %v4609_v12, %v1571_v61 }
 0x1d5   : > { %v5106_v37 = vpop.eup %5105  ;;  %v4307_v3 = vpack.c.bf16 %v2746_v53, %v2745_v29  ;;  %v2477_v9 = vadd.f32 1.0, %v5104_v19  ;;  %5125 = vpow2.f32 %v3982_v0  ;;  %v6151_v11 = vadd.f32 %v1963_v4, %v1563_v23 }
 0x1d6   : > { %v5108_v15 = vpop.eup %5107  ;;  %v4302_v33 = vpack.c.bf16 %v2744_v35, %v2743_v45  ;;  %v2475_v21 = vadd.f32 1.0, %v5106_v37  ;;  %v3988_v25 = vmul.f32 -1.442695, %v6147_v28  ;;  %v1575_v0 = vpop.f32.mrb[88].mxu0 }
 0x1d7   : > { %v5110_v52 = vpop.eup %5109  ;;  %4481 = vst [vmem:[%s5983_s26 + $0x68] sm:$0xff] %v4307_v3   ;;  %5127 = vrcp.f32 %v2477_v9  ;;  %v2478_v36 = vadd.f32 1.0, %v5108_v15  ;;  %v4612_v13 = vpop.f32.mrb[88].mxu1  ;;  %v3986_v40 = vmul.f32 -1.442695, %v6151_v11  ;;  %v1576_v29 = vadd.f32 %v5861_v27, %v1575_v0 }
 0x1d8   : > { %v5112_v31 = vpop.eup %5111  ;;  %4480 = vst [vmem:[%s5983_s26 + $0x60] sm:$0xff] %v4302_v33   ;;  %5129 = vrcp.f32 %v2475_v21  ;;  %v2476_v30 = vadd.f32 1.0, %v5110_v52  ;;  %v1577_v10 = vpop.f32.mrb[89].mxu0 }
 0x1d9   : > { %v5114_v41 = vpop.eup %5113  ;;  %5131 = vrcp.f32 %v2478_v36  ;;  %v1976_v60 = vpop.f32.mrb[89].mxu1  ;;  %v2749_v18 = vmul.f32 %v5112_v31, %v6067_v59 }
 0x1da   : > { %v5116_v55 = vpop.eup %5115  ;;  %5133 = vrcp.f32 %v2476_v30  ;;  %v2747_v45 = vmul.f32 %v5114_v41, %v6069_v39  ;;  %v1578_v7 = vpop.f32.mrb[90].mxu0  ;;  %v6163_v1 = vadd.f32 %v1976_v60, %v1576_v29 }
 0x1db   : > { %v5118_v49 = vpop.eup %5117  ;;  %v2750_v53 = vmul.f32 %v5116_v55, %v6079_v48  ;;  %5135 = vpow2.f32 %v3987_v5  ;;  %v4613_v12 = vpop.f32.mrb[90].mxu1  ;;  %v1579_v61 = vadd.f32 %v5861_v27, %v1578_v7 }
 0x1dc   : > { %v5120_v19 = vpop.eup %5119  ;;  %v2748_v35 = vmul.f32 %v5118_v49, %v6081_v46  ;;  %5137 = vpow2.f32 %v3985_v57  ;;  %v1580_v4 = vpop.f32.mrb[91].mxu0  ;;  %v3989_v33 = vmul.f32 -1.442695, %v6163_v1 }
 0x1dd   : > { %v1979_v37 = vpop.f32.mrb[91].mxu1  ;;  %v5122_v59 = vpop.eup %5121  ;;  %v4317_v3 = vpack.c.bf16 %v2750_v53, %v2749_v18  ;;  %v2481_v39 = vadd.f32 1.0, %v5120_v19  ;;  %5139 = vpow2.f32 %v3988_v25 }
 0x1de   : > { %v5124_v48 = vpop.eup %5123  ;;  %v4312_v9 = vpack.c.bf16 %v2748_v35, %v2747_v45  ;;  %v2479_v23 = vadd.f32 1.0, %v5122_v59  ;;  %5141 = vpow2.f32 %v3986_v40  ;;  %v6167_v21 = vadd.f32 %v1979_v37, %v1579_v61  ;;  %v1583_v31 = vpop.f32.mrb[92].mxu0 }
 0x1df   : > { %v5126_v15 = vpop.eup %5125  ;;  %4483 = vst [vmem:[%s5983_s26 + $0x78] sm:$0xff] %v4317_v3   ;;  %5143 = vrcp.f32 %v2481_v39  ;;  %v2482_v46 = vadd.f32 1.0, %v5124_v48  ;;  %v6171_v30 = vpop.f32.mrb[92].mxu1  ;;  %v1584_v41 = vadd.f32 %v5861_v27, %v1583_v31  ;;  %v6183_v27 = vld [vmem:[%s6745_s2] ss:$0 sm:$0xff] }
 0x1e0   : > { %4482 = vst [vmem:[%s5983_s26 + $0x70] sm:$0xff] %v4312_v9   ;;  %5145 = vrcp.f32 %v2479_v23  ;;  %v2480_v52 = vadd.f32 1.0, %v5126_v15  ;;  %v3990_v5 = vmul.f32 -1.442695, %v6167_v21  ;;  %v1585_v25 = vpop.f32.mrb[93].mxu0  ;;  %v1992_v0 = vpop.f32.mrb[93].mxu1 }
 0x1e1   : > { %v5128_v36 = vpop.eup %5127  ;;  %5147 = vrcp.f32 %v2482_v46  ;;  %v1586_v29 = vpop.f32.mrb[94].mxu0  ;;  %v6178_v18 = vadd.f32 %v4612_v13, %v1584_v41 }
 0x1e2   : > { %v5130_v57 = vpop.eup %5129  ;;  %5149 = vrcp.f32 %v2480_v52  ;;  %v2753_v40 = vmul.f32 %v5128_v36, %v6093_v34  ;;  %v6175_v10 = vpop.f32.mrb[94].mxu1  ;;  %v1587_v45 = vadd.f32 %v6183_v27, %v1586_v29 }
 0x1e3   : > { %v5132_v55 = vpop.eup %5131  ;;  %5151 = vpow2.f32 %v3989_v33  ;;  %v1588_v53 = vpop.f32.mrb[95].mxu0  ;;  %v2751_v19 = vmul.f32 %v5130_v57, %v6097_v42  ;;  %v3991_v9 = vmul.f32 -1.442695, %v6178_v18 }
 0x1e4   : > { %v5134_v60 = vpop.eup %5133  ;;  %v2754_v49 = vmul.f32 %v5132_v55, %v6103_v43  ;;  %5153 = vpow2.f32 %v3990_v5  ;;  %v1995_v34 = vpop.f32.mrb[95].mxu1  ;;  %v6188_v4 = vadd.f32 %v4613_v12, %v1587_v45 }
 0x1e5   : > { %v5136_v7 = vpop.eup %5135  ;;  %v2752_v35 = vmul.f32 %v5134_v60, %v6105_v22 }
 0x1e6   : > { %v5138_v43 = vpop.eup %5137  ;;  %v4327_v61 = vpack.c.bf16 %v2754_v49, %v2753_v40  ;;  %v2485_v13 = vadd.f32 1.0, %v5136_v7  ;;  %v3992_v22 = vmul.f32 -1.442695, %v6188_v4  ;;  %v1591_v15 = vpop.f32.mrb[96].mxu0 }
 0x1e7   : > { %v5140_v37 = vpop.eup %5139  ;;  %v4322_v59 = vpack.c.bf16 %v2752_v35, %v2751_v19  ;;  %v2483_v3 = vadd.f32 1.0, %v5138_v43  ;;  %v6194_v46 = vpop.f32.mrb[96].mxu1  ;;  %v1592_v33 = vadd.f32 %v6183_v27, %v1591_v15 }
 0x1e8   : > { %v5142_v39 = vpop.eup %5141  ;;  %4485 = vst [vmem:[%s5983_s26 + $0x88] sm:$0xff] %v4327_v61   ;;  %5155 = vrcp.f32 %v2485_v13  ;;  %v2486_v48 = vadd.f32 1.0, %v5140_v37  ;;  %v1593_v52 = vpop.f32.mrb[97].mxu0 }
 0x1e9   : > { %v5144_v23 = vpop.eup %5143  ;;  %4484 = vst [vmem:[%s5983_s26 + $0x80] sm:$0xff] %v4322_v59   ;;  %5157 = vrcp.f32 %v2483_v3  ;;  %v2484_v42 = vadd.f32 1.0, %v5142_v39  ;;  %v6197_v36 = vpop.f32.mrb[97].mxu1  ;;  %v6203_v40 = vadd.f32 %v1992_v0, %v1592_v33 }
 0x1ea   : > { %v5146_v12 = vpop.eup %5145  ;;  %5159 = vrcp.f32 %v2486_v48  ;;  %v2757_v31 = vmul.f32 %v5144_v23, %v6116_v17  ;;  %v1594_v57 = vpop.f32.mrb[98].mxu0 }
 0x1eb   : > { %v5148_v5 = vpop.eup %5147  ;;  %5161 = vrcp.f32 %v2484_v42  ;;  %v6200_v41 = vpop.f32.mrb[98].mxu1  ;;  %v1595_v29 = vadd.f32 %v6183_v27, %v1594_v57  ;;  %v2755_v17 = vmul.f32 %v5146_v12, %v6120_v54 }
 0x1ec   : > { %v5150_v25 = vpop.eup %5149  ;;  %v2758_v55 = vmul.f32 %v5148_v5, %v6127_v47  ;;  %5163 = vpow2.f32 %v3991_v9  ;;  %v1596_v60 = vpop.f32.mrb[99].mxu0  ;;  %v3993_v47 = vmul.f32 -1.442695, %v6203_v40 }
 0x1ed   : > { %v6206_v49 = vpop.f32.mrb[99].mxu1  ;;  %v5152_v45 = vpop.eup %5151  ;;  %v2756_v53 = vmul.f32 %v5150_v25, %v6131_v51  ;;  %5165 = vpow2.f32 %v3992_v22  ;;  %v6211_v43 = vadd.f32 %v1995_v34, %v1595_v29 }
 0x1ee   : > { %v5154_v7 = vpop.eup %5153  ;;  %v4337_v19 = vpack.c.bf16 %v2758_v55, %v2757_v31  ;;  %v2487_v35 = vadd.f32 1.0, %v5152_v45  ;;  %v1599_v37 = vpop.f32.mrb[100].mxu0 }
 0x1ef   : > { %v4332_v0 = vpack.c.bf16 %v2756_v53, %v2755_v17  ;;  %v2488_v61 = vadd.f32 1.0, %v5154_v7  ;;  %v3994_v13 = vmul.f32 -1.442695, %v6211_v43  ;;  %v6216_v54 = vpop.f32.mrb[100].mxu1  ;;  %v1600_v59 = vadd.f32 %v6183_v27, %v1599_v37  ;;  %v1601_v3 = vpop.f32.mrb[101].mxu0 }
 0x1f0   : > { %4487 = vst [vmem:[%s5983_s26 + $0x98] sm:$0xff] %v4337_v19   ;;  %5167 = vrcp.f32 %v2487_v35  ;;  %v6219_v39 = vpop.f32.mrb[101].mxu1  ;;  %v1602_v48 = vpop.f32.mrb[102].mxu0 }
 0x1f1   : > { %4486 = vst [vmem:[%s5983_s26 + $0x90] sm:$0xff] %v4332_v0   ;;  %5169 = vrcp.f32 %v2488_v61  ;;  %v6221_v9 = vpop.f32.mrb[102].mxu1  ;;  %v6224_v42 = vadd.f32 %v6171_v30, %v1600_v59  ;;  %v1603_v22 = vadd.f32 %v6183_v27, %v1602_v48  ;;  %v1604_v15 = vpop.f32.mrb[103].mxu0 }
 0x1f2   : > { %v5156_v51 = vpop.eup %5155  ;;  %5171 = vpow2.f32 %v3993_v47  ;;  %v6227_v12 = vpop.f32.mrb[103].mxu1 }
 0x1f3   : > { %v5158_v34 = vpop.eup %5157  ;;  %5173 = vpow2.f32 %v3994_v13  ;;  %v2761_v52 = vmul.f32 %v5156_v51, %v6143_v58  ;;  %v3995_v30 = vmul.f32 -1.442695, %v6224_v42  ;;  %v6235_v55 = vadd.f32 %v6175_v10, %v1603_v22 }
 0x1f4   : > { %v5160_v23 = vpop.eup %5159  ;;  %v2759_v57 = vmul.f32 %v5158_v34, %v6140_v63 }
 0x1f5   : > { %v5162_v33 = vpop.eup %5161  ;;  %v2762_v5 = vmul.f32 %v5160_v23, %v6147_v28  ;;  %5175 = vpow2.f32 %v3995_v30  ;;  %v3996_v58 = vmul.f32 -1.442695, %v6235_v55 }
 0x1f6   : > { %v5164_v31 = vpop.eup %5163  ;;  %v2760_v25 = vmul.f32 %v5162_v33, %v6151_v11  ;;  %v1607_v28 = vpop.f32.mrb[104].mxu0 }
 0x1f7   : > { %v5166_v29 = vpop.eup %5165  ;;  %v4347_v60 = vpack.c.bf16 %v2762_v5, %v2761_v52  ;;  %v2489_v45 = vadd.f32 1.0, %v5164_v31  ;;  %v6239_v63 = vpop.f32.mrb[104].mxu1  ;;  %v1608_v11 = vadd.f32 %v6183_v27, %v1607_v28 }
 0x1f8   : > { %v4342_v17 = vpack.c.bf16 %v2760_v25, %v2759_v57  ;;  %v2490_v53 = vadd.f32 1.0, %v5166_v29  ;;  %v1609_v10 = vpop.f32.mrb[105].mxu0  ;;  %v6243_v19 = vpop.f32.mrb[105].mxu1 }
 0x1f9   : > { %4489 = vst [vmem:[%s5983_s26 + $0xa8] sm:$0xff] %v4347_v60   ;;  %5177 = vrcp.f32 %v2489_v45  ;;  %v1610_v47 = vpop.f32.mrb[106].mxu0  ;;  %v6245_v0 = vpop.f32.mrb[106].mxu1  ;;  %v6250_v51 = vadd.f32 %v6197_v36, %v1608_v11 }
 0x1fa   : > { %v5168_v7 = vpop.eup %5167  ;;  %4488 = vst [vmem:[%s5983_s26 + $0xa0] sm:$0xff] %v4342_v17   ;;  %5179 = vrcp.f32 %v2490_v53  ;;  %v1611_v59 = vadd.f32 %v6183_v27, %v1610_v47  ;;  %v1612_v3 = vpop.f32.mrb[107].mxu0 }
 0x1fb   : > { %v5170_v35 = vpop.eup %5169  ;;  %5181 = vpow2.f32 %v3996_v58  ;;  %v2763_v13 = vmul.f32 %v5168_v7, %v6163_v1  ;;  %v6253_v34 = vpop.f32.mrb[107].mxu1  ;;  %v3997_v33 = vmul.f32 -1.442695, %v6250_v51 }
 0x1fc   : > { %v5172_v61 = vpop.eup %5171  ;;  %v2764_v37 = vmul.f32 %v5170_v35, %v6167_v21  ;;  %v6257_v52 = vadd.f32 %v6206_v49, %v1611_v59 }
 0x1fd   : > { %v5174_v48 = vpop.eup %5173  ;;  %v2491_v23 = vadd.f32 1.0, %v5172_v61 }
 0x1fe   : > { %v4352_v22 = vpack.c.bf16 %v2764_v37, %v2763_v13  ;;  %v2492_v15 = vadd.f32 1.0, %v5174_v48  ;;  %v3998_v1 = vmul.f32 -1.442695, %v6257_v52  ;;  %v1615_v21 = vpop.f32.mrb[108].mxu0  ;;  %v6261_v36 = vpop.f32.mrb[108].mxu1  ;;  %v1680_v13 = vadd.f32 %v6183_v27, %v5731_v2 }
 0x1ff   : > { %5183 = vrcp.f32 %v2491_v23  ;;  %v5176_v5 = vpop.eup %5175  ;;  %v1616_v31 = vadd.f32 %v6183_v27, %v1615_v21  ;;  %v1617_v57 = vpop.f32.mrb[109].mxu0  ;;  %v1683_v2 = vadd.f32 %v6183_v27, %v5737_v8 }
 0x200   : > { %4490 = vst [vmem:[%s5983_s26 + $0xb0] sm:$0xff] %v4352_v22   ;;  %5185 = vrcp.f32 %v2492_v15  ;;  %v6264_v25 = vpop.f32.mrb[109].mxu1  ;;  %v2493_v29 = vadd.f32 1.0, %v5176_v5  ;;  %v1618_v49 = vpop.f32.mrb[110].mxu0 }
 0x201   : > { %5187 = vpow2.f32 %v3997_v33  ;;  %v6266_v60 = vpop.f32.mrb[110].mxu1  ;;  %v6269_v17 = vadd.f32 %v6194_v46, %v1616_v31  ;;  %v1619_v53 = vadd.f32 %v6183_v27, %v1618_v49  ;;  %v1620_v58 = vpop.f32.mrb[111].mxu0 }
 0x202   : > { %5189 = vpow2.f32 %v3998_v1  ;;  %v6272_v28 = vpop.f32.mrb[111].mxu1 }
 0x203   : > { %v5178_v30 = vpop.eup %5177  ;;  %5191 = vrcp.f32 %v2493_v29  ;;  %v3999_v47 = vmul.f32 -1.442695, %v6269_v17  ;;  %v6278_v61 = vadd.f32 %v6200_v41, %v1619_v53 }
 0x204   : > { %v5180_v45 = vpop.eup %5179  ;;  %v2765_v11 = vmul.f32 %v5178_v30, %v6178_v18 }
 0x205   : > { %v5182_v7 = vpop.eup %5181  ;;  %v2766_v10 = vmul.f32 %v5180_v45, %v6188_v4  ;;  %v4000_v37 = vmul.f32 -1.442695, %v6278_v61 }
 0x206   : > { %v2494_v35 = vadd.f32 1.0, %v5182_v7  ;;  %v1623_v18 = vpop.f32.mrb[112].mxu0  ;;  %v4636_v3 = vpop.f32.mrb[112].mxu1 }
 0x207   : > { %v4357_v46 = vpack.c.bf16 %v2766_v10, %v2765_v11  ;;  %v1624_v48 = vadd.f32 %v6183_v27, %v1623_v18  ;;  %v6285_v23 = vadd.f32 %v4636_v3, %v1680_v13  ;;  %v1625_v41 = vpop.f32.mrb[113].mxu0  ;;  %v6287_v22 = vpop.f32.mrb[113].mxu1  ;;  %v1696_v10 = vadd.f32 %v6183_v27, %v5759_v26 }
 0x208   : > { %5193 = vrcp.f32 %v2494_v35  ;;  %v1626_v21 = vpop.f32.mrb[114].mxu0  ;;  %v4637_v5 = vpop.f32.mrb[114].mxu1 }
 0x209   : > { %v5184_v59 = vpop.eup %5183  ;;  %4491 = vst [vmem:[%s5983_s26 + $0xb8] sm:$0xff] %v4357_v46   ;;  %5195 = vpow2.f32 %v3999_v47  ;;  %v6294_v30 = vadd.f32 %v6219_v39, %v1624_v48  ;;  %v1627_v29 = vadd.f32 %v6183_v27, %v1626_v21  ;;  %v1628_v49 = vpop.f32.mrb[115].mxu0  ;;  %v4015_v8 = vmul.f32 -1.442695, %v6285_v23 }
 0x20a   : > { %v5186_v4 = vpop.eup %5185  ;;  %5197 = vpow2.f32 %v4000_v37  ;;  %v2767_v33 = vmul.f32 %v5184_v59, %v6203_v40  ;;  %v6297_v45 = vpop.f32.mrb[115].mxu1  ;;  %v6300_v40 = vadd.f32 %v4637_v5, %v1683_v2  ;;  %v1688_v47 = vadd.f32 %v6183_v27, %v5745_v14 }
 0x20b   : > { %v5188_v15 = vpop.eup %5187  ;;  %v2768_v1 = vmul.f32 %v5186_v4, %v6211_v43  ;;  %v4001_v43 = vmul.f32 -1.442695, %v6294_v30  ;;  %v6304_v7 = vadd.f32 %v6227_v12, %v1627_v29  ;;  %v1691_v46 = vadd.f32 %v6183_v27, %v5751_v20 }
 0x20c   : > { %v5190_v31 = vpop.eup %5189  ;;  %v2495_v57 = vadd.f32 1.0, %v5188_v15  ;;  %v4016_v39 = vmul.f32 -1.442695, %v6300_v40  ;;  %v1699_v59 = vadd.f32 %v6183_v27, %v5765_v32 }
 0x20d   : > { %v4362_v53 = vpack.c.bf16 %v2768_v1, %v2767_v33  ;;  %v2496_v58 = vadd.f32 1.0, %v5190_v31  ;;  %v5192_v11 = vpop.eup %5191  ;;  %v4002_v35 = vmul.f32 -1.442695, %v6304_v7 }
 0x20e   : > { %5199 = vrcp.f32 %v2495_v57  ;;  %v1631_v12 = vpop.f32.mrb[116].mxu0  ;;  %v4640_v13 = vpop.f32.mrb[116].mxu1  ;;  %v2769_v14 = vmul.f32 %v5192_v11, %v6224_v42 }
 0x20f   : > { %4492 = vst [vmem:[%s5983_s26 + $0xc0] sm:$0xff] %v4362_v53   ;;  %5201 = vrcp.f32 %v2496_v58  ;;  %v1632_v18 = vadd.f32 %v6183_v27, %v1631_v12  ;;  %v6318_v26 = vadd.f32 %v4640_v13, %v1696_v10  ;;  %v1633_v3 = vpop.f32.mrb[117].mxu0  ;;  %v2088_v4 = vpop.f32.mrb[117].mxu1 }
 0x210   : > { %5203 = vpow2.f32 %v4001_v43  ;;  %v6322_v20 = vadd.f32 %v2088_v4, %v1688_v47  ;;  %v1634_v15 = vpop.f32.mrb[118].mxu0  ;;  %v4641_v2 = vpop.f32.mrb[118].mxu1  ;;  %v1715_v47 = vadd.f32 %v6183_v27, %v5793_v56 }
 0x211   : > { %5205 = vpow2.f32 %v4015_v8  ;;  %v6325_v1 = vadd.f32 %v6216_v54, %v1632_v18  ;;  %v4019_v21 = vmul.f32 -1.442695, %v6318_v26  ;;  %v1635_v5 = vadd.f32 %v6183_v27, %v1634_v15  ;;  %v1636_v31 = vpop.f32.mrb[119].mxu0  ;;  %v2091_v57 = vpop.f32.mrb[119].mxu1 }
 0x212   : > { %v5194_v37 = vpop.eup %5193  ;;  %5207 = vpow2.f32 %v4002_v35  ;;  %v6330_v49 = vadd.f32 %v4641_v2, %v1699_v59  ;;  %v6336_v54 = vadd.f32 %v2091_v57, %v1691_v46  ;;  %v1704_v8 = vadd.f32 %v6183_v27, %v5773_v38 }
 0x213   : > { %v5196_v48 = vpop.eup %5195  ;;  %v2770_v41 = vmul.f32 %v5194_v37, %v6235_v55  ;;  %5209 = vpow2.f32 %v4016_v39  ;;  %v4017_v55 = vmul.f32 -1.442695, %v6322_v20  ;;  %v4003_v53 = vmul.f32 -1.442695, %v6325_v1 }
 0x214   : > { %v5198_v33 = vpop.eup %5197  ;;  %v2497_v32 = vadd.f32 1.0, %v5196_v48  ;;  %v6334_v58 = vadd.f32 %v6221_v9, %v1635_v5  ;;  %v1712_v39 = vadd.f32 %v6183_v27, %v5787_v50  ;;  %v4020_v10 = vmul.f32 -1.442695, %v6330_v49 }
 0x215   : > { %v4367_v42 = vpack.c.bf16 %v2770_v41, %v2769_v14  ;;  %v2498_v29 = vadd.f32 1.0, %v5198_v33  ;;  %v1707_v9 = vadd.f32 %v6183_v27, %v5779_v44  ;;  %v1720_v44 = vadd.f32 %v6183_v27, %v5801_v62 }
 0x216   : > { %5211 = vrcp.f32 %v2497_v32  ;;  %v4004_v11 = vmul.f32 -1.442695, %v6334_v58  ;;  %v1639_v46 = vpop.f32.mrb[120].mxu0  ;;  %v4644_v12 = vpop.f32.mrb[120].mxu1  ;;  %v1723_v62 = vadd.f32 %v6183_v27, %v5807_v6  ;;  %v4018_v31 = vmul.f32 -1.442695, %v6336_v54 }
 0x217   : > { %4493 = vst [vmem:[%s5983_s26 + $0xc8] sm:$0xff] %v4367_v42   ;;  %5213 = vrcp.f32 %v2498_v29  ;;  %v1640_v37 = vadd.f32 %v6183_v27, %v1639_v46  ;;  %v6352_v59 = vadd.f32 %v4644_v12, %v1712_v39  ;;  %v1641_v18 = vpop.f32.mrb[121].mxu0  ;;  %v2104_v3 = vpop.f32.mrb[121].mxu1  ;;  %v1728_v6 = vadd.f32 %v6183_v27, %v5815_v16 }
 0x218   : > { %v5200_v43 = vpop.eup %5199  ;;  %5215 = vpow2.f32 %v4003_v53  ;;  %v1642_v48 = vpop.f32.mrb[122].mxu0 }
 0x219   : > { %v5202_v35 = vpop.eup %5201  ;;  %v2771_v38 = vmul.f32 %v5200_v43, %v6250_v51  ;;  %5217 = vpow2.f32 %v4019_v21  ;;  %v6356_v51 = vadd.f32 %v2104_v3, %v1704_v8  ;;  %v4645_v14 = vpop.f32.mrb[122].mxu1  ;;  %v6359_v2 = vadd.f32 %v6243_v19, %v1640_v37 }
 0x21a   : > { %v5204_v13 = vpop.eup %5203  ;;  %v2772_v50 = vmul.f32 %v5202_v35, %v6257_v52  ;;  %5219 = vpow2.f32 %v4017_v55  ;;  %v1644_v33 = vpop.f32.mrb[123].mxu0  ;;  %v1643_v29 = vadd.f32 %v6183_v27, %v1642_v48  ;;  %v4023_v19 = vmul.f32 -1.442695, %v6352_v59  ;;  %v6756_v35 = vld [vmem:[#allocation3_spill] sm:$0xff] }
 0x21b   : > { %v5206_v4 = vpop.eup %5205  ;;  %v2499_v56 = vadd.f32 1.0, %v5204_v13  ;;  %5221 = vpow2.f32 %v4004_v11  ;;  %v2107_v32 = vpop.f32.mrb[123].mxu1  ;;  %v4005_v42 = vmul.f32 -1.442695, %v6359_v2  ;;  %v6368_v55 = vadd.f32 %v4645_v14, %v1715_v47 }
 0x21c   : > { %v5208_v41 = vpop.eup %5207  ;;  %v4372_v52 = vpack.c.bf16 %v2772_v50, %v2771_v38  ;;  %v2513_v15 = vadd.f32 1.0, %v5206_v4  ;;  %5223 = vpow2.f32 %v4020_v10  ;;  %v6370_v53 = vadd.f32 %v2107_v32, %v1707_v9  ;;  %v6757_v9 = vld [vmem:[#allocation4_spill] sm:$0xff] }
 0x21d   : > { %v5210_v21 = vpop.eup %5209  ;;  %5225 = vrcp.f32 %v2499_v56  ;;  %v2500_v5 = vadd.f32 1.0, %v5208_v41  ;;  %v4021_v43 = vmul.f32 -1.442695, %v6356_v51  ;;  %v6376_v39 = vadd.f32 %v6253_v34, %v1643_v29 }
 0x21e   : > { %4494 = vst [vmem:[%s5983_s26 + $0xd0] sm:$0xff] %v4372_v52   ;;  %5227 = vrcp.f32 %v2513_v15  ;;  %v2514_v57 = vadd.f32 1.0, %v5210_v21  ;;  %v1731_v10 = vadd.f32 %v6183_v27, %v5821_v24  ;;  %v6382_v47 = vadd.f32 %v6183_v27, %v6756_v35  ;;  %v1647_v16 = vpop.f32.mrb[124].mxu0  ;;  %v4648_v46 = vpop.f32.mrb[124].mxu1  ;;  %v6758_v21 = vld [vmem:[#allocation5_spill] sm:$0xff]  ;;  %v6759_v35 = vld [vmem:[#allocation6_spill] sm:$0xff] }
 0x21f   : > { %5229 = vrcp.f32 %v2500_v5  ;;  %v6386_v38 = vadd.f32 %v6183_v27, %v6757_v9  ;;  %v1648_v50 = vadd.f32 %v6183_v27, %v1647_v16  ;;  %v1649_v24 = vpop.f32.mrb[125].mxu0  ;;  %v2120_v37 = vpop.f32.mrb[125].mxu1  ;;  %v6391_v4 = vadd.f32 %v4648_v46, %v1728_v6 }
 0x220   : > { %v5212_v8 = vpop.eup %5211  ;;  %5231 = vrcp.f32 %v2514_v57  ;;  %v6393_v56 = vadd.f32 %v2120_v37, %v1720_v44  ;;  %v1650_v48 = vpop.f32.mrb[126].mxu0  ;;  %v1744_v5 = vadd.f32 %v6183_v27, %v6758_v21  ;;  %v4024_v44 = vmul.f32 -1.442695, %v6368_v55 }
 0x221   : > { %v5214_v11 = vpop.eup %5213  ;;  %5233 = vpow2.f32 %v4018_v31  ;;  %v2773_v13 = vmul.f32 %v5212_v8, %v6269_v17  ;;  %v4649_v14 = vpop.f32.mrb[126].mxu1  ;;  %v4006_v29 = vmul.f32 -1.442695, %v6376_v39  ;;  %v1747_v9 = vadd.f32 %v6183_v27, %v6759_v35 }
 0x222   : > { %v5216_v12 = vpop.eup %5215  ;;  %v2774_v34 = vmul.f32 %v5214_v11, %v6278_v61  ;;  %5235 = vpow2.f32 %v4005_v42  ;;  %v6396_v61 = vadd.f32 %v6239_v63, %v1648_v50  ;;  %v1652_v15 = vpop.f32.mrb[127].mxu0  ;;  %v6404_v6 = vadd.f32 %v4649_v14, %v1731_v10 }
 0x223   : > { %v5218_v18 = vpop.eup %5217  ;;  %v2501_v3 = vadd.f32 1.0, %v5216_v12  ;;  %5237 = vpow2.f32 %v4023_v19  ;;  %v2123_v33 = vpop.f32.mrb[127].mxu1  ;;  %v1651_v19 = vadd.f32 %v6183_v27, %v1650_v48  ;;  %v4022_v16 = vmul.f32 -1.442695, %v6370_v53 }
 0x224   : > { %v5220_v41 = vpop.eup %5219  ;;  %v4377_v52 = vpack.c.bf16 %v2774_v34, %v2773_v13  ;;  %v2517_v17 = vadd.f32 1.0, %v5218_v18  ;;  %5239 = vpow2.f32 %v4021_v43  ;;  %v6406_v43 = vadd.f32 %v2123_v33, %v1723_v62  ;;  %v6760_v13 = vld [vmem:[#allocation7_spill] sm:$0xff] }
 0x225   : > { %v5222_v32 = vpop.eup %5221  ;;  %5241 = vrcp.f32 %v2501_v3  ;;  %v2515_v31 = vadd.f32 1.0, %v5220_v41  ;;  %v6412_v46 = vadd.f32 %v6245_v0, %v1651_v19  ;;  %v6416_v34 = vadd.f32 %v6183_v27, %v6760_v13  ;;  %v6762_v13 = vld [vmem:[#allocation9_spill] sm:$0xff] }
 0x226   : > { %v5224_v57 = vpop.eup %5223  ;;  %4495 = vst [vmem:[%s5983_s26 + $0xd8] sm:$0xff] %v4377_v52   ;;  %5243 = vrcp.f32 %v2517_v17  ;;  %v2502_v42 = vadd.f32 1.0, %v5222_v32  ;;  %v4007_v62 = vmul.f32 -1.442695, %v6396_v61  ;;  %v1655_v50 = vpop.f32.mrb[128].mxu0 }
 0x227   : > { %v5226_v63 = vpop.eup %5225  ;;  %5245 = vrcp.f32 %v2515_v31  ;;  %v2518_v8 = vadd.f32 1.0, %v5224_v57  ;;  %v4652_v24 = vpop.f32.mrb[128].mxu1  ;;  %v1656_v0 = vadd.f32 %v6183_v27, %v1655_v50 }
 0x228   : > { %v5228_v11 = vpop.eup %5227  ;;  %5247 = vrcp.f32 %v2502_v42  ;;  %v2775_v10 = vmul.f32 %v5226_v63, %v6294_v30  ;;  %v1657_v48 = vpop.f32.mrb[129].mxu0  ;;  %v6424_v30 = vadd.f32 %v4652_v24, %v1744_v5  ;;  %v4027_v63 = vmul.f32 -1.442695, %v6391_v4 }
 0x229   : > { %v5230_v12 = vpop.eup %5229  ;;  %5249 = vrcp.f32 %v2518_v8  ;;  %v2789_v18 = vmul.f32 %v5228_v11, %v6285_v23  ;;  %v2136_v14 = vpop.f32.mrb[129].mxu1  ;;  %v6430_v21 = vadd.f32 %v6264_v25, %v1656_v0  ;;  %v4025_v8 = vmul.f32 -1.442695, %v6393_v56 }
 0x22a   : > { %v5232_v37 = vpop.eup %5231  ;;  %v2776_v3 = vmul.f32 %v5230_v12, %v6304_v7  ;;  %5251 = vpow2.f32 %v4006_v29  ;;  %v6427_v17 = vadd.f32 %v2136_v14, %v6382_v47  ;;  %v1658_v15 = vpop.f32.mrb[130].mxu0 }
 0x22b   : > { %v5234_v41 = vpop.eup %5233  ;;  %v2790_v52 = vmul.f32 %v5232_v37, %v6300_v40  ;;  %5253 = vpow2.f32 %v4024_v44  ;;  %v4653_v33 = vpop.f32.mrb[130].mxu1  ;;  %v6761_v44 = vld [vmem:[#allocation8_spill] sm:$0xff]  ;;  %v1659_v35 = vadd.f32 %v6183_v27, %v1658_v15  ;;  %v6763_v37 = vld [vmem:[#allocation10_spill] sm:$0xff] }
 0x22c   : > { %v5236_v23 = vpop.eup %5235  ;;  %v4382_v32 = vpack.c.bf16 %v2776_v3, %v2775_v10  ;;  %v2516_v7 = vadd.f32 1.0, %v5234_v41  ;;  %5255 = vpow2.f32 %v4022_v16  ;;  %v1660_v31 = vpop.f32.mrb[131].mxu0  ;;  %v6434_v5 = vadd.f32 %v6183_v27, %v6761_v44 }
 0x22d   : > { %v2139_v57 = vpop.f32.mrb[131].mxu1  ;;  %v5238_v40 = vpop.eup %5237  ;;  %v4417_v47 = vpack.c.bf16 %v2790_v52, %v2789_v18  ;;  %v2503_v42 = vadd.f32 1.0, %v5236_v23  ;;  %5257 = vpow2.f32 %v4007_v62  ;;  %v6441_v16 = vadd.f32 %v4653_v33, %v1747_v9 }
 0x22e   : > { %v5240_v29 = vpop.eup %5239  ;;  %4496 = vst [vmem:[%s5983_s26 + $0xe0] sm:$0xff] %v4382_v32   ;;  %5259 = vrcp.f32 %v2516_v7  ;;  %v2521_v19 = vadd.f32 1.0, %v5238_v40  ;;  %v1760_v10 = vadd.f32 %v6183_v27, %v6762_v13  ;;  %v4008_v62 = vmul.f32 -1.442695, %v6412_v46  ;;  %v1663_v0 = vpop.f32.mrb[132].mxu0 }
 0x22f   : > { %v5242_v25 = vpop.eup %5241  ;;  %4503 = vst [vmem:[%s5983_s26 + $0x118] sm:$0xff] %v4417_v47   ;;  %5261 = vrcp.f32 %v2503_v42  ;;  %v2519_v11 = vadd.f32 1.0, %v5240_v29  ;;  %v6447_v50 = vadd.f32 %v2139_v57, %v6386_v38  ;;  %v1763_v18 = vadd.f32 %v6183_v27, %v6763_v37  ;;  %v4656_v48 = vpop.f32.mrb[132].mxu1 }
 0x230   : > { %v5244_v12 = vpop.eup %5243  ;;  %5263 = vrcp.f32 %v2521_v19  ;;  %v4028_v3 = vmul.f32 -1.442695, %v6404_v6  ;;  %v6453_v9 = vadd.f32 %v6272_v28, %v1659_v35  ;;  %v2777_v41 = vmul.f32 %v5242_v25, %v6325_v1  ;;  %v1665_v15 = vpop.f32.mrb[133].mxu0 }
 0x231   : > { %v5246_v24 = vpop.eup %5245  ;;  %5265 = vrcp.f32 %v2519_v11  ;;  %v4026_v52 = vmul.f32 -1.442695, %v6406_v43  ;;  %v1664_v38 = vadd.f32 %v6183_v27, %v1663_v0  ;;  %v2152_v33 = vpop.f32.mrb[133].mxu1  ;;  %v2793_v32 = vmul.f32 %v5244_v12, %v6318_v26 }
 0x232   : > { %v5248_v14 = vpop.eup %5247  ;;  %5267 = vpow2.f32 %v4027_v63  ;;  %v6460_v28 = vadd.f32 %v4656_v48, %v1760_v10  ;;  %v1666_v31 = vpop.f32.mrb[134].mxu0  ;;  %v6467_v47 = vadd.f32 %v2152_v33, %v6416_v34  ;;  %v4031_v63 = vmul.f32 -1.442695, %v6424_v30 }
 0x233   : > { %v5250_v23 = vpop.eup %5249  ;;  %v2778_v7 = vmul.f32 %v5248_v14, %v6334_v58  ;;  %5269 = vpow2.f32 %v4025_v8  ;;  %v4657_v57 = vpop.f32.mrb[134].mxu1  ;;  %v6464_v44 = vadd.f32 %v6261_v36, %v1664_v38  ;;  %v4009_v11 = vmul.f32 -1.442695, %v6430_v21 }
 0x234   : > { %v5252_v40 = vpop.eup %5251  ;;  %v2794_v1 = vmul.f32 %v5250_v23, %v6330_v49  ;;  %5271 = vpow2.f32 %v4008_v62  ;;  %v1668_v42 = vpop.f32.mrb[135].mxu0  ;;  %v4029_v35 = vmul.f32 -1.442695, %v6427_v17  ;;  %v1667_v12 = vadd.f32 %v6183_v27, %v1666_v31 }
 0x235   : > { %v2155_v26 = vpop.f32.mrb[135].mxu1  ;;  %v5254_v29 = vpop.eup %5253  ;;  %v4387_v58 = vpack.c.bf16 %v2778_v7, %v2777_v41  ;;  %v2504_v19 = vadd.f32 1.0, %v5252_v40  ;;  %5273 = vpow2.f32 %v4028_v3  ;;  %v6475_v62 = vadd.f32 %v4657_v57, %v1763_v18 }
 0x236   : > { %v5256_v8 = vpop.eup %5255  ;;  %v4427_v25 = vpack.c.bf16 %v2794_v1, %v2793_v32  ;;  %v2522_v49 = vadd.f32 1.0, %v5254_v29  ;;  %5275 = vpow2.f32 %v4026_v52  ;;  %v6478_v37 = vadd.f32 %v2155_v26, %v6434_v5  ;;  %v1671_v41 = vpop.f32.mrb[136].mxu0 }
 0x237   : > { %v5258_v36 = vpop.eup %5257  ;;  %4497 = vst [vmem:[%s5983_s26 + $0xe8] sm:$0xff] %v4387_v58   ;;  %5277 = vrcp.f32 %v2504_v19  ;;  %v2520_v34 = vadd.f32 1.0, %v5256_v8  ;;  %v2791_v0 = vmul.f32 %v5246_v24, %v6322_v20  ;;  %v6483_v14 = vadd.f32 %v6266_v60, %v1667_v12  ;;  %v1673_v18 = vpop.f32.mrb[137].mxu0 }
 0x238   : > { %v5260_v13 = vpop.eup %5259  ;;  %4505 = vst [vmem:[%s5983_s26 + $0x128] sm:$0xff] %v4427_v25   ;;  %5279 = vrcp.f32 %v2522_v49  ;;  %v2505_v10 = vadd.f32 1.0, %v5258_v36  ;;  %v4010_v38 = vmul.f32 -1.442695, %v6453_v9  ;;  %v1674_v5 = vpop.f32.mrb[138].mxu0  ;;  %v1672_v20 = vadd.f32 %v6183_v27, %v1671_v41 }
 0x239   : > { %v5262_v3 = vpop.eup %5261  ;;  %v2792_v48 = vmul.f32 %v5260_v13, %v6336_v54  ;;  %5281 = vrcp.f32 %v2520_v34  ;;  %v1675_v54 = vadd.f32 %v6183_v27, %v1674_v5  ;;  %v1676_v24 = vpop.f32.mrb[139].mxu0  ;;  %v4032_v29 = vmul.f32 -1.442695, %v6441_v16 }
 0x23a   : > { %v5264_v52 = vpop.eup %5263  ;;  %5283 = vrcp.f32 %v2505_v10  ;;  %v6490_v57 = vadd.f32 %v6287_v22, %v1672_v20  ;;  %v2779_v22 = vmul.f32 %v5262_v3, %v6359_v2  ;;  %v4035_v34 = vmul.f32 -1.442695, %v6460_v28 }
 0x23b   : > { %v5266_v15 = vpop.eup %5265  ;;  %v4422_v33 = vpack.c.bf16 %v2792_v48, %v2791_v0  ;;  %5285 = vpow2.f32 %v4009_v11  ;;  %v6493_v40 = vadd.f32 %v6297_v45, %v1675_v54  ;;  %v4011_v45 = vmul.f32 -1.442695, %v6464_v44 }
 0x23c   : > { %v5268_v23 = vpop.eup %5267  ;;  %5287 = vpow2.f32 %v4031_v63  ;;  %v4030_v63 = vmul.f32 -1.442695, %v6447_v50  ;;  %v2797_v11 = vmul.f32 %v5264_v52, %v6352_v59  ;;  %v2795_v12 = vmul.f32 %v5266_v15, %v6356_v51 }
 0x23d   : > { %v5270_v60 = vpop.eup %5269  ;;  %4504 = vst [vmem:[%s5983_s26 + $0x120] sm:$0xff] %v4422_v33   ;;  %v2525_v32 = vadd.f32 1.0, %v5268_v23  ;;  %5289 = vpow2.f32 %v4029_v35  ;;  %v4033_v52 = vmul.f32 -1.442695, %v6467_v47  ;;  %v4012_v18 = vmul.f32 -1.442695, %v6483_v14 }
 0x23e   : > { %v5272_v7 = vpop.eup %5271  ;;  %v2523_v31 = vadd.f32 1.0, %v5270_v60  ;;  %5291 = vpow2.f32 %v4010_v38  ;;  %v4036_v33 = vmul.f32 -1.442695, %v6475_v62  ;;  %v4034_v23 = vmul.f32 -1.442695, %v6478_v37 }
 0x23f   : > { %v5274_v1 = vpop.eup %5273  ;;  %5293 = vrcp.f32 %v2525_v32  ;;  %v2506_v42 = vadd.f32 1.0, %v5272_v7  ;;  %v4013_v60 = vmul.f32 -1.442695, %v6490_v57 }
 0x240   : > { %v5276_v26 = vpop.eup %5275  ;;  %5295 = vrcp.f32 %v2523_v31  ;;  %v2526_v27 = vadd.f32 1.0, %v5274_v1 }
 0x241   : > { %v5278_v58 = vpop.eup %5277  ;;  %5297 = vrcp.f32 %v2506_v42  ;;  %v2524_v19 = vadd.f32 1.0, %v5276_v26 }
 0x242   : > { %v5280_v8 = vpop.eup %5279  ;;  %v2780_v25 = vmul.f32 %v5278_v58, %v6376_v39  ;;  %5299 = vrcp.f32 %v2526_v27 }
 0x243   : > { %v5282_v49 = vpop.eup %5281  ;;  %v2798_v36 = vmul.f32 %v5280_v8, %v6368_v55  ;;  %5301 = vrcp.f32 %v2524_v19 }
 0x244   : > { %v5284_v35 = vpop.eup %5283  ;;  %v4392_v13 = vpack.c.bf16 %v2780_v25, %v2779_v22  ;;  %v2796_v2 = vmul.f32 %v5282_v49, %v6370_v53  ;;  %5303 = vpow2.f32 %v4032_v29 }
 0x245   : > { %v5286_v39 = vpop.eup %5285  ;;  %v4437_v10 = vpack.c.bf16 %v2798_v36, %v2797_v11  ;;  %5305 = vpow2.f32 %v4030_v63  ;;  %v2781_v54 = vmul.f32 %v5284_v35, %v6396_v61  ;;  %v4014_v63 = vmul.f32 -1.442695, %v6493_v40 }
 0x246   : > { %v5288_v3 = vpop.eup %5287  ;;  %4498 = vst [vmem:[%s5983_s26 + $0xf0] sm:$0xff] %v4392_v13   ;;  %v4432_v59 = vpack.c.bf16 %v2796_v2, %v2795_v12  ;;  %v2507_v0 = vadd.f32 1.0, %v5286_v39  ;;  %5307 = vpow2.f32 %v4011_v45 }
 0x247   : > { %v5290_v55 = vpop.eup %5289  ;;  %4507 = vst [vmem:[%s5983_s26 + $0x138] sm:$0xff] %v4437_v10   ;;  %v2529_v48 = vadd.f32 1.0, %v5288_v3  ;;  %5309 = vpow2.f32 %v4035_v34 }
 0x248   : > { %v5292_v41 = vpop.eup %5291  ;;  %4506 = vst [vmem:[%s5983_s26 + $0x130] sm:$0xff] %v4432_v59   ;;  %5311 = vrcp.f32 %v2507_v0  ;;  %v2527_v51 = vadd.f32 1.0, %v5290_v55 }
 0x249   : > { %v5294_v53 = vpop.eup %5293  ;;  %5313 = vrcp.f32 %v2529_v48  ;;  %v2508_v38 = vadd.f32 1.0, %v5292_v41 }
 0x24a   : > { %v5296_v15 = vpop.eup %5295  ;;  %5315 = vrcp.f32 %v2527_v51  ;;  %v2801_v7 = vmul.f32 %v5294_v53, %v6391_v4 }
 0x24b   : > { %v5298_v5 = vpop.eup %5297  ;;  %5317 = vrcp.f32 %v2508_v38  ;;  %v2799_v42 = vmul.f32 %v5296_v15, %v6393_v56 }
 0x24c   : > { %v5300_v20 = vpop.eup %5299  ;;  %v2782_v24 = vmul.f32 %v5298_v5, %v6412_v46  ;;  %5319 = vpow2.f32 %v4033_v52 }
 0x24d   : > { %v5302_v32 = vpop.eup %5301  ;;  %v2802_v31 = vmul.f32 %v5300_v20, %v6404_v6  ;;  %5321 = vpow2.f32 %v4012_v18 }
 0x24e   : > { %v5304_v1 = vpop.eup %5303  ;;  %v4397_v26 = vpack.c.bf16 %v2782_v24, %v2781_v54  ;;  %v2800_v27 = vmul.f32 %v5302_v32, %v6406_v43  ;;  %5323 = vpow2.f32 %v4036_v33 }
 0x24f   : > { %v5306_v61 = vpop.eup %5305  ;;  %v4447_v46 = vpack.c.bf16 %v2802_v31, %v2801_v7  ;;  %v2530_v29 = vadd.f32 1.0, %v5304_v1  ;;  %5325 = vpow2.f32 %v4034_v23 }
 0x250   : > { %v5308_v58 = vpop.eup %5307  ;;  %4499 = vst [vmem:[%s5983_s26 + $0xf8] sm:$0xff] %v4397_v26   ;;  %v4442_v19 = vpack.c.bf16 %v2800_v27, %v2799_v42  ;;  %v2528_v4 = vadd.f32 1.0, %v5306_v61  ;;  %5327 = vpow2.f32 %v4013_v60 }
 0x251   : > { %v5310_v6 = vpop.eup %5309  ;;  %4509 = vst [vmem:[%s5983_s26 + $0x148] sm:$0xff] %v4447_v46   ;;  %5329 = vrcp.f32 %v2530_v29  ;;  %v2509_v8 = vadd.f32 1.0, %v5308_v58 }
 0x252   : > { %v5312_v56 = vpop.eup %5311  ;;  %4508 = vst [vmem:[%s5983_s26 + $0x140] sm:$0xff] %v4442_v19   ;;  %5331 = vrcp.f32 %v2528_v4  ;;  %v2533_v25 = vadd.f32 1.0, %v5310_v6 }
 0x253   : > { %v5314_v43 = vpop.eup %5313  ;;  %5333 = vpow2.f32 %v4014_v63  ;;  %v2783_v11 = vmul.f32 %v5312_v56, %v6430_v21 }
 0x254   : > { %v5316_v22 = vpop.eup %5315  ;;  %5335 = vrcp.f32 %v2509_v8 }
 0x255   : > { %v5318_v45 = vpop.eup %5317  ;;  %5337 = vrcp.f32 %v2533_v25  ;;  %v2803_v41 = vmul.f32 %v5316_v22, %v6427_v17 }
 0x256   : > { %v5320_v49 = vpop.eup %5319  ;;  %v2784_v36 = vmul.f32 %v5318_v45, %v6453_v9  ;;  %v2805_v9 = vmul.f32 %v5314_v43, %v6424_v30 }
 0x257   : > { %v5322_v34 = vpop.eup %5321  ;;  %v2531_v35 = vadd.f32 1.0, %v5320_v49 }
 0x258   : > { %v5324_v12 = vpop.eup %5323  ;;  %v4402_v13 = vpack.c.bf16 %v2784_v36, %v2783_v11  ;;  %v2510_v2 = vadd.f32 1.0, %v5322_v34 }
 0x259   : > { %v5326_v39 = vpop.eup %5325  ;;  %5339 = vrcp.f32 %v2531_v35  ;;  %v2534_v10 = vadd.f32 1.0, %v5324_v12 }
 0x25a   : > { %v5328_v3 = vpop.eup %5327  ;;  %4500 = vst [vmem:[%s5983_s26 + $0x100] sm:$0xff] %v4402_v13   ;;  %5341 = vrcp.f32 %v2510_v2  ;;  %v2532_v59 = vadd.f32 1.0, %v5326_v39 }
 0x25b   : > { %v5330_v0 = vpop.eup %5329  ;;  %5343 = vrcp.f32 %v2534_v10  ;;  %v2511_v48 = vadd.f32 1.0, %v5328_v3 }
 0x25c   : > { %v5332_v21 = vpop.eup %5331  ;;  %v2806_v55 = vmul.f32 %v5330_v0, %v6441_v16  ;;  %5345 = vrcp.f32 %v2532_v59 }
 0x25d   : > { %v2804_v51 = vmul.f32 %v5332_v21, %v6447_v50  ;;  %v5334_v53 = vpop.eup %5333  ;;  %5347 = vrcp.f32 %v2511_v48 }
 0x25e   : > { %v4457_v52 = vpack.c.bf16 %v2806_v55, %v2805_v9  ;;  %v2512_v18 = vadd.f32 1.0, %v5334_v53  ;;  %v5336_v15 = vpop.eup %5335 }
 0x25f   : > { %v4452_v38 = vpack.c.bf16 %v2804_v51, %v2803_v41  ;;  %v5338_v33 = vpop.eup %5337  ;;  %v2785_v17 = vmul.f32 %v5336_v15, %v6464_v44 }
 0x260   : > { %4511 = vst [vmem:[%s5983_s26 + $0x158] sm:$0xff] %v4457_v52   ;;  %5349 = vrcp.f32 %v2512_v18  ;;  %v2809_v20 = vmul.f32 %v5338_v33, %v6460_v28 }
 0x261   : > { %4510 = vst [vmem:[%s5983_s26 + $0x150] sm:$0xff] %v4452_v38  }
 0x263   : > { %v5340_v30 = vpop.eup %5339 }
 0x264   : > { %v5342_v16 = vpop.eup %5341  ;;  %v2807_v24 = vmul.f32 %v5340_v30, %v6467_v47 }
 0x265   : > { %v5344_v5 = vpop.eup %5343  ;;  %v2786_v50 = vmul.f32 %v5342_v16, %v6483_v14 }
 0x266   : > { %v5346_v23 = vpop.eup %5345  ;;  %v2810_v54 = vmul.f32 %v5344_v5, %v6475_v62 }
 0x267   : > { %v4407_v60 = vpack.c.bf16 %v2786_v50, %v2785_v17  ;;  %v2808_v32 = vmul.f32 %v5346_v23, %v6478_v37  ;;  %v5348_v1 = vpop.eup %5347 }
 0x268   : > { %v4467_v7 = vpack.c.bf16 %v2810_v54, %v2809_v20  ;;  %v2787_v14 = vmul.f32 %v5348_v1, %v6490_v57 }
 0x269   : > { %4501 = vst [vmem:[%s5983_s26 + $0x108] sm:$0xff] %v4407_v60   ;;  %v4462_v31 = vpack.c.bf16 %v2808_v32, %v2807_v24  ;;  %3277 = sbr.rel (!%p5486_p4) target bundleno = 715 (0x2cb), region = 36 }
 0x26a   : > { %4513 = vst [vmem:[%s5983_s26 + $0x168] sm:$0xff] %v4467_v7   ;;  %v5350_v44 = vpop.eup %5349 }
 0x26b   : > { %4512 = vst [vmem:[%s5983_s26 + $0x160] sm:$0xff] %v4462_v31   ;;  %v2788_v42 = vmul.f32 %v5350_v44, %v6493_v40 }
 0x26d   : > { %v4412_v26 = vpack.c.bf16 %v2788_v42, %v2787_v14 }
 0x26f   : > { %4502 = vst [vmem:[%s5983_s26 + $0x110] sm:$0xff] %v4412_v26  }
 0x270   : > { %s6771_s29 = smov (!%p3280_p8, %s3279_s29), 92 }
 0x271   : > { %s4129_s7 = sshll.u32 %s6771_s29, 6 }
 0x272   : > { %p4132_p9 = scmp.eq.s32.totalorder %s4129_s7, 0 }
 0x273   : > { %s6557_s8 = sshrl.u32 (!%p4132_p9), %s6771_s29, 6 }
 0x274   : > { %3288 = sbr.rel (%p4132_p9) target bundleno = 715 (0x2cb), region = 40  ;;  %p4133_p10 = scmp.le.s32.totalorder (!%p4132_p9), %s6557_s8, 0 }
 0x27b   : > { %3693 = sbr.rel (%p4133_p10) target bundleno = 694 (0x2b6), region = 112  ;;  %s6764_s15 = smov (!%p4133_p10), %s6551_s6 }
 0x27c   : > { %s6765_s20 = smov (!%p4133_p10), %s5983_s26  ;;  %s6566_s23 = smov (!%p4133_p10), 0  }
 0x27d   : > { %s6568_s10 = smov (!%p4133_p10), 0  }
 0x282 LB: >> { %v3304_v28 = vld [vmem:[%s5414_s20] sm:$0xf]  ;;  %v3306_v47 = vld [vmem:[%s5414_s20 + $0x4] sm:$0xf]  ;;  %v3308_v62 = vld [vmem:[%s5414_s20 + $0x8] sm:$0xf]  ;;  %s5422_s10 = sphi %s6568_s10, %s3298_s10   ;;  %s5418_s23 = sphi %s6566_s23, %s6766_s23   ;;  %s5414_s20 = sphi %s6765_s20, %s3437_s20   ;;  %s5410_s15 = sphi %s6764_s15, %s3438_s15  }
 0x283   : >> { %3305 = vst [vmem:[%s5410_s15] sm:$0xf] %v3304_v28  ;;  %3307 = vst [vmem:[%s5410_s15 + $0x4] sm:$0xf] %v3306_v47  ;;  %v3310_v37 = vld [vmem:[%s5414_s20 + $0xc] sm:$0xf]  ;;  %s3432_s11 = sadd.s32 1, %s5418_s23 }
 0x284   : >> { %3309 = vst [vmem:[%s5410_s15 + $0x8] sm:$0xf] %v3308_v62  ;;  %v3312_v57 = vld [vmem:[%s5414_s20 + $0x10] sm:$0xf]  ;;  %v3314_v40 = vld [vmem:[%s5414_s20 + $0x14] sm:$0xf]  ;;  %p3433_p11 = scmp.ge.s32.totalorder %s3432_s11, %s6557_s8 }
 0x285   : >> { %3311 = vst [vmem:[%s5410_s15 + $0xc] sm:$0xf] %v3310_v37  ;;  %3313 = vst [vmem:[%s5410_s15 + $0x10] sm:$0xf] %v3312_v57  ;;  %v3316_v27 = vld [vmem:[%s5414_s20 + $0x18] sm:$0xf] }
 0x286   : >> { %3315 = vst [vmem:[%s5410_s15 + $0x14] sm:$0xf] %v3314_v40  ;;  %v3318_v61 = vld [vmem:[%s5414_s20 + $0x1c] sm:$0xf]  ;;  %v3320_v46 = vld [vmem:[%s5414_s20 + $0x20] sm:$0xf] }
 0x287   : >> { %3317 = vst [vmem:[%s5410_s15 + $0x18] sm:$0xf] %v3316_v27  ;;  %3319 = vst [vmem:[%s5410_s15 + $0x1c] sm:$0xf] %v3318_v61  ;;  %v3322_v29 = vld [vmem:[%s5414_s20 + $0x24] sm:$0xf] }
 0x288   : >> { %3321 = vst [vmem:[%s5410_s15 + $0x20] sm:$0xf] %v3320_v46  ;;  %v3324_v58 = vld [vmem:[%s5414_s20 + $0x28] sm:$0xf]  ;;  %v3326_v19 = vld [vmem:[%s5414_s20 + $0x2c] sm:$0xf] }
 0x289   : >> { %3323 = vst [vmem:[%s5410_s15 + $0x24] sm:$0xf] %v3322_v29  ;;  %3325 = vst [vmem:[%s5410_s15 + $0x28] sm:$0xf] %v3324_v58  ;;  %v3328_v4 = vld [vmem:[%s5414_s20 + $0x30] sm:$0xf] }
 0x28a   : >> { %3327 = vst [vmem:[%s5410_s15 + $0x2c] sm:$0xf] %v3326_v19  ;;  %v3330_v6 = vld [vmem:[%s5414_s20 + $0x34] sm:$0xf]  ;;  %v3332_v63 = vld [vmem:[%s5414_s20 + $0x38] sm:$0xf] }
 0x28b   : >> { %3329 = vst [vmem:[%s5410_s15 + $0x30] sm:$0xf] %v3328_v4  ;;  %3331 = vst [vmem:[%s5410_s15 + $0x34] sm:$0xf] %v3330_v6  ;;  %v3334_v56 = vld [vmem:[%s5414_s20 + $0x3c] sm:$0xf] }
 0x28c   : >> { %3333 = vst [vmem:[%s5410_s15 + $0x38] sm:$0xf] %v3332_v63  ;;  %v3336_v43 = vld [vmem:[%s5414_s20 + $0x40] sm:$0xf]  ;;  %v3338_v8 = vld [vmem:[%s5414_s20 + $0x44] sm:$0xf] }
 0x28d   : >> { %3335 = vst [vmem:[%s5410_s15 + $0x3c] sm:$0xf] %v3334_v56  ;;  %3337 = vst [vmem:[%s5410_s15 + $0x40] sm:$0xf] %v3336_v43  ;;  %v3340_v22 = vld [vmem:[%s5414_s20 + $0x48] sm:$0xf] }
 0x28e   : >> { %3339 = vst [vmem:[%s5410_s15 + $0x44] sm:$0xf] %v3338_v8  ;;  %v3342_v25 = vld [vmem:[%s5414_s20 + $0x4c] sm:$0xf]  ;;  %v3344_v45 = vld [vmem:[%s5414_s20 + $0x50] sm:$0xf] }
 0x28f   : >> { %3341 = vst [vmem:[%s5410_s15 + $0x48] sm:$0xf] %v3340_v22  ;;  %3343 = vst [vmem:[%s5410_s15 + $0x4c] sm:$0xf] %v3342_v25  ;;  %v3346_v49 = vld [vmem:[%s5414_s20 + $0x54] sm:$0xf] }
 0x290   : >> { %3345 = vst [vmem:[%s5410_s15 + $0x50] sm:$0xf] %v3344_v45  ;;  %v3348_v11 = vld [vmem:[%s5414_s20 + $0x58] sm:$0xf]  ;;  %v3350_v36 = vld [vmem:[%s5414_s20 + $0x5c] sm:$0xf] }
 0x291   : >> { %3347 = vst [vmem:[%s5410_s15 + $0x54] sm:$0xf] %v3346_v49  ;;  %3349 = vst [vmem:[%s5410_s15 + $0x58] sm:$0xf] %v3348_v11  ;;  %v3352_v34 = vld [vmem:[%s5414_s20 + $0x60] sm:$0xf] }
 0x292   : >> { %3351 = vst [vmem:[%s5410_s15 + $0x5c] sm:$0xf] %v3350_v36  ;;  %v3354_v35 = vld [vmem:[%s5414_s20 + $0x64] sm:$0xf]  ;;  %v3356_v12 = vld [vmem:[%s5414_s20 + $0x68] sm:$0xf] }
 0x293   : >> { %3353 = vst [vmem:[%s5410_s15 + $0x60] sm:$0xf] %v3352_v34  ;;  %3355 = vst [vmem:[%s5410_s15 + $0x64] sm:$0xf] %v3354_v35  ;;  %v3358_v13 = vld [vmem:[%s5414_s20 + $0x6c] sm:$0xf] }
 0x294   : >> { %3357 = vst [vmem:[%s5410_s15 + $0x68] sm:$0xf] %v3356_v12  ;;  %v3360_v2 = vld [vmem:[%s5414_s20 + $0x70] sm:$0xf]  ;;  %v3362_v39 = vld [vmem:[%s5414_s20 + $0x74] sm:$0xf] }
 0x295   : >> { %3359 = vst [vmem:[%s5410_s15 + $0x6c] sm:$0xf] %v3358_v13  ;;  %3361 = vst [vmem:[%s5410_s15 + $0x70] sm:$0xf] %v3360_v2  ;;  %v3364_v10 = vld [vmem:[%s5414_s20 + $0x78] sm:$0xf] }
 0x296   : >> { %3363 = vst [vmem:[%s5410_s15 + $0x74] sm:$0xf] %v3362_v39  ;;  %v3366_v3 = vld [vmem:[%s5414_s20 + $0x7c] sm:$0xf]  ;;  %v3368_v59 = vld [vmem:[%s5414_s20 + $0x80] sm:$0xf] }
 0x297   : >> { %3365 = vst [vmem:[%s5410_s15 + $0x78] sm:$0xf] %v3364_v10  ;;  %3367 = vst [vmem:[%s5410_s15 + $0x7c] sm:$0xf] %v3366_v3  ;;  %v3370_v0 = vld [vmem:[%s5414_s20 + $0x84] sm:$0xf] }
 0x298   : >> { %3369 = vst [vmem:[%s5410_s15 + $0x80] sm:$0xf] %v3368_v59  ;;  %v3372_v21 = vld [vmem:[%s5414_s20 + $0x88] sm:$0xf]  ;;  %v3374_v9 = vld [vmem:[%s5414_s20 + $0x8c] sm:$0xf] }
 0x299   : >> { %3371 = vst [vmem:[%s5410_s15 + $0x84] sm:$0xf] %v3370_v0  ;;  %3373 = vst [vmem:[%s5410_s15 + $0x88] sm:$0xf] %v3372_v21  ;;  %v3376_v55 = vld [vmem:[%s5414_s20 + $0x90] sm:$0xf] }
 0x29a   : >> { %3375 = vst [vmem:[%s5410_s15 + $0x8c] sm:$0xf] %v3374_v9  ;;  %v3378_v48 = vld [vmem:[%s5414_s20 + $0x94] sm:$0xf]  ;;  %v3380_v41 = vld [vmem:[%s5414_s20 + $0x98] sm:$0xf] }
 0x29b   : >> { %3377 = vst [vmem:[%s5410_s15 + $0x90] sm:$0xf] %v3376_v55  ;;  %3379 = vst [vmem:[%s5410_s15 + $0x94] sm:$0xf] %v3378_v48  ;;  %v3382_v51 = vld [vmem:[%s5414_s20 + $0x9c] sm:$0xf] }
 0x29c   : >> { %3381 = vst [vmem:[%s5410_s15 + $0x98] sm:$0xf] %v3380_v41  ;;  %v3384_v52 = vld [vmem:[%s5414_s20 + $0xa0] sm:$0xf]  ;;  %v3386_v53 = vld [vmem:[%s5414_s20 + $0xa4] sm:$0xf] }
 0x29d   : >> { %3383 = vst [vmem:[%s5410_s15 + $0x9c] sm:$0xf] %v3382_v51  ;;  %3385 = vst [vmem:[%s5410_s15 + $0xa0] sm:$0xf] %v3384_v52  ;;  %v3388_v38 = vld [vmem:[%s5414_s20 + $0xa8] sm:$0xf] }
 0x29e   : >> { %3387 = vst [vmem:[%s5410_s15 + $0xa4] sm:$0xf] %v3386_v53  ;;  %v3390_v18 = vld [vmem:[%s5414_s20 + $0xac] sm:$0xf]  ;;  %v3392_v15 = vld [vmem:[%s5414_s20 + $0xb0] sm:$0xf] }
 0x29f   : >> { %3389 = vst [vmem:[%s5410_s15 + $0xa8] sm:$0xf] %v3388_v38  ;;  %3391 = vst [vmem:[%s5410_s15 + $0xac] sm:$0xf] %v3390_v18  ;;  %v3394_v33 = vld [vmem:[%s5414_s20 + $0xb4] sm:$0xf] }
 0x2a0   : >> { %3393 = vst [vmem:[%s5410_s15 + $0xb0] sm:$0xf] %v3392_v15  ;;  %v3396_v30 = vld [vmem:[%s5414_s20 + $0xb8] sm:$0xf]  ;;  %v3398_v16 = vld [vmem:[%s5414_s20 + $0xbc] sm:$0xf] }
 0x2a1   : >> { %3395 = vst [vmem:[%s5410_s15 + $0xb4] sm:$0xf] %v3394_v33  ;;  %3397 = vst [vmem:[%s5410_s15 + $0xb8] sm:$0xf] %v3396_v30  ;;  %v3400_v5 = vld [vmem:[%s5414_s20 + $0xc0] sm:$0xf] }
 0x2a2   : >> { %3399 = vst [vmem:[%s5410_s15 + $0xbc] sm:$0xf] %v3398_v16  ;;  %v3402_v17 = vld [vmem:[%s5414_s20 + $0xc4] sm:$0xf]  ;;  %v3404_v50 = vld [vmem:[%s5414_s20 + $0xc8] sm:$0xf] }
 0x2a3   : >> { %3401 = vst [vmem:[%s5410_s15 + $0xc0] sm:$0xf] %v3400_v5  ;;  %3403 = vst [vmem:[%s5410_s15 + $0xc4] sm:$0xf] %v3402_v17  ;;  %v3406_v23 = vld [vmem:[%s5414_s20 + $0xcc] sm:$0xf] }
 0x2a4   : >> { %3405 = vst [vmem:[%s5410_s15 + $0xc8] sm:$0xf] %v3404_v50  ;;  %v3408_v20 = vld [vmem:[%s5414_s20 + $0xd0] sm:$0xf]  ;;  %v3410_v54 = vld [vmem:[%s5414_s20 + $0xd4] sm:$0xf] }
 0x2a5   : >> { %3407 = vst [vmem:[%s5410_s15 + $0xcc] sm:$0xf] %v3406_v23  ;;  %3409 = vst [vmem:[%s5410_s15 + $0xd0] sm:$0xf] %v3408_v20  ;;  %v3412_v24 = vld [vmem:[%s5414_s20 + $0xd8] sm:$0xf] }
 0x2a6   : >> { %3411 = vst [vmem:[%s5410_s15 + $0xd4] sm:$0xf] %v3410_v54  ;;  %v3414_v60 = vld [vmem:[%s5414_s20 + $0xdc] sm:$0xf]  ;;  %v3416_v32 = vld [vmem:[%s5414_s20 + $0xe0] sm:$0xf] }
 0x2a7   : >> { %3413 = vst [vmem:[%s5410_s15 + $0xd8] sm:$0xf] %v3412_v24  ;;  %3415 = vst [vmem:[%s5410_s15 + $0xdc] sm:$0xf] %v3414_v60  ;;  %v3418_v7 = vld [vmem:[%s5414_s20 + $0xe4] sm:$0xf] }
 0x2a8   : >> { %3417 = vst [vmem:[%s5410_s15 + $0xe0] sm:$0xf] %v3416_v32  ;;  %v3420_v31 = vld [vmem:[%s5414_s20 + $0xe8] sm:$0xf]  ;;  %v3422_v1 = vld [vmem:[%s5414_s20 + $0xec] sm:$0xf] }
 0x2a9   : >> { %3419 = vst [vmem:[%s5410_s15 + $0xe4] sm:$0xf] %v3418_v7  ;;  %3421 = vst [vmem:[%s5410_s15 + $0xe8] sm:$0xf] %v3420_v31  ;;  %v3424_v44 = vld [vmem:[%s5414_s20 + $0xf0] sm:$0xf] }
 0x2aa   : >> { %3423 = vst [vmem:[%s5410_s15 + $0xec] sm:$0xf] %v3422_v1  ;;  %v3426_v14 = vld [vmem:[%s5414_s20 + $0xf4] sm:$0xf]  ;;  %v3428_v42 = vld [vmem:[%s5414_s20 + $0xf8] sm:$0xf] }
 0x2ab   : >> { %3425 = vst [vmem:[%s5410_s15 + $0xf0] sm:$0xf] %v3424_v44  ;;  %3427 = vst [vmem:[%s5410_s15 + $0xf4] sm:$0xf] %v3426_v14  ;;  %v3430_v26 = vld [vmem:[%s5414_s20 + $0xfc] sm:$0xf] }
 0x2ac   : >> { %3429 = vst [vmem:[%s5410_s15 + $0xf8] sm:$0xf] %v3428_v42  ;;  %3431 = vst [vmem:[%s5410_s15 + $0xfc] sm:$0xf] %v3430_v26  ;;  %s6773_s11 = smov (%p3433_p11, %s3432_s11), 0  ;;  %s3298_s10 = sadd.s32 1, %s5422_s10  }
 0x2ad   : >> { %s4134_s14 = sshll.u32 %s6773_s11, 8  ;;  %p3297_p12 = scmp.ge.s32.totalorder %s3298_s10, %s6557_s8 }
 0x2ae   : >> { %s3437_s20 = scalar_lea.vmem %s5983_s26, %s4134_s14 [#allocation2]   ;;  %s3438_s15 = scalar_lea.vmem %s6551_s6, %s4134_s14  }
 0x2af   : >> { %s6766_s23 = smov %s6773_s11  ;;  %3300 = sbr.rel (!%p3297_p12) target bundleno = 642 (0x282), region = 118 }
 0x2b6 PF: > { %s6725_s17 = sand.u32 63, %s6771_s29   ;;  %s4237_s18 = sshll.u32 %s6557_s8, 8 }
 0x2b7   : > { %s3443_s21 = scalar_lea.vmem %s5983_s26, %s4237_s18 [#allocation2]   ;;  %s3445_s22 = scalar_lea.vmem %s6551_s6, %s4237_s18  }
 0x2b8   : > { %p4139_p13 = scmp.le.s32.totalorder %s6725_s17, 0 }
 0x2b9   : > { %s5424_s9 = smov (!%p4139_p13), %s3445_s22   ;;  %s5428_s24 = smov (!%p4139_p13), %s3443_s21  }
 0x2ba   : > { %3707 = sbr.rel (%p4139_p13) target bundleno = 715 (0x2cb), region = 123  ;;  %s5432_s25 = smov (!%p4139_p13), 0  }
 0x2bb   : > { %s5436_s12 = smov (!%p4139_p13), 0  }
 0x2c1 LB: >> { %v3455_v28 = vld [vmem:[%s5430_s24] sm:$0xf]  ;;  %s3457_s27 = sadd.s32 1, %s5434_s25  ;;  %s3449_s12 = sadd.s32 1, %s5438_s12   ;;  %s5438_s12 = sphi %s5436_s12, %s3449_s12   ;;  %s5434_s25 = sphi %s5432_s25, %s5433_s25   ;;  %s5430_s24 = sphi %s5428_s24, %s3462_s24   ;;  %s5426_s9 = sphi %s5424_s9, %s3463_s9  }
 0x2c2   : >> { %3456 = vst [vmem:[%s5426_s9] sm:$0xf] %v3455_v28  ;;  %p3458_p0 = scmp.ge.s32.totalorder %s3457_s27, %s6725_s17  ;;  %p3448_p1 = scmp.ge.s32.totalorder %s3449_s12, %s6725_s17 }
 0x2c4   : >> { %s6775_s27 = smov (%p3458_p0, %s3457_s27), 0  ;;  %3451 = sbr.rel (!%p3448_p1) target bundleno = 705 (0x2c1), region = 129 }
 0x2c5   : >> { %s4140_s26 = sshll.u32 %s6775_s27, 2  ;;  %s5433_s25 = smov %s6775_s27  }
 0x2c6   : >> { %s3462_s24 = scalar_lea.vmem %s3443_s21, %s4140_s26 [#allocation2]   ;;  %s3463_s9 = scalar_lea.vmem %s3445_s22, %s4140_s26  }
 0x2cb PF: > { %p10_p2 = scmp.ge.s32.totalorder %s5476_s16, 4   ;;  %s6767_s12 = smov %s5402_s13 }
 0x2cc   : > { %s6768_s13 = smov %s5484_s19  ;;  %s6769_s14 = smov %s5476_s16 }
 0x2cd   :  { %12 = sbr.rel (!%p10_p2) target bundleno = 2 (0x2), region = 140 }

// kernel: stem_layer_forward.8
= control target key start
LH: loop header
LB: loop body
LE: loop exit
PB: predicated region body
PF: predicated region fallthrough
CT: control target
= control target key end

     0   :  { %v1160_v34 = vmov 0.0   ;;  %vm1161_vm0 = vmmov 0   ;;  %vm454_vm1 = vcmask 523264   ;;  %s1447_s1 = inlined_call_operand.vmem [shape: bf16[576,128], index: 1, kind: input, shape index: {}]   ;;  %s1448_s0 = inlined_call_operand.vmem [shape: bf16[72,576], index: 0, kind: input, shape index: {}]   ;;  %s1449_s2 = inlined_call_operand.vmem [shape: f32[1,128], index: 2, kind: input, shape index: {}]   ;;  %s1450_s3 = inlined_call_operand.vmem [shape: bf16[72,128], index: 3, kind: output, shape index: {}]  }
   0x1   :  { %v1055_v0 = vld [vmem:[%s1447_s1 + $0x40] sm:$0xff]   ;;  %v1059_v4 = vld [vmem:[%s1447_s1 + $0x48] sm:$0xff]   ;;  %v1063_v8 = vld [vmem:[%s1447_s1 + $0x50] sm:$0xff]  }
   0x2   :  { %v1056_v1 = vld [vmem:[%s1447_s1 + $0xc0] sm:$0xff]   ;;  %916 = vmatprep.subr.bf16.mxu0 %v1055_v0  ;;  %v1060_v5 = vld [vmem:[%s1447_s1 + $0xc8] sm:$0xff]   ;;  %v1064_v9 = vld [vmem:[%s1447_s1 + $0xd0] sm:$0xff]  }
   0x3   :  { %v1057_v2 = vld [vmem:[%s1447_s1] sm:$0xff]   ;;  %962 = vmatprep.subr.bf16.mxu1 %v1056_v1  ;;  %v1061_v6 = vld [vmem:[%s1447_s1 + $0x8] sm:$0xff]   ;;  %v1065_v10 = vld [vmem:[%s1447_s1 + $0x10] sm:$0xff]  }
   0x4   :  { %v1058_v3 = vld [vmem:[%s1447_s1 + $0x80] sm:$0xff]   ;;  %917 = vmatpush3.bf16.msra.mxu0 %v1057_v2  ;;  %v1062_v7 = vld [vmem:[%s1447_s1 + $0x88] sm:$0xff]   ;;  %v1066_v11 = vld [vmem:[%s1447_s1 + $0x90] sm:$0xff]  }
   0x5   :  { %963 = vmatpush3.bf16.msra.mxu1 %v1058_v3  ;;  %918 = vmatprep.subr.bf16.mxu0 %v1059_v4  ;;  %v1067_v12 = vld [vmem:[%s1447_s1 + $0x58] sm:$0xff]   ;;  %v1071_v16 = vld [vmem:[%s1447_s1 + $0x60] sm:$0xff]   ;;  %v1075_v20 = vld [vmem:[%s1447_s1 + $0x68] sm:$0xff]  }
   0x6   :  { %964 = vmatprep.subr.bf16.mxu1 %v1060_v5  ;;  %v1068_v13 = vld [vmem:[%s1447_s1 + $0xd8] sm:$0xff]   ;;  %v1072_v17 = vld [vmem:[%s1447_s1 + $0xe0] sm:$0xff]   ;;  %v1076_v21 = vld [vmem:[%s1447_s1 + $0xe8] sm:$0xff]  }
   0x7   :  { %v1069_v14 = vld [vmem:[%s1447_s1 + $0x18] sm:$0xff]   ;;  %v1073_v18 = vld [vmem:[%s1447_s1 + $0x20] sm:$0xff]   ;;  %v1077_v22 = vld [vmem:[%s1447_s1 + $0x28] sm:$0xff]  }
   0x8   :  { %919 = vmatpush3.bf16.msra.mxu0 %v1061_v6  ;;  %v1070_v15 = vld [vmem:[%s1447_s1 + $0x98] sm:$0xff]   ;;  %v1074_v19 = vld [vmem:[%s1447_s1 + $0xa0] sm:$0xff]   ;;  %v1078_v23 = vld [vmem:[%s1447_s1 + $0xa8] sm:$0xff]  }
   0x9   :  { %965 = vmatpush3.bf16.msra.mxu1 %v1062_v7  ;;  %920 = vmatprep.subr.bf16.mxu0 %v1063_v8  ;;  %v1079_v24 = vld [vmem:[%s1447_s1 + $0x70] sm:$0xff]   ;;  %v1083_v28 = vld [vmem:[%s1447_s1 + $0x78] sm:$0xff]   ;;  %v1092_v36 = vld [vmem:[%s1448_s0 + $0xc] ss:$20 sps:$4 sm:$0xff]  }
   0xa   :  { %966 = vmatprep.subr.bf16.mxu1 %v1064_v9  ;;  %v1080_v25 = vld [vmem:[%s1447_s1 + $0xf0] sm:$0xff]   ;;  %v1084_v29 = vld [vmem:[%s1447_s1 + $0xf8] sm:$0xff]   ;;  %v1093_v37 = vld [vmem:[%s1447_s1 + $0x100] sm:$0xff]   ;;  %574 = vmatprep.mubr.bf16.mxu1 %v1092_v36 }
   0xb   :  { %v1081_v26 = vld [vmem:[%s1447_s1 + $0x30] sm:$0xff]   ;;  %v1085_v30 = vld [vmem:[%s1447_s1 + $0x38] sm:$0xff]   ;;  %v1094_v38 = vld [vmem:[%s1448_s0 + $0x2c] ss:$20 sps:$4 sm:$0xff]  }
   0xc   :  { %921 = vmatpush3.bf16.msra.mxu0 %v1065_v10  ;;  %v1082_v27 = vld [vmem:[%s1447_s1 + $0xb0] sm:$0xff]   ;;  %v1086_v31 = vld [vmem:[%s1447_s1 + $0xb8] sm:$0xff]   ;;  %v1100_v40 = vld [vmem:[%s1447_s1 + $0x108] sm:$0xff]  }
   0xd   :  { %967 = vmatpush3.bf16.msra.mxu1 %v1066_v11  ;;  %922 = vmatprep.subr.bf16.mxu0 %v1067_v12  ;;  %v1087_v32 = vld [vmem:[%s1448_s0] ss:$20 sps:$4 sm:$0xff]   ;;  %v1089_v33 = vld [vmem:[%s1448_s0 + $0x4] ss:$20 sps:$4 sm:$0xff]   ;;  %v1090_v35 = vld [vmem:[%s1448_s0 + $0x8] ss:$20 sps:$4 sm:$0xff]  }
   0xe   :  { %968 = vmatprep.subr.bf16.mxu1 %v1068_v13  ;;  %502 = vmatprep.mubr.bf16.mxu0 %v1089_v33  ;;  %v1096_v39 = vld [vmem:[%s1448_s0 + $0x34] ss:$20 sps:$4 sm:$0xff]   ;;  %v1099_v42 = vld [vmem:[%s1448_s0 + $0x30] ss:$20 sps:$4 sm:$0xff]   ;;  %v1116_v47 = vld [vmem:[%s1447_s1 + $0x118] sm:$0xff]  }
   0xf   :  { %v1098_v41 = vld [vmem:[%s1448_s0 + $0x28] ss:$20 sps:$4 sm:$0xff]   ;;  %v1107_v45 = vld [vmem:[%s1447_s1 + $0x110] sm:$0xff]   ;;  %v1106_v48 = vld [vmem:[%s1448_s0 + $0x58] ss:$20 sps:$4 sm:$0xff]  }
  0x10   :  { %923 = vmatpush3.bf16.msra.mxu0 %v1069_v14  ;;  %v1101_v43 = vld [vmem:[%s1448_s0 + $0x54] ss:$20 sps:$4 sm:$0xff]   ;;  %v1103_v44 = vld [vmem:[%s1448_s0 + $0x5c] ss:$20 sps:$4 sm:$0xff]   ;;  %v1110_v50 = vld [vmem:[%s1448_s0 + $0x84] ss:$20 sps:$4 sm:$0xff]  }
  0x11   :  { %969 = vmatpush3.bf16.msra.mxu1 %v1070_v15  ;;  %924 = vmatprep.subr.bf16.mxu0 %v1071_v16  ;;  %v1105_v46 = vld [vmem:[%s1448_s0 + $0x50] ss:$20 sps:$4 sm:$0xff]   ;;  %v40_v52 = vld [vmem:[%s1448_s0 + $0xa8] sm:$0xff]  ;;  %v1113_v54 = vld [vmem:[%s1448_s0 + $0x80] ss:$20 sps:$4 sm:$0xff]  }
  0x12   :  { %970 = vmatprep.subr.bf16.mxu1 %v1072_v17  ;;  %v1108_v49 = vld [vmem:[%s1448_s0 + $0x7c] ss:$20 sps:$4 sm:$0xff]   ;;  %v39_v51 = vld [vmem:[%s1448_s0 + $0xa0] sm:$0xff]  ;;  %v1112_v53 = vld [vmem:[%s1448_s0 + $0x78] ss:$20 sps:$4 sm:$0xff]   ;;  %v823_v56 = vcombine.high %v40_v52, %v40_v52  ;;  %v822_v58 = vcombine.low %v40_v52, %v40_v52 }
  0x13   :  { %v821_v55 = vcombine.high %v39_v51, %v39_v51  ;;  %v820_v57 = vcombine.low %v39_v51, %v39_v51  ;;  %v1119_v59 = vld [vmem:[%s1448_s0 + $0x10] ss:$20 sps:$4 sm:$0xff]   ;;  %v1120_v60 = vld [vmem:[%s1448_s0 + $0x88] ss:$20 sps:$4 sm:$0xff]   ;;  %v1121_v61 = vld [vmem:[%s1448_s0 + $0x38] ss:$20 sps:$4 sm:$0xff]  }
  0x14   :  { %925 = vmatpush3.bf16.msra.mxu0 %v1073_v18  ;;  %v1122_v62 = vld [vmem:[%s1448_s0 + $0xb0] ss:$0 sps:$4 sm:$0xff]   ;;  %v1123_v63 = vld [vmem:[%s1448_s0 + $0x60] ss:$20 sps:$4 sm:$0xff]  }
  0x15   :  { %971 = vmatpush3.bf16.msra.mxu1 %v1074_v19  ;;  %926 = vmatprep.subr.bf16.mxu0 %v1075_v20  ;;  %v1375_v1 = vld [vmem:[%s1449_s2] ss:$0 sm:$0xff] }
  0x16   :  { %972 = vmatprep.subr.bf16.mxu1 %v1076_v21 }
  0x18   :  { %927 = vmatpush3.bf16.msra.mxu0 %v1077_v22 }
  0x19   :  { %973 = vmatpush3.bf16.msra.mxu1 %v1078_v23  ;;  %928 = vmatprep.subr.bf16.mxu0 %v1079_v24 }
  0x1a   :  { %974 = vmatprep.subr.bf16.mxu1 %v1080_v25 }
  0x1c   :  { %929 = vmatpush3.bf16.msra.mxu0 %v1081_v26 }
  0x1d   :  { %975 = vmatpush3.bf16.msra.mxu1 %v1082_v27  ;;  %930 = vmatprep.subr.bf16.mxu0 %v1083_v28 }
  0x1e   :  { %976 = vmatprep.subr.bf16.mxu1 %v1084_v29 }
  0x20   :  { %931 = vmatpush3.bf16.msra.mxu0 %v1085_v30 }
  0x21   :  { %977 = vmatpush3.bf16.msra.mxu1 %v1086_v31  ;;  %1017 = vmatprep.subr.bf16.mxu0 %v1160_v34 }
  0x22   :  { %1045 = vmatprep.subr.bf16.mxu1 %v1160_v34 }
  0x23   :  { %503 = vmatmul.mubr.bf16.vlgmr.msra.gmra.mrb[0].mxu0 %v1087_v32 }
  0x24   :  { %575 = vmatmul.mubr.bf16.vlgmr.msra.gmra.mrb[0].mxu1 %v1090_v35  ;;  %1018 = vmatpush3.bf16.msra.mxu0 %v1093_v37 }
  0x25   :  { %510 = vmatprep.mubr.bf16.mxu0 %v1094_v38  ;;  %1019 = vmatprep.subr.bf16.mxu0 %v1160_v34 }
  0x26   :  { %582 = vmatprep.mubr.bf16.mxu1 %v1096_v39  ;;  %1049 = vmatpush3.bf16.msra.mxu1 %v1093_v37 }
  0x27   :  { %1046 = vmatprep.subr.bf16.mxu1 %v1160_v34 }
  0x28   :  { %1020 = vmatpush3.bf16.msra.mxu0 %v1100_v40 }
  0x29   :  { %1021 = vmatprep.subr.bf16.mxu0 %v1160_v34 }
  0x2a   :  { %1050 = vmatpush3.bf16.msra.mxu1 %v1100_v40 }
  0x2b   :  { %511 = vmatmul.mubr.bf16.gmra.mrb[4].mxu0 %v1098_v41  ;;  %1047 = vmatprep.subr.bf16.mxu1 %v1160_v34 }
  0x2c   :  { %583 = vmatmul.mubr.bf16.gmra.mrb[4].mxu1 %v1099_v42  ;;  %518 = vmatprep.mubr.bf16.mxu0 %v1101_v43 }
  0x2d   :  { %590 = vmatprep.mubr.bf16.mxu1 %v1103_v44  ;;  %1022 = vmatpush3.bf16.msra.mxu0 %v1107_v45 }
  0x2e   :  { %1023 = vmatprep.subr.bf16.mxu0 %v1160_v34  ;;  %1051 = vmatpush3.bf16.msra.mxu1 %v1107_v45 }
  0x2f   :  { %1048 = vmatprep.subr.bf16.mxu1 %v1160_v34 }
  0x31   :  { %1024 = vmatpush3.bf16.msra.mxu0 %v1116_v47 }
  0x32   :  { %1052 = vmatpush3.bf16.msra.mxu1 %v1116_v47 }
  0x33   :  { %519 = vmatmul.mubr.bf16.gmra.mrb[8].mxu0 %v1105_v46 }
  0x34   :  { %591 = vmatmul.mubr.bf16.gmra.mrb[8].mxu1 %v1106_v48  ;;  %526 = vmatprep.mubr.bf16.mxu0 %v1108_v49 }
  0x35   :  { %598 = vmatprep.mubr.bf16.mxu1 %v1110_v50 }
  0x3b   :  { %527 = vmatmul.mubr.bf16.gmra.mrb[12].mxu0 %v1112_v53 }
  0x3c   :  { %599 = vmatmul.mubr.bf16.gmra.mrb[12].mxu1 %v1113_v54  ;;  %534 = vmatprep.mubr.bf16.mxu0 %v821_v55 }
  0x3d   :  { %606 = vmatprep.mubr.bf16.mxu1 %v823_v56 }
  0x43   :  { %535 = vmatmul.mubr.bf16.gmra.mrb[16].mxu0 %v820_v57 }
  0x44   :  { %607 = vmatmul.mubr.bf16.gmra.mrb[16].mxu1 %v822_v58  ;;  %1025 = vmatprep.mubr.msk.bf16.mxu0 %vm1161_vm0, %v1160_v34 }
  0x45   :  { %1037 = vmatprep.mubr.msk.bf16.mxu1 %vm1161_vm0, %v1160_v34 }
  0x4b   :  { %1026 = vmatmul.mubr.msk.bf16.vlgmr.msra.gmra.mrb[20].mxu0 %vm454_vm1, %v1119_v59 }
  0x4c   :  { %1038 = vmatmul.mubr.msk.bf16.vlgmr.msra.gmra.mrb[20].mxu1 %vm454_vm1, %v1120_v60  ;;  %1029 = vmatprep.mubr.msk.bf16.mxu0 %vm1161_vm0, %v1160_v34 }
  0x4d   :  { %1041 = vmatprep.mubr.msk.bf16.mxu1 %vm1161_vm0, %v1160_v34 }
  0x53   :  { %1030 = vmatmul.mubr.msk.bf16.gmra.mrb[24].mxu0 %vm454_vm1, %v1121_v61 }
  0x54   :  { %1042 = vmatmul.mubr.msk.bf16.gmra.mrb[24].mxu1 %vm454_vm1, %v1122_v62  ;;  %1033 = vmatprep.mubr.msk.bf16.mxu0 %vm1161_vm0, %v1160_v34 }
  0x5b   :  { %1034 = vmatmul.mubr.msk.bf16.gmra.mrb[28].mxu0 %vm454_vm1, %v1123_v63 }
  0xf6   :  { %v932_v0 = vpop.f32.mrb[0].mxu0 }
  0xf7   :  { %v933_v2 = vpop.f32.mrb[1].mxu0  ;;  %v978_v3 = vpop.f32.mrb[0].mxu1 }
  0xf8   :  { %v934_v4 = vadd.f32 %v933_v2, %v932_v0  ;;  %v935_v5 = vpop.f32.mrb[2].mxu0  ;;  %v979_v6 = vpop.f32.mrb[1].mxu1 }
  0xf9   :  { %v936_v7 = vpop.f32.mrb[3].mxu0  ;;  %v980_v8 = vadd.f32 %v979_v6, %v978_v3  ;;  %v981_v9 = vpop.f32.mrb[2].mxu1 }
  0xfa   :  { %v505_v10 = vadd.f32 %v934_v4, %v1375_v1  ;;  %v937_v11 = vadd.f32 %v936_v7, %v935_v5  ;;  %v982_v12 = vpop.f32.mrb[3].mxu1 }
  0xfb   :  { %v983_v13 = vadd.f32 %v982_v12, %v981_v9 }
  0xfc   :  { %v508_v14 = vadd.f32 %v937_v11, %v1375_v1  ;;  %v1379_v15 = vadd.f32 %v980_v8, %v505_v10 }
  0xfe   :  { %v938_v16 = vpop.f32.mrb[4].mxu0  ;;  %v1381_v17 = vadd.f32 %v983_v13, %v508_v14 }
  0xff   :  { %v939_v18 = vpop.f32.mrb[5].mxu0  ;;  %v984_v19 = vpop.f32.mrb[4].mxu1 }
 0x100   :  { %v940_v20 = vadd.f32 %v939_v18, %v938_v16  ;;  %v941_v21 = vpop.f32.mrb[6].mxu0  ;;  %v985_v22 = vpop.f32.mrb[5].mxu1 }
 0x101   :  { %v942_v23 = vpop.f32.mrb[7].mxu0  ;;  %v986_v24 = vadd.f32 %v985_v22, %v984_v19  ;;  %v987_v25 = vpop.f32.mrb[6].mxu1 }
 0x102   :  { %v513_v26 = vadd.f32 %v940_v20, %v1375_v1  ;;  %v943_v27 = vadd.f32 %v942_v23, %v941_v21  ;;  %v988_v28 = vpop.f32.mrb[7].mxu1 }
 0x103   :  { %v989_v29 = vadd.f32 %v988_v28, %v987_v25 }
 0x104   :  { %v516_v30 = vadd.f32 %v943_v27, %v1375_v1  ;;  %v1385_v31 = vadd.f32 %v986_v24, %v513_v26 }
 0x106   :  { %v944_v32 = vpop.f32.mrb[8].mxu0  ;;  %v1387_v33 = vadd.f32 %v989_v29, %v516_v30 }
 0x107   :  { %v945_v34 = vpop.f32.mrb[9].mxu0  ;;  %v990_v35 = vpop.f32.mrb[8].mxu1 }
 0x108   :  { %v946_v36 = vadd.f32 %v945_v34, %v944_v32  ;;  %v947_v37 = vpop.f32.mrb[10].mxu0  ;;  %v991_v38 = vpop.f32.mrb[9].mxu1 }
 0x109   :  { %v948_v39 = vpop.f32.mrb[11].mxu0  ;;  %v992_v40 = vadd.f32 %v991_v38, %v990_v35  ;;  %v993_v41 = vpop.f32.mrb[10].mxu1 }
 0x10a   :  { %v521_v42 = vadd.f32 %v946_v36, %v1375_v1  ;;  %v949_v43 = vadd.f32 %v948_v39, %v947_v37  ;;  %v994_v44 = vpop.f32.mrb[11].mxu1 }
 0x10b   :  { %v995_v45 = vadd.f32 %v994_v44, %v993_v41 }
 0x10c   :  { %v524_v46 = vadd.f32 %v949_v43, %v1375_v1  ;;  %v1391_v47 = vadd.f32 %v992_v40, %v521_v42 }
 0x10e   :  { %v950_v48 = vpop.f32.mrb[12].mxu0  ;;  %v1393_v49 = vadd.f32 %v995_v45, %v524_v46 }
 0x10f   :  { %v951_v50 = vpop.f32.mrb[13].mxu0  ;;  %v996_v51 = vpop.f32.mrb[12].mxu1 }
 0x110   :  { %v952_v52 = vadd.f32 %v951_v50, %v950_v48  ;;  %v953_v53 = vpop.f32.mrb[14].mxu0  ;;  %v997_v54 = vpop.f32.mrb[13].mxu1 }
 0x111   :  { %v954_v55 = vpop.f32.mrb[15].mxu0  ;;  %v998_v56 = vadd.f32 %v997_v54, %v996_v51  ;;  %v999_v57 = vpop.f32.mrb[14].mxu1 }
 0x112   :  { %v529_v58 = vadd.f32 %v952_v52, %v1375_v1  ;;  %v955_v59 = vadd.f32 %v954_v55, %v953_v53  ;;  %v1000_v60 = vpop.f32.mrb[15].mxu1 }
 0x113   :  { %v1001_v61 = vadd.f32 %v1000_v60, %v999_v57 }
 0x114   :  { %v532_v62 = vadd.f32 %v955_v59, %v1375_v1  ;;  %v601_v63 = vadd.f32 %v998_v56, %v529_v58 }
 0x116   :  { %v956_v0 = vpop.f32.mrb[16].mxu0  ;;  %v604_v2 = vadd.f32 %v1001_v61, %v532_v62 }
 0x117   :  { %v957_v3 = vpop.f32.mrb[17].mxu0  ;;  %v1002_v4 = vpop.f32.mrb[16].mxu1 }
 0x118   :  { %v958_v5 = vadd.f32 %v957_v3, %v956_v0  ;;  %v959_v6 = vpop.f32.mrb[18].mxu0  ;;  %v1003_v7 = vpop.f32.mrb[17].mxu1 }
 0x119   :  { %v960_v8 = vpop.f32.mrb[19].mxu0  ;;  %v1004_v9 = vadd.f32 %v1003_v7, %v1002_v4  ;;  %v1005_v10 = vpop.f32.mrb[18].mxu1 }
 0x11a   :  { %v537_v11 = vadd.f32 %v958_v5, %v1375_v1  ;;  %v1006_v12 = vpop.f32.mrb[19].mxu1 }
 0x11c   :  { %v609_v13 = vadd.f32 %v1004_v9, %v537_v11 }
 0x11e   :  { %v648_v14 = vpop.f32.mrb[20].mxu0 }
 0x11f   :  { %v1399_v16 = vadd.f32 %v648_v14, %v1379_v15  ;;  %v672_v18 = vpop.f32.mrb[20].mxu1  ;;  %v1027_v19 = vpop.f32.mrb[21].mxu0 }
 0x120   :  { %v1401_v20 = vadd.f32 %v672_v18, %v601_v63  ;;  %v1039_v21 = vpop.f32.mrb[21].mxu1  ;;  %v651_v22 = vpop.f32.mrb[22].mxu0 }
 0x121   :  { %v866_v23 = vmul.f32 -1.442695, %v1399_v16  ;;  %v1405_v24 = vadd.f32 %v651_v22, %v1381_v17  ;;  %v675_v25 = vpop.f32.mrb[22].mxu1  ;;  %v1028_v26 = vpop.f32.mrb[23].mxu0 }
 0x122   :  { %v872_v1 = vmul.f32 -1.442695, %v1401_v20  ;;  %v1408_v27 = vadd.f32 %v675_v25, %v604_v2  ;;  %v1040_v28 = vpop.f32.mrb[23].mxu1 }
 0x123   :  { %1124 = vpow2.f32 %v866_v23  ;;  %v867_v15 = vmul.f32 -1.442695, %v1405_v24 }
 0x124   :  { %1126 = vpow2.f32 %v872_v1  ;;  %v873_v29 = vmul.f32 -1.442695, %v1408_v27 }
 0x125   :  { %1128 = vpow2.f32 %v867_v15 }
 0x126   :  { %1130 = vpow2.f32 %v873_v29  ;;  %v656_v30 = vpop.f32.mrb[24].mxu0 }
 0x127   :  { %v1413_v32 = vadd.f32 %v656_v30, %v1385_v31  ;;  %v680_v17 = vpop.f32.mrb[24].mxu1  ;;  %v1031_v34 = vpop.f32.mrb[25].mxu0 }
 0x128   :  { %v1415_v35 = vadd.f32 %v680_v17, %v609_v13  ;;  %v659_v36 = vpop.f32.mrb[26].mxu0  ;;  %v1043_v37 = vpop.f32.mrb[25].mxu1 }
 0x129   :  { %v868_v38 = vmul.f32 -1.442695, %v1413_v32  ;;  %v1419_v39 = vadd.f32 %v659_v36, %v1387_v33  ;;  %v1032_v40 = vpop.f32.mrb[27].mxu0  ;;  %v683_v41 = vpop.f32.mrb[26].mxu1 }
 0x12a   :  { %v874_v42 = vmul.f32 -1.442695, %v1415_v35  ;;  %v1044_v43 = vpop.f32.mrb[27].mxu1 }
 0x12b   :  { %1132 = vpow2.f32 %v868_v38  ;;  %v869_v31 = vmul.f32 -1.442695, %v1419_v39 }
 0x12c   :  { %1134 = vpow2.f32 %v874_v42 }
 0x12d   :  { %v1125_v44 = vpop.eup %1124  ;;  %1136 = vpow2.f32 %v869_v31 }
 0x12e   :  { %v1127_v45 = vpop.eup %1126  ;;  %v713_v46 = vadd.f32 1.0, %v1125_v44  ;;  %v664_v48 = vpop.f32.mrb[28].mxu0 }
 0x12f   :  { %v1129_v50 = vpop.eup %1128  ;;  %v719_v51 = vadd.f32 1.0, %v1127_v45  ;;  %v665_v52 = vadd.f32 %v664_v48, %v1391_v47  ;;  %v1035_v33 = vpop.f32.mrb[29].mxu0 }
 0x130   :  { %v1131_v53 = vpop.eup %1130  ;;  %1138 = vrcp.f32 %v713_v46  ;;  %v714_v54 = vadd.f32 1.0, %v1129_v50  ;;  %v667_v55 = vpop.f32.mrb[30].mxu0 }
 0x131   :  { %1140 = vrcp.f32 %v719_v51  ;;  %v720_v56 = vadd.f32 1.0, %v1131_v53  ;;  %v870_v57 = vmul.f32 -1.442695, %v665_v52  ;;  %v668_v58 = vadd.f32 %v667_v55, %v1393_v49  ;;  %v1036_v59 = vpop.f32.mrb[31].mxu0 }
 0x132   :  { %1142 = vrcp.f32 %v714_v54 }
 0x133   :  { %1144 = vrcp.f32 %v720_v56  ;;  %v871_v60 = vmul.f32 -1.442695, %v668_v58 }
 0x134   :  { %1146 = vpow2.f32 %v870_v57 }
 0x135   :  { %v1133_v61 = vpop.eup %1132  ;;  %1148 = vpow2.f32 %v871_v60 }
 0x136   :  { %v1135_v62 = vpop.eup %1134  ;;  %v715_v63 = vadd.f32 1.0, %v1133_v61 }
 0x137   :  { %v1137_v47 = vpop.eup %1136  ;;  %v721_v0 = vadd.f32 1.0, %v1135_v62 }
 0x138   :  { %1150 = vrcp.f32 %v715_v63  ;;  %v716_v2 = vadd.f32 1.0, %v1137_v47 }
 0x139   :  { %1152 = vrcp.f32 %v721_v0 }
 0x13a   :  { %v1139_v3 = vpop.eup %1138  ;;  %1154 = vrcp.f32 %v716_v2 }
 0x13b   :  { %v1141_v4 = vpop.eup %1140  ;;  %v740_v49 = vmul.f32 %v1139_v3, %v1399_v16 }
 0x13c   :  { %v1143_v5 = vpop.eup %1142  ;;  %v746_v9 = vmul.f32 %v1141_v4, %v1401_v20 }
 0x13d   :  { %v1145_v6 = vpop.eup %1144  ;;  %v741_v7 = vmul.f32 %v1143_v5, %v1405_v24 }
 0x13e   :  { %v1147_v8 = vpop.eup %1146  ;;  %v747_v10 = vmul.f32 %v1145_v6, %v1408_v27 }
 0x13f   :  { %v1149_v11 = vpop.eup %1148  ;;  %v896_v12 = vpack.c.bf16 %v741_v7, %v740_v49  ;;  %v717_v13 = vadd.f32 1.0, %v1147_v8 }
 0x140   :  { %v911_v14 = vpack.c.bf16 %v747_v10, %v746_v9  ;;  %v718_v18 = vadd.f32 1.0, %v1149_v11 }
 0x141   :  { %897 = vst [vmem:[%s1450_s3] sm:$0xff] %v896_v12   ;;  %1156 = vrcp.f32 %v717_v13 }
 0x142   :  { %v1151_v19 = vpop.eup %1150  ;;  %915 = vst [vmem:[%s1450_s3 + $0x18] sm:$0xff] %v911_v14   ;;  %1158 = vrcp.f32 %v718_v18 }
 0x143   :  { %v1153_v16 = vpop.eup %1152  ;;  %v742_v22 = vmul.f32 %v1151_v19, %v1413_v32 }
 0x144   :  { %v1155_v20 = vpop.eup %1154  ;;  %v748_v21 = vmul.f32 %v1153_v16, %v1415_v35 }
 0x145   :  { %v743_v23 = vmul.f32 %v1155_v20, %v1419_v39 }
 0x146   :  { %v892_v24 = vpack.c.bf16 %v748_v21, %v748_v21 }
 0x147   :  { %v901_v25 = vpack.c.bf16 %v743_v23, %v742_v22 }
 0x148   :  { %794 = vst [vmem:[%s1450_s3 + $0x20] sm:$0xf] %v892_v24 }
 0x149   :  { %913 = vst [vmem:[%s1450_s3 + $0x8] sm:$0xff] %v901_v25  }
 0x14b   :  { %v1157_v26 = vpop.eup %1156 }
 0x14c   :  { %v1159_v1 = vpop.eup %1158  ;;  %v744_v27 = vmul.f32 %v1157_v26, %v665_v52 }
 0x14d   :  { %v745_v28 = vmul.f32 %v1159_v1, %v668_v58 }
 0x14f   :  { %v906_v15 = vpack.c.bf16 %v745_v28, %v744_v27 }
 0x151   :  { %914 = vst [vmem:[%s1450_s3 + $0x10] sm:$0xff] %v906_v15  }

// kernel: stem_layer_forward.9
= control target key start
LH: loop header
LB: loop body
LE: loop exit
PB: predicated region body
PF: predicated region fallthrough
CT: control target
= control target key end

     0   :  { %vm637_vm0 = vcmask 654336   ;;  %s1587_s1 = inlined_call_operand.vmem [shape: bf16[720,256], index: 1, kind: input, shape index: {}]   ;;  %s1588_s0 = inlined_call_operand.vmem [shape: bf16[32,720], index: 0, kind: input, shape index: {}]   ;;  %s1589_s2 = inlined_call_operand.vmem [shape: f32[1,256], index: 2, kind: input, shape index: {}]   ;;  %s1590_s3 = inlined_call_operand.vmem [shape: bf16[32,256], index: 3, kind: output, shape index: {}]  }
   0x1   :  { %v1061_v0 = vld [vmem:[%s1587_s1 + $0x4] ss:$8 sps:$4 sm:$0xff]   ;;  %v1065_v2 = vld [vmem:[%s1587_s1] ss:$8 sps:$4 sm:$0xff]   ;;  %v1067_v4 = vld [vmem:[%s1587_s1 + $0x14] ss:$8 sps:$4 sm:$0xff]  }
   0x2   :  { %v1063_v1 = vld [vmem:[%s1587_s1 + $0x104] ss:$8 sps:$4 sm:$0xff]   ;;  %644 = vmatprep.subr.bf16.mxu1 %v1061_v0  ;;  %v1066_v3 = vld [vmem:[%s1587_s1 + $0x100] ss:$8 sps:$4 sm:$0xff]   ;;  %v1069_v5 = vld [vmem:[%s1587_s1 + $0x114] ss:$8 sps:$4 sm:$0xff]  }
   0x3   :  { %697 = vmatprep.subr.bf16.mxu0 %v1063_v1  ;;  %645 = vmatpush1.bf16.msra.mxu1 %v1065_v2  ;;  %v1071_v6 = vld [vmem:[%s1587_s1 + $0x10] ss:$8 sps:$4 sm:$0xff]   ;;  %v1073_v8 = vld [vmem:[%s1587_s1 + $0x24] ss:$8 sps:$4 sm:$0xff]   ;;  %v1077_v10 = vld [vmem:[%s1587_s1 + $0x20] ss:$8 sps:$4 sm:$0xff]  }
   0x4   :  { %698 = vmatpush1.bf16.msra.mxu0 %v1066_v3  ;;  %646 = vmatprep.subr.bf16.mxu1 %v1067_v4  ;;  %v1072_v7 = vld [vmem:[%s1587_s1 + $0x110] ss:$8 sps:$4 sm:$0xff]   ;;  %v1075_v9 = vld [vmem:[%s1587_s1 + $0x124] ss:$8 sps:$4 sm:$0xff]   ;;  %v1078_v11 = vld [vmem:[%s1587_s1 + $0x120] ss:$8 sps:$4 sm:$0xff]  }
   0x5   :  { %699 = vmatprep.subr.bf16.mxu0 %v1069_v5  ;;  %v1079_v12 = vld [vmem:[%s1587_s1 + $0x34] ss:$8 sps:$4 sm:$0xff]   ;;  %v1083_v14 = vld [vmem:[%s1587_s1 + $0x30] ss:$8 sps:$4 sm:$0xff]   ;;  %v1085_v16 = vld [vmem:[%s1587_s1 + $0x44] ss:$8 sps:$4 sm:$0xff]  }
   0x6   :  { %v1081_v13 = vld [vmem:[%s1587_s1 + $0x134] ss:$8 sps:$4 sm:$0xff]   ;;  %v1084_v15 = vld [vmem:[%s1587_s1 + $0x130] ss:$8 sps:$4 sm:$0xff]   ;;  %v1087_v17 = vld [vmem:[%s1587_s1 + $0x144] ss:$8 sps:$4 sm:$0xff]  }
   0x7   :  { %647 = vmatpush1.bf16.msra.mxu1 %v1071_v6  ;;  %v1089_v18 = vld [vmem:[%s1587_s1 + $0x40] ss:$8 sps:$4 sm:$0xff]   ;;  %v1091_v20 = vld [vmem:[%s1587_s1 + $0x54] ss:$8 sps:$4 sm:$0xff]   ;;  %v1095_v22 = vld [vmem:[%s1587_s1 + $0x50] ss:$8 sps:$4 sm:$0xff]  }
   0x8   :  { %700 = vmatpush1.bf16.msra.mxu0 %v1072_v7  ;;  %648 = vmatprep.subr.bf16.mxu1 %v1073_v8  ;;  %v1090_v19 = vld [vmem:[%s1587_s1 + $0x140] ss:$8 sps:$4 sm:$0xff]   ;;  %v1093_v21 = vld [vmem:[%s1587_s1 + $0x154] ss:$8 sps:$4 sm:$0xff]   ;;  %v1096_v23 = vld [vmem:[%s1587_s1 + $0x150] ss:$8 sps:$4 sm:$0xff]  }
   0x9   :  { %701 = vmatprep.subr.bf16.mxu0 %v1075_v9  ;;  %v1097_v24 = vld [vmem:[%s1587_s1 + $0x64] ss:$8 sps:$4 sm:$0xff]   ;;  %v1101_v26 = vld [vmem:[%s1587_s1 + $0x60] ss:$8 sps:$4 sm:$0xff]   ;;  %v1103_v28 = vld [vmem:[%s1587_s1 + $0x74] ss:$8 sps:$4 sm:$0xff]  }
   0xa   :  { %v1099_v25 = vld [vmem:[%s1587_s1 + $0x164] ss:$8 sps:$4 sm:$0xff]   ;;  %v1102_v27 = vld [vmem:[%s1587_s1 + $0x160] ss:$8 sps:$4 sm:$0xff]   ;;  %v1105_v29 = vld [vmem:[%s1587_s1 + $0x174] ss:$8 sps:$4 sm:$0xff]  }
   0xb   :  { %649 = vmatpush1.bf16.msra.mxu1 %v1077_v10  ;;  %v1107_v30 = vld [vmem:[%s1587_s1 + $0x70] ss:$8 sps:$4 sm:$0xff]   ;;  %v1109_v32 = vld [vmem:[%s1587_s1 + $0x84] ss:$8 sps:$4 sm:$0xff]   ;;  %v1113_v34 = vld [vmem:[%s1587_s1 + $0x80] ss:$8 sps:$4 sm:$0xff]  }
   0xc   :  { %702 = vmatpush1.bf16.msra.mxu0 %v1078_v11  ;;  %650 = vmatprep.subr.bf16.mxu1 %v1079_v12  ;;  %v1108_v31 = vld [vmem:[%s1587_s1 + $0x170] ss:$8 sps:$4 sm:$0xff]   ;;  %v1111_v33 = vld [vmem:[%s1587_s1 + $0x184] ss:$8 sps:$4 sm:$0xff]   ;;  %v1114_v35 = vld [vmem:[%s1587_s1 + $0x180] ss:$8 sps:$4 sm:$0xff]  }
   0xd   :  { %703 = vmatprep.subr.bf16.mxu0 %v1081_v13  ;;  %v1115_v36 = vld [vmem:[%s1587_s1 + $0x94] ss:$8 sps:$4 sm:$0xff]   ;;  %v1119_v38 = vld [vmem:[%s1587_s1 + $0x90] ss:$8 sps:$4 sm:$0xff]   ;;  %v1121_v40 = vld [vmem:[%s1587_s1 + $0xa4] ss:$8 sps:$4 sm:$0xff]  }
   0xe   :  { %v1117_v37 = vld [vmem:[%s1587_s1 + $0x194] ss:$8 sps:$4 sm:$0xff]   ;;  %v1120_v39 = vld [vmem:[%s1587_s1 + $0x190] ss:$8 sps:$4 sm:$0xff]   ;;  %v1123_v41 = vld [vmem:[%s1587_s1 + $0x1a4] ss:$8 sps:$4 sm:$0xff]  }
   0xf   :  { %651 = vmatpush1.bf16.msra.mxu1 %v1083_v14  ;;  %v1125_v42 = vld [vmem:[%s1587_s1 + $0xa0] ss:$8 sps:$4 sm:$0xff]   ;;  %v1127_v44 = vld [vmem:[%s1587_s1 + $0xb4] ss:$8 sps:$4 sm:$0xff]   ;;  %v1131_v46 = vld [vmem:[%s1587_s1 + $0xb0] ss:$8 sps:$4 sm:$0xff]  }
  0x10   :  { %704 = vmatpush1.bf16.msra.mxu0 %v1084_v15  ;;  %652 = vmatprep.subr.bf16.mxu1 %v1085_v16  ;;  %v1126_v43 = vld [vmem:[%s1587_s1 + $0x1a0] ss:$8 sps:$4 sm:$0xff]   ;;  %v1129_v45 = vld [vmem:[%s1587_s1 + $0x1b4] ss:$8 sps:$4 sm:$0xff]   ;;  %v1132_v47 = vld [vmem:[%s1587_s1 + $0x1b0] ss:$8 sps:$4 sm:$0xff]  }
  0x11   :  { %705 = vmatprep.subr.bf16.mxu0 %v1087_v17  ;;  %v1133_v48 = vld [vmem:[%s1587_s1 + $0xc4] ss:$8 sps:$4 sm:$0xff]   ;;  %v1137_v52 = vld [vmem:[%s1587_s1 + $0xc0] ss:$8 sps:$4 sm:$0xff]   ;;  %v1139_v54 = vld [vmem:[%s1587_s1 + $0xd4] ss:$8 sps:$4 sm:$0xff]  }
  0x12   :  { %v1159_v49 = vld [vmem:[%s1588_s0 + $0x4] ss:$24 sps:$4 sm:$0xff]   ;;  %v1138_v53 = vld [vmem:[%s1587_s1 + $0x1c0] ss:$8 sps:$4 sm:$0xff]   ;;  %v1143_v56 = vld [vmem:[%s1587_s1 + $0xd0] ss:$8 sps:$4 sm:$0xff]  }
  0x13   :  { %653 = vmatpush1.bf16.msra.mxu1 %v1089_v18  ;;  %v1135_v50 = vld [vmem:[%s1587_s1 + $0x1c4] ss:$8 sps:$4 sm:$0xff]   ;;  %676 = vmatprep.mubr.bf16.mxu1 %v1159_v49  ;;  %v1141_v55 = vld [vmem:[%s1587_s1 + $0x1d4] ss:$8 sps:$4 sm:$0xff]   ;;  %v1144_v57 = vld [vmem:[%s1587_s1 + $0x1d0] ss:$8 sps:$4 sm:$0xff]  }
  0x14   :  { %706 = vmatpush1.bf16.msra.mxu0 %v1090_v19  ;;  %654 = vmatprep.subr.bf16.mxu1 %v1091_v20  ;;  %v1162_v51 = vld [vmem:[%s1588_s0 + $0xc] ss:$24 sps:$4 sm:$0xff]   ;;  %v1149_v60 = vld [vmem:[%s1587_s1 + $0xe0] ss:$8 sps:$4 sm:$0xff]   ;;  %v1151_v62 = vld [vmem:[%s1587_s1 + $0xf4] ss:$8 sps:$4 sm:$0xff]  }
  0x15   :  { %707 = vmatprep.subr.bf16.mxu0 %v1093_v21  ;;  %729 = vmatprep.mubr.bf16.mxu0 %v1162_v51  ;;  %v1145_v58 = vld [vmem:[%s1587_s1 + $0xe4] ss:$8 sps:$4 sm:$0xff]   ;;  %v1150_v61 = vld [vmem:[%s1587_s1 + $0x1e0] ss:$8 sps:$4 sm:$0xff]   ;;  %v1153_v63 = vld [vmem:[%s1587_s1 + $0x1f4] ss:$8 sps:$4 sm:$0xff]  }
  0x16   :  { %v1147_v59 = vld [vmem:[%s1587_s1 + $0x1e4] ss:$8 sps:$4 sm:$0xff]   ;;  %v1155_v0 = vld [vmem:[%s1587_s1 + $0xf0] ss:$8 sps:$4 sm:$0xff]   ;;  %v1160_v4 = vld [vmem:[%s1588_s0 + $0x8] ss:$24 sps:$4 sm:$0xff]  }
  0x17   :  { %655 = vmatpush1.bf16.msra.mxu1 %v1095_v22  ;;  %v1156_v1 = vld [vmem:[%s1587_s1 + $0x1f0] ss:$8 sps:$4 sm:$0xff]   ;;  %v1165_v2 = vld [vmem:[%s1587_s1 + $0x204] ss:$8 sps:$4 sm:$0xff]   ;;  %v1163_v5 = vld [vmem:[%s1587_s1 + $0x200] ss:$8 sps:$4 sm:$0xff]  }
  0x18   :  { %708 = vmatpush1.bf16.msra.mxu0 %v1096_v23  ;;  %656 = vmatprep.subr.bf16.mxu1 %v1097_v24  ;;  %v1157_v3 = vld [vmem:[%s1588_s0] ss:$24 sps:$4 sm:$0xff]   ;;  %v1168_v6 = vld [vmem:[%s1587_s1 + $0x214] ss:$8 sps:$4 sm:$0xff]   ;;  %v1171_v10 = vld [vmem:[%s1587_s1 + $0x224] ss:$8 sps:$4 sm:$0xff]  }
  0x19   :  { %709 = vmatprep.subr.bf16.mxu0 %v1099_v25  ;;  %v1193_v7 = vld [vmem:[%s1588_s0 + $0x34] ss:$24 sps:$4 sm:$0xff]   ;;  %v1166_v9 = vld [vmem:[%s1587_s1 + $0x210] ss:$8 sps:$4 sm:$0xff]   ;;  %v1169_v13 = vld [vmem:[%s1587_s1 + $0x220] ss:$8 sps:$4 sm:$0xff]  }
  0x1a   :  { %v1196_v8 = vld [vmem:[%s1588_s0 + $0x3c] ss:$24 sps:$4 sm:$0xff]   ;;  %v1195_v11 = vld [vmem:[%s1588_s0 + $0x30] ss:$24 sps:$4 sm:$0xff]   ;;  %v1177_v18 = vld [vmem:[%s1587_s1 + $0x244] ss:$8 sps:$4 sm:$0xff]  }
  0x1b   :  { %657 = vmatpush1.bf16.msra.mxu1 %v1101_v26  ;;  %v1201_v12 = vld [vmem:[%s1588_s0 + $0x38] ss:$24 sps:$4 sm:$0xff]   ;;  %v1174_v14 = vld [vmem:[%s1587_s1 + $0x234] ss:$8 sps:$4 sm:$0xff]   ;;  %v1175_v19 = vld [vmem:[%s1587_s1 + $0x240] ss:$8 sps:$4 sm:$0xff]  }
  0x1c   :  { %710 = vmatpush1.bf16.msra.mxu0 %v1102_v27  ;;  %658 = vmatprep.subr.bf16.mxu1 %v1103_v28  ;;  %v1210_v15 = vld [vmem:[%s1588_s0 + $0x14] ss:$24 sps:$4 sm:$0xff]   ;;  %v1213_v16 = vld [vmem:[%s1588_s0 + $0x44] ss:$24 sps:$4 sm:$0xff]   ;;  %v1172_v17 = vld [vmem:[%s1587_s1 + $0x230] ss:$8 sps:$4 sm:$0xff]  }
  0x1d   :  { %711 = vmatprep.subr.bf16.mxu0 %v1105_v29  ;;  %v1180_v20 = vld [vmem:[%s1587_s1 + $0x254] ss:$8 sps:$4 sm:$0xff]   ;;  %v1178_v21 = vld [vmem:[%s1587_s1 + $0x250] ss:$8 sps:$4 sm:$0xff]   ;;  %v1183_v22 = vld [vmem:[%s1587_s1 + $0x264] ss:$8 sps:$4 sm:$0xff]  }
  0x1e   :  { %v1181_v23 = vld [vmem:[%s1587_s1 + $0x260] ss:$8 sps:$4 sm:$0xff]   ;;  %v1186_v24 = vld [vmem:[%s1587_s1 + $0x274] ss:$8 sps:$4 sm:$0xff]   ;;  %v1184_v25 = vld [vmem:[%s1587_s1 + $0x270] ss:$8 sps:$4 sm:$0xff]  }
  0x1f   :  { %659 = vmatpush1.bf16.msra.mxu1 %v1107_v30  ;;  %v1189_v26 = vld [vmem:[%s1587_s1 + $0x284] ss:$8 sps:$4 sm:$0xff]   ;;  %v1187_v27 = vld [vmem:[%s1587_s1 + $0x280] ss:$8 sps:$4 sm:$0xff]   ;;  %v1192_v28 = vld [vmem:[%s1587_s1 + $0x294] ss:$8 sps:$4 sm:$0xff]  }
  0x20   :  { %712 = vmatpush1.bf16.msra.mxu0 %v1108_v31  ;;  %660 = vmatprep.subr.bf16.mxu1 %v1109_v32  ;;  %v1190_v29 = vld [vmem:[%s1587_s1 + $0x290] ss:$8 sps:$4 sm:$0xff]   ;;  %v1200_v30 = vld [vmem:[%s1587_s1 + $0x2a4] ss:$8 sps:$4 sm:$0xff]   ;;  %v1198_v31 = vld [vmem:[%s1587_s1 + $0x2a0] ss:$8 sps:$4 sm:$0xff]  }
  0x21   :  { %713 = vmatprep.subr.bf16.mxu0 %v1111_v33  ;;  %v1204_v32 = vld [vmem:[%s1587_s1 + $0x2b4] ss:$8 sps:$4 sm:$0xff]   ;;  %v1202_v33 = vld [vmem:[%s1587_s1 + $0x2b0] ss:$8 sps:$4 sm:$0xff]  }
  0x23   :  { %661 = vmatpush1.bf16.msra.mxu1 %v1113_v34  ;;  %v1207_v34 = vld [vmem:[%s1587_s1 + $0x2c4] ss:$8 sps:$4 sm:$0xff]  }
  0x24   :  { %714 = vmatpush1.bf16.msra.mxu0 %v1114_v35  ;;  %662 = vmatprep.subr.bf16.mxu1 %v1115_v36  ;;  %v1205_v35 = vld [vmem:[%s1587_s1 + $0x2c0] ss:$8 sps:$4 sm:$0xff]  }
  0x25   :  { %715 = vmatprep.subr.bf16.mxu0 %v1117_v37  ;;  %v1208_v36 = vld [vmem:[%s1588_s0 + $0x10] ss:$24 sps:$4 sm:$0xff]   ;;  %v1211_v37 = vld [vmem:[%s1588_s0 + $0x40] ss:$24 sps:$4 sm:$0xff]  }
  0x27   :  { %663 = vmatpush1.bf16.msra.mxu1 %v1119_v38  ;;  %v119_v38 = vlaneseq }
  0x28   :  { %716 = vmatpush1.bf16.msra.mxu0 %v1120_v39  ;;  %664 = vmatprep.subr.bf16.mxu1 %v1121_v40 }
  0x29   :  { %717 = vmatprep.subr.bf16.mxu0 %v1123_v41  ;;  %v120_v39 = vshrl.u32 %v119_v38, 7 }
  0x2b   :  { %665 = vmatpush1.bf16.msra.mxu1 %v1125_v42 }
  0x2c   :  { %718 = vmatpush1.bf16.msra.mxu0 %v1126_v43  ;;  %666 = vmatprep.subr.bf16.mxu1 %v1127_v44  ;;  %v121_v43 = vsub.s32 0, %v120_v39 }
  0x2d   :  { %719 = vmatprep.subr.bf16.mxu0 %v1129_v45  ;;  %v117_v45 = vld [vmem:[%s1589_s2] sm:$0x3] }
  0x2f   :  { %667 = vmatpush1.bf16.msra.mxu1 %v1131_v46  ;;  %v125_v46 = vsub.s32 1, %v120_v39 }
  0x30   :  { %720 = vmatpush1.bf16.msra.mxu0 %v1132_v47  ;;  %668 = vmatprep.subr.bf16.mxu1 %v1133_v48  ;;  %v122_v47 = vrot.slane %v117_v45, %v121_v43 }
  0x31   :  { %721 = vmatprep.subr.bf16.mxu0 %v1135_v50  ;;  %v126_v48 = vrot.slane %v117_v45, %v125_v46 }
  0x33   :  { %669 = vmatpush1.bf16.msra.mxu1 %v1137_v52 }
  0x34   :  { %722 = vmatpush1.bf16.msra.mxu0 %v1138_v53  ;;  %670 = vmatprep.subr.bf16.mxu1 %v1139_v54 }
  0x35   :  { %723 = vmatprep.subr.bf16.mxu0 %v1141_v55 }
  0x37   :  { %671 = vmatpush1.bf16.msra.mxu1 %v1143_v56 }
  0x38   :  { %724 = vmatpush1.bf16.msra.mxu0 %v1144_v57  ;;  %672 = vmatprep.subr.bf16.mxu1 %v1145_v58 }
  0x39   :  { %725 = vmatprep.subr.bf16.mxu0 %v1147_v59 }
  0x3b   :  { %673 = vmatpush1.bf16.msra.mxu1 %v1149_v60 }
  0x3c   :  { %726 = vmatpush1.bf16.msra.mxu0 %v1150_v61  ;;  %674 = vmatprep.subr.bf16.mxu1 %v1151_v62 }
  0x3d   :  { %727 = vmatprep.subr.bf16.mxu0 %v1153_v63 }
  0x3f   :  { %675 = vmatpush1.bf16.msra.mxu1 %v1155_v0 }
  0x40   :  { %728 = vmatpush1.bf16.msra.mxu0 %v1156_v1  ;;  %1011 = vmatprep.subr.bf16.mxu1 %v1165_v2 }
  0x41   :  { %750 = vmatprep.subr.bf16.mxu0 %v1165_v2 }
  0x42   :  { %677 = vmatmul.mubr.bf16.vlgmr.msra.gmra.mrb[0].mxu1 %v1157_v3 }
  0x43   :  { %730 = vmatmul.mubr.bf16.vlgmr.msra.gmra.mrb[0].mxu0 %v1160_v4  ;;  %1024 = vmatpush1.bf16.msra.mxu1 %v1163_v5 }
  0x44   :  { %751 = vmatpush1.bf16.msra.mxu0 %v1163_v5  ;;  %1012 = vmatprep.subr.bf16.mxu1 %v1168_v6 }
  0x45   :  { %752 = vmatprep.subr.bf16.mxu0 %v1168_v6  ;;  %686 = vmatprep.mubr.bf16.mxu1 %v1193_v7 }
  0x46   :  { %739 = vmatprep.mubr.bf16.mxu0 %v1196_v8 }
  0x47   :  { %1025 = vmatpush1.bf16.msra.mxu1 %v1166_v9 }
  0x48   :  { %753 = vmatpush1.bf16.msra.mxu0 %v1166_v9  ;;  %1013 = vmatprep.subr.bf16.mxu1 %v1171_v10 }
  0x49   :  { %754 = vmatprep.subr.bf16.mxu0 %v1171_v10 }
  0x4a   :  { %687 = vmatmul.mubr.bf16.gmra.mrb[4].mxu1 %v1195_v11 }
  0x4b   :  { %740 = vmatmul.mubr.bf16.gmra.mrb[4].mxu0 %v1201_v12  ;;  %1026 = vmatpush1.bf16.msra.mxu1 %v1169_v13 }
  0x4c   :  { %755 = vmatpush1.bf16.msra.mxu0 %v1169_v13  ;;  %1014 = vmatprep.subr.bf16.mxu1 %v1174_v14 }
  0x4d   :  { %756 = vmatprep.subr.bf16.mxu0 %v1174_v14  ;;  %993 = vmatprep.mubr.msk.bf16.mxu0 %vm637_vm0, %v1210_v15 }
  0x4e   :  { %994 = vmatprep.mubr.msk.bf16.mxu1 %vm637_vm0, %v1213_v16 }
  0x4f   :  { %1027 = vmatpush1.bf16.msra.mxu1 %v1172_v17 }
  0x50   :  { %757 = vmatpush1.bf16.msra.mxu0 %v1172_v17  ;;  %1015 = vmatprep.subr.bf16.mxu1 %v1177_v18 }
  0x51   :  { %758 = vmatprep.subr.bf16.mxu0 %v1177_v18 }
  0x53   :  { %1028 = vmatpush1.bf16.msra.mxu1 %v1175_v19 }
  0x54   :  { %759 = vmatpush1.bf16.msra.mxu0 %v1175_v19  ;;  %1016 = vmatprep.subr.bf16.mxu1 %v1180_v20 }
  0x55   :  { %760 = vmatprep.subr.bf16.mxu0 %v1180_v20 }
  0x57   :  { %1029 = vmatpush1.bf16.msra.mxu1 %v1178_v21 }
  0x58   :  { %761 = vmatpush1.bf16.msra.mxu0 %v1178_v21  ;;  %1017 = vmatprep.subr.bf16.mxu1 %v1183_v22 }
  0x59   :  { %762 = vmatprep.subr.bf16.mxu0 %v1183_v22 }
  0x5b   :  { %1030 = vmatpush1.bf16.msra.mxu1 %v1181_v23 }
  0x5c   :  { %763 = vmatpush1.bf16.msra.mxu0 %v1181_v23  ;;  %1018 = vmatprep.subr.bf16.mxu1 %v1186_v24 }
  0x5d   :  { %764 = vmatprep.subr.bf16.mxu0 %v1186_v24 }
  0x5f   :  { %1031 = vmatpush1.bf16.msra.mxu1 %v1184_v25 }
  0x60   :  { %765 = vmatpush1.bf16.msra.mxu0 %v1184_v25  ;;  %1019 = vmatprep.subr.bf16.mxu1 %v1189_v26 }
  0x61   :  { %766 = vmatprep.subr.bf16.mxu0 %v1189_v26 }
  0x63   :  { %1032 = vmatpush1.bf16.msra.mxu1 %v1187_v27 }
  0x64   :  { %767 = vmatpush1.bf16.msra.mxu0 %v1187_v27  ;;  %1020 = vmatprep.subr.bf16.mxu1 %v1192_v28 }
  0x65   :  { %768 = vmatprep.subr.bf16.mxu0 %v1192_v28 }
  0x67   :  { %1033 = vmatpush1.bf16.msra.mxu1 %v1190_v29 }
  0x68   :  { %769 = vmatpush1.bf16.msra.mxu0 %v1190_v29  ;;  %1021 = vmatprep.subr.bf16.mxu1 %v1200_v30 }
  0x69   :  { %770 = vmatprep.subr.bf16.mxu0 %v1200_v30 }
  0x6b   :  { %1034 = vmatpush1.bf16.msra.mxu1 %v1198_v31 }
  0x6c   :  { %771 = vmatpush1.bf16.msra.mxu0 %v1198_v31  ;;  %1022 = vmatprep.subr.bf16.mxu1 %v1204_v32 }
  0x6d   :  { %772 = vmatprep.subr.bf16.mxu0 %v1204_v32 }
  0x6f   :  { %1035 = vmatpush1.bf16.msra.mxu1 %v1202_v33 }
  0x70   :  { %773 = vmatpush1.bf16.msra.mxu0 %v1202_v33  ;;  %1023 = vmatprep.subr.bf16.mxu1 %v1207_v34 }
  0x71   :  { %774 = vmatprep.subr.bf16.mxu0 %v1207_v34 }
  0x73   :  { %1036 = vmatpush1.bf16.msra.mxu1 %v1205_v35 }
  0x74   :  { %775 = vmatpush1.bf16.msra.mxu0 %v1205_v35 }
  0x76   :  { %793 = vmatmul.mubr.bf16.vlgmr.msra.gmra.mrb[8].mxu1 %v1211_v37 }
  0x77   :  { %783 = vmatmul.mubr.bf16.vlgmr.msra.gmra.mrb[0].mxu0 %v1208_v36 }
 0x115   :  { %v678_v40 = vpop.f32.mrb[0].mxu1 }
 0x116   :  { %v680_v41 = vpop.f32.mrb[1].mxu1  ;;  %v679_v1 = vadd.f32 %v678_v40, %v122_v47 }
 0x117   :  { %v682_v42 = vpop.f32.mrb[2].mxu1  ;;  %v681_v2 = vadd.f32 %v680_v41, %v126_v48 }
 0x118   :  { %v684_v44 = vpop.f32.mrb[3].mxu1  ;;  %v683_v5 = vadd.f32 %v682_v42, %v122_v47 }
 0x119   :  { %v685_v10 = vadd.f32 %v684_v44, %v126_v48 }
 0x11d   :  { %v688_v49 = vpop.f32.mrb[4].mxu1 }
 0x11e   :  { %v741_v50 = vpop.f32.mrb[4].mxu0  ;;  %v689_v51 = vadd.f32 %v688_v49, %v122_v47  ;;  %v690_v52 = vpop.f32.mrb[5].mxu1 }
 0x11f   :  { %v743_v53 = vpop.f32.mrb[5].mxu0  ;;  %v691_v54 = vadd.f32 %v690_v52, %v126_v48  ;;  %v692_v55 = vpop.f32.mrb[6].mxu1 }
 0x120   :  { %v745_v56 = vpop.f32.mrb[6].mxu0  ;;  %v693_v57 = vadd.f32 %v692_v55, %v122_v47  ;;  %v742_v58 = vadd.f32 %v741_v50, %v689_v51  ;;  %v694_v59 = vpop.f32.mrb[7].mxu1 }
 0x121   :  { %v747_v60 = vpop.f32.mrb[7].mxu0  ;;  %v695_v61 = vadd.f32 %v694_v59, %v126_v48  ;;  %v744_v62 = vadd.f32 %v743_v53, %v691_v54 }
 0x122   :  { %v746_v63 = vadd.f32 %v745_v56, %v693_v57 }
 0x123   :  { %v748_v0 = vadd.f32 %v747_v60, %v695_v61 }
 0x149   :  { %v794_v4 = vpop.f32.mrb[8].mxu1 }
 0x14a   :  { %v784_v3 = vpop.f32.mrb[0].mxu0  ;;  %v795_v7 = vadd.f32 %v794_v4, %v742_v58  ;;  %v796_v9 = vpop.f32.mrb[9].mxu1 }
 0x14b   :  { %v1038_v6 = vadd.f32 %v784_v3, %v679_v1  ;;  %v786_v8 = vpop.f32.mrb[1].mxu0  ;;  %v797_v12 = vadd.f32 %v796_v9, %v744_v62  ;;  %v798_v14 = vpop.f32.mrb[10].mxu1 }
 0x14c   :  { %v1040_v11 = vadd.f32 %v786_v8, %v681_v2  ;;  %v788_v13 = vpop.f32.mrb[2].mxu0  ;;  %v999_v16 = vmul.f32 -1.442695, %v795_v7  ;;  %v799_v18 = vadd.f32 %v798_v14, %v746_v63  ;;  %v800_v20 = vpop.f32.mrb[11].mxu1 }
 0x14d   :  { %v995_v15 = vmul.f32 -1.442695, %v1038_v6  ;;  %v1042_v17 = vadd.f32 %v788_v13, %v683_v5  ;;  %v790_v19 = vpop.f32.mrb[3].mxu0  ;;  %v1000_v22 = vmul.f32 -1.442695, %v797_v12  ;;  %v801_v24 = vadd.f32 %v800_v20, %v748_v0 }
 0x14e   :  { %v996_v21 = vmul.f32 -1.442695, %v1040_v11  ;;  %v1044_v23 = vadd.f32 %v790_v19, %v685_v10  ;;  %v1001_v26 = vmul.f32 -1.442695, %v799_v18 }
 0x14f   :  { %1214 = vpow2.f32 %v995_v15  ;;  %v997_v25 = vmul.f32 -1.442695, %v1042_v17  ;;  %v1002_v28 = vmul.f32 -1.442695, %v801_v24 }
 0x150   :  { %1216 = vpow2.f32 %v999_v16  ;;  %v998_v27 = vmul.f32 -1.442695, %v1044_v23 }
 0x151   :  { %1218 = vpow2.f32 %v996_v21 }
 0x152   :  { %1220 = vpow2.f32 %v1000_v22 }
 0x153   :  { %1222 = vpow2.f32 %v997_v25 }
 0x154   :  { %1224 = vpow2.f32 %v1001_v26 }
 0x155   :  { %1226 = vpow2.f32 %v998_v27 }
 0x156   :  { %1228 = vpow2.f32 %v1002_v28 }
 0x159   :  { %v1215_v29 = vpop.eup %1214 }
 0x15a   :  { %v1217_v30 = vpop.eup %1216  ;;  %v827_v31 = vadd.f32 1.0, %v1215_v29 }
 0x15b   :  { %v1219_v32 = vpop.eup %1218  ;;  %v831_v33 = vadd.f32 1.0, %v1217_v30 }
 0x15c   :  { %v1221_v34 = vpop.eup %1220  ;;  %1230 = vrcp.f32 %v827_v31  ;;  %v828_v35 = vadd.f32 1.0, %v1219_v32 }
 0x15d   :  { %v1223_v36 = vpop.eup %1222  ;;  %1232 = vrcp.f32 %v831_v33  ;;  %v832_v37 = vadd.f32 1.0, %v1221_v34 }
 0x15e   :  { %v1225_v38 = vpop.eup %1224  ;;  %1234 = vrcp.f32 %v828_v35  ;;  %v829_v39 = vadd.f32 1.0, %v1223_v36 }
 0x15f   :  { %v1227_v40 = vpop.eup %1226  ;;  %1236 = vrcp.f32 %v832_v37  ;;  %v833_v41 = vadd.f32 1.0, %v1225_v38 }
 0x160   :  { %v1229_v42 = vpop.eup %1228  ;;  %1238 = vrcp.f32 %v829_v39  ;;  %v830_v43 = vadd.f32 1.0, %v1227_v40 }
 0x161   :  { %1240 = vrcp.f32 %v833_v41  ;;  %v834_v44 = vadd.f32 1.0, %v1229_v42 }
 0x162   :  { %1242 = vrcp.f32 %v830_v43 }
 0x163   :  { %1244 = vrcp.f32 %v834_v44 }
 0x166   :  { %v1231_v45 = vpop.eup %1230 }
 0x167   :  { %v1233_v46 = vpop.eup %1232  ;;  %v851_v47 = vmul.f32 %v1231_v45, %v1038_v6 }
 0x168   :  { %v1235_v48 = vpop.eup %1234  ;;  %v855_v49 = vmul.f32 %v1233_v46, %v795_v7 }
 0x169   :  { %v1237_v50 = vpop.eup %1236  ;;  %v852_v51 = vmul.f32 %v1235_v48, %v1040_v11 }
 0x16a   :  { %v1239_v52 = vpop.eup %1238  ;;  %v856_v53 = vmul.f32 %v1237_v50, %v797_v12 }
 0x16b   :  { %v1241_v54 = vpop.eup %1240  ;;  %v1007_v55 = vpack.c.bf16 %v852_v51, %v851_v47  ;;  %v853_v56 = vmul.f32 %v1239_v52, %v1042_v17 }
 0x16c   :  { %v1243_v57 = vpop.eup %1242  ;;  %v1009_v58 = vpack.c.bf16 %v856_v53, %v855_v49  ;;  %v857_v59 = vmul.f32 %v1241_v54, %v799_v18 }
 0x16d   :  { %v1245_v60 = vpop.eup %1244  ;;  %883 = vst [vmem:[%s1590_s3] sm:$0xff] %v1007_v55  ;;  %v854_v61 = vmul.f32 %v1243_v57, %v1044_v23 }
 0x16e   :  { %885 = vst [vmem:[%s1590_s3 + $0x10] sm:$0xff] %v1009_v58  ;;  %v858_v62 = vmul.f32 %v1245_v60, %v801_v24 }
 0x16f   :  { %v1008_v63 = vpack.c.bf16 %v854_v61, %v853_v56 }
 0x170   :  { %v1010_v0 = vpack.c.bf16 %v858_v62, %v857_v59 }
 0x171   :  { %884 = vst [vmem:[%s1590_s3 + $0x8] sm:$0xff] %v1008_v63 }
 0x172   :  { %886 = vst [vmem:[%s1590_s3 + $0x18] sm:$0xff] %v1010_v0 }

</bundles_post_ra>
